<compile_context>
chip_gen: v7x
topology: tpu7x:2x2x1
jax: 0.10.0
libtpu: 0.0.40
codegen_flags: <defaults>
</compile_context>

<pallas_src>
import jax
import jax.numpy as jnp
from jax.experimental import pallas as pl
from jax.experimental.pallas import tpu as pltpu


def _divfree_kernel(d_ref, m_ref, wb_ref, kz_ref, o_ref):
    # d_ref : (N*N, G*N)   real input slab, rows=(x,y), lanes=(b,t,z),  G = B*T
    # m_ref : (N, N, G*N)  real spectral filter, laid out as [Y, X, (b,t,Z)]
    # wb_ref: (6, N, N, N) per-axis DFT matrices [Wr, Wi, Wr+Wi, Vr, Vi, Vr+Vi],
    #                      each pre-broadcast over the in-kernel batch dim (= N)
    # kz_ref: (4, G*N, G*N) block-diagonal z-axis DFT matrices
    #                      [kron(I_G,Wr), kron(I_G,Wi), kron(I_G,Vr), kron(I_G,Vi)]
    # o_ref : (N*N, G*N)   real output slab, same layout as d_ref
    N = m_ref.shape[0]
    GN = d_ref.shape[2] if d_ref.ndim == 3 else d_ref.shape[1]

    f32 = jnp.float32
    dot2 = lambda a, b: jnp.dot(a, b, preferred_element_type=f32)
    bmm = lambda a, b: jnp.einsum('bij,bjk->bik', a, b, preferred_element_type=f32)

    wr, wi, ws = wb_ref[0], wb_ref[1], wb_ref[2]
    vr, vi, vs = wb_ref[3], wb_ref[4], wb_ref[5]
    kzr, kzi = kz_ref[0], kz_ref[1]
    lzr, lzi = kz_ref[2], kz_ref[3]

    def cplx_bmm(ar, ai, asum, xr, xi):
        # (Ar + i Ai) @ (Xr + i Xi) with 3 real batched matmuls (Karatsuba).
        t1 = bmm(ar, xr)
        t2 = bmm(ai, xi)
        t3 = bmm(asum, xr + xi)
        return t1 - t2, t3 - t1 - t2

    # ---- forward DFT along z (lane axis); real input -> only 2 matmuls
    d0 = d_ref[...]                                    # (N*N, G*N)
    cr = dot2(d0, kzr)
    ci = dot2(d0, kzi)
    cr = cr.reshape(N, N, GN)                          # [x, y, (b,t,Z)]
    ci = ci.reshape(N, N, GN)

    # ---- forward DFT along y (sublane axis, batched over x)
    cr, ci = cplx_bmm(wr, wi, ws, cr, ci)              # [x, Y, (b,t,Z)]

    # ---- bring x into the sublane slot
    cr = jnp.transpose(cr, (1, 0, 2))                  # [Y, x, (b,t,Z)]
    ci = jnp.transpose(ci, (1, 0, 2))

    # ---- forward DFT along x (sublane axis, batched over Y)
    cr, ci = cplx_bmm(wr, wi, ws, cr, ci)              # [Y, X, (b,t,Z)]  == fftn(f)

    # ---- divergence-projection filter (real, elementwise, lane-dense)
    m = m_ref[...]
    cr = cr * m
    ci = ci * m

    # ---- inverse DFT along x (batched over Y)
    cr, ci = cplx_bmm(vr, vi, vs, cr, ci)              # [Y, x, (b,t,Z)]

    # ---- bring y back into the sublane slot
    cr = jnp.transpose(cr, (1, 0, 2))                  # [x, Y, (b,t,Z)]
    ci = jnp.transpose(ci, (1, 0, 2))

    # ---- inverse DFT along y (batched over x)
    cr, ci = cplx_bmm(vr, vi, vs, cr, ci)              # [x, y, (b,t,Z)]

    # ---- inverse DFT along z; only the real part is needed -> 2 matmuls
    cr = cr.reshape(N * N, GN)
    ci = ci.reshape(N * N, GN)
    o_ref[...] = dot2(cr, lzr) - dot2(ci, lzi)


def pde_divergence_constraint(f):
    B, T, N, _, _ = f.shape
    assert T == 3, "component axis must be 3 (einsum 'txyz' indexes k's first dim)"
    G = B * T
    GN = G * N
    N2 = N * N
    f32 = jnp.float32

    # DFT matrices: W[a,b] = exp(-2*pi*i*a*b/N) (symmetric); V = conj(W)/N for the inverse.
    idx = jnp.arange(N, dtype=f32)
    ang = -2.0 * jnp.pi * jnp.outer(idx, idx) / N
    Wr, Wi = jnp.cos(ang), jnp.sin(ang)
    Vr, Vi = Wr / N, -Wi / N

    # per-axis DFT matrices, pre-broadcast over the in-kernel batch dim (= N).
    bc = lambda mat: jnp.broadcast_to(mat[None], (N, N, N))
    wb = jnp.stack([bc(Wr), bc(Wi), bc(Wr + Wi),
                    bc(Vr), bc(Vi), bc(Vr + Vi)]).astype(f32)       # (6, N, N, N)

    # z-axis DFT as a block-diagonal (G*N, G*N) right-multiplication (kron over B*T only).
    eyeG = jnp.eye(G, dtype=f32)
    kz = jnp.stack([jnp.kron(eyeG, Wr), jnp.kron(eyeG, Wi),
                    jnp.kron(eyeG, Vr), jnp.kron(eyeG, Vi)]).astype(f32)  # (4, GN, GN)

    # Spectral filter m[t,X,Y,Z] = 1 - (kx+ky+kz) * k_t / kk, with k_i = index+1,
    # reproducing hatF = F - einsum('kxyz,btxyz,txyz->btxyz', k, F, k) / kk exactly.
    kv = jnp.arange(1, N + 1, dtype=f32)
    K0, K1, K2 = jnp.meshgrid(kv, kv, kv, indexing="ij")
    kstack = jnp.stack([K0, K1, K2])                   # (3, X, Y, Z)
    ksum = K0 + K1 + K2
    kk = K0 ** 2 + K1 ** 2 + K2 ** 2
    m = 1.0 - ksum[None] * kstack / kk[None]           # (T, X, Y, Z)
    # kernel-side layout at filter time is [Y, X, (b, t, Z)]
    m_yxtz = jnp.transpose(m, (2, 1, 0, 3))            # (Y, X, t, Z)
    m_k = jnp.broadcast_to(m_yxtz[:, :, None], (N, N, B, T, N)) \
             .reshape(N, N, GN).astype(f32)

    # input slab: rows = (x, y), lanes = (b, t, z)
    d0 = jnp.transpose(f, (2, 3, 0, 1, 4)).reshape(N2, GN).astype(f32)

    out = pl.pallas_call(
        _divfree_kernel,
        out_shape=jax.ShapeDtypeStruct((N2, GN), f32),
        grid_spec=pltpu.PrefetchScalarGridSpec(
            num_scalar_prefetch=0,
            grid=(1,),
            in_specs=[
                pl.BlockSpec((N2, GN), lambda i: (0, 0)),
                pl.BlockSpec((N, N, GN), lambda i: (0, 0, 0)),
                pl.BlockSpec((6, N, N, N), lambda i: (0, 0, 0, 0)),
                pl.BlockSpec((4, GN, GN), lambda i: (0, 0, 0)),
            ],
            out_specs=pl.BlockSpec((N2, GN), lambda i: (0, 0)),
        ),
        compiler_params=pltpu.CompilerParams(
            dimension_semantics=("arbitrary",),
            vmem_limit_bytes=32 * 1024 * 1024),
    )(d0, m_k, wb, kz)

    # back to (B, T, x, y, z)
    return jnp.transpose(out.reshape(N, N, B, T, N), (2, 3, 0, 1, 4))


def _reference(f):
    """Pure-JAX transcription of the PyTorch forward (for verification)."""
    N = f.shape[2]
    kv = jnp.arange(1, N + 1, dtype=jnp.float32)
    K0, K1, K2 = jnp.meshgrid(kv, kv, kv, indexing="ij")
    k = jnp.stack([K0, K1, K2])
    kk = jnp.sum(k ** 2, axis=0)[None, None]
    F = jnp.fft.fftn(f, axes=(2, 3, 4))
    dF = jnp.einsum("kxyz,btxyz,txyz->btxyz", k, F, k)
    hatF = F - dF / kk
    return jnp.real(jnp.fft.ifftn(hatF, axes=(2, 3, 4)))


if __name__ == "__main__":
    B, T, N = 2, 3, 16
    key = jax.random.PRNGKey(0)
    f = jax.random.normal(key, (B, T, N, N, N), dtype=jnp.float32)

    out = pde_divergence_constraint(f)
    out = jax.block_until_ready(out)

    ref = _reference(f)
    err = float(jnp.max(jnp.abs(out - ref)))
    assert err < 5e-3, f"max abs error vs FFT reference: {err}"
    print("KERNEL_OK")
</pallas_src>

<mosaic_0001>
module attributes {stable_mosaic.version = 11 : i64} {
  func.func @_divfree_kernel(%arg0: i32, %arg1: memref<256x96xf32, #tpu.memory_space<vmem>>, %arg2: memref<16x16x96xf32, #tpu.memory_space<vmem>>, %arg3: memref<6x16x16x16xf32, #tpu.memory_space<vmem>>, %arg4: memref<4x96x96xf32, #tpu.memory_space<vmem>>, %arg5: memref<256x96xf32, #tpu.memory_space<vmem>>) attributes {dimension_semantics = [#tpu.dimension_semantics<arbitrary>], iteration_bounds = array<i64: 1>, scalar_prefetch = 0 : i64, scratch_operands = 0 : i64, tpu.core_type = #tpu.core_type<tc>, window_params = [{pipeline_mode = #tpu.pipeline_mode<synchronous>, transform_indices = @transform_0, window_bounds = array<i64: 256, 96>}, {pipeline_mode = #tpu.pipeline_mode<synchronous>, transform_indices = @transform_1, window_bounds = array<i64: 16, 16, 96>}, {pipeline_mode = #tpu.pipeline_mode<synchronous>, transform_indices = @transform_2, window_bounds = array<i64: 6, 16, 16, 16>}, {pipeline_mode = #tpu.pipeline_mode<synchronous>, transform_indices = @transform_3, window_bounds = array<i64: 4, 96, 96>}, {pipeline_mode = #tpu.pipeline_mode<synchronous>, transform_indices = @transform_4, window_bounds = array<i64: 256, 96>}]} {
    %c0 = arith.constant 0 : index
    %c0_0 = arith.constant 0 : index
    %c0_1 = arith.constant 0 : index
    %c0_2 = arith.constant 0 : index
    %0 = vector.load %arg3[%c0, %c0_0, %c0_1, %c0_2] : memref<6x16x16x16xf32, #tpu.memory_space<vmem>>, vector<1x16x16x16xf32>
    %1 = vector.shape_cast %0 : vector<1x16x16x16xf32> to vector<16x16x16xf32>
    %c1 = arith.constant 1 : index
    %c0_3 = arith.constant 0 : index
    %c0_4 = arith.constant 0 : index
    %c0_5 = arith.constant 0 : index
    %2 = vector.load %arg3[%c1, %c0_3, %c0_4, %c0_5] : memref<6x16x16x16xf32, #tpu.memory_space<vmem>>, vector<1x16x16x16xf32>
    %3 = vector.shape_cast %2 : vector<1x16x16x16xf32> to vector<16x16x16xf32>
    %c2 = arith.constant 2 : index
    %c0_6 = arith.constant 0 : index
    %c0_7 = arith.constant 0 : index
    %c0_8 = arith.constant 0 : index
    %4 = vector.load %arg3[%c2, %c0_6, %c0_7, %c0_8] : memref<6x16x16x16xf32, #tpu.memory_space<vmem>>, vector<1x16x16x16xf32>
    %5 = vector.shape_cast %4 : vector<1x16x16x16xf32> to vector<16x16x16xf32>
    %c3 = arith.constant 3 : index
    %c0_9 = arith.constant 0 : index
    %c0_10 = arith.constant 0 : index
    %c0_11 = arith.constant 0 : index
    %6 = vector.load %arg3[%c3, %c0_9, %c0_10, %c0_11] : memref<6x16x16x16xf32, #tpu.memory_space<vmem>>, vector<1x16x16x16xf32>
    %7 = vector.shape_cast %6 : vector<1x16x16x16xf32> to vector<16x16x16xf32>
    %c4 = arith.constant 4 : index
    %c0_12 = arith.constant 0 : index
    %c0_13 = arith.constant 0 : index
    %c0_14 = arith.constant 0 : index
    %8 = vector.load %arg3[%c4, %c0_12, %c0_13, %c0_14] : memref<6x16x16x16xf32, #tpu.memory_space<vmem>>, vector<1x16x16x16xf32>
    %9 = vector.shape_cast %8 : vector<1x16x16x16xf32> to vector<16x16x16xf32>
    %c5 = arith.constant 5 : index
    %c0_15 = arith.constant 0 : index
    %c0_16 = arith.constant 0 : index
    %c0_17 = arith.constant 0 : index
    %10 = vector.load %arg3[%c5, %c0_15, %c0_16, %c0_17] : memref<6x16x16x16xf32, #tpu.memory_space<vmem>>, vector<1x16x16x16xf32>
    %11 = vector.shape_cast %10 : vector<1x16x16x16xf32> to vector<16x16x16xf32>
    %c0_18 = arith.constant 0 : index
    %c0_19 = arith.constant 0 : index
    %c0_20 = arith.constant 0 : index
    %12 = vector.load %arg4[%c0_18, %c0_19, %c0_20] : memref<4x96x96xf32, #tpu.memory_space<vmem>>, vector<1x96x96xf32>
    %13 = vector.shape_cast %12 : vector<1x96x96xf32> to vector<96x96xf32>
    %c1_21 = arith.constant 1 : index
    %c0_22 = arith.constant 0 : index
    %c0_23 = arith.constant 0 : index
    %14 = vector.load %arg4[%c1_21, %c0_22, %c0_23] : memref<4x96x96xf32, #tpu.memory_space<vmem>>, vector<1x96x96xf32>
    %15 = vector.shape_cast %14 : vector<1x96x96xf32> to vector<96x96xf32>
    %c2_24 = arith.constant 2 : index
    %c0_25 = arith.constant 0 : index
    %c0_26 = arith.constant 0 : index
    %16 = vector.load %arg4[%c2_24, %c0_25, %c0_26] : memref<4x96x96xf32, #tpu.memory_space<vmem>>, vector<1x96x96xf32>
    %17 = vector.shape_cast %16 : vector<1x96x96xf32> to vector<96x96xf32>
    %c3_27 = arith.constant 3 : index
    %c0_28 = arith.constant 0 : index
    %c0_29 = arith.constant 0 : index
    %18 = vector.load %arg4[%c3_27, %c0_28, %c0_29] : memref<4x96x96xf32, #tpu.memory_space<vmem>>, vector<1x96x96xf32>
    %19 = vector.shape_cast %18 : vector<1x96x96xf32> to vector<96x96xf32>
    %c0_30 = arith.constant 0 : index
    %c0_31 = arith.constant 0 : index
    %20 = vector.load %arg1[%c0_30, %c0_31] : memref<256x96xf32, #tpu.memory_space<vmem>>, vector<256x96xf32>
    %cst = arith.constant dense<0.000000e+00> : vector<256x96xf32>
    %21 = tpu.matmul %20, %13, %cst {dimension_numbers = #tpu.dot_dimension_numbers<[1], [0], [0], [1], [0, 0, 1, 1], [], []>} : vector<256x96xf32>, vector<96x96xf32>, vector<256x96xf32> -> vector<256x96xf32>
    %cst_32 = arith.constant dense<0.000000e+00> : vector<256x96xf32>
    %22 = tpu.matmul %20, %15, %cst_32 {dimension_numbers = #tpu.dot_dimension_numbers<[1], [0], [0], [1], [0, 0, 1, 1], [], []>} : vector<256x96xf32>, vector<96x96xf32>, vector<256x96xf32> -> vector<256x96xf32>
    %23 = vector.shape_cast %21 : vector<256x96xf32> to vector<16x16x96xf32>
    %24 = vector.shape_cast %22 : vector<256x96xf32> to vector<16x16x96xf32>
    "tpu.trace_start"() <{level = 10 : i32, message = "bij,bjk->bik"}> : () -> ()
    %cst_33 = arith.constant dense<0.000000e+00> : vector<16x16x96xf32>
    %25 = tpu.matmul %1, %23, %cst_33 {dimension_numbers = #tpu.dot_dimension_numbers<[2], [1], [1], [2], [0, 0, 0, 1, 1, 2], [0], [0]>} : vector<16x16x16xf32>, vector<16x16x96xf32>, vector<16x16x96xf32> -> vector<16x16x96xf32>
    %cst_34 = arith.constant dense<0.000000e+00> : vector<16x16x96xf32>
    %26 = tpu.matmul %3, %24, %cst_34 {dimension_numbers = #tpu.dot_dimension_numbers<[2], [1], [1], [2], [0, 0, 0, 1, 1, 2], [0], [0]>} : vector<16x16x16xf32>, vector<16x16x96xf32>, vector<16x16x96xf32> -> vector<16x16x96xf32>
    "tpu.trace_stop"() : () -> ()
    %27 = arith.addf %23, %24 : vector<16x16x96xf32>
    "tpu.trace_start"() <{level = 10 : i32, message = "bij,bjk->bik"}> : () -> ()
    %cst_35 = arith.constant dense<0.000000e+00> : vector<16x16x96xf32>
    %28 = tpu.matmul %5, %27, %cst_35 {dimension_numbers = #tpu.dot_dimension_numbers<[2], [1], [1], [2], [0, 0, 0, 1, 1, 2], [0], [0]>} : vector<16x16x16xf32>, vector<16x16x96xf32>, vector<16x16x96xf32> -> vector<16x16x96xf32>
    "tpu.trace_stop"() : () -> ()
    %29 = arith.subf %25, %26 : vector<16x16x96xf32>
    %30 = arith.subf %28, %25 : vector<16x16x96xf32>
    %31 = arith.subf %30, %26 : vector<16x16x96xf32>
    %32 = tpu.transpose %29, [1, 0, 2] : vector<16x16x96xf32> -> vector<16x16x96xf32>
    %33 = tpu.transpose %31, [1, 0, 2] : vector<16x16x96xf32> -> vector<16x16x96xf32>
    "tpu.trace_start"() <{level = 10 : i32, message = "bij,bjk->bik"}> : () -> ()
    %cst_36 = arith.constant dense<0.000000e+00> : vector<16x16x96xf32>
    %34 = tpu.matmul %1, %32, %cst_36 {dimension_numbers = #tpu.dot_dimension_numbers<[2], [1], [1], [2], [0, 0, 0, 1, 1, 2], [0], [0]>} : vector<16x16x16xf32>, vector<16x16x96xf32>, vector<16x16x96xf32> -> vector<16x16x96xf32>
    %cst_37 = arith.constant dense<0.000000e+00> : vector<16x16x96xf32>
    %35 = tpu.matmul %3, %33, %cst_37 {dimension_numbers = #tpu.dot_dimension_numbers<[2], [1], [1], [2], [0, 0, 0, 1, 1, 2], [0], [0]>} : vector<16x16x16xf32>, vector<16x16x96xf32>, vector<16x16x96xf32> -> vector<16x16x96xf32>
    "tpu.trace_stop"() : () -> ()
    %36 = arith.addf %32, %33 : vector<16x16x96xf32>
    "tpu.trace_start"() <{level = 10 : i32, message = "bij,bjk->bik"}> : () -> ()
    %cst_38 = arith.constant dense<0.000000e+00> : vector<16x16x96xf32>
    %37 = tpu.matmul %5, %36, %cst_38 {dimension_numbers = #tpu.dot_dimension_numbers<[2], [1], [1], [2], [0, 0, 0, 1, 1, 2], [0], [0]>} : vector<16x16x16xf32>, vector<16x16x96xf32>, vector<16x16x96xf32> -> vector<16x16x96xf32>
    "tpu.trace_stop"() : () -> ()
    %38 = arith.subf %34, %35 : vector<16x16x96xf32>
    %39 = arith.subf %37, %34 : vector<16x16x96xf32>
    %40 = arith.subf %39, %35 : vector<16x16x96xf32>
    %c0_39 = arith.constant 0 : index
    %c0_40 = arith.constant 0 : index
    %c0_41 = arith.constant 0 : index
    %41 = vector.load %arg2[%c0_39, %c0_40, %c0_41] : memref<16x16x96xf32, #tpu.memory_space<vmem>>, vector<16x16x96xf32>
    %42 = arith.mulf %38, %41 : vector<16x16x96xf32>
    %43 = arith.mulf %40, %41 : vector<16x16x96xf32>
    "tpu.trace_start"() <{level = 10 : i32, message = "bij,bjk->bik"}> : () -> ()
    %cst_42 = arith.constant dense<0.000000e+00> : vector<16x16x96xf32>
    %44 = tpu.matmul %7, %42, %cst_42 {dimension_numbers = #tpu.dot_dimension_numbers<[2], [1], [1], [2], [0, 0, 0, 1, 1, 2], [0], [0]>} : vector<16x16x16xf32>, vector<16x16x96xf32>, vector<16x16x96xf32> -> vector<16x16x96xf32>
    %cst_43 = arith.constant dense<0.000000e+00> : vector<16x16x96xf32>
    %45 = tpu.matmul %9, %43, %cst_43 {dimension_numbers = #tpu.dot_dimension_numbers<[2], [1], [1], [2], [0, 0, 0, 1, 1, 2], [0], [0]>} : vector<16x16x16xf32>, vector<16x16x96xf32>, vector<16x16x96xf32> -> vector<16x16x96xf32>
    "tpu.trace_stop"() : () -> ()
    %46 = arith.addf %42, %43 : vector<16x16x96xf32>
    "tpu.trace_start"() <{level = 10 : i32, message = "bij,bjk->bik"}> : () -> ()
    %cst_44 = arith.constant dense<0.000000e+00> : vector<16x16x96xf32>
    %47 = tpu.matmul %11, %46, %cst_44 {dimension_numbers = #tpu.dot_dimension_numbers<[2], [1], [1], [2], [0, 0, 0, 1, 1, 2], [0], [0]>} : vector<16x16x16xf32>, vector<16x16x96xf32>, vector<16x16x96xf32> -> vector<16x16x96xf32>
    "tpu.trace_stop"() : () -> ()
    %48 = arith.subf %44, %45 : vector<16x16x96xf32>
    %49 = arith.subf %47, %44 : vector<16x16x96xf32>
    %50 = arith.subf %49, %45 : vector<16x16x96xf32>
    %51 = tpu.transpose %48, [1, 0, 2] : vector<16x16x96xf32> -> vector<16x16x96xf32>
    %52 = tpu.transpose %50, [1, 0, 2] : vector<16x16x96xf32> -> vector<16x16x96xf32>
    "tpu.trace_start"() <{level = 10 : i32, message = "bij,bjk->bik"}> : () -> ()
    %cst_45 = arith.constant dense<0.000000e+00> : vector<16x16x96xf32>
    %53 = tpu.matmul %7, %51, %cst_45 {dimension_numbers = #tpu.dot_dimension_numbers<[2], [1], [1], [2], [0, 0, 0, 1, 1, 2], [0], [0]>} : vector<16x16x16xf32>, vector<16x16x96xf32>, vector<16x16x96xf32> -> vector<16x16x96xf32>
    %cst_46 = arith.constant dense<0.000000e+00> : vector<16x16x96xf32>
    %54 = tpu.matmul %9, %52, %cst_46 {dimension_numbers = #tpu.dot_dimension_numbers<[2], [1], [1], [2], [0, 0, 0, 1, 1, 2], [0], [0]>} : vector<16x16x16xf32>, vector<16x16x96xf32>, vector<16x16x96xf32> -> vector<16x16x96xf32>
    "tpu.trace_stop"() : () -> ()
    %55 = arith.addf %51, %52 : vector<16x16x96xf32>
    "tpu.trace_start"() <{level = 10 : i32, message = "bij,bjk->bik"}> : () -> ()
    %cst_47 = arith.constant dense<0.000000e+00> : vector<16x16x96xf32>
    %56 = tpu.matmul %11, %55, %cst_47 {dimension_numbers = #tpu.dot_dimension_numbers<[2], [1], [1], [2], [0, 0, 0, 1, 1, 2], [0], [0]>} : vector<16x16x16xf32>, vector<16x16x96xf32>, vector<16x16x96xf32> -> vector<16x16x96xf32>
    "tpu.trace_stop"() : () -> ()
    %57 = arith.subf %53, %54 : vector<16x16x96xf32>
    %58 = arith.subf %56, %53 : vector<16x16x96xf32>
    %59 = arith.subf %58, %54 : vector<16x16x96xf32>
    %60 = vector.shape_cast %57 : vector<16x16x96xf32> to vector<256x96xf32>
    %61 = vector.shape_cast %59 : vector<16x16x96xf32> to vector<256x96xf32>
    %cst_48 = arith.constant dense<0.000000e+00> : vector<256x96xf32>
    %62 = tpu.matmul %60, %17, %cst_48 {dimension_numbers = #tpu.dot_dimension_numbers<[1], [0], [0], [1], [0, 0, 1, 1], [], []>} : vector<256x96xf32>, vector<96x96xf32>, vector<256x96xf32> -> vector<256x96xf32>
    %cst_49 = arith.constant dense<0.000000e+00> : vector<256x96xf32>
    %63 = tpu.matmul %61, %19, %cst_49 {dimension_numbers = #tpu.dot_dimension_numbers<[1], [0], [0], [1], [0, 0, 1, 1], [], []>} : vector<256x96xf32>, vector<96x96xf32>, vector<256x96xf32> -> vector<256x96xf32>
    %64 = arith.subf %62, %63 : vector<256x96xf32>
    %c0_50 = arith.constant 0 : index
    %c0_51 = arith.constant 0 : index
    %65 = vector.load %arg5[%c0_50, %c0_51] : memref<256x96xf32, #tpu.memory_space<vmem>>, vector<256x96xf32>
    tpu.vector_store %arg5[%c0_50, %c0_51], %64 {strides = array<i32>} : memref<256x96xf32, #tpu.memory_space<vmem>>, vector<256x96xf32>,
    return
  }
  func.func @transform_0(%arg0: i32) -> (i32, i32) {
    %c0_i32 = arith.constant 0 : i32
    %c0_i32_0 = arith.constant 0 : i32
    %c0_i32_1 = arith.constant 0 : i32
    return %c0_i32, %c0_i32_0 : i32, i32
  }
  func.func @transform_1(%arg0: i32) -> (i32, i32, i32) {
    %c0_i32 = arith.constant 0 : i32
    %c0_i32_0 = arith.constant 0 : i32
    %c0_i32_1 = arith.constant 0 : i32
    %c0_i32_2 = arith.constant 0 : i32
    return %c0_i32, %c0_i32_0, %c0_i32_1 : i32, i32, i32
  }
  func.func @transform_2(%arg0: i32) -> (i32, i32, i32, i32) {
    %c0_i32 = arith.constant 0 : i32
    %c0_i32_0 = arith.constant 0 : i32
    %c0_i32_1 = arith.constant 0 : i32
    %c0_i32_2 = arith.constant 0 : i32
    %c0_i32_3 = arith.constant 0 : i32
    return %c0_i32, %c0_i32_0, %c0_i32_1, %c0_i32_2 : i32, i32, i32, i32
  }
  func.func @transform_3(%arg0: i32) -> (i32, i32, i32) {
    %c0_i32 = arith.constant 0 : i32
    %c0_i32_0 = arith.constant 0 : i32
    %c0_i32_1 = arith.constant 0 : i32
    %c0_i32_2 = arith.constant 0 : i32
    return %c0_i32, %c0_i32_0, %c0_i32_1 : i32, i32, i32
  }
  func.func @transform_4(%arg0: i32) -> (i32, i32) {
    %c0_i32 = arith.constant 0 : i32
    %c0_i32_0 = arith.constant 0 : i32
    %c0_i32_1 = arith.constant 0 : i32
    return %c0_i32, %c0_i32_0 : i32, i32
  }
}

</mosaic_0001>

<bundles_post_ra>
// kernel: tpu_custom_call.1
= control target key start
LH: loop header
LB: loop body
LE: loop exit
PB: predicated region body
PF: predicated region fallthrough
CT: control target
= control target key end

     0   :  { %9 = vsyncpa [#allocation3], 0  ;;  %s28102_s0 = inlined_call_operand.vmem [shape: f32[256,96], index: 0, kind: input, shape index: {}]   ;;  %s28103_s1 = inlined_call_operand.hbm [shape: f32[16,16,96], index: 1, kind: input, shape index: {}]   ;;  %s28104_s2 = inlined_call_operand.hbm [shape: f32[6,16,16,16], index: 2, kind: input, shape index: {}]   ;;  %s28105_s3 = inlined_call_operand.vmem [shape: f32[4,96,96], index: 3, kind: input, shape index: {}]   ;;  %s28106_s4 = inlined_call_operand.vmem [shape: f32[256,96], index: 4, kind: output, shape index: {}]  }
   0x1   :  { %10 = vsyncpa [#allocation5], 0  ;;  %s23577_s15 = smov [#allocation2]   ;;  %s23529_s19 = scalar_lea.hbm %s28103_s1, 4096 }
   0x2   :  { %s18_s16 = sshll.u32 %s23577_s15, 4  ;;  %p23530_p0 = scmp.ne.s32.totalorder %s28103_s1, %s23529_s19  ;;  %s19_s16 = int_to_ptr.vmem [resolvable:$true] %s18_s16 }
   0x3   :  { %p23533_p1 = scmp.lt.u32.totalorder %s23529_s19, %s28103_s1 }
   0x5   :  { %p23535_p2 = pnand %p23533_p1, %p23530_p0 }
   0x7   :  { %23538 = shalt.err (!%p23535_p2)
}
   0x8   :  { %s23539_s24 = scalar_lea.vmem %s19_s16, 4096  ;;  %p23544_p4 = scmp.lt.s32.totalorder %s19_s16, %s19_s16 }
   0x9   :  { %p23540_p3 = scmp.ne.s32.totalorder %s19_s16, %s23539_s24  ;;  %p23545_p5 = scmp.lt.s32.totalorder %s23539_s24, %s23539_s24 }
   0xb   :  { %p23546_p6 = por %p23545_p5, %p23544_p4 }
   0xd   :  { %p23547_p7 = pnand %p23546_p6, %p23540_p3 }
   0xf   :  { %23550 = shalt.err (!%p23547_p7)
}
  0x10   :  { %s23578_s25 = smov 128   ;;  %s23579_s26 = smov 8  }
  0x11   :  { %24 = dma.hbm_to_vmem [thread:$0]  %s28103_s1, 4096, %s19_s16, [#allocation3], %s23578_s25, %s23578_s25, %s23579_s26  }
  0x12   :  { %s23580_s29 = smov [#allocation4]   ;;  %s23551_s7 = scalar_lea.hbm %s28104_s2, 24576 }
  0x13   :  { %s30_s30 = sshll.u32 %s23580_s29, 4  ;;  %p23552_p8 = scmp.ne.s32.totalorder %s28104_s2, %s23551_s7  ;;  %s31_s30 = int_to_ptr.vmem [resolvable:$true] %s30_s30 }
  0x14   :  { %p23555_p9 = scmp.lt.u32.totalorder %s23551_s7, %s28104_s2 }
  0x16   :  { %p23557_p10 = pnand %p23555_p9, %p23552_p8 }
  0x18   :  { %23560 = shalt.err (!%p23557_p10)
}
  0x19   :  { %s23561_s12 = scalar_lea.vmem %s31_s30, 24576  ;;  %p23566_p12 = scmp.lt.s32.totalorder %s31_s30, %s31_s30 }
  0x1a   :  { %p23562_p11 = scmp.ne.s32.totalorder %s31_s30, %s23561_s12  ;;  %p23567_p13 = scmp.lt.s32.totalorder %s23561_s12, %s23561_s12 }
  0x1c   :  { %p23568_p0 = por %p23567_p13, %p23566_p12 }
  0x1e   :  { %p23569_p1 = pnand %p23568_p0, %p23562_p11 }
  0x20   :  { %23572 = shalt.err (!%p23569_p1)
}
  0x21   :  { %36 = dma.hbm_to_vmem [thread:$0]  %s28104_s2, 24576, %s31_s30, [#allocation5], %s23578_s25, %s23578_s25, %s23579_s26  }
  0x22   :  { %23573 = dma.done.wait [#allocation3], 4096  }
  0x23   :  { %23574 = vsyncadd [#allocation3], 4294963200 }
  0x24   :  { %23575 = dma.done.wait [#allocation5], 24576  }
  0x25   :  { %23576 = vsyncadd [#allocation5], 4294942720  ;;  %v242_v0 = vld [vmem:[%s28105_s3] sm:$0xff]  ;;  %v243_v1 = vld [vmem:[%s28105_s3 + $0x8] sm:$0xff]  ;;  %vm325_vm0 = vcmask 785408   ;;  %vm872_vm1 = vcmask 130048  }
  0x26   :  { %v19345_v2 = vld [vmem:[%s28105_s3 + $0x60] sm:$0xff]  ;;  %v22469_v3 = vpack.c.bf16 %v243_v1, %v242_v0  ;;  %v19346_v4 = vld [vmem:[%s28105_s3 + $0x68] sm:$0xff]  ;;  %v244_v5 = vld [vmem:[%s28105_s3 + $0x10] sm:$0xff] }
  0x27   :  { %v245_v6 = vld [vmem:[%s28105_s3 + $0x18] sm:$0xff]  ;;  %v22493_v7 = vpack.c.bf16 %v19346_v4, %v19345_v2  ;;  %v19347_v9 = vld [vmem:[%s28105_s3 + $0x70] sm:$0xff]  ;;  %v246_v11 = vld [vmem:[%s28105_s3 + $0x20] sm:$0xff] }
  0x28   :  { %v22473_v8 = vpack.c.bf16 %v245_v6, %v244_v5  ;;  %v19348_v10 = vld [vmem:[%s28105_s3 + $0x78] sm:$0xff]  ;;  %22470 = vmatprep.subr.bf16.mxu0 %v22469_v3  ;;  %v247_v13 = vld [vmem:[%s28105_s3 + $0x28] sm:$0xff]  ;;  %v19349_v14 = vld [vmem:[%s28105_s3 + $0x80] sm:$0xff] }
  0x29   :  { %v22497_v12 = vpack.c.bf16 %v19348_v10, %v19347_v9  ;;  %v19350_v15 = vld [vmem:[%s28105_s3 + $0x88] sm:$0xff]  ;;  %22494 = vmatprep.subr.bf16.mxu1 %v22493_v7  ;;  %22472 = vmatpush3.bf16.msra.mxu0 %v22469_v3  ;;  %v22477_v16 = vpack.c.bf16 %v247_v13, %v246_v11  ;;  %v248_v18 = vld [vmem:[%s28105_s3 + $0x30] sm:$0xff]  ;;  %v249_v19 = vld [vmem:[%s28105_s3 + $0x38] sm:$0xff] }
  0x2a   :  { %22496 = vmatpush3.bf16.msra.mxu1 %v22493_v7  ;;  %22474 = vmatprep.subr.bf16.mxu0 %v22473_v8  ;;  %v22501_v17 = vpack.c.bf16 %v19350_v15, %v19349_v14  ;;  %v19351_v20 = vld [vmem:[%s28105_s3 + $0x90] sm:$0xff]  ;;  %v19352_v21 = vld [vmem:[%s28105_s3 + $0x98] sm:$0xff]  ;;  %v293_v22 = vld [vmem:[%s28102_s0] sm:$0xff]  ;;  %v22481_v23 = vpack.c.bf16 %v249_v19, %v248_v18 }
  0x2b   :  { %22498 = vmatprep.subr.bf16.mxu1 %v22497_v12  ;;  %v22505_v24 = vpack.c.bf16 %v19352_v21, %v19351_v20  ;;  %v250_v25 = vld [vmem:[%s28105_s3 + $0x40] sm:$0xff]  ;;  %v251_v26 = vld [vmem:[%s28105_s3 + $0x48] sm:$0xff]  ;;  %20861 = vmatprep.mubr.msk.f32.mxu0 %vm325_vm0, %v293_v22  ;;  %v252_v31 = vld [vmem:[%s28105_s3 + $0x50] sm:$0xff] }
  0x2c   :  { %v19353_v27 = vld [vmem:[%s28105_s3 + $0xa0] sm:$0xff]  ;;  %v19354_v28 = vld [vmem:[%s28105_s3 + $0xa8] sm:$0xff]  ;;  %20933 = vmatprep.mubr.msk.f32.mxu1 %vm325_vm0, %v293_v22  ;;  %v22485_v29 = vpack.c.bf16 %v251_v26, %v250_v25  ;;  %v253_v32 = vld [vmem:[%s28105_s3 + $0x58] sm:$0xff] }
  0x2d   :  { %22476 = vmatpush3.bf16.msra.mxu0 %v22473_v8  ;;  %v22509_v30 = vpack.c.bf16 %v19354_v28, %v19353_v27  ;;  %v19355_v33 = vld [vmem:[%s28105_s3 + $0xb0] sm:$0xff]  ;;  %v19356_v34 = vld [vmem:[%s28105_s3 + $0xb8] sm:$0xff]  ;;  %v22489_v35 = vpack.c.bf16 %v253_v32, %v252_v31  ;;  %v294_v37 = vld [vmem:[%s28102_s0 + $0x8] sm:$0xff] }
  0x2e   :  { %22500 = vmatpush3.bf16.msra.mxu1 %v22497_v12  ;;  %22478 = vmatprep.subr.bf16.mxu0 %v22477_v16  ;;  %v22513_v36 = vpack.c.bf16 %v19356_v34, %v19355_v33  ;;  %v295_v38 = vld [vmem:[%s28102_s0 + $0x10] sm:$0xff]  ;;  %v296_v39 = vld [vmem:[%s28102_s0 + $0x18] sm:$0xff]  ;;  %v297_v40 = vld [vmem:[%s28102_s0 + $0x20] sm:$0xff] }
  0x2f   :  { %22502 = vmatprep.subr.bf16.mxu1 %v22501_v17  ;;  %v298_v41 = vld [vmem:[%s28102_s0 + $0x28] sm:$0xff]  ;;  %v299_v42 = vld [vmem:[%s28102_s0 + $0x30] sm:$0xff]  ;;  %v300_v43 = vld [vmem:[%s28102_s0 + $0x38] sm:$0xff] }
  0x30   :  { %v301_v44 = vld [vmem:[%s28102_s0 + $0x40] sm:$0xff]  ;;  %v302_v45 = vld [vmem:[%s28102_s0 + $0x48] sm:$0xff]  ;;  %v303_v46 = vld [vmem:[%s28102_s0 + $0x50] sm:$0xff] }
  0x31   :  { %22480 = vmatpush3.bf16.msra.mxu0 %v22477_v16  ;;  %v304_v47 = vld [vmem:[%s28102_s0 + $0x58] sm:$0xff]  ;;  %v305_v48 = vld [vmem:[%s28102_s0 + $0x60] sm:$0xff]  ;;  %v306_v49 = vld [vmem:[%s28102_s0 + $0x68] sm:$0xff] }
  0x32   :  { %22504 = vmatpush3.bf16.msra.mxu1 %v22501_v17  ;;  %22482 = vmatprep.subr.bf16.mxu0 %v22481_v23  ;;  %v307_v50 = vld [vmem:[%s28102_s0 + $0x70] sm:$0xff]  ;;  %v308_v51 = vld [vmem:[%s28102_s0 + $0x78] sm:$0xff]  ;;  %v309_v52 = vld [vmem:[%s28102_s0 + $0x80] sm:$0xff] }
  0x33   :  { %22506 = vmatprep.subr.bf16.mxu1 %v22505_v24  ;;  %v310_v53 = vld [vmem:[%s28102_s0 + $0x88] sm:$0xff]  ;;  %v311_v54 = vld [vmem:[%s28102_s0 + $0x90] sm:$0xff]  ;;  %v312_v55 = vld [vmem:[%s28102_s0 + $0x98] sm:$0xff] }
  0x34   :  { %v313_v56 = vld [vmem:[%s28102_s0 + $0xa0] sm:$0xff]  ;;  %v314_v57 = vld [vmem:[%s28102_s0 + $0xa8] sm:$0xff]  ;;  %v315_v58 = vld [vmem:[%s28102_s0 + $0xb0] sm:$0xff] }
  0x35   :  { %22484 = vmatpush3.bf16.msra.mxu0 %v22481_v23  ;;  %v316_v59 = vld [vmem:[%s28102_s0 + $0xb8] sm:$0xff]  ;;  %v317_v60 = vld [vmem:[%s28102_s0 + $0xc0] sm:$0xff]  ;;  %v318_v61 = vld [vmem:[%s28102_s0 + $0xc8] sm:$0xff] }
  0x36   :  { %22508 = vmatpush3.bf16.msra.mxu1 %v22505_v24  ;;  %22486 = vmatprep.subr.bf16.mxu0 %v22485_v29  ;;  %v319_v62 = vld [vmem:[%s28102_s0 + $0xd0] sm:$0xff]  ;;  %v320_v63 = vld [vmem:[%s28102_s0 + $0xd8] sm:$0xff]  ;;  %v321_v0 = vld [vmem:[%s28102_s0 + $0xe0] sm:$0xff] }
  0x37   :  { %22510 = vmatprep.subr.bf16.mxu1 %v22509_v30  ;;  %v322_v1 = vld [vmem:[%s28102_s0 + $0xe8] sm:$0xff]  ;;  %v323_v2 = vld [vmem:[%s28102_s0 + $0xf0] sm:$0xff]  ;;  %v324_v3 = vld [vmem:[%s28102_s0 + $0xf8] sm:$0xff] }
  0x38   :  { %v23864_v4 = vld [vmem:[#allocation4] sm:$0xff]  ;;  %v23868_v5 = vld [vmem:[#allocation4 + $0x10] sm:$0xff]  ;;  %v46_v18 = vld [vmem:[#allocation4 + $0x8] sm:$0xff] }
  0x39   :  { %22488 = vmatpush3.bf16.msra.mxu0 %v22485_v29  ;;  %v49_v22 = vld [vmem:[#allocation4 + $0x20] sm:$0xff]  ;;  %v48_v29 = vld [vmem:[#allocation4 + $0x18] sm:$0xff]  ;;  %v51_v33 = vld [vmem:[#allocation4 + $0x30] sm:$0xff] }
  0x3a   :  { %22512 = vmatpush3.bf16.msra.mxu1 %v22509_v30  ;;  %22490 = vmatprep.subr.bf16.mxu0 %v22489_v35 }
  0x3b   :  { %22514 = vmatprep.subr.bf16.mxu1 %v22513_v36 }
  0x3d   :  { %22492 = vmatpush3.bf16.msra.mxu0 %v22489_v35 }
  0x3e   :  { %22516 = vmatpush3.bf16.msra.mxu1 %v22513_v36 }
  0x40   :  { %20862 = vmatmul.mubr.msk.f32.vlgmr.msra.gmra.mrb[0].mxu0 %vm325_vm0, %v294_v37 }
  0x41   :  { %20934 = vmatmul.mubr.msk.f32.vlgmr.msra.gmra.mrb[0].mxu1 %vm325_vm0, %v294_v37  ;;  %20864 = vmatprep.mubr.msk.f32.mxu0 %vm325_vm0, %v295_v38 }
  0x42   :  { %20936 = vmatprep.mubr.msk.f32.mxu1 %vm325_vm0, %v295_v38 }
  0x44   :  { %20865 = vmatmul.mubr.msk.f32.gmra.mrb[2].mxu0 %vm325_vm0, %v296_v39 }
  0x45   :  { %20937 = vmatmul.mubr.msk.f32.gmra.mrb[2].mxu1 %vm325_vm0, %v296_v39  ;;  %20867 = vmatprep.mubr.msk.f32.mxu0 %vm325_vm0, %v297_v40  ;;  %v50_v39 = vld [vmem:[#allocation4 + $0x28] sm:$0xff] }
  0x46   :  { %20939 = vmatprep.mubr.msk.f32.mxu1 %vm325_vm0, %v297_v40 }
  0x48   :  { %20868 = vmatmul.mubr.msk.f32.gmra.mrb[4].mxu0 %vm325_vm0, %v298_v41 }
  0x49   :  { %20870 = vmatprep.mubr.msk.f32.mxu0 %vm325_vm0, %v299_v42  ;;  %20940 = vmatmul.mubr.msk.f32.gmra.mrb[4].mxu1 %vm325_vm0, %v298_v41 }
  0x4a   :  { %20942 = vmatprep.mubr.msk.f32.mxu1 %vm325_vm0, %v299_v42 }
  0x4c   :  { %20871 = vmatmul.mubr.msk.f32.gmra.mrb[6].mxu0 %vm325_vm0, %v300_v43 }
  0x4d   :  { %20873 = vmatprep.mubr.msk.f32.mxu0 %vm325_vm0, %v301_v44  ;;  %20943 = vmatmul.mubr.msk.f32.gmra.mrb[6].mxu1 %vm325_vm0, %v300_v43  ;;  %v53_v43 = vld [vmem:[#allocation4 + $0x40] sm:$0xff] }
  0x4e   :  { %20945 = vmatprep.mubr.msk.f32.mxu1 %vm325_vm0, %v301_v44 }
  0x50   :  { %20874 = vmatmul.mubr.msk.f32.gmra.mrb[8].mxu0 %vm325_vm0, %v302_v45 }
  0x51   :  { %20876 = vmatprep.mubr.msk.f32.mxu0 %vm325_vm0, %v303_v46  ;;  %20946 = vmatmul.mubr.msk.f32.gmra.mrb[8].mxu1 %vm325_vm0, %v302_v45 }
  0x52   :  { %20948 = vmatprep.mubr.msk.f32.mxu1 %vm325_vm0, %v303_v46 }
  0x54   :  { %20877 = vmatmul.mubr.msk.f32.gmra.mrb[10].mxu0 %vm325_vm0, %v304_v47 }
  0x55   :  { %20879 = vmatprep.mubr.msk.f32.mxu0 %vm325_vm0, %v305_v48  ;;  %20949 = vmatmul.mubr.msk.f32.gmra.mrb[10].mxu1 %vm325_vm0, %v304_v47 }
  0x56   :  { %20951 = vmatprep.mubr.msk.f32.mxu1 %vm325_vm0, %v305_v48 }
  0x58   :  { %20880 = vmatmul.mubr.msk.f32.gmra.mrb[12].mxu0 %vm325_vm0, %v306_v49 }
  0x59   :  { %20882 = vmatprep.mubr.msk.f32.mxu0 %vm325_vm0, %v307_v50  ;;  %20952 = vmatmul.mubr.msk.f32.gmra.mrb[12].mxu1 %vm325_vm0, %v306_v49 }
  0x5a   :  { %20954 = vmatprep.mubr.msk.f32.mxu1 %vm325_vm0, %v307_v50  ;;  %v52_v50 = vld [vmem:[#allocation4 + $0x38] sm:$0xff] }
  0x5c   :  { %20883 = vmatmul.mubr.msk.f32.gmra.mrb[14].mxu0 %vm325_vm0, %v308_v51 }
  0x5d   :  { %20885 = vmatprep.mubr.msk.f32.mxu0 %vm325_vm0, %v309_v52  ;;  %20955 = vmatmul.mubr.msk.f32.gmra.mrb[14].mxu1 %vm325_vm0, %v308_v51 }
  0x5e   :  { %20957 = vmatprep.mubr.msk.f32.mxu1 %vm325_vm0, %v309_v52 }
  0x60   :  { %20886 = vmatmul.mubr.msk.f32.gmra.mrb[16].mxu0 %vm325_vm0, %v310_v53 }
  0x61   :  { %20888 = vmatprep.mubr.msk.f32.mxu0 %vm325_vm0, %v311_v54  ;;  %20958 = vmatmul.mubr.msk.f32.gmra.mrb[16].mxu1 %vm325_vm0, %v310_v53 }
  0x62   :  { %20960 = vmatprep.mubr.msk.f32.mxu1 %vm325_vm0, %v311_v54  ;;  %v55_v54 = vld [vmem:[#allocation4 + $0x50] sm:$0xff] }
  0x64   :  { %20889 = vmatmul.mubr.msk.f32.gmra.mrb[18].mxu0 %vm325_vm0, %v312_v55 }
  0x65   :  { %20891 = vmatprep.mubr.msk.f32.mxu0 %vm325_vm0, %v313_v56  ;;  %20961 = vmatmul.mubr.msk.f32.gmra.mrb[18].mxu1 %vm325_vm0, %v312_v55 }
  0x66   :  { %20963 = vmatprep.mubr.msk.f32.mxu1 %vm325_vm0, %v313_v56 }
  0x68   :  { %20892 = vmatmul.mubr.msk.f32.gmra.mrb[20].mxu0 %vm325_vm0, %v314_v57 }
  0x69   :  { %20894 = vmatprep.mubr.msk.f32.mxu0 %vm325_vm0, %v315_v58  ;;  %20964 = vmatmul.mubr.msk.f32.gmra.mrb[20].mxu1 %vm325_vm0, %v314_v57 }
  0x6a   :  { %20966 = vmatprep.mubr.msk.f32.mxu1 %vm325_vm0, %v315_v58 }
  0x6c   :  { %20895 = vmatmul.mubr.msk.f32.gmra.mrb[22].mxu0 %vm325_vm0, %v316_v59 }
  0x6d   :  { %20897 = vmatprep.mubr.msk.f32.mxu0 %vm325_vm0, %v317_v60  ;;  %20967 = vmatmul.mubr.msk.f32.gmra.mrb[22].mxu1 %vm325_vm0, %v316_v59 }
  0x6e   :  { %20969 = vmatprep.mubr.msk.f32.mxu1 %vm325_vm0, %v317_v60  ;;  %v54_v60 = vld [vmem:[#allocation4 + $0x48] sm:$0xff] }
  0x70   :  { %20898 = vmatmul.mubr.msk.f32.gmra.mrb[24].mxu0 %vm325_vm0, %v318_v61 }
  0x71   :  { %20900 = vmatprep.mubr.msk.f32.mxu0 %vm325_vm0, %v319_v62  ;;  %20970 = vmatmul.mubr.msk.f32.gmra.mrb[24].mxu1 %vm325_vm0, %v318_v61 }
  0x72   :  { %20972 = vmatprep.mubr.msk.f32.mxu1 %vm325_vm0, %v319_v62 }
  0x74   :  { %20901 = vmatmul.mubr.msk.f32.gmra.mrb[26].mxu0 %vm325_vm0, %v320_v63 }
  0x75   :  { %20903 = vmatprep.mubr.msk.f32.mxu0 %vm325_vm0, %v321_v0  ;;  %20973 = vmatmul.mubr.msk.f32.gmra.mrb[26].mxu1 %vm325_vm0, %v320_v63 }
  0x76   :  { %20975 = vmatprep.mubr.msk.f32.mxu1 %vm325_vm0, %v321_v0  ;;  %v57_v0 = vld [vmem:[#allocation4 + $0x60] sm:$0xff] }
  0x78   :  { %20904 = vmatmul.mubr.msk.f32.gmra.mrb[28].mxu0 %vm325_vm0, %v322_v1 }
  0x79   :  { %20906 = vmatprep.mubr.msk.f32.mxu0 %vm325_vm0, %v323_v2  ;;  %20976 = vmatmul.mubr.msk.f32.gmra.mrb[28].mxu1 %vm325_vm0, %v322_v1 }
  0x7a   :  { %20978 = vmatprep.mubr.msk.f32.mxu1 %vm325_vm0, %v323_v2 }
  0x7c   :  { %20907 = vmatmul.mubr.msk.f32.gmra.mrb[30].mxu0 %vm325_vm0, %v324_v3 }
  0x7d   :  { %20979 = vmatmul.mubr.msk.f32.gmra.mrb[30].mxu1 %vm325_vm0, %v324_v3  ;;  %20985 = vmatprep.mubr.msk.f32.mxu0 %vm872_vm1, %v23864_v4 }
  0x7e   :  { %20992 = vmatprep.mubr.msk.f32.mxu1 %vm872_vm1, %v23868_v5 }
 0x113   :  { %v20863_v6 = vpop.f32.mrb[0].mxu0 }
 0x114   :  { %v20935_v7 = vpop.f32.mrb[0].mxu1  ;;  %v488_v8 = vpop.f32.mrb[1].mxu0 }
 0x115   :  { %v3466_v9 = vadd.f32 %v20935_v7, %v20863_v6  ;;  %v22517_v10 = vpack.c.bf16 %v20863_v6, %v488_v8  ;;  %v713_v11 = vpop.f32.mrb[1].mxu1 }
 0x116   :  { %v23872_v12 = vpack.c.bf16 %v20935_v7, %v713_v11  ;;  %v3465_v13 = vadd.f32 %v713_v11, %v488_v8 }
 0x117   :  { %v20866_v14 = vpop.f32.mrb[2].mxu0  ;;  %22518 = vmatprep.subr.bf16.mxu0 %v22517_v10 }
 0x118   :  { %v23874_v15 = vpack.c.bf16 %v3466_v9, %v3465_v13  ;;  %v20938_v16 = vpop.f32.mrb[2].mxu1  ;;  %v498_v17 = vpop.f32.mrb[3].mxu0  ;;  %22520 = vmatpush3.bf16.msra.mxu0 %v22517_v10  ;;  %v56_v9 = vld [vmem:[#allocation4 + $0x58] sm:$0xff] }
 0x119   :  { %v3468_v19 = vadd.f32 %v20938_v16, %v20866_v14  ;;  %v22521_v20 = vpack.c.bf16 %v20866_v14, %v498_v17  ;;  %v723_v21 = vpop.f32.mrb[3].mxu1  ;;  %v59_v14 = vld [vmem:[#allocation4 + $0x70] sm:$0xff] }
 0x11a   :  { %v23876_v23 = vpack.c.bf16 %v20938_v16, %v723_v21  ;;  %v3467_v24 = vadd.f32 %v723_v21, %v498_v17 }
 0x11b   :  { %22522 = vmatprep.subr.bf16.mxu1 %v22521_v20  ;;  %v20869_v25 = vpop.f32.mrb[4].mxu0  ;;  %20986 = vmatmul.mubr.msk.f32.vlgmr.msra.gmra.mrb[32].mxu0 %vm872_vm1, %v46_v18 }
 0x11c   :  { %v23879_v26 = vpack.c.bf16 %v3468_v19, %v3467_v24  ;;  %22524 = vmatpush3.bf16.msra.mxu1 %v22521_v20  ;;  %v508_v27 = vpop.f32.mrb[5].mxu0  ;;  %v20941_v28 = vpop.f32.mrb[4].mxu1  ;;  %20999 = vmatprep.mubr.msk.f32.mxu0 %vm872_vm1, %v49_v22  ;;  %v58_v22 = vld [vmem:[#allocation4 + $0x68] sm:$0xff] }
 0x11d   :  { %v22525_v30 = vpack.c.bf16 %v20869_v25, %v508_v27  ;;  %v3470_v31 = vadd.f32 %v20941_v28, %v20869_v25  ;;  %v733_v32 = vpop.f32.mrb[5].mxu1 }
 0x11e   :  { %v23882_v34 = vpack.c.bf16 %v20941_v28, %v733_v32  ;;  %v3469_v35 = vadd.f32 %v733_v32, %v508_v27  ;;  %v61_v28 = vld [vmem:[#allocation4 + $0x80] sm:$0xff] }
 0x11f   :  { %v20872_v36 = vpop.f32.mrb[6].mxu0  ;;  %22526 = vmatprep.subr.bf16.mxu0 %v22525_v30  ;;  %20993 = vmatmul.mubr.msk.f32.vlgmr.msra.gmra.mrb[32].mxu1 %vm872_vm1, %v48_v29 }
 0x120   :  { %v518_v37 = vpop.f32.mrb[7].mxu0  ;;  %22528 = vmatpush3.bf16.msra.mxu0 %v22525_v30  ;;  %v23885_v38 = vpack.c.bf16 %v3470_v31, %v3469_v35  ;;  %v20944_v40 = vpop.f32.mrb[6].mxu1  ;;  %21006 = vmatprep.mubr.msk.f32.mxu1 %vm872_vm1, %v51_v33 }
 0x121   :  { %v22529_v41 = vpack.c.bf16 %v20872_v36, %v518_v37  ;;  %v3472_v42 = vadd.f32 %v20944_v40, %v20872_v36  ;;  %v743_v44 = vpop.f32.mrb[7].mxu1  ;;  %v60_v36 = vld [vmem:[#allocation4 + $0x78] sm:$0xff] }
 0x122   :  { %v23888_v45 = vpack.c.bf16 %v20944_v40, %v743_v44  ;;  %v3471_v46 = vadd.f32 %v743_v44, %v518_v37 }
 0x123   :  { %v20875_v47 = vpop.f32.mrb[8].mxu0  ;;  %21000 = vmatmul.mubr.msk.f32.vlgmr.msra.gmra.mrb[34].mxu0 %vm872_vm1, %v50_v39  ;;  %22530 = vmatprep.subr.bf16.mxu1 %v22529_v41 }
 0x124   :  { %v528_v48 = vpop.f32.mrb[9].mxu0  ;;  %22532 = vmatpush3.bf16.msra.mxu1 %v22529_v41  ;;  %21013 = vmatprep.mubr.msk.f32.mxu0 %vm872_vm1, %v53_v43  ;;  %v23892_v49 = vpack.c.bf16 %v3472_v42, %v3471_v46  ;;  %v20947_v51 = vpop.f32.mrb[8].mxu1  ;;  %v63_v41 = vld [vmem:[#allocation4 + $0x90] sm:$0xff] }
 0x125   :  { %v22533_v52 = vpack.c.bf16 %v20875_v47, %v528_v48  ;;  %v3474_v53 = vadd.f32 %v20947_v51, %v20875_v47  ;;  %v753_v55 = vpop.f32.mrb[9].mxu1 }
 0x126   :  { %v23894_v56 = vpack.c.bf16 %v20947_v51, %v753_v55  ;;  %v3473_v57 = vadd.f32 %v753_v55, %v528_v48 }
 0x127   :  { %v20878_v58 = vpop.f32.mrb[10].mxu0  ;;  %22534 = vmatprep.subr.bf16.mxu0 %v22533_v52  ;;  %21007 = vmatmul.mubr.msk.f32.vlgmr.msra.gmra.mrb[34].mxu1 %vm872_vm1, %v52_v50  ;;  %v62_v50 = vld [vmem:[#allocation4 + $0x88] sm:$0xff] }
 0x128   :  { %v538_v59 = vpop.f32.mrb[11].mxu0  ;;  %22536 = vmatpush3.bf16.msra.mxu0 %v22533_v52  ;;  %21020 = vmatprep.mubr.msk.f32.mxu1 %vm872_vm1, %v55_v54  ;;  %v23898_v61 = vpack.c.bf16 %v3474_v53, %v3473_v57  ;;  %v20950_v62 = vpop.f32.mrb[10].mxu1  ;;  %v65_v54 = vld [vmem:[#allocation4 + $0xa0] sm:$0xff] }
 0x129   :  { %v22537_v63 = vpack.c.bf16 %v20878_v58, %v538_v59  ;;  %v3476_v1 = vadd.f32 %v20950_v62, %v20878_v58  ;;  %v763_v2 = vpop.f32.mrb[11].mxu1 }
 0x12a   :  { %v23900_v3 = vpack.c.bf16 %v20950_v62, %v763_v2  ;;  %v3475_v6 = vadd.f32 %v763_v2, %v538_v59 }
 0x12b   :  { %v20881_v7 = vpop.f32.mrb[12].mxu0  ;;  %21014 = vmatmul.mubr.msk.f32.vlgmr.msra.gmra.mrb[36].mxu0 %vm872_vm1, %v54_v60  ;;  %22538 = vmatprep.subr.bf16.mxu1 %v22537_v63 }
 0x12c   :  { %v548_v8 = vpop.f32.mrb[13].mxu0  ;;  %22540 = vmatpush3.bf16.msra.mxu1 %v22537_v63  ;;  %21027 = vmatprep.mubr.msk.f32.mxu0 %vm872_vm1, %v57_v0  ;;  %v23904_v10 = vpack.c.bf16 %v3476_v1, %v3475_v6  ;;  %v20953_v11 = vpop.f32.mrb[12].mxu1  ;;  %v64_v63 = vld [vmem:[#allocation4 + $0x98] sm:$0xff]  ;;  %v67_v6 = vld [vmem:[#allocation4 + $0xb0] sm:$0xff] }
 0x12d   :  { %v22541_v13 = vpack.c.bf16 %v20881_v7, %v548_v8  ;;  %v3478_v16 = vadd.f32 %v20953_v11, %v20881_v7  ;;  %v773_v17 = vpop.f32.mrb[13].mxu1 }
 0x12e   :  { %v23906_v18 = vpack.c.bf16 %v20953_v11, %v773_v17  ;;  %v3477_v19 = vadd.f32 %v773_v17, %v548_v8 }
 0x12f   :  { %v20884_v20 = vpop.f32.mrb[14].mxu0  ;;  %22542 = vmatprep.subr.bf16.mxu0 %v22541_v13  ;;  %21021 = vmatmul.mubr.msk.f32.vlgmr.msra.gmra.mrb[36].mxu1 %vm872_vm1, %v56_v9 }
 0x130   :  { %v558_v21 = vpop.f32.mrb[15].mxu0  ;;  %22544 = vmatpush3.bf16.msra.mxu0 %v22541_v13  ;;  %21034 = vmatprep.mubr.msk.f32.mxu1 %vm872_vm1, %v59_v14  ;;  %v23910_v24 = vpack.c.bf16 %v3478_v16, %v3477_v19  ;;  %v20956_v25 = vpop.f32.mrb[14].mxu1  ;;  %v66_v16 = vld [vmem:[#allocation4 + $0xa8] sm:$0xff] }
 0x131   :  { %v22545_v27 = vpack.c.bf16 %v20884_v20, %v558_v21  ;;  %v3480_v29 = vadd.f32 %v20956_v25, %v20884_v20  ;;  %v783_v30 = vpop.f32.mrb[15].mxu1 }
 0x132   :  { %v23912_v31 = vpack.c.bf16 %v20956_v25, %v783_v30  ;;  %v3479_v32 = vadd.f32 %v783_v30, %v558_v21  ;;  %v69_v21 = vld [vmem:[#allocation4 + $0xc0] sm:$0xff] }
 0x133   :  { %v20887_v33 = vpop.f32.mrb[16].mxu0  ;;  %21028 = vmatmul.mubr.msk.f32.vlgmr.msra.gmra.mrb[38].mxu0 %vm872_vm1, %v58_v22  ;;  %22546 = vmatprep.subr.bf16.mxu1 %v22545_v27 }
 0x134   :  { %v568_v35 = vpop.f32.mrb[17].mxu0  ;;  %22548 = vmatpush3.bf16.msra.mxu1 %v22545_v27  ;;  %21041 = vmatprep.mubr.msk.f32.mxu0 %vm872_vm1, %v61_v28  ;;  %v23916_v37 = vpack.c.bf16 %v3480_v29, %v3479_v32  ;;  %v20959_v39 = vpop.f32.mrb[16].mxu1  ;;  %v68_v32 = vld [vmem:[#allocation4 + $0xb8] sm:$0xff] }
 0x135   :  { %v22549_v40 = vpack.c.bf16 %v20887_v33, %v568_v35  ;;  %v3482_v42 = vadd.f32 %v20959_v39, %v20887_v33  ;;  %v793_v43 = vpop.f32.mrb[17].mxu1 }
 0x136   :  { %v23918_v44 = vpack.c.bf16 %v20959_v39, %v793_v43  ;;  %v3481_v46 = vadd.f32 %v793_v43, %v568_v35  ;;  %v71_v39 = vld [vmem:[#allocation4 + $0xd0] sm:$0xff] }
 0x137   :  { %v20890_v47 = vpop.f32.mrb[18].mxu0  ;;  %22550 = vmatprep.subr.bf16.mxu0 %v22549_v40  ;;  %21035 = vmatmul.mubr.msk.f32.vlgmr.msra.gmra.mrb[38].mxu1 %vm872_vm1, %v60_v36 }
 0x138   :  { %v578_v48 = vpop.f32.mrb[19].mxu0  ;;  %22552 = vmatpush3.bf16.msra.mxu0 %v22549_v40  ;;  %21048 = vmatprep.mubr.msk.f32.mxu1 %vm872_vm1, %v63_v41  ;;  %v23922_v51 = vpack.c.bf16 %v3482_v42, %v3481_v46  ;;  %v20962_v52 = vpop.f32.mrb[18].mxu1 }
 0x139   :  { %v22553_v53 = vpack.c.bf16 %v20890_v47, %v578_v48  ;;  %v3484_v55 = vadd.f32 %v20962_v52, %v20890_v47  ;;  %v803_v57 = vpop.f32.mrb[19].mxu1 }
 0x13a   :  { %v23924_v58 = vpack.c.bf16 %v20962_v52, %v803_v57  ;;  %v3483_v59 = vadd.f32 %v803_v57, %v578_v48  ;;  %v70_v48 = vld [vmem:[#allocation4 + $0xc8] sm:$0xff] }
 0x13b   :  { %v20893_v60 = vpop.f32.mrb[20].mxu0  ;;  %21042 = vmatmul.mubr.msk.f32.vlgmr.msra.gmra.mrb[40].mxu0 %vm872_vm1, %v62_v50  ;;  %22554 = vmatprep.subr.bf16.mxu1 %v22553_v53 }
 0x13c   :  { %v588_v62 = vpop.f32.mrb[21].mxu0  ;;  %22556 = vmatpush3.bf16.msra.mxu1 %v22553_v53  ;;  %21055 = vmatprep.mubr.msk.f32.mxu0 %vm872_vm1, %v65_v54  ;;  %v23928_v0 = vpack.c.bf16 %v3484_v55, %v3483_v59  ;;  %v20965_v1 = vpop.f32.mrb[20].mxu1  ;;  %v73_v54 = vld [vmem:[#allocation4 + $0xe0] sm:$0xff] }
 0x13d   :  { %v22557_v2 = vpack.c.bf16 %v20893_v60, %v588_v62  ;;  %v3486_v7 = vadd.f32 %v20965_v1, %v20893_v60  ;;  %v813_v8 = vpop.f32.mrb[21].mxu1 }
 0x13e   :  { %v23930_v9 = vpack.c.bf16 %v20965_v1, %v813_v8  ;;  %v3485_v11 = vadd.f32 %v813_v8, %v588_v62  ;;  %v72_v1 = vld [vmem:[#allocation4 + $0xd8] sm:$0xff]  ;;  %v75_v8 = vld [vmem:[#allocation4 + $0xf0] sm:$0xff] }
 0x13f   :  { %v20896_v13 = vpop.f32.mrb[22].mxu0  ;;  %22558 = vmatprep.subr.bf16.mxu0 %v22557_v2  ;;  %21049 = vmatmul.mubr.msk.f32.vlgmr.msra.gmra.mrb[40].mxu1 %vm872_vm1, %v64_v63 }
 0x140   :  { %v598_v14 = vpop.f32.mrb[23].mxu0  ;;  %22560 = vmatpush3.bf16.msra.mxu0 %v22557_v2  ;;  %21062 = vmatprep.mubr.msk.f32.mxu1 %vm872_vm1, %v67_v6  ;;  %v23934_v17 = vpack.c.bf16 %v3486_v7, %v3485_v11  ;;  %v20968_v19 = vpop.f32.mrb[22].mxu1 }
 0x141   :  { %v22561_v20 = vpack.c.bf16 %v20896_v13, %v598_v14  ;;  %v3488_v22 = vadd.f32 %v20968_v19, %v20896_v13  ;;  %v823_v25 = vpop.f32.mrb[23].mxu1 }
 0x142   :  { %v23936_v27 = vpack.c.bf16 %v20968_v19, %v823_v25  ;;  %v3487_v28 = vadd.f32 %v823_v25, %v598_v14 }
 0x143   :  { %v20899_v29 = vpop.f32.mrb[24].mxu0  ;;  %21056 = vmatmul.mubr.msk.f32.vlgmr.msra.gmra.mrb[42].mxu0 %vm872_vm1, %v66_v16  ;;  %22562 = vmatprep.subr.bf16.mxu1 %v22561_v20 }
 0x144   :  { %v608_v30 = vpop.f32.mrb[25].mxu0  ;;  %22564 = vmatpush3.bf16.msra.mxu1 %v22561_v20  ;;  %21069 = vmatprep.mubr.msk.f32.mxu0 %vm872_vm1, %v69_v21  ;;  %v23940_v33 = vpack.c.bf16 %v3488_v22, %v3487_v28  ;;  %v20971_v35 = vpop.f32.mrb[24].mxu1  ;;  %v74_v21 = vld [vmem:[#allocation4 + $0xe8] sm:$0xff] }
 0x145   :  { %v22565_v36 = vpack.c.bf16 %v20899_v29, %v608_v30  ;;  %v3490_v40 = vadd.f32 %v20971_v35, %v20899_v29  ;;  %v833_v41 = vpop.f32.mrb[25].mxu1 }
 0x146   :  { %v23942_v42 = vpack.c.bf16 %v20971_v35, %v833_v41  ;;  %v3489_v43 = vadd.f32 %v833_v41, %v608_v30 }
 0x147   :  { %v20902_v46 = vpop.f32.mrb[26].mxu0  ;;  %22566 = vmatprep.subr.bf16.mxu0 %v22565_v36  ;;  %21063 = vmatmul.mubr.msk.f32.vlgmr.msra.gmra.mrb[42].mxu1 %vm872_vm1, %v68_v32  ;;  %v78_v32 = vld [vmem:[#allocation4 + $0x100] sm:$0xff] }
 0x148   :  { %v618_v47 = vpop.f32.mrb[27].mxu0  ;;  %22568 = vmatpush3.bf16.msra.mxu0 %v22565_v36  ;;  %21076 = vmatprep.mubr.msk.f32.mxu1 %vm872_vm1, %v71_v39  ;;  %v23946_v50 = vpack.c.bf16 %v3490_v40, %v3489_v43  ;;  %v20974_v52 = vpop.f32.mrb[26].mxu1  ;;  %v76_v39 = vld [vmem:[#allocation4 + $0xf8] sm:$0xff]  ;;  %v79_v40 = vld [vmem:[#allocation4 + $0x108] sm:$0xff]  ;;  %v80_v43 = vld [vmem:[#allocation4 + $0x110] sm:$0xff] }
 0x149   :  { %v22569_v53 = vpack.c.bf16 %v20902_v46, %v618_v47  ;;  %v3492_v55 = vadd.f32 %v20974_v52, %v20902_v46  ;;  %v843_v57 = vpop.f32.mrb[27].mxu1  ;;  %v82_v46 = vld [vmem:[#allocation4 + $0x120] sm:$0xff] }
 0x14a   :  { %v23948_v59 = vpack.c.bf16 %v20974_v52, %v843_v57  ;;  %v3491_v60 = vadd.f32 %v843_v57, %v618_v47  ;;  %v83_v47 = vld [vmem:[#allocation4 + $0x128] sm:$0xff]  ;;  %v86_v52 = vld [vmem:[#allocation4 + $0x140] sm:$0xff] }
 0x14b   :  { %v20905_v62 = vpop.f32.mrb[28].mxu0  ;;  %21070 = vmatmul.mubr.msk.f32.vlgmr.msra.gmra.mrb[44].mxu0 %vm872_vm1, %v70_v48  ;;  %22570 = vmatprep.subr.bf16.mxu1 %v22569_v53  ;;  %v84_v48 = vld [vmem:[#allocation4 + $0x130] sm:$0xff]  ;;  %v94_v57 = vld [vmem:[#allocation4 + $0x180] sm:$0xff] }
 0x14c   :  { %v628_v63 = vpop.f32.mrb[29].mxu0  ;;  %22572 = vmatpush3.bf16.msra.mxu1 %v22569_v53  ;;  %21083 = vmatprep.mubr.msk.f32.mxu0 %vm872_vm1, %v73_v54  ;;  %v23952_v2 = vpack.c.bf16 %v3492_v55, %v3491_v60  ;;  %v20977_v6 = vpop.f32.mrb[28].mxu1  ;;  %v88_v53 = vld [vmem:[#allocation4 + $0x150] sm:$0xff]  ;;  %v90_v54 = vld [vmem:[#allocation4 + $0x160] sm:$0xff] }
 0x14d   :  { %v22573_v7 = vpack.c.bf16 %v20905_v62, %v628_v63  ;;  %v3494_v11 = vadd.f32 %v20977_v6, %v20905_v62  ;;  %v853_v13 = vpop.f32.mrb[29].mxu1  ;;  %v92_v55 = vld [vmem:[#allocation4 + $0x170] sm:$0xff]  ;;  %v98_v62 = vld [vmem:[#allocation4 + $0x1a0] sm:$0xff] }
 0x14e   :  { %v23954_v14 = vpack.c.bf16 %v20977_v6, %v853_v13  ;;  %v3493_v16 = vadd.f32 %v853_v13, %v628_v63  ;;  %v96_v60 = vld [vmem:[#allocation4 + $0x190] sm:$0xff]  ;;  %v112_v13 = vld [vmem:[#allocation4 + $0x208] sm:$0xff] }
 0x14f   :  { %v20908_v19 = vpop.f32.mrb[30].mxu0  ;;  %22574 = vmatprep.subr.bf16.mxu0 %v22573_v7  ;;  %21077 = vmatmul.mubr.msk.f32.vlgmr.msra.gmra.mrb[44].mxu1 %vm872_vm1, %v72_v1  ;;  %v100_v63 = vld [vmem:[#allocation4 + $0x1b0] sm:$0xff]  ;;  %v102_v1 = vld [vmem:[#allocation4 + $0x1c0] sm:$0xff] }
 0x150   :  { %v638_v20 = vpop.f32.mrb[31].mxu0  ;;  %22576 = vmatpush3.bf16.msra.mxu0 %v22573_v7  ;;  %21090 = vmatprep.mubr.msk.f32.mxu1 %vm872_vm1, %v75_v8  ;;  %v23958_v22 = vpack.c.bf16 %v3494_v11, %v3493_v16  ;;  %v20980_v25 = vpop.f32.mrb[30].mxu1  ;;  %v104_v6 = vld [vmem:[#allocation4 + $0x1d0] sm:$0xff]  ;;  %v106_v7 = vld [vmem:[#allocation4 + $0x1e0] sm:$0xff] }
 0x151   :  { %v22577_v28 = vpack.c.bf16 %v20908_v19, %v638_v20  ;;  %22582 = vmatprep.subr.bf16.mxu0 %v23872_v12  ;;  %v3496_v29 = vadd.f32 %v20980_v25, %v20908_v19  ;;  %v863_v30 = vpop.f32.mrb[31].mxu1  ;;  %v108_v8 = vld [vmem:[#allocation4 + $0x1f0] sm:$0xff]  ;;  %v111_v11 = vld [vmem:[#allocation4 + $0x200] sm:$0xff]  ;;  %v116_v19 = vld [vmem:[#allocation4 + $0x228] sm:$0xff] }
 0x152   :  { %v23961_v35 = vpack.c.bf16 %v20980_v25, %v863_v30  ;;  %v3495_v36 = vadd.f32 %v863_v30, %v638_v20  ;;  %v115_v16 = vld [vmem:[#allocation4 + $0x220] sm:$0xff]  ;;  %v117_v20 = vld [vmem:[#allocation4 + $0x230] sm:$0xff] }
 0x153   :  { %21084 = vmatmul.mubr.msk.f32.vlgmr.msra.gmra.mrb[46].mxu0 %vm872_vm1, %v74_v21  ;;  %22578 = vmatprep.subr.bf16.mxu1 %v22577_v28  ;;  %v119_v21 = vld [vmem:[#allocation4 + $0x240] sm:$0xff]  ;;  %v121_v25 = vld [vmem:[#allocation4 + $0x250] sm:$0xff] }
 0x154   :  { %22580 = vmatpush3.bf16.msra.mxu1 %v22577_v28  ;;  %22584 = vmatpush3.bf16.msra.mxu0 %v23872_v12  ;;  %v23965_v41 = vpack.c.bf16 %v3496_v29, %v3495_v36  ;;  %v81_v12 = vld [vmem:[#allocation4 + $0x118] sm:$0xff]  ;;  %v123_v28 = vld [vmem:[#allocation4 + $0x260] sm:$0xff]  ;;  %v125_v29 = vld [vmem:[#allocation4 + $0x270] sm:$0xff] }
 0x155   :  { %21097 = vmatprep.mubr.msk.f32.mxu0 %vm872_vm1, %v78_v32  ;;  %22586 = vmatprep.subr.bf16.mxu1 %v23876_v23  ;;  %v127_v30 = vld [vmem:[#allocation4 + $0x280] sm:$0xff]  ;;  %v129_v32 = vld [vmem:[#allocation4 + $0x290] sm:$0xff] }
 0x156   :  { %22590 = vmatprep.subr.bf16.mxu0 %v23882_v34  ;;  %v133_v36 = vld [vmem:[#allocation4 + $0x2b0] sm:$0xff] }
 0x157   :  { %21091 = vmatmul.mubr.msk.f32.vlgmr.msra.gmra.mrb[46].mxu1 %vm872_vm1, %v76_v39  ;;  %21098 = vmatmul.mubr.msk.f32.vlgmr.msra.gmra.mrb[48].mxu0 %vm872_vm1, %v79_v40  ;;  %v135_v39 = vld [vmem:[#allocation4 + $0x2c0] sm:$0xff]  ;;  %v137_v40 = vld [vmem:[#allocation4 + $0x2d0] sm:$0xff] }
 0x158   :  { %22588 = vmatpush3.bf16.msra.mxu1 %v23876_v23  ;;  %22592 = vmatpush3.bf16.msra.mxu0 %v23882_v34  ;;  %v85_v23 = vld [vmem:[#allocation4 + $0x138] sm:$0xff]  ;;  %v87_v34 = vld [vmem:[#allocation4 + $0x148] sm:$0xff] }
 0x159   :  { %21104 = vmatprep.mubr.msk.f32.mxu1 %vm872_vm1, %v80_v43  ;;  %21111 = vmatprep.mubr.msk.f32.mxu0 %vm872_vm1, %v82_v46  ;;  %v139_v43 = vld [vmem:[#allocation4 + $0x2e0] sm:$0xff]  ;;  %v141_v46 = vld [vmem:[#allocation4 + $0x2f0] sm:$0xff] }
 0x15a   :  { %22594 = vmatprep.subr.bf16.mxu1 %v23888_v45  ;;  %22598 = vmatprep.subr.bf16.mxu0 %v23894_v56 }
 0x15b   :  { %21105 = vmatmul.mubr.msk.f32.vlgmr.msra.gmra.mrb[48].mxu1 %vm872_vm1, %v81_v12  ;;  %21112 = vmatmul.mubr.msk.f32.vlgmr.msra.gmra.mrb[50].mxu0 %vm872_vm1, %v83_v47 }
 0x15c   :  { %22596 = vmatpush3.bf16.msra.mxu1 %v23888_v45  ;;  %22600 = vmatpush3.bf16.msra.mxu0 %v23894_v56  ;;  %v89_v45 = vld [vmem:[#allocation4 + $0x158] sm:$0xff]  ;;  %v91_v56 = vld [vmem:[#allocation4 + $0x168] sm:$0xff] }
 0x15d   :  { %21118 = vmatprep.mubr.msk.f32.mxu1 %vm872_vm1, %v84_v48  ;;  %21125 = vmatprep.mubr.msk.f32.mxu0 %vm872_vm1, %v86_v52 }
 0x15e   :  { %22602 = vmatprep.subr.bf16.mxu1 %v23900_v3  ;;  %22606 = vmatprep.subr.bf16.mxu0 %v23906_v18 }
 0x15f   :  { %21119 = vmatmul.mubr.msk.f32.vlgmr.msra.gmra.mrb[50].mxu1 %vm872_vm1, %v85_v23  ;;  %21126 = vmatmul.mubr.msk.f32.vlgmr.msra.gmra.mrb[52].mxu0 %vm872_vm1, %v87_v34 }
 0x160   :  { %22604 = vmatpush3.bf16.msra.mxu1 %v23900_v3  ;;  %22608 = vmatpush3.bf16.msra.mxu0 %v23906_v18  ;;  %v93_v3 = vld [vmem:[#allocation4 + $0x178] sm:$0xff]  ;;  %v95_v18 = vld [vmem:[#allocation4 + $0x188] sm:$0xff] }
 0x161   :  { %21132 = vmatprep.mubr.msk.f32.mxu1 %vm872_vm1, %v88_v53  ;;  %21139 = vmatprep.mubr.msk.f32.mxu0 %vm872_vm1, %v90_v54 }
 0x162   :  { %22610 = vmatprep.subr.bf16.mxu1 %v23912_v31  ;;  %22614 = vmatprep.subr.bf16.mxu0 %v23918_v44 }
 0x163   :  { %21133 = vmatmul.mubr.msk.f32.vlgmr.msra.gmra.mrb[52].mxu1 %vm872_vm1, %v89_v45  ;;  %21140 = vmatmul.mubr.msk.f32.vlgmr.msra.gmra.mrb[54].mxu0 %vm872_vm1, %v91_v56 }
 0x164   :  { %22612 = vmatpush3.bf16.msra.mxu1 %v23912_v31  ;;  %22616 = vmatpush3.bf16.msra.mxu0 %v23918_v44  ;;  %v97_v31 = vld [vmem:[#allocation4 + $0x198] sm:$0xff]  ;;  %v99_v44 = vld [vmem:[#allocation4 + $0x1a8] sm:$0xff] }
 0x165   :  { %21146 = vmatprep.mubr.msk.f32.mxu1 %vm872_vm1, %v92_v55  ;;  %21153 = vmatprep.mubr.msk.f32.mxu0 %vm872_vm1, %v94_v57 }
 0x166   :  { %22618 = vmatprep.subr.bf16.mxu1 %v23924_v58  ;;  %22622 = vmatprep.subr.bf16.mxu0 %v23930_v9 }
 0x167   :  { %21147 = vmatmul.mubr.msk.f32.vlgmr.msra.gmra.mrb[54].mxu1 %vm872_vm1, %v93_v3  ;;  %21154 = vmatmul.mubr.msk.f32.vlgmr.msra.gmra.mrb[56].mxu0 %vm872_vm1, %v95_v18 }
 0x168   :  { %22620 = vmatpush3.bf16.msra.mxu1 %v23924_v58  ;;  %22624 = vmatpush3.bf16.msra.mxu0 %v23930_v9  ;;  %v101_v58 = vld [vmem:[#allocation4 + $0x1b8] sm:$0xff]  ;;  %v103_v9 = vld [vmem:[#allocation4 + $0x1c8] sm:$0xff] }
 0x169   :  { %21160 = vmatprep.mubr.msk.f32.mxu1 %vm872_vm1, %v96_v60  ;;  %21167 = vmatprep.mubr.msk.f32.mxu0 %vm872_vm1, %v98_v62 }
 0x16a   :  { %22626 = vmatprep.subr.bf16.mxu1 %v23936_v27  ;;  %22630 = vmatprep.subr.bf16.mxu0 %v23942_v42 }
 0x16b   :  { %21161 = vmatmul.mubr.msk.f32.vlgmr.msra.gmra.mrb[56].mxu1 %vm872_vm1, %v97_v31  ;;  %21168 = vmatmul.mubr.msk.f32.vlgmr.msra.gmra.mrb[58].mxu0 %vm872_vm1, %v99_v44 }
 0x16c   :  { %22628 = vmatpush3.bf16.msra.mxu1 %v23936_v27  ;;  %22632 = vmatpush3.bf16.msra.mxu0 %v23942_v42  ;;  %v105_v27 = vld [vmem:[#allocation4 + $0x1d8] sm:$0xff]  ;;  %v107_v42 = vld [vmem:[#allocation4 + $0x1e8] sm:$0xff] }
 0x16d   :  { %21174 = vmatprep.mubr.msk.f32.mxu1 %vm872_vm1, %v100_v63  ;;  %21181 = vmatprep.mubr.msk.f32.mxu0 %vm872_vm1, %v102_v1 }
 0x16e   :  { %22634 = vmatprep.subr.bf16.mxu1 %v23948_v59  ;;  %22638 = vmatprep.subr.bf16.mxu0 %v23954_v14 }
 0x16f   :  { %21175 = vmatmul.mubr.msk.f32.vlgmr.msra.gmra.mrb[58].mxu1 %vm872_vm1, %v101_v58  ;;  %21182 = vmatmul.mubr.msk.f32.vlgmr.msra.gmra.mrb[60].mxu0 %vm872_vm1, %v103_v9 }
 0x170   :  { %22636 = vmatpush3.bf16.msra.mxu1 %v23948_v59  ;;  %22640 = vmatpush3.bf16.msra.mxu0 %v23954_v14  ;;  %v109_v59 = vld [vmem:[#allocation4 + $0x1f8] sm:$0xff]  ;;  %v113_v14 = vld [vmem:[#allocation4 + $0x210] sm:$0xff] }
 0x171   :  { %22646 = vmatprep.subr.bf16.mxu0 %v23874_v15  ;;  %21188 = vmatprep.mubr.msk.f32.mxu1 %vm872_vm1, %v104_v6 }
 0x172   :  { %21195 = vmatprep.mubr.msk.f32.mxu0 %vm872_vm1, %v106_v7  ;;  %22642 = vmatprep.subr.bf16.mxu1 %v23961_v35 }
 0x173   :  { %21189 = vmatmul.mubr.msk.f32.vlgmr.msra.gmra.mrb[60].mxu1 %vm872_vm1, %v105_v27  ;;  %21196 = vmatmul.mubr.msk.f32.vlgmr.msra.gmra.mrb[62].mxu0 %vm872_vm1, %v107_v42 }
 0x174   :  { %22644 = vmatpush3.bf16.msra.mxu1 %v23961_v35  ;;  %22648 = vmatpush3.bf16.msra.mxu0 %v23874_v15  ;;  %v114_v15 = vld [vmem:[#allocation4 + $0x218] sm:$0xff]  ;;  %v131_v35 = vld [vmem:[#allocation4 + $0x2a0] sm:$0xff] }
 0x175   :  { %22650 = vmatprep.subr.bf16.mxu1 %v23879_v26  ;;  %22654 = vmatprep.subr.bf16.mxu0 %v23885_v38 }
 0x176   :  { %21202 = vmatprep.mubr.msk.f32.mxu1 %vm872_vm1, %v108_v8  ;;  %21209 = vmatprep.mubr.msk.f32.mxu0 %vm872_vm1, %v111_v11  ;;  %v23581_v8 = vmov 1983009808  }
 0x177   :  { %21203 = vmatmul.mubr.msk.f32.vlgmr.msra.gmra.mrb[62].mxu1 %vm872_vm1, %v109_v59  ;;  %21210 = vmatmul.mubr.msk.f32.vlgmr.msra.gmra.mrb[64].mxu0 %vm872_vm1, %v112_v13  ;;  %v4892_v11 = vunpack.c.l.s4 %v23581_v8  ;;  %v4894_v59 = vlaneseq }
 0x178   :  { %22652 = vmatpush3.bf16.msra.mxu1 %v23879_v26  ;;  %22656 = vmatpush3.bf16.msra.mxu0 %v23885_v38  ;;  %v118_v26 = vld [vmem:[#allocation4 + $0x238] sm:$0xff]  ;;  %v120_v38 = vld [vmem:[#allocation4 + $0x248] sm:$0xff] }
 0x179   :  { %22658 = vmatprep.subr.bf16.mxu1 %v23892_v49  ;;  %22662 = vmatprep.subr.bf16.mxu0 %v23898_v61 }
 0x17a   :  { %21216 = vmatprep.mubr.msk.f32.mxu1 %vm872_vm1, %v113_v14  ;;  %21223 = vmatprep.mubr.msk.f32.mxu0 %vm872_vm1, %v115_v16 }
 0x17b   :  { %21217 = vmatmul.mubr.msk.f32.vlgmr.msra.gmra.mrb[64].mxu1 %vm872_vm1, %v114_v15  ;;  %21224 = vmatmul.mubr.msk.f32.vlgmr.msra.gmra.mrb[66].mxu0 %vm872_vm1, %v116_v19 }
 0x17c   :  { %22660 = vmatpush3.bf16.msra.mxu1 %v23892_v49  ;;  %22664 = vmatpush3.bf16.msra.mxu0 %v23898_v61  ;;  %v122_v49 = vld [vmem:[#allocation4 + $0x258] sm:$0xff]  ;;  %v124_v61 = vld [vmem:[#allocation4 + $0x268] sm:$0xff] }
 0x17d   :  { %22666 = vmatprep.subr.bf16.mxu1 %v23904_v10  ;;  %22670 = vmatprep.subr.bf16.mxu0 %v23910_v24 }
 0x17e   :  { %21230 = vmatprep.mubr.msk.f32.mxu1 %vm872_vm1, %v117_v20  ;;  %21237 = vmatprep.mubr.msk.f32.mxu0 %vm872_vm1, %v119_v21  ;;  %v23582_v21 = vmov 1934713408  }
 0x17f   :  { %21231 = vmatmul.mubr.msk.f32.vlgmr.msra.gmra.mrb[66].mxu1 %vm872_vm1, %v118_v26  ;;  %21238 = vmatmul.mubr.msk.f32.vlgmr.msra.gmra.mrb[68].mxu0 %vm872_vm1, %v120_v38  ;;  %v4956_v26 = vunpack.c.l.s4 %v23582_v21  ;;  %v4893_v38 = vunpack.c.0.s8 %v4892_v11 }
 0x180   :  { %22668 = vmatpush3.bf16.msra.mxu1 %v23904_v10  ;;  %22672 = vmatpush3.bf16.msra.mxu0 %v23910_v24  ;;  %v126_v10 = vld [vmem:[#allocation4 + $0x278] sm:$0xff]  ;;  %v128_v24 = vld [vmem:[#allocation4 + $0x288] sm:$0xff] }
 0x181   :  { %22674 = vmatprep.subr.bf16.mxu1 %v23916_v37  ;;  %22678 = vmatprep.subr.bf16.mxu0 %v23922_v51 }
 0x182   :  { %21244 = vmatprep.mubr.msk.f32.mxu1 %vm872_vm1, %v121_v25  ;;  %21251 = vmatprep.mubr.msk.f32.mxu0 %vm872_vm1, %v123_v28  ;;  %v4895_v25 = vshrl.u32 %v4894_v59, 7 }
 0x183   :  { %21245 = vmatmul.mubr.msk.f32.vlgmr.msra.gmra.mrb[68].mxu1 %vm872_vm1, %v122_v49  ;;  %21252 = vmatmul.mubr.msk.f32.vlgmr.msra.gmra.mrb[70].mxu0 %vm872_vm1, %v124_v61 }
 0x184   :  { %22676 = vmatpush3.bf16.msra.mxu1 %v23916_v37  ;;  %22680 = vmatpush3.bf16.msra.mxu0 %v23922_v51  ;;  %v130_v37 = vld [vmem:[#allocation4 + $0x298] sm:$0xff]  ;;  %v132_v51 = vld [vmem:[#allocation4 + $0x2a8] sm:$0xff] }
 0x185   :  { %22682 = vmatprep.subr.bf16.mxu1 %v23928_v0  ;;  %22686 = vmatprep.subr.bf16.mxu0 %v23934_v17 }
 0x186   :  { %21258 = vmatprep.mubr.msk.f32.mxu1 %vm872_vm1, %v125_v29  ;;  %21265 = vmatprep.mubr.msk.f32.mxu0 %vm872_vm1, %v127_v30 }
 0x187   :  { %21259 = vmatmul.mubr.msk.f32.vlgmr.msra.gmra.mrb[70].mxu1 %vm872_vm1, %v126_v10  ;;  %21266 = vmatmul.mubr.msk.f32.vlgmr.msra.gmra.mrb[72].mxu0 %vm872_vm1, %v128_v24 }
 0x188   :  { %22684 = vmatpush3.bf16.msra.mxu1 %v23928_v0  ;;  %22688 = vmatpush3.bf16.msra.mxu0 %v23934_v17  ;;  %v134_v0 = vld [vmem:[#allocation4 + $0x2b8] sm:$0xff]  ;;  %v136_v17 = vld [vmem:[#allocation4 + $0x2c8] sm:$0xff] }
 0x189   :  { %22690 = vmatprep.subr.bf16.mxu1 %v23940_v33  ;;  %22694 = vmatprep.subr.bf16.mxu0 %v23946_v50 }
 0x18a   :  { %21272 = vmatprep.mubr.msk.f32.mxu1 %vm872_vm1, %v129_v32  ;;  %21279 = vmatprep.mubr.msk.f32.mxu0 %vm872_vm1, %v131_v35  ;;  %v4957_v35 = vunpack.c.0.s8 %v4956_v26 }
 0x18b   :  { %21273 = vmatmul.mubr.msk.f32.vlgmr.msra.gmra.mrb[72].mxu1 %vm872_vm1, %v130_v37  ;;  %21280 = vmatmul.mubr.msk.f32.vlgmr.msra.gmra.mrb[74].mxu0 %vm872_vm1, %v132_v51  ;;  %v24186_v37 = vsub.s32 %v4893_v38, %v4895_v25 }
 0x18c   :  { %22692 = vmatpush3.bf16.msra.mxu1 %v23940_v33  ;;  %22696 = vmatpush3.bf16.msra.mxu0 %v23946_v50  ;;  %v138_v33 = vld [vmem:[#allocation4 + $0x2d8] sm:$0xff]  ;;  %v140_v50 = vld [vmem:[#allocation4 + $0x2e8] sm:$0xff]  ;;  %v24204_v11 = vsub.s32 %v4957_v35, %v4895_v25 }
 0x18d   :  { %22698 = vmatprep.subr.bf16.mxu1 %v23952_v2  ;;  %22702 = vmatprep.subr.bf16.mxu0 %v23958_v22  ;;  %28398 = vst [vmem:[#allocation20_spill] sm:$0xff] %v24186_v37 }
 0x18e   :  { %21286 = vmatprep.mubr.msk.f32.mxu1 %vm872_vm1, %v133_v36  ;;  %21293 = vmatprep.mubr.msk.f32.mxu0 %vm872_vm1, %v135_v39  ;;  %28402 = vst [vmem:[#allocation24_spill] sm:$0xff] %v24204_v11 }
 0x18f   :  { %21287 = vmatmul.mubr.msk.f32.vlgmr.msra.gmra.mrb[74].mxu1 %vm872_vm1, %v134_v0  ;;  %21294 = vmatmul.mubr.msk.f32.vlgmr.msra.gmra.mrb[76].mxu0 %vm872_vm1, %v136_v17 }
 0x190   :  { %22700 = vmatpush3.bf16.msra.mxu1 %v23952_v2  ;;  %22704 = vmatpush3.bf16.msra.mxu0 %v23958_v22  ;;  %v142_v2 = vld [vmem:[#allocation4 + $0x2f8] sm:$0xff] }
 0x191   :  { %22706 = vmatprep.subr.bf16.mxu1 %v23965_v41  ;;  %21300 = vmatprep.mubr.msk.f32.mxu1 %vm872_vm1, %v137_v40 }
 0x192   :  { %21307 = vmatprep.mubr.msk.f32.mxu0 %vm872_vm1, %v139_v43 }
 0x193   :  { %21301 = vmatmul.mubr.msk.f32.vlgmr.msra.gmra.mrb[76].mxu1 %vm872_vm1, %v138_v33  ;;  %21308 = vmatmul.mubr.msk.f32.vlgmr.msra.gmra.mrb[78].mxu0 %vm872_vm1, %v140_v50 }
 0x194   :  { %22708 = vmatpush3.bf16.msra.mxu1 %v23965_v41  ;;  %21314 = vmatprep.mubr.msk.f32.mxu1 %vm872_vm1, %v141_v46 }
 0x195   :  { %21321 = vmatprep.mubr.msk.f32.mxu0 %vm872_vm1, %v23864_v4 }
 0x197   :  { %21315 = vmatmul.mubr.msk.f32.vlgmr.msra.gmra.mrb[78].mxu1 %vm872_vm1, %v142_v2 }
 0x198   :  { %21328 = vmatprep.mubr.msk.f32.mxu1 %vm872_vm1, %v23868_v5 }
 0x1ee   :  { %v24098_v22 = vpop.f32.mrb[32].mxu0 }
 0x1ef   :  { %v24100_v12 = vpop.f32.mrb[33].mxu0 }
 0x1f2   :  { %v24102_v47 = vpop.f32.mrb[32].mxu1 }
 0x1f3   :  { %v24104_v48 = vpop.f32.mrb[33].mxu1 }
 0x1f6   :  { %v24106_v41 = vpop.f32.mrb[34].mxu0 }
 0x1f7   :  { %v24108_v52 = vpop.f32.mrb[35].mxu0 }
 0x1fa   :  { %v24110_v23 = vpop.f32.mrb[34].mxu1 }
 0x1fb   :  { %v24112_v4 = vpop.f32.mrb[35].mxu1 }
 0x1fe   :  { %v24114_v34 = vpop.f32.mrb[36].mxu0 }
 0x1ff   :  { %v24116_v53 = vpop.f32.mrb[37].mxu0 }
 0x202   :  { %v24118_v5 = vpop.f32.mrb[36].mxu1 }
 0x203   :  { %v24120_v54 = vpop.f32.mrb[37].mxu1 }
 0x204   :  { %28386 = vst [vmem:[#allocation8_spill] sm:$0xff] %v24120_v54 }
 0x206   :  { %v24122_v45 = vpop.f32.mrb[38].mxu0 }
 0x207   :  { %v24124_v56 = vpop.f32.mrb[39].mxu0 }
 0x208   :  { %28387 = vst [vmem:[#allocation9_spill] sm:$0xff] %v24124_v56 }
 0x20a   :  { %v24126_v55 = vpop.f32.mrb[38].mxu1 }
 0x20b   :  { %v24128_v57 = vpop.f32.mrb[39].mxu1 }
 0x20e   :  { %v24130_v3 = vpop.f32.mrb[40].mxu0 }
 0x20f   :  { %v24132_v18 = vpop.f32.mrb[41].mxu0 }
 0x212   :  { %v24134_v60 = vpop.f32.mrb[40].mxu1 }
 0x213   :  { %28388 = vst [vmem:[#allocation10_spill] sm:$0xff] %v24134_v60  ;;  %v24136_v62 = vpop.f32.mrb[41].mxu1 }
 0x216   :  { %v24138_v31 = vpop.f32.mrb[42].mxu0 }
 0x217   :  { %28389 = vst [vmem:[#allocation11_spill] sm:$0xff] %v24138_v31  ;;  %v24140_v44 = vpop.f32.mrb[43].mxu0 }
 0x218   :  { %28390 = vst [vmem:[#allocation12_spill] sm:$0xff] %v24140_v44 }
 0x21a   :  { %v24142_v63 = vpop.f32.mrb[42].mxu1 }
 0x21b   :  { %v24144_v1 = vpop.f32.mrb[43].mxu1 }
 0x21c   :  { %28391 = vst [vmem:[#allocation13_spill] sm:$0xff] %v24144_v1 }
 0x21e   :  { %v24146_v58 = vpop.f32.mrb[44].mxu0 }
 0x21f   :  { %v24148_v9 = vpop.f32.mrb[45].mxu0 }
 0x220   :  { %28392 = vst [vmem:[#allocation14_spill] sm:$0xff] %v24148_v9 }
 0x222   :  { %v24150_v6 = vpop.f32.mrb[44].mxu1 }
 0x223   :  { %28393 = vst [vmem:[#allocation15_spill] sm:$0xff] %v24150_v6  ;;  %v24152_v7 = vpop.f32.mrb[45].mxu1 }
 0x224   :  { %28394 = vst [vmem:[#allocation16_spill] sm:$0xff] %v24152_v7 }
 0x226   :  { %v24154_v27 = vpop.f32.mrb[46].mxu0 }
 0x227   :  { %28395 = vst [vmem:[#allocation17_spill] sm:$0xff] %v24154_v27  ;;  %v24156_v42 = vpop.f32.mrb[47].mxu0 }
 0x228   :  { %28396 = vst [vmem:[#allocation18_spill] sm:$0xff] %v24156_v42 }
 0x22a   :  { %v24158_v13 = vpop.f32.mrb[46].mxu1  ;;  %v24160_v14 = vpop.f32.mrb[48].mxu0 }
 0x22b   :  { %v4794_v16 = vsub.f32 %v24098_v22, %v24160_v14  ;;  %v24164_v15 = vpop.f32.mrb[47].mxu1  ;;  %v24166_v19 = vpop.f32.mrb[49].mxu0 }
 0x22c   :  { %28397 = vst [vmem:[#allocation19_spill] sm:$0xff] %v24164_v15  ;;  %v4793_v20 = vsub.f32 %v24100_v12, %v24166_v19 }
 0x22e   :  { %v24170_v28 = vpop.f32.mrb[48].mxu1  ;;  %v24172_v49 = vpop.f32.mrb[50].mxu0 }
 0x22f   :  { %v4796_v61 = vsub.f32 %v24102_v47, %v24170_v28  ;;  %v4798_v29 = vsub.f32 %v24106_v41, %v24172_v49  ;;  %v24178_v30 = vpop.f32.mrb[49].mxu1  ;;  %v24180_v10 = vpop.f32.mrb[51].mxu0 }
 0x230   :  { %v4795_v24 = vsub.f32 %v24104_v48, %v24178_v30  ;;  %v4797_v32 = vsub.f32 %v24108_v52, %v24180_v10 }
 0x231   :  { %v5161_v51 = vcombine.low %v4794_v16, %v4798_v29  ;;  %v5162_v36 = vcombine.high %v4794_v16, %v4798_v29 }
 0x232   :  { %v4889_v39 = vcombine.low %v4793_v20, %v4797_v32  ;;  %v4890_v0 = vcombine.high %v4793_v20, %v4797_v32  ;;  %v24188_v17 = vpop.f32.mrb[50].mxu1  ;;  %v24190_v40 = vpop.f32.mrb[52].mxu0 }
 0x233   :  { %28399 = vst [vmem:[#allocation21_spill] sm:$0xff] %v24190_v40  ;;  %v4800_v43 = vsub.f32 %v24110_v23, %v24188_v17  ;;  %v24194_v33 = vpop.f32.mrb[51].mxu1  ;;  %v4802_v50 = vsub.f32 %v24114_v34, %v24190_v40  ;;  %v24198_v46 = vpop.f32.mrb[53].mxu0  ;;  %v24207_v59 = vrot.slane %v5161_v51, %v24186_v37  ;;  %v24210_v16 = vrot.slane %v5162_v36, %v24186_v37 }
 0x234   :  { %28400 = vst [vmem:[#allocation22_spill] sm:$0xff] %v24194_v33  ;;  %28401 = vst [vmem:[#allocation23_spill] sm:$0xff] %v24198_v46  ;;  %v4799_v2 = vsub.f32 %v24112_v4, %v24194_v33  ;;  %v4801_v8 = vsub.f32 %v24116_v53, %v24198_v46  ;;  %v4897_v26 = vrot.slane %v4889_v39, %v24186_v37 }
 0x235   :  { %28403 = vst [vmem:[#allocation25_spill] sm:$0xff] %v24207_v59  ;;  %28404 = vst [vmem:[#allocation26_spill] sm:$0xff] %v24210_v16  ;;  %v5177_v20 = vcombine.low %v4796_v61, %v4800_v43  ;;  %v5178_v21 = vcombine.high %v4796_v61, %v4800_v43  ;;  %v24214_v38 = vrot.slane %v4890_v0, %v24186_v37 }
 0x236   :  { %v4905_v29 = vcombine.low %v4795_v24, %v4799_v2  ;;  %v4906_v32 = vcombine.high %v4795_v24, %v4799_v2  ;;  %v24216_v33 = vpop.f32.mrb[52].mxu1  ;;  %v24218_v46 = vpop.f32.mrb[54].mxu0 }
 0x237   :  { %28405 = vst [vmem:[#allocation27_spill] sm:$0xff] %v24214_v38  ;;  %28406 = vst [vmem:[#allocation28_spill] sm:$0xff] %v24216_v33  ;;  %v24221_v25 = vrot.slane %v5177_v20, %v24186_v37  ;;  %v24224_v35 = vrot.slane %v5178_v21, %v24186_v37  ;;  %v4804_v61 = vsub.f32 %v24118_v5, %v24216_v33  ;;  %v24230_v36 = vpop.f32.mrb[53].mxu1  ;;  %v24232_v39 = vpop.f32.mrb[55].mxu0 }
 0x238   :  { %28407 = vst [vmem:[#allocation29_spill] sm:$0xff] %v24218_v46  ;;  %v4806_v51 = vsub.f32 %v24122_v45, %v24218_v46  ;;  %28410 = vst [vmem:[#allocation32_spill] sm:$0xff] %v24230_v36  ;;  %v4913_v24 = vrot.slane %v4905_v29, %v24186_v37  ;;  %v24236_v0 = vrot.slane %v4906_v32, %v24186_v37 }
 0x239   :  { %28408 = vst [vmem:[#allocation30_spill] sm:$0xff] %v24221_v25  ;;  %28409 = vst [vmem:[#allocation31_spill] sm:$0xff] %v24224_v35  ;;  %v4803_v43 = vsub.f32 %v24120_v54, %v24230_v36  ;;  %v4805_v2 = vsub.f32 %v24124_v56, %v24232_v39 }
 0x23a   :  { %28411 = vst [vmem:[#allocation33_spill] sm:$0xff] %v24232_v39  ;;  %28412 = vst [vmem:[#allocation34_spill] sm:$0xff] %v24236_v0  ;;  %v4953_v32 = vcombine.low %v4897_v26, %v4913_v24  ;;  %v4954_v33 = vcombine.high %v4897_v26, %v4913_v24  ;;  %v24254_v56 = vpop.f32.mrb[54].mxu1  ;;  %v24256_v20 = vpop.f32.mrb[56].mxu0  ;;  %v5193_v54 = vcombine.low %v4802_v50, %v4806_v51 }
 0x23b   :  { %v5194_v21 = vcombine.high %v4802_v50, %v4806_v51  ;;  %v4921_v25 = vcombine.low %v4801_v8, %v4805_v2  ;;  %v4922_v59 = vcombine.high %v4801_v8, %v4805_v2  ;;  %v24258_v46 = vpop.f32.mrb[55].mxu1  ;;  %v24260_v40 = vpop.f32.mrb[57].mxu0  ;;  %v4808_v26 = vsub.f32 %v24126_v55, %v24254_v56 }
 0x23c   :  { %28413 = vst [vmem:[#allocation35_spill] sm:$0xff] %v24258_v46  ;;  %28414 = vst [vmem:[#allocation36_spill] sm:$0xff] %v24260_v40  ;;  %v4807_v24 = vsub.f32 %v24128_v57, %v24258_v46  ;;  %v4810_v29 = vsub.f32 %v24130_v3, %v24256_v20  ;;  %v4809_v39 = vsub.f32 %v24132_v18, %v24260_v40 }
 0x23d   :  { %v24271_v50 = vrot.slane %v5193_v54, %v24186_v37  ;;  %v24274_v8 = vrot.slane %v5194_v21, %v24186_v37  ;;  %v4929_v51 = vrot.slane %v4921_v25, %v24186_v37  ;;  %v24278_v2 = vrot.slane %v4922_v59, %v24186_v37 }
 0x23e   :  { %v5209_v36 = vcombine.low %v4804_v61, %v4808_v26  ;;  %v5210_v35 = vcombine.high %v4804_v61, %v4808_v26  ;;  %v4937_v16 = vcombine.low %v4803_v43, %v4807_v24  ;;  %v4938_v0 = vcombine.high %v4803_v43, %v4807_v24  ;;  %v24280_v38 = vpop.f32.mrb[56].mxu1  ;;  %v24282_v46 = vpop.f32.mrb[58].mxu0 }
 0x23f   :  { %28415 = vst [vmem:[#allocation37_spill] sm:$0xff] %v24271_v50  ;;  %28416 = vst [vmem:[#allocation38_spill] sm:$0xff] %v24274_v8  ;;  %v4812_v54 = vsub.f32 %v24134_v60, %v24280_v38  ;;  %v4814_v21 = vsub.f32 %v24138_v31, %v24282_v46  ;;  %v24288_v40 = vpop.f32.mrb[57].mxu1  ;;  %v24290_v25 = vpop.f32.mrb[59].mxu0  ;;  %v24293_v59 = vrot.slane %v4953_v32, %v24204_v11 }
 0x240   :  { %28417 = vst [vmem:[#allocation39_spill] sm:$0xff] %v24280_v38  ;;  %28418 = vst [vmem:[#allocation40_spill] sm:$0xff] %v24282_v46  ;;  %v24296_v61 = vrot.slane %v4954_v33, %v24204_v11  ;;  %v24299_v43 = vrot.slane %v5209_v36, %v24186_v37  ;;  %v24302_v26 = vrot.slane %v5210_v35, %v24186_v37 }
 0x241   :  { %28419 = vst [vmem:[#allocation41_spill] sm:$0xff] %v24288_v40  ;;  %28420 = vst [vmem:[#allocation42_spill] sm:$0xff] %v24290_v25  ;;  %v4945_v24 = vrot.slane %v4937_v16, %v24186_v37  ;;  %v24306_v46 = vrot.slane %v4938_v0, %v24186_v37  ;;  %v5297_v31 = vcombine.low %v4810_v29, %v4814_v21 }
 0x242   :  { %28421 = vst [vmem:[#allocation43_spill] sm:$0xff] %v24299_v43  ;;  %28422 = vst [vmem:[#allocation44_spill] sm:$0xff] %v24302_v26  ;;  %v5298_v38 = vcombine.high %v4810_v29, %v4814_v21  ;;  %v4811_v32 = vsub.f32 %v24136_v62, %v24288_v40  ;;  %v4813_v33 = vsub.f32 %v24140_v44, %v24290_v25  ;;  %v24320_v60 = vpop.f32.mrb[58].mxu1  ;;  %v24322_v29 = vpop.f32.mrb[60].mxu0 }
 0x243   :  { %28423 = vst [vmem:[#allocation45_spill] sm:$0xff] %v24320_v60  ;;  %28424 = vst [vmem:[#allocation46_spill] sm:$0xff] %v24322_v29  ;;  %v4985_v21 = vcombine.low %v4929_v51, %v4945_v24  ;;  %v4986_v40 = vcombine.high %v4929_v51, %v4945_v24  ;;  %v24328_v44 = vpop.f32.mrb[59].mxu1  ;;  %v24330_v35 = vpop.f32.mrb[61].mxu0  ;;  %v24333_v16 = vrot.slane %v5297_v31, %v24186_v37 }
 0x244   :  { %28425 = vst [vmem:[#allocation47_spill] sm:$0xff] %v24328_v44  ;;  %28426 = vst [vmem:[#allocation48_spill] sm:$0xff] %v24330_v35  ;;  %v24336_v0 = vrot.slane %v5298_v38, %v24186_v37  ;;  %v5025_v26 = vcombine.low %v4809_v39, %v4813_v33  ;;  %v5026_v8 = vcombine.high %v4809_v39, %v4813_v33 }
 0x245   :  { %28427 = vst [vmem:[#allocation49_spill] sm:$0xff] %v24333_v16  ;;  %v4816_v51 = vsub.f32 %v24142_v63, %v24320_v60  ;;  %v4815_v24 = vsub.f32 %v24144_v1, %v24328_v44  ;;  %v4818_v36 = vsub.f32 %v24146_v58, %v24322_v29  ;;  %v4817_v25 = vsub.f32 %v24148_v9, %v24330_v35 }
 0x246   :  { %28428 = vst [vmem:[#allocation50_spill] sm:$0xff] %v24336_v0  ;;  %v24347_v31 = vrot.slane %v5025_v26, %v24186_v37  ;;  %v24350_v38 = vrot.slane %v5026_v8, %v24186_v37  ;;  %v24352_v43 = vpop.f32.mrb[60].mxu1  ;;  %v24354_v39 = vpop.f32.mrb[62].mxu0  ;;  %v24357_v33 = vrot.slane %v4985_v21, %v24204_v11  ;;  %v24360_v50 = vrot.slane %v4986_v40, %v24204_v11 }
 0x247   :  { %28429 = vst [vmem:[#allocation51_spill] sm:$0xff] %v24352_v43  ;;  %28430 = vst [vmem:[#allocation52_spill] sm:$0xff] %v24354_v39  ;;  %v5313_v44 = vcombine.low %v4812_v54, %v4816_v51  ;;  %v5314_v29 = vcombine.high %v4812_v54, %v4816_v51  ;;  %v5041_v1 = vcombine.low %v4811_v32, %v4815_v24  ;;  %v24362_v9 = vpop.f32.mrb[61].mxu1  ;;  %v24364_v26 = vpop.f32.mrb[63].mxu0 }
 0x248   :  { %v5042_v35 = vcombine.high %v4811_v32, %v4815_v24  ;;  %28431 = vst [vmem:[#allocation53_spill] sm:$0xff] %v24362_v9  ;;  %28432 = vst [vmem:[#allocation54_spill] sm:$0xff] %v24364_v26  ;;  %v4820_v8 = vsub.f32 %v24150_v6, %v24352_v43  ;;  %v4822_v60 = vsub.f32 %v24154_v27, %v24354_v39 }
 0x249   :  { %v4819_v21 = vsub.f32 %v24152_v7, %v24362_v9  ;;  %v4821_v40 = vsub.f32 %v24156_v42, %v24364_v26  ;;  %v24375_v54 = vrot.slane %v5313_v44, %v24186_v37  ;;  %v24378_v32 = vrot.slane %v5314_v29, %v24186_v37 }
 0x24a   :  { %v24381_v51 = vrot.slane %v5041_v1, %v24186_v37  ;;  %v24384_v24 = vrot.slane %v5042_v35, %v24186_v37  ;;  %v5329_v43 = vcombine.low %v4818_v36, %v4822_v60  ;;  %v5330_v39 = vcombine.high %v4818_v36, %v4822_v60  ;;  %v24386_v9 = vpop.f32.mrb[62].mxu1  ;;  %v21211_v7 = vpop.f32.mrb[64].mxu0 }
 0x24b   :  { %28433 = vst [vmem:[#allocation55_spill] sm:$0xff] %v24375_v54  ;;  %28434 = vst [vmem:[#allocation56_spill] sm:$0xff] %v24378_v32  ;;  %v5057_v27 = vcombine.low %v4817_v25, %v4821_v40  ;;  %v5058_v6 = vcombine.high %v4817_v25, %v4821_v40  ;;  %v24396_v26 = vpop.f32.mrb[63].mxu1  ;;  %v3569_v60 = vpop.f32.mrb[65].mxu0  ;;  %v4824_v36 = vsub.f32 %v24158_v13, %v24386_v9 }
 0x24c   :  { %28435 = vst [vmem:[#allocation57_spill] sm:$0xff] %v24386_v9  ;;  %28436 = vst [vmem:[#allocation58_spill] sm:$0xff] %v24396_v26  ;;  %v5089_v25 = vcombine.low %v24347_v31, %v24381_v51  ;;  %v24407_v1 = vrot.slane %v5329_v43, %v24186_v37  ;;  %v24410_v35 = vrot.slane %v5330_v39, %v24186_v37 }
 0x24d   :  { %v24413_v44 = vrot.slane %v5057_v27, %v24186_v37  ;;  %v24416_v32 = vrot.slane %v5058_v6, %v24186_v37  ;;  %v4826_v40 = vsub.f32 %v21211_v7, %v24098_v22  ;;  %v4823_v29 = vsub.f32 %v24164_v15, %v24396_v26 }
 0x24e   :  { %v4825_v43 = vsub.f32 %v3569_v60, %v24100_v12  ;;  %v21218_v0 = vpop.f32.mrb[64].mxu1  ;;  %v21225_v54 = vpop.f32.mrb[66].mxu0  ;;  %v24428_v6 = vcombine.low %v24293_v59, %v24357_v33  ;;  %v24431_v9 = vrot.slane %v5089_v25, %v24204_v11  ;;  %v5345_v22 = vcombine.low %v4820_v8, %v4824_v36 }
 0x24f   :  { %v4828_v39 = vsub.f32 %v21218_v0, %v24102_v47  ;;  %v4830_v27 = vsub.f32 %v21225_v54, %v24106_v41  ;;  %v3650_v16 = vpop.f32.mrb[65].mxu1  ;;  %v3731_v42 = vpop.f32.mrb[67].mxu0  ;;  %v5346_v7 = vcombine.high %v4820_v8, %v4824_v36  ;;  %v4858_v26 = vsub.f32 %v4826_v40, %v24160_v14 }
 0x250   :  { %28437 = vst [vmem:[#allocation59_spill] sm:$0xff] %v24428_v6  ;;  %v5073_v12 = vcombine.low %v4819_v21, %v4823_v29  ;;  %v5074_v60 = vcombine.high %v4819_v21, %v4823_v29  ;;  %v4857_v15 = vsub.f32 %v4825_v43, %v24166_v19  ;;  %v24438_v0 = vrot.slane %v5345_v22, %v24186_v37 }
 0x251   :  { %v4860_v47 = vsub.f32 %v4828_v39, %v24170_v28  ;;  %v4862_v41 = vsub.f32 %v4830_v27, %v24172_v49  ;;  %v24441_v54 = vrot.slane %v5346_v7, %v24186_v37  ;;  %v4827_v8 = vsub.f32 %v3650_v16, %v24104_v48 }
 0x252   :  { %v24444_v25 = vrot.slane %v5073_v12, %v24186_v37  ;;  %v21232_v14 = vpop.f32.mrb[66].mxu1  ;;  %v21239_v36 = vpop.f32.mrb[68].mxu0  ;;  %v24448_v21 = vrot.slane %v5074_v60, %v24186_v37  ;;  %v4829_v49 = vsub.f32 %v3731_v42, %v24108_v52 }
 0x253   :  { %28438 = vst [vmem:[#allocation60_spill] sm:$0xff] %v24441_v54  ;;  %v5705_v19 = vcombine.low %v4858_v26, %v4862_v41  ;;  %v5706_v28 = vcombine.high %v4858_v26, %v4862_v41  ;;  %v3812_v29 = vpop.f32.mrb[67].mxu1  ;;  %v3893_v40 = vpop.f32.mrb[69].mxu0  ;;  %v4859_v12 = vsub.f32 %v4827_v8, %v24178_v30  ;;  %v4832_v48 = vsub.f32 %v21232_v14, %v24110_v23  ;;  %v28439_v8 = vld [vmem:[#allocation21_spill] sm:$0xff]  ;;  %v28440_v54 = vld [vmem:[#allocation22_spill] sm:$0xff]  ;;  %v28441_v14 = vld [vmem:[#allocation23_spill] sm:$0xff] }
 0x254   :  { %v4861_v60 = vsub.f32 %v4829_v49, %v24180_v10  ;;  %v4834_v39 = vsub.f32 %v21239_v36, %v24114_v34  ;;  %v4831_v43 = vsub.f32 %v3812_v29, %v24112_v4  ;;  %v4833_v26 = vsub.f32 %v3893_v40, %v24116_v53  ;;  %v28442_v36 = vld [vmem:[#allocation28_spill] sm:$0xff] }
 0x255   :  { %v24468_v22 = vrot.slane %v5705_v19, %v24186_v37  ;;  %v24471_v7 = vrot.slane %v5706_v28, %v24186_v37  ;;  %v4864_v10 = vsub.f32 %v4832_v48, %v24188_v17 }
 0x256   :  { %v21246_v41 = vpop.f32.mrb[68].mxu1  ;;  %v21253_v16 = vpop.f32.mrb[70].mxu0  ;;  %v5433_v52 = vcombine.low %v4857_v15, %v4861_v60  ;;  %v5434_v27 = vcombine.high %v4857_v15, %v4861_v60  ;;  %v4866_v49 = vsub.f32 %v4834_v39, %v28439_v8  ;;  %v4863_v23 = vsub.f32 %v4831_v43, %v28440_v54  ;;  %v28445_v8 = vld [vmem:[#allocation9_spill] sm:$0xff] }
 0x257   :  { %v3974_v42 = vpop.f32.mrb[69].mxu1  ;;  %v4055_v19 = vpop.f32.mrb[71].mxu0  ;;  %v4836_v28 = vsub.f32 %v21246_v41, %v24118_v5  ;;  %v4838_v30 = vsub.f32 %v21253_v16, %v24122_v45  ;;  %v4865_v34 = vsub.f32 %v4833_v26, %v28441_v14  ;;  %v28443_v5 = vld [vmem:[#allocation29_spill] sm:$0xff]  ;;  %v5721_v17 = vcombine.low %v4860_v47, %v4864_v10 }
 0x258   :  { %v24486_v4 = vrot.slane %v5433_v52, %v24186_v37  ;;  %v24489_v53 = vrot.slane %v5434_v27, %v24186_v37  ;;  %v5722_v48 = vcombine.high %v4860_v47, %v4864_v10  ;;  %v5449_v39 = vcombine.low %v4859_v12, %v4863_v23  ;;  %v28444_v52 = vld [vmem:[#allocation8_spill] sm:$0xff] }
 0x259   :  { %v24492_v15 = vsub.f32 %v4836_v28, %v28442_v36  ;;  %v4870_v29 = vsub.f32 %v4838_v30, %v28443_v5  ;;  %v5450_v16 = vcombine.high %v4859_v12, %v4863_v23  ;;  %v4835_v41 = vsub.f32 %v3974_v42, %v28444_v52  ;;  %v28447_v42 = vld [vmem:[#allocation32_spill] sm:$0xff] }
 0x25a   :  { %v21260_v45 = vpop.f32.mrb[70].mxu1  ;;  %v21267_v40 = vpop.f32.mrb[72].mxu0  ;;  %v4837_v27 = vsub.f32 %v4055_v19, %v28445_v8  ;;  %v24498_v14 = vrot.slane %v5721_v17, %v24186_v37  ;;  %v24501_v28 = vrot.slane %v5722_v48, %v24186_v37  ;;  %v24504_v30 = vrot.slane %v5449_v39, %v24186_v37 }
 0x25b   :  { %v4136_v54 = vpop.f32.mrb[71].mxu1  ;;  %v4217_v43 = vpop.f32.mrb[73].mxu0  ;;  %v5737_v26 = vcombine.low %v4866_v49, %v4870_v29  ;;  %v5738_v60 = vcombine.high %v4866_v49, %v4870_v29  ;;  %v24507_v47 = vrot.slane %v5450_v16, %v24186_v37  ;;  %v4867_v19 = vsub.f32 %v4835_v41, %v28447_v42  ;;  %v28448_v49 = vld [vmem:[#allocation33_spill] sm:$0xff] }
 0x25c   :  { %v4869_v23 = vsub.f32 %v4837_v27, %v28448_v49  ;;  %v4840_v49 = vsub.f32 %v21260_v45, %v24126_v55  ;;  %v4842_v39 = vsub.f32 %v21267_v40, %v24130_v3  ;;  %v28449_v48 = vcombine.low %v24413_v44, %v24444_v25 }
 0x25d   :  { %v24510_v12 = vrot.slane %v5737_v26, %v24186_v37  ;;  %v24513_v10 = vrot.slane %v5738_v60, %v24186_v37  ;;  %v24549_v29 = vcombine.high %v24293_v59, %v24357_v33  ;;  %v4839_v41 = vsub.f32 %v4136_v54, %v24128_v57  ;;  %v28453_v54 = vld [vmem:[#allocation35_spill] sm:$0xff] }
 0x25e   :  { %v24517_v36 = vpop.f32.mrb[72].mxu1  ;;  %v24519_v5 = vpop.f32.mrb[74].mxu0  ;;  %v5465_v27 = vcombine.low %v4865_v34, %v4869_v23  ;;  %v5466_v42 = vcombine.high %v4865_v34, %v4869_v23  ;;  %v5129_v17 = vrot.slane %v28449_v48, %v24204_v11  ;;  %v4841_v52 = vsub.f32 %v4217_v43, %v24132_v18  ;;  %v28454_v23 = vld [vmem:[#allocation36_spill] sm:$0xff] }
 0x25f   :  { %28446 = vst [vmem:[#allocation21_spill] sm:$0xff] %v24513_v10  ;;  %v24529_v16 = vpop.f32.mrb[73].mxu1  ;;  %v24531_v26 = vpop.f32.mrb[75].mxu0  ;;  %28450 = vst [vmem:[#allocation22_spill] sm:$0xff] %v24549_v29  ;;  %v4872_v45 = vsub.f32 %v4840_v49, %v24254_v56  ;;  %v24565_v40 = vsub.f32 %v4842_v39, %v24256_v20  ;;  %v4871_v43 = vsub.f32 %v4839_v41, %v28453_v54 }
 0x260   :  { %v24558_v55 = vrot.slane %v5465_v27, %v24186_v37  ;;  %v24561_v3 = vrot.slane %v5466_v42, %v24186_v37  ;;  %v24572_v18 = vcombine.low %v24431_v9, %v5129_v17  ;;  %v24575_v33 = vcombine.high %v24431_v9, %v5129_v17 }
 0x261   :  { %v24579_v48 = vsub.f32 %v4841_v52, %v28454_v23  ;;  %v5753_v56 = vcombine.low %v24492_v15, %v4872_v45  ;;  %v5754_v20 = vcombine.high %v24492_v15, %v4872_v45  ;;  %v24585_v39 = vcombine.low %v24296_v61, %v24360_v50 }
 0x262   :  { %v24553_v8 = vpop.f32.mrb[74].mxu1  ;;  %v24555_v34 = vpop.f32.mrb[76].mxu0  ;;  %28451 = vst [vmem:[#allocation23_spill] sm:$0xff] %v24572_v18  ;;  %28452 = vst [vmem:[#allocation28_spill] sm:$0xff] %v24575_v33  ;;  %v28455_v27 = vcombine.high %v24347_v31, %v24381_v51  ;;  %v22709_v9 = vpack.c.bf16 %v24572_v18, %v24428_v6  ;;  %v22713_v17 = vpack.c.bf16 %v24575_v33, %v24549_v29  ;;  %v28463_v33 = vld [vmem:[#allocation12_spill] sm:$0xff]  ;;  %v28470_v18 = vld [vmem:[#allocation41_spill] sm:$0xff] }
 0x263   :  { %v24567_v59 = vpop.f32.mrb[75].mxu1  ;;  %v24569_v57 = vpop.f32.mrb[77].mxu0  ;;  %v5481_v52 = vcombine.low %v4867_v19, %v4871_v43  ;;  %v5482_v41 = vcombine.high %v4867_v19, %v4871_v43  ;;  %v24600_v45 = vrot.slane %v5753_v56, %v24186_v37  ;;  %v24603_v54 = vrot.slane %v5754_v20, %v24186_v37 }
 0x264   :  { %v5104_v42 = vrot.slane %v28455_v27, %v24204_v11  ;;  %v28457_v31 = vcombine.high %v24413_v44, %v24444_v25  ;;  %v24611_v23 = vcombine.high %v24296_v61, %v24360_v50  ;;  %22710 = vmatprep.subr.bf16.mxu0 %v22709_v9  ;;  %22714 = vmatprep.subr.bf16.mxu1 %v22713_v17  ;;  %v28459_v27 = vld [vmem:[#allocation10_spill] sm:$0xff] }
 0x265   :  { %28456 = vst [vmem:[#allocation29_spill] sm:$0xff] %v24603_v54  ;;  %v24618_v56 = vrot.slane %v5481_v52, %v24186_v37  ;;  %v24621_v20 = vrot.slane %v5482_v41, %v24186_v37  ;;  %v4844_v44 = vsub.f32 %v24517_v36, %v28459_v27  ;;  %22712 = vmatpush3.bf16.msra.mxu0 %v22709_v9  ;;  %v28461_v9 = vld [vmem:[#allocation39_spill] sm:$0xff]  ;;  %v23339_v27 = vld [vmem:[#allocation4 + $0x8] sm:$0xff] }
 0x266   :  { %v24595_v49 = vpop.f32.mrb[76].mxu1  ;;  %v24597_v15 = vpop.f32.mrb[78].mxu0  ;;  %v5136_v51 = vrot.slane %v28457_v31, %v24204_v11  ;;  %28458 = vst [vmem:[#allocation8_spill] sm:$0xff] %v24611_v23  ;;  %22716 = vmatpush3.bf16.msra.mxu1 %v22713_v17  ;;  %v28462_v52 = vld [vmem:[#allocation11_spill] sm:$0xff]  ;;  %v4843_v36 = vsub.f32 %v24529_v16, %v24136_v62  ;;  %v4845_v17 = vsub.f32 %v24531_v26, %v28463_v33  ;;  %v28468_v16 = vld [vmem:[#allocation40_spill] sm:$0xff] }
 0x267   :  { %v24613_v19 = vpop.f32.mrb[77].mxu1  ;;  %v24615_v43 = vpop.f32.mrb[79].mxu0  ;;  %v24648_v31 = vsub.f32 %v4844_v44, %v28461_v9  ;;  %v4846_v60 = vsub.f32 %v24519_v5, %v28462_v52  ;;  %v28467_v5 = vcombine.low %v24278_v2, %v24306_v46  ;;  %v23340_v33 = vld [vmem:[#allocation4 + $0x18] sm:$0xff] }
 0x268   :  { %v24643_v61 = vcombine.low %v5104_v42, %v5136_v51  ;;  %v24645_v25 = vcombine.high %v5104_v42, %v5136_v51  ;;  %21322 = vmatmul.mubr.msk.f32.vlgmr.msra.gmra.mrb[80].mxu0 %vm872_vm1, %v23339_v27  ;;  %v28464_v42 = vld [vmem:[#allocation27_spill] sm:$0xff]  ;;  %v28465_v51 = vld [vmem:[#allocation34_spill] sm:$0xff]  ;;  %v24678_v6 = vsub.f32 %v4843_v36, %v28470_v18 }
 0x269   :  { %v28466_v29 = vcombine.low %v28464_v42, %v28465_v51  ;;  %v5009_v52 = vrot.slane %v28467_v5, %v24204_v11  ;;  %v4878_v26 = vsub.f32 %v4846_v60, %v28468_v16  ;;  %21329 = vmatmul.mubr.msk.f32.vlgmr.msra.gmra.mrb[80].mxu1 %vm872_vm1, %v23340_v33  ;;  %v28471_v5 = vld [vmem:[#allocation42_spill] sm:$0xff]  ;;  %v23341_v16 = vld [vmem:[#allocation4 + $0x20] sm:$0xff] }
 0x26a   :  { %v24641_v50 = vpop.f32.mrb[78].mxu1  ;;  %28460 = vst [vmem:[#allocation9_spill] sm:$0xff] %v24645_v25  ;;  %v22717_v9 = vpack.c.bf16 %v24643_v61, %v24585_v39  ;;  %v22721_v62 = vpack.c.bf16 %v24645_v25, %v24611_v23  ;;  %v4877_v54 = vsub.f32 %v4845_v17, %v28471_v5  ;;  %v28472_v25 = vcombine.low %v24416_v32, %v24448_v21 }
 0x26b   :  { %v24652_v41 = vpop.f32.mrb[79].mxu1  ;;  %v4977_v44 = vrot.slane %v28466_v29, %v24204_v11  ;;  %v28469_v29 = vcombine.low %v24350_v38, %v24384_v24  ;;  %21335 = vmatprep.mubr.msk.f32.mxu0 %vm872_vm1, %v23341_v16  ;;  %v5841_v33 = vcombine.low %v24565_v40, %v4878_v26 }
 0x26c   :  { %v5145_v60 = vrot.slane %v28472_v25, %v24204_v11  ;;  %22718 = vmatprep.subr.bf16.mxu0 %v22717_v9  ;;  %22722 = vmatprep.subr.bf16.mxu1 %v22721_v62  ;;  %v5569_v36 = vcombine.low %v24579_v48, %v4877_v54  ;;  %v5570_v17 = vcombine.high %v24579_v48, %v4877_v54 }
 0x26d   :  { %v5113_v27 = vrot.slane %v28469_v29, %v24204_v11  ;;  %v24681_v10 = vcombine.low %v4977_v44, %v5009_v52  ;;  %v5842_v29 = vcombine.high %v24565_v40, %v4878_v26  ;;  %v24690_v18 = vcombine.high %v4977_v44, %v5009_v52  ;;  %22720 = vmatpush3.bf16.msra.mxu0 %v22717_v9  ;;  %v23342_v44 = vld [vmem:[#allocation4 + $0x30] sm:$0xff]  ;;  %v28473_v26 = vld [vmem:[#allocation45_spill] sm:$0xff] }
 0x26e   :  { %22724 = vmatpush3.bf16.msra.mxu1 %v22721_v62  ;;  %v24697_v25 = vrot.slane %v5841_v33, %v24186_v37  ;;  %v4848_v40 = vsub.f32 %v24553_v8, %v24142_v63  ;;  %21342 = vmatprep.mubr.msk.f32.mxu1 %vm872_vm1, %v23342_v44  ;;  %v24708_v48 = vrot.slane %v5569_v36, %v24186_v37  ;;  %v28474_v8 = vld [vmem:[#allocation13_spill] sm:$0xff]  ;;  %v28476_v36 = vld [vmem:[#allocation46_spill] sm:$0xff]  ;;  %v23344_v44 = vld [vmem:[#allocation4 + $0x38] sm:$0xff] }
 0x26f   :  { %v24694_v5 = vcombine.low %v5113_v27, %v5145_v60  ;;  %v24700_v16 = vrot.slane %v5842_v29, %v24186_v37  ;;  %v24702_v23 = vcombine.high %v5113_v27, %v5145_v60  ;;  %v24711_v54 = vrot.slane %v5570_v17, %v24186_v37  ;;  %v28475_v60 = vld [vmem:[#allocation14_spill] sm:$0xff]  ;;  %v23343_v29 = vld [vmem:[#allocation4 + $0x28] sm:$0xff] }
 0x270   :  { %v4850_v9 = vsub.f32 %v24555_v34, %v24146_v58  ;;  %v4880_v63 = vsub.f32 %v4848_v40, %v28473_v26  ;;  %v4847_v27 = vsub.f32 %v24567_v59, %v28474_v8  ;;  %v4849_v33 = vsub.f32 %v24569_v57, %v28475_v60  ;;  %21336 = vmatmul.mubr.msk.f32.vlgmr.msra.gmra.mrb[82].mxu0 %vm872_vm1, %v23343_v29  ;;  %v28480_v60 = vld [vmem:[#allocation48_spill] sm:$0xff] }
 0x271   :  { %v22725_v52 = vpack.c.bf16 %v24694_v5, %v24681_v10  ;;  %v22729_v62 = vpack.c.bf16 %v24702_v23, %v24690_v18  ;;  %21343 = vmatmul.mubr.msk.f32.vlgmr.msra.gmra.mrb[82].mxu1 %vm872_vm1, %v23344_v44  ;;  %v28477_v58 = vcombine.high %v28464_v42, %v28465_v51  ;;  %v28478_v59 = vcombine.high %v24278_v2, %v24306_v46  ;;  %v23346_v44 = vld [vmem:[#allocation4 + $0x50] sm:$0xff] }
 0x272   :  { %v24726_v17 = vsub.f32 %v4850_v9, %v28476_v36  ;;  %v5857_v40 = vcombine.low %v24648_v31, %v4880_v63  ;;  %v5858_v26 = vcombine.high %v24648_v31, %v4880_v63  ;;  %v28479_v9 = vld [vmem:[#allocation47_spill] sm:$0xff]  ;;  %v24741_v29 = vsub.f32 %v4849_v33, %v28480_v60  ;;  %21356 = vmatprep.mubr.msk.f32.mxu1 %vm872_vm1, %v23346_v44 }
 0x273   :  { %22726 = vmatprep.subr.bf16.mxu0 %v22725_v52  ;;  %v4984_v34 = vrot.slane %v28477_v58, %v24204_v11  ;;  %v5016_v57 = vrot.slane %v28478_v59, %v24204_v11  ;;  %22730 = vmatprep.subr.bf16.mxu1 %v22729_v62  ;;  %v4879_v8 = vsub.f32 %v4847_v27, %v28479_v9  ;;  %v23345_v27 = vld [vmem:[#allocation4 + $0x40] sm:$0xff]  ;;  %v28486_v60 = vld [vmem:[#allocation51_spill] sm:$0xff] }
 0x274   :  { %22728 = vmatpush3.bf16.msra.mxu0 %v22725_v52  ;;  %22732 = vmatpush3.bf16.msra.mxu1 %v22729_v62  ;;  %v28481_v42 = vcombine.high %v24350_v38, %v24384_v24  ;;  %v28482_v2 = vcombine.high %v24416_v32, %v24448_v21  ;;  %v24754_v31 = vrot.slane %v5857_v40, %v24186_v37  ;;  %v28485_v32 = vld [vmem:[#allocation15_spill] sm:$0xff] }
 0x275   :  { %v24743_v36 = vcombine.low %v4984_v34, %v5016_v57  ;;  %v24757_v63 = vrot.slane %v5858_v26, %v24186_v37  ;;  %v5585_v52 = vcombine.low %v24678_v6, %v4879_v8  ;;  %v5586_v62 = vcombine.high %v24678_v6, %v4879_v8  ;;  %21349 = vmatprep.mubr.msk.f32.mxu0 %vm872_vm1, %v23345_v27  ;;  %v23348_v8 = vld [vmem:[#allocation4 + $0x58] sm:$0xff]  ;;  %v28496_v6 = vld [vmem:[#allocation37_spill] sm:$0xff] }
 0x276   :  { %v5120_v46 = vrot.slane %v28481_v42, %v24204_v11  ;;  %v5152_v51 = vrot.slane %v28482_v2, %v24204_v11  ;;  %v24764_v24 = vcombine.high %v4984_v34, %v5016_v57  ;;  %v4852_v21 = vsub.f32 %v24595_v49, %v28485_v32  ;;  %v23347_v57 = vld [vmem:[#allocation4 + $0x48] sm:$0xff]  ;;  %v23349_v32 = vld [vmem:[#allocation4 + $0x60] sm:$0xff]  ;;  %v28497_v58 = vld [vmem:[#allocation43_spill] sm:$0xff] }
 0x277   :  { %21350 = vmatmul.mubr.msk.f32.vlgmr.msra.gmra.mrb[84].mxu0 %vm872_vm1, %v23347_v57  ;;  %v24781_v49 = vrot.slane %v5585_v52, %v24186_v37  ;;  %v24784_v40 = vrot.slane %v5586_v62, %v24186_v37  ;;  %21357 = vmatmul.mubr.msk.f32.vlgmr.msra.gmra.mrb[84].mxu1 %vm872_vm1, %v23348_v8  ;;  %v28489_v62 = vld [vmem:[#allocation18_spill] sm:$0xff]  ;;  %v28499_v57 = vld [vmem:[#allocation49_spill] sm:$0xff]  ;;  %v28500_v44 = vld [vmem:[#allocation55_spill] sm:$0xff] }
 0x278   :  { %v24762_v38 = vcombine.low %v5120_v46, %v5152_v51  ;;  %28483 = vst [vmem:[#allocation32_spill] sm:$0xff] %v24764_v24  ;;  %v24766_v33 = vcombine.high %v5120_v46, %v5152_v51  ;;  %v24792_v42 = vsub.f32 %v4852_v21, %v28486_v60  ;;  %v28487_v46 = vld [vmem:[#allocation17_spill] sm:$0xff]  ;;  %v28488_v51 = vld [vmem:[#allocation16_spill] sm:$0xff]  ;;  %v4853_v27 = vsub.f32 %v24615_v43, %v28489_v62 }
 0x279   :  { %v4854_v2 = vsub.f32 %v24597_v15, %v28487_v46  ;;  %v4851_v52 = vsub.f32 %v24613_v19, %v28488_v51  ;;  %21363 = vmatprep.mubr.msk.f32.mxu0 %vm872_vm1, %v23349_v32  ;;  %v28490_v19 = vld [vmem:[#allocation52_spill] sm:$0xff]  ;;  %v28491_v43 = vld [vmem:[#allocation53_spill] sm:$0xff]  ;;  %v28492_v46 = vld [vmem:[#allocation54_spill] sm:$0xff]  ;;  %v28498_v21 = vcombine.low %v28496_v6, %v28497_v58 }
 0x27a   :  { %28484 = vst [vmem:[#allocation33_spill] sm:$0xff] %v24766_v33  ;;  %v22733_v26 = vpack.c.bf16 %v24762_v38, %v24743_v36  ;;  %v22737_v9 = vpack.c.bf16 %v24766_v33, %v24764_v24  ;;  %v4885_v51 = vsub.f32 %v4853_v27, %v28492_v46  ;;  %v28493_v62 = vld [vmem:[#allocation25_spill] sm:$0xff]  ;;  %v28494_v32 = vld [vmem:[#allocation30_spill] sm:$0xff] }
 0x27b   :  { %v4886_v8 = vsub.f32 %v4854_v2, %v28490_v19  ;;  %v4883_v60 = vsub.f32 %v4851_v52, %v28491_v43  ;;  %v28495_v34 = vcombine.low %v28493_v62, %v28494_v32  ;;  %v5265_v15 = vrot.slane %v28498_v21, %v24204_v11  ;;  %v23350_v46 = vld [vmem:[#allocation4 + $0x70] sm:$0xff] }
 0x27c   :  { %22734 = vmatprep.subr.bf16.mxu0 %v22733_v26  ;;  %22738 = vmatprep.subr.bf16.mxu1 %v22737_v9  ;;  %v28501_v2 = vcombine.low %v28499_v57, %v28500_v44  ;;  %v5602_v43 = vcombine.high %v24741_v29, %v4885_v51 }
 0x27d   :  { %22736 = vmatpush3.bf16.msra.mxu0 %v22733_v26  ;;  %22740 = vmatpush3.bf16.msra.mxu1 %v22737_v9  ;;  %v5233_v59 = vrot.slane %v28495_v34, %v24204_v11  ;;  %v28502_v26 = vcombine.low %v24407_v1, %v24438_v0  ;;  %v5873_v52 = vcombine.low %v24726_v17, %v4886_v8 }
 0x27e   :  { %v5369_v19 = vrot.slane %v28501_v2, %v24204_v11  ;;  %v5874_v27 = vcombine.high %v24726_v17, %v4886_v8  ;;  %v5601_v34 = vcombine.low %v24741_v29, %v4885_v51  ;;  %21370 = vmatprep.mubr.msk.f32.mxu1 %vm872_vm1, %v23350_v46  ;;  %v24852_v51 = vrot.slane %v5602_v43, %v24186_v37  ;;  %v23352_v46 = vld [vmem:[#allocation4 + $0x78] sm:$0xff] }
 0x27f   :  { %v5401_v9 = vrot.slane %v28502_v26, %v24204_v11  ;;  %v24833_v21 = vcombine.low %v5233_v59, %v5265_v15  ;;  %v24837_v2 = vcombine.high %v5233_v59, %v5265_v15  ;;  %v23351_v26 = vld [vmem:[#allocation4 + $0x68] sm:$0xff]  ;;  %v24843_v17 = vrot.slane %v5873_v52, %v24186_v37 }
 0x280   :  { %21364 = vmatmul.mubr.msk.f32.vlgmr.msra.gmra.mrb[86].mxu0 %vm872_vm1, %v23351_v26  ;;  %v24846_v8 = vrot.slane %v5874_v27, %v24186_v37  ;;  %v24849_v29 = vrot.slane %v5601_v34, %v24186_v37  ;;  %21371 = vmatmul.mubr.msk.f32.vlgmr.msra.gmra.mrb[86].mxu1 %vm872_vm1, %v23352_v46  ;;  %v23353_v27 = vld [vmem:[#allocation4 + $0x80] sm:$0xff]  ;;  %v28508_v34 = vcombine.high %v28493_v62, %v28494_v32  ;;  %v28512_v62 = vld [vmem:[#allocation57_spill] sm:$0xff] }
 0x281   :  { %28503 = vst [vmem:[#allocation35_spill] sm:$0xff] %v24833_v21  ;;  %v24835_v33 = vcombine.low %v5369_v19, %v5401_v9  ;;  %28505 = vst [vmem:[#allocation10_spill] sm:$0xff] %v24837_v2  ;;  %v24839_v24 = vcombine.high %v5369_v19, %v5401_v9  ;;  %v4856_v19 = vsub.f32 %v24641_v50, %v24158_v13  ;;  %v28507_v9 = vld [vmem:[#allocation19_spill] sm:$0xff]  ;;  %21377 = vmatprep.mubr.msk.f32.mxu0 %vm872_vm1, %v23353_v27  ;;  %v23354_v27 = vld [vmem:[#allocation4 + $0x90] sm:$0xff] }
 0x282   :  { %v4855_v52 = vsub.f32 %v24652_v41, %v28507_v9  ;;  %v5240_v43 = vrot.slane %v28508_v34, %v24204_v11  ;;  %v28509_v26 = vcombine.high %v28496_v6, %v28497_v58  ;;  %v28510_v13 = vcombine.high %v28499_v57, %v28500_v44  ;;  %21384 = vmatprep.mubr.msk.f32.mxu1 %vm872_vm1, %v23354_v27  ;;  %v28513_v34 = vld [vmem:[#allocation58_spill] sm:$0xff] }
 0x283   :  { %28504 = vst [vmem:[#allocation36_spill] sm:$0xff] %v24835_v33  ;;  %28506 = vst [vmem:[#allocation39_spill] sm:$0xff] %v24839_v24  ;;  %v22741_v59 = vpack.c.bf16 %v24835_v33, %v24833_v21  ;;  %v22745_v15 = vpack.c.bf16 %v24839_v24, %v24837_v2  ;;  %v28511_v41 = vcombine.high %v24407_v1, %v24438_v0  ;;  %v28514_v6 = vld [vmem:[#allocation26_spill] sm:$0xff] }
 0x284   :  { %v5272_v46 = vrot.slane %v28509_v26, %v24204_v11  ;;  %v5376_v50 = vrot.slane %v28510_v13, %v24204_v11  ;;  %v4888_v32 = vsub.f32 %v4856_v19, %v28512_v62  ;;  %v4887_v58 = vsub.f32 %v4855_v52, %v28513_v34  ;;  %v28515_v26 = vld [vmem:[#allocation31_spill] sm:$0xff]  ;;  %v28522_v2 = vld [vmem:[#allocation50_spill] sm:$0xff] }
 0x285   :  { %v5408_v9 = vrot.slane %v28511_v41, %v24204_v11  ;;  %22742 = vmatprep.subr.bf16.mxu0 %v22741_v59  ;;  %22746 = vmatprep.subr.bf16.mxu1 %v22745_v15  ;;  %v28516_v24 = vcombine.low %v28514_v6, %v28515_v26 }
 0x286   :  { %22744 = vmatpush3.bf16.msra.mxu0 %v22741_v59  ;;  %22748 = vmatpush3.bf16.msra.mxu1 %v22745_v15  ;;  %v24887_v57 = vcombine.low %v5240_v43, %v5272_v46  ;;  %v24891_v0 = vcombine.high %v5240_v43, %v5272_v46  ;;  %v5889_v13 = vcombine.low %v24792_v42, %v4888_v32  ;;  %v28520_v59 = vld [vmem:[#allocation44_spill] sm:$0xff] }
 0x287   :  { %v5249_v44 = vrot.slane %v28516_v24, %v24204_v11  ;;  %v24889_v1 = vcombine.low %v5376_v50, %v5408_v9  ;;  %v5890_v41 = vcombine.high %v24792_v42, %v4888_v32  ;;  %v5617_v19 = vcombine.low %v4883_v60, %v4887_v58  ;;  %v28519_v24 = vld [vmem:[#allocation38_spill] sm:$0xff]  ;;  %v28523_v43 = vld [vmem:[#allocation56_spill] sm:$0xff] }
 0x288   :  { %28517 = vst [vmem:[#allocation11_spill] sm:$0xff] %v24891_v0  ;;  %v5618_v27 = vcombine.high %v4883_v60, %v4887_v58  ;;  %v24897_v62 = vcombine.high %v5376_v50, %v5408_v9  ;;  %v28521_v15 = vcombine.low %v28519_v24, %v28520_v59  ;;  %v28524_v46 = vcombine.low %v28522_v2, %v28523_v43  ;;  %v23355_v9 = vld [vmem:[#allocation4 + $0x88] sm:$0xff]  ;;  %v23356_v58 = vld [vmem:[#allocation4 + $0x98] sm:$0xff] }
 0x289   :  { %v22749_v52 = vpack.c.bf16 %v24889_v1, %v24887_v57  ;;  %v24908_v21 = vrot.slane %v5889_v13, %v24186_v37  ;;  %v24911_v42 = vrot.slane %v5890_v41, %v24186_v37  ;;  %v24914_v60 = vrot.slane %v5617_v19, %v24186_v37  ;;  %21378 = vmatmul.mubr.msk.f32.vlgmr.msra.gmra.mrb[88].mxu0 %vm872_vm1, %v23355_v9  ;;  %v28525_v41 = vld [vmem:[#allocation60_spill] sm:$0xff] }
 0x28a   :  { %28518 = vst [vmem:[#allocation12_spill] sm:$0xff] %v24897_v62  ;;  %v5281_v34 = vrot.slane %v28521_v15, %v24204_v11  ;;  %v5385_v33 = vrot.slane %v28524_v46, %v24204_v11  ;;  %v24917_v50 = vrot.slane %v5618_v27, %v24186_v37  ;;  %v22753_v32 = vpack.c.bf16 %v24897_v62, %v24891_v0  ;;  %v23358_v0 = vld [vmem:[#allocation4 + $0xb0] sm:$0xff] }
 0x28b   :  { %22750 = vmatprep.subr.bf16.mxu0 %v22749_v52  ;;  %21385 = vmatmul.mubr.msk.f32.vlgmr.msra.gmra.mrb[88].mxu1 %vm872_vm1, %v23356_v58  ;;  %v28526_v19 = vcombine.low %v24410_v35, %v28525_v41  ;;  %v5665_v58 = vcombine.low %v24849_v29, %v24914_v60  ;;  %v5666_v62 = vcombine.high %v24849_v29, %v24914_v60  ;;  %v23359_v29 = vld [vmem:[#allocation4 + $0xa8] sm:$0xff] }
 0x28c   :  { %v24923_v13 = vcombine.low %v5249_v44, %v5281_v34  ;;  %22752 = vmatpush3.bf16.msra.mxu0 %v22749_v52  ;;  %22754 = vmatprep.subr.bf16.mxu1 %v22753_v32  ;;  %v24947_v9 = vcombine.high %v5249_v44, %v5281_v34  ;;  %v23357_v52 = vld [vmem:[#allocation4 + $0xa0] sm:$0xff]  ;;  %v28528_v60 = vcombine.high %v28514_v6, %v28515_v26 }
 0x28d   :  { %v5417_v15 = vrot.slane %v28526_v19, %v24204_v11  ;;  %22756 = vmatpush3.bf16.msra.mxu1 %v22753_v32  ;;  %21391 = vmatprep.mubr.msk.f32.mxu0 %vm872_vm1, %v23357_v52  ;;  %v28529_v44 = vcombine.high %v28519_v24, %v28520_v59  ;;  %v28530_v34 = vcombine.high %v28522_v2, %v28523_v43  ;;  %v23361_v59 = vld [vmem:[#allocation4 + $0xb8] sm:$0xff]  ;;  %v23365_v19 = vld [vmem:[#allocation4 + $0xe0] sm:$0xff] }
 0x28e   :  { %21398 = vmatprep.mubr.msk.f32.mxu1 %vm872_vm1, %v23358_v0  ;;  %v5256_v32 = vrot.slane %v28528_v60, %v24204_v11  ;;  %v28531_v6 = vcombine.high %v24410_v35, %v28525_v41  ;;  %v28532_v24 = vcombine.low %v24486_v4, %v24504_v30  ;;  %v28535_v35 = vcombine.low %v24558_v55, %v24618_v56 }
 0x28f   :  { %v24945_v46 = vcombine.low %v5385_v33, %v5417_v15  ;;  %v24949_v37 = vcombine.high %v5385_v33, %v5417_v15  ;;  %21392 = vmatmul.mubr.msk.f32.vlgmr.msra.gmra.mrb[90].mxu0 %vm872_vm1, %v23359_v29  ;;  %v5288_v33 = vrot.slane %v28529_v44, %v24204_v11  ;;  %v5392_v15 = vrot.slane %v28530_v34, %v24204_v11  ;;  %v23360_v29 = vld [vmem:[#allocation4 + $0xc0] sm:$0xff] }
 0x290   :  { %v5424_v26 = vrot.slane %v28531_v6, %v24204_v11  ;;  %21405 = vmatprep.mubr.msk.f32.mxu0 %vm872_vm1, %v23360_v29  ;;  %v5505_v2 = vrot.slane %v28532_v24, %v24204_v11  ;;  %21399 = vmatmul.mubr.msk.f32.vlgmr.msra.gmra.mrb[90].mxu1 %vm872_vm1, %v23361_v59  ;;  %v5537_v41 = vrot.slane %v28535_v35, %v24204_v11 }
 0x291   :  { %28527 = vst [vmem:[#allocation27_spill] sm:$0xff] %v24949_v37  ;;  %v22757_v0 = vpack.c.bf16 %v24945_v46, %v24923_v13  ;;  %v22761_v52 = vpack.c.bf16 %v24949_v37, %v24947_v9  ;;  %v24980_v43 = vcombine.low %v5256_v32, %v5288_v33  ;;  %v24982_v60 = vcombine.high %v5256_v32, %v5288_v33 }
 0x292   :  { %v28536_v44 = vcombine.low %v24708_v48, %v24781_v49  ;;  %v24992_v6 = vcombine.low %v5392_v15, %v5424_v26  ;;  %v24994_v29 = vcombine.high %v5392_v15, %v5424_v26  ;;  %v5673_v24 = vrot.slane %v5665_v58, %v24204_v11  ;;  %v23362_v26 = vld [vmem:[#allocation4 + $0xd0] sm:$0xff] }
 0x293   :  { %28533 = vst [vmem:[#allocation34_spill] sm:$0xff] %v24980_v43  ;;  %28534 = vst [vmem:[#allocation40_spill] sm:$0xff] %v24982_v60  ;;  %22758 = vmatprep.subr.bf16.mxu0 %v22757_v0  ;;  %22762 = vmatprep.subr.bf16.mxu1 %v22761_v52  ;;  %v24997_v32 = vcombine.low %v5505_v2, %v5537_v41  ;;  %v24999_v33 = vcombine.high %v5505_v2, %v5537_v41 }
 0x294   :  { %v5641_v34 = vrot.slane %v28536_v44, %v24204_v11  ;;  %28537 = vst [vmem:[#allocation41_spill] sm:$0xff] %v24992_v6  ;;  %28538 = vst [vmem:[#allocation42_spill] sm:$0xff] %v24994_v29  ;;  %22760 = vmatpush3.bf16.msra.mxu0 %v22757_v0  ;;  %22764 = vmatpush3.bf16.msra.mxu1 %v22761_v52  ;;  %v28539_v59 = vcombine.high %v24486_v4, %v24504_v30 }
 0x295   :  { %v22765_v44 = vpack.c.bf16 %v24992_v6, %v24980_v43  ;;  %v22769_v15 = vpack.c.bf16 %v24994_v29, %v24982_v60  ;;  %21412 = vmatprep.mubr.msk.f32.mxu1 %vm872_vm1, %v23362_v26  ;;  %v28540_v52 = vcombine.high %v24558_v55, %v24618_v56  ;;  %v28541_v4 = vcombine.high %v24708_v48, %v24781_v49  ;;  %v23363_v49 = vld [vmem:[#allocation4 + $0xc8] sm:$0xff] }
 0x296   :  { %v5512_v35 = vrot.slane %v28539_v59, %v24204_v11  ;;  %v25010_v58 = vcombine.low %v5641_v34, %v5673_v24  ;;  %v25012_v0 = vcombine.high %v5641_v34, %v5673_v24  ;;  %v5680_v41 = vrot.slane %v5666_v62, %v24204_v11  ;;  %v23364_v62 = vld [vmem:[#allocation4 + $0xd8] sm:$0xff]  ;;  %v23367_v29 = vld [vmem:[#allocation4 + $0xe8] sm:$0xff] }
 0x297   :  { %v5544_v2 = vrot.slane %v28540_v52, %v24204_v11  ;;  %v5648_v30 = vrot.slane %v28541_v4, %v24204_v11  ;;  %v28542_v59 = vcombine.low %v24489_v53, %v24507_v47  ;;  %22766 = vmatprep.subr.bf16.mxu0 %v22765_v44  ;;  %22770 = vmatprep.subr.bf16.mxu1 %v22769_v15 }
 0x298   :  { %v22773_v34 = vpack.c.bf16 %v25010_v58, %v24997_v32  ;;  %v22777_v55 = vpack.c.bf16 %v25012_v0, %v24999_v33  ;;  %v28543_v56 = vcombine.low %v24561_v3, %v24621_v20  ;;  %21406 = vmatmul.mubr.msk.f32.vlgmr.msra.gmra.mrb[92].mxu0 %vm872_vm1, %v23363_v49  ;;  %21413 = vmatmul.mubr.msk.f32.vlgmr.msra.gmra.mrb[92].mxu1 %vm872_vm1, %v23364_v62  ;;  %v23366_v62 = vld [vmem:[#allocation4 + $0xf0] sm:$0xff] }
 0x299   :  { %v5521_v26 = vrot.slane %v28542_v59, %v24204_v11  ;;  %v25037_v24 = vcombine.low %v5512_v35, %v5544_v2  ;;  %v25039_v52 = vcombine.low %v5648_v30, %v5680_v41  ;;  %v25041_v4 = vcombine.high %v5512_v35, %v5544_v2  ;;  %22768 = vmatpush3.bf16.msra.mxu0 %v22765_v44 }
 0x29a   :  { %v5553_v48 = vrot.slane %v28543_v56, %v24204_v11  ;;  %22772 = vmatpush3.bf16.msra.mxu1 %v22769_v15  ;;  %v25043_v59 = vcombine.high %v5648_v30, %v5680_v41  ;;  %v28544_v56 = vcombine.low %v24711_v54, %v24784_v40  ;;  %21419 = vmatprep.mubr.msk.f32.mxu0 %vm872_vm1, %v23365_v19 }
 0x29b   :  { %21426 = vmatprep.mubr.msk.f32.mxu1 %vm872_vm1, %v23366_v62  ;;  %v22781_v35 = vpack.c.bf16 %v25039_v52, %v25037_v24  ;;  %v28545_v44 = vcombine.low %v24852_v51, %v24917_v50  ;;  %22774 = vmatprep.subr.bf16.mxu0 %v22773_v34  ;;  %v28546_v19 = vcombine.high %v24489_v53, %v24507_v47 }
 0x29c   :  { %v25045_v27 = vcombine.low %v5521_v26, %v5553_v48  ;;  %v5657_v49 = vrot.slane %v28544_v56, %v24204_v11  ;;  %v25059_v2 = vcombine.high %v5521_v26, %v5553_v48  ;;  %22778 = vmatprep.subr.bf16.mxu1 %v22777_v55  ;;  %v22785_v30 = vpack.c.bf16 %v25043_v59, %v25041_v4  ;;  %v23368_v26 = vld [vmem:[#allocation4 + $0xf8] sm:$0xff] }
 0x29d   :  { %v5689_v15 = vrot.slane %v28545_v44, %v24204_v11  ;;  %v5528_v41 = vrot.slane %v28546_v19, %v24204_v11  ;;  %v28547_v56 = vcombine.high %v24561_v3, %v24621_v20  ;;  %21420 = vmatmul.mubr.msk.f32.vlgmr.msra.gmra.mrb[94].mxu0 %vm872_vm1, %v23367_v29  ;;  %21427 = vmatmul.mubr.msk.f32.vlgmr.msra.gmra.mrb[94].mxu1 %vm872_vm1, %v23368_v26  ;;  %v23372_v26 = vld [vmem:[#allocation4 + $0x118] sm:$0xff] }
 0x29e   :  { %v28548_v53 = vcombine.high %v24711_v54, %v24784_v40  ;;  %22776 = vmatpush3.bf16.msra.mxu0 %v22773_v34  ;;  %22780 = vmatpush3.bf16.msra.mxu1 %v22777_v55  ;;  %v28549_v3 = vcombine.high %v24852_v51, %v24917_v50  ;;  %v28550_v40 = vcombine.low %v24468_v22, %v24498_v14  ;;  %v23369_v55 = vld [vmem:[#allocation4 + $0x100] sm:$0xff]  ;;  %v23370_v51 = vld [vmem:[#allocation4 + $0x110] sm:$0xff] }
 0x29f   :  { %v5560_v62 = vrot.slane %v28547_v56, %v24204_v11  ;;  %v25073_v48 = vcombine.low %v5657_v49, %v5689_v15  ;;  %v25075_v44 = vcombine.high %v5657_v49, %v5689_v15  ;;  %22782 = vmatprep.subr.bf16.mxu0 %v22781_v35  ;;  %22786 = vmatprep.subr.bf16.mxu1 %v22785_v30 }
 0x2a0   :  { %v5664_v47 = vrot.slane %v28548_v53, %v24204_v11  ;;  %v5696_v20 = vrot.slane %v28549_v3, %v24204_v11  ;;  %v5777_v34 = vrot.slane %v28550_v40, %v24204_v11  ;;  %21433 = vmatprep.mubr.msk.f32.mxu0 %vm872_vm1, %v23369_v55  ;;  %21440 = vmatprep.mubr.msk.f32.mxu1 %vm872_vm1, %v23370_v51 }
 0x2a1   :  { %v25081_v19 = vcombine.low %v5528_v41, %v5560_v62  ;;  %v25087_v29 = vcombine.high %v5528_v41, %v5560_v62  ;;  %v22789_v49 = vpack.c.bf16 %v25073_v48, %v25045_v27  ;;  %v22793_v54 = vpack.c.bf16 %v25075_v44, %v25059_v2  ;;  %v23371_v62 = vld [vmem:[#allocation4 + $0x108] sm:$0xff]  ;;  %21441 = vmatmul.mubr.msk.f32.vlgmr.msra.gmra.mrb[96].mxu1 %vm872_vm1, %v23372_v26 }
 0x2a2   :  { %v25099_v50 = vcombine.low %v5664_v47, %v5696_v20  ;;  %v25101_v15 = vcombine.high %v5664_v47, %v5696_v20  ;;  %v28551_v41 = vcombine.low %v24510_v12, %v24600_v45  ;;  %21434 = vmatmul.mubr.msk.f32.vlgmr.msra.gmra.mrb[96].mxu0 %vm872_vm1, %v23371_v62  ;;  %v28552_v53 = vcombine.low %v24697_v25, %v24754_v31 }
 0x2a3   :  { %v28553_v47 = vcombine.low %v24843_v17, %v24908_v21  ;;  %v28554_v40 = vcombine.high %v24468_v22, %v24498_v14  ;;  %22784 = vmatpush3.bf16.msra.mxu0 %v22781_v35  ;;  %22788 = vmatpush3.bf16.msra.mxu1 %v22785_v30  ;;  %v23373_v22 = vld [vmem:[#allocation4 + $0x120] sm:$0xff]  ;;  %v23374_v14 = vld [vmem:[#allocation4 + $0x130] sm:$0xff]  ;;  %v28555_v35 = vcombine.high %v24510_v12, %v24600_v45 }
 0x2a4   :  { %v5809_v56 = vrot.slane %v28551_v41, %v24204_v11  ;;  %v5913_v3 = vrot.slane %v28552_v53, %v24204_v11  ;;  %v22797_v51 = vpack.c.bf16 %v25099_v50, %v25081_v19  ;;  %v22801_v41 = vpack.c.bf16 %v25101_v15, %v25087_v29  ;;  %22790 = vmatprep.subr.bf16.mxu0 %v22789_v49 }
 0x2a5   :  { %v5945_v20 = vrot.slane %v28553_v47, %v24204_v11  ;;  %v5784_v55 = vrot.slane %v28554_v40, %v24204_v11  ;;  %22794 = vmatprep.subr.bf16.mxu1 %v22793_v54  ;;  %21447 = vmatprep.mubr.msk.f32.mxu0 %vm872_vm1, %v23373_v22  ;;  %v5816_v30 = vrot.slane %v28555_v35, %v24204_v11  ;;  %v28559_v35 = vld [vmem:[#allocation21_spill] sm:$0xff] }
 0x2a6   :  { %v25125_v62 = vcombine.low %v5777_v34, %v5809_v56  ;;  %v25129_v53 = vcombine.high %v5777_v34, %v5809_v56  ;;  %21454 = vmatprep.mubr.msk.f32.mxu1 %vm872_vm1, %v23374_v14  ;;  %v28556_v40 = vcombine.high %v24697_v25, %v24754_v31  ;;  %v28557_v34 = vcombine.high %v24843_v17, %v24908_v21 }
 0x2a7   :  { %v25127_v26 = vcombine.low %v5913_v3, %v5945_v20  ;;  %v25131_v47 = vcombine.high %v5913_v3, %v5945_v20  ;;  %v23375_v3 = vld [vmem:[#allocation4 + $0x128] sm:$0xff]  ;;  %v23376_v20 = vld [vmem:[#allocation4 + $0x138] sm:$0xff]  ;;  %v28558_v25 = vcombine.low %v24471_v7, %v24501_v28  ;;  %v25157_v21 = vcombine.low %v5784_v55, %v5816_v30 }
 0x2a8   :  { %v5920_v60 = vrot.slane %v28556_v40, %v24204_v11  ;;  %v5952_v56 = vrot.slane %v28557_v34, %v24204_v11  ;;  %21448 = vmatmul.mubr.msk.f32.vlgmr.msra.gmra.mrb[98].mxu0 %vm872_vm1, %v23375_v3  ;;  %21455 = vmatmul.mubr.msk.f32.vlgmr.msra.gmra.mrb[98].mxu1 %vm872_vm1, %v23376_v20  ;;  %v25161_v22 = vcombine.high %v5784_v55, %v5816_v30  ;;  %v28560_v40 = vld [vmem:[#allocation29_spill] sm:$0xff]  ;;  %v23377_v20 = vld [vmem:[#allocation4 + $0x140] sm:$0xff] }
 0x2a9   :  { %v22805_v12 = vpack.c.bf16 %v25127_v26, %v25125_v62  ;;  %v22809_v45 = vpack.c.bf16 %v25131_v47, %v25129_v53  ;;  %v5793_v31 = vrot.slane %v28558_v25, %v24204_v11  ;;  %22792 = vmatpush3.bf16.msra.mxu0 %v22789_v49  ;;  %22796 = vmatpush3.bf16.msra.mxu1 %v22793_v54  ;;  %v23378_v25 = vld [vmem:[#allocation4 + $0x150] sm:$0xff] }
 0x2aa   :  { %v25159_v17 = vcombine.low %v5920_v60, %v5952_v56  ;;  %22798 = vmatprep.subr.bf16.mxu0 %v22797_v51  ;;  %22802 = vmatprep.subr.bf16.mxu1 %v22801_v41  ;;  %v25163_v14 = vcombine.high %v5920_v60, %v5952_v56  ;;  %v28561_v34 = vcombine.low %v28559_v35, %v28560_v40 }
 0x2ab   :  { %v28562_v49 = vcombine.low %v24700_v16, %v24757_v63  ;;  %21461 = vmatprep.mubr.msk.f32.mxu0 %vm872_vm1, %v23377_v20  ;;  %21468 = vmatprep.mubr.msk.f32.mxu1 %vm872_vm1, %v23378_v25  ;;  %v28563_v55 = vcombine.low %v24846_v8, %v24911_v42  ;;  %v28564_v56 = vcombine.high %v24471_v7, %v24501_v28  ;;  %v23380_v20 = vld [vmem:[#allocation4 + $0x158] sm:$0xff] }
 0x2ac   :  { %v5825_v3 = vrot.slane %v28561_v34, %v24204_v11  ;;  %v22813_v60 = vpack.c.bf16 %v25159_v17, %v25157_v21  ;;  %21469 = vmatmul.mubr.msk.f32.vlgmr.msra.gmra.mrb[100].mxu1 %vm872_vm1, %v23380_v20  ;;  %v22817_v25 = vpack.c.bf16 %v25163_v14, %v25161_v22  ;;  %v28565_v7 = vcombine.high %v28559_v35, %v28560_v40  ;;  %v23382_v35 = vld [vmem:[#allocation4 + $0x170] sm:$0xff] }
 0x2ad   :  { %v5929_v54 = vrot.slane %v28562_v49, %v24204_v11  ;;  %v5961_v30 = vrot.slane %v28563_v55, %v24204_v11  ;;  %v5800_v34 = vrot.slane %v28564_v56, %v24204_v11  ;;  %v23379_v49 = vld [vmem:[#allocation4 + $0x148] sm:$0xff]  ;;  %22804 = vmatpush3.bf16.msra.mxu1 %v22801_v41  ;;  %v28566_v56 = vcombine.high %v24700_v16, %v24757_v63 }
 0x2ae   :  { %21462 = vmatmul.mubr.msk.f32.vlgmr.msra.gmra.mrb[100].mxu0 %vm872_vm1, %v23379_v49  ;;  %v25189_v6 = vcombine.low %v5793_v31, %v5825_v3  ;;  %v25191_v43 = vcombine.high %v5793_v31, %v5825_v3  ;;  %v5832_v28 = vrot.slane %v28565_v7, %v24204_v11  ;;  %22810 = vmatprep.subr.bf16.mxu1 %v22809_v45  ;;  %v28568_v31 = vld [vmem:[#allocation59_spill] sm:$0xff] }
 0x2af   :  { %22800 = vmatpush3.bf16.msra.mxu0 %v22797_v51  ;;  %v25193_v55 = vcombine.low %v5929_v54, %v5961_v30  ;;  %v25195_v37 = vcombine.high %v5929_v54, %v5961_v30  ;;  %v5936_v49 = vrot.slane %v28566_v56, %v24204_v11  ;;  %v28567_v51 = vcombine.high %v24846_v8, %v24911_v42  ;;  %v23381_v54 = vld [vmem:[#allocation4 + $0x160] sm:$0xff]  ;;  %v23383_v30 = vld [vmem:[#allocation4 + $0x168] sm:$0xff]  ;;  %v23384_v8 = vld [vmem:[#allocation4 + $0x178] sm:$0xff] }
 0x2b0   :  { %22806 = vmatprep.subr.bf16.mxu0 %v22805_v12  ;;  %v8377_v3 = vadd.f32 %v24997_v32, %v28568_v31  ;;  %21475 = vmatprep.mubr.msk.f32.mxu0 %vm872_vm1, %v23381_v54  ;;  %v25217_v63 = vcombine.low %v5800_v34, %v5832_v28  ;;  %v25223_v32 = vcombine.high %v5800_v34, %v5832_v28  ;;  %v28569_v7 = vld [vmem:[#allocation23_spill] sm:$0xff]  ;;  %v28571_v54 = vld [vmem:[#allocation28_spill] sm:$0xff] }
 0x2b1   :  { %v5968_v41 = vrot.slane %v28567_v51, %v24204_v11  ;;  %21482 = vmatprep.mubr.msk.f32.mxu1 %vm872_vm1, %v23382_v35  ;;  %v22821_v40 = vpack.c.bf16 %v25193_v55, %v25189_v6  ;;  %v22825_v16 = vpack.c.bf16 %v25195_v37, %v25191_v43  ;;  %v8378_v56 = vadd.f32 %v25010_v58, %v28569_v7  ;;  %v28570_v51 = vld [vmem:[#allocation22_spill] sm:$0xff]  ;;  %v23385_v58 = vld [vmem:[#allocation4 + $0x180] sm:$0xff]  ;;  %v25557_v11 = vld [vmem:[#allocation2 + $0x48] sm:$0xff] }
 0x2b2   :  { %21476 = vmatmul.mubr.msk.f32.vlgmr.msra.gmra.mrb[102].mxu0 %vm872_vm1, %v23383_v30  ;;  %21483 = vmatmul.mubr.msk.f32.vlgmr.msra.gmra.mrb[102].mxu1 %vm872_vm1, %v23384_v8  ;;  %v8379_v31 = vadd.f32 %v24999_v33, %v28570_v51  ;;  %v8380_v35 = vadd.f32 %v25012_v0, %v28571_v54  ;;  %v23386_v33 = vld [vmem:[#allocation4 + $0x190] sm:$0xff]  ;;  %v8382_v28 = vadd.f32 %v25039_v52, %v24643_v61  ;;  %v28573_v8 = vld [vmem:[#allocation9_spill] sm:$0xff] }
 0x2b3   :  { %v25221_v42 = vcombine.low %v5936_v49, %v5968_v41  ;;  %v25225_v20 = vcombine.high %v5936_v49, %v5968_v41  ;;  %22808 = vmatpush3.bf16.msra.mxu0 %v22805_v12  ;;  %22812 = vmatpush3.bf16.msra.mxu1 %v22809_v45  ;;  %v8381_v12 = vadd.f32 %v25037_v24, %v24585_v39  ;;  %v23387_v49 = vld [vmem:[#allocation4 + $0x188] sm:$0xff]  ;;  %v23388_v41 = vld [vmem:[#allocation4 + $0x198] sm:$0xff]  ;;  %v28572_v39 = vld [vmem:[#allocation8_spill] sm:$0xff] }
 0x2b4   :  { %22814 = vmatprep.subr.bf16.mxu0 %v22813_v60  ;;  %22818 = vmatprep.subr.bf16.mxu1 %v22817_v25  ;;  %v25245_v0 = vpack.c.bf16 %v8378_v56, %v8377_v3  ;;  %v25247_v45 = vpack.c.bf16 %v8380_v35, %v8379_v31  ;;  %v8383_v24 = vadd.f32 %v25041_v4, %v28572_v39  ;;  %v28578_v54 = vld [vmem:[#allocation10_spill] sm:$0xff] }
 0x2b5   :  { %v25235_v30 = vpack.c.bf16 %v25221_v42, %v25217_v63  ;;  %v25239_v34 = vpack.c.bf16 %v25225_v20, %v25223_v32  ;;  %21489 = vmatprep.mubr.msk.f32.mxu0 %vm872_vm1, %v23385_v58  ;;  %21496 = vmatprep.mubr.msk.f32.mxu1 %vm872_vm1, %v23386_v33  ;;  %v8384_v7 = vadd.f32 %v25043_v59, %v28573_v8  ;;  %v23390_v59 = vld [vmem:[#allocation4 + $0x1b0] sm:$0xff]  ;;  %v28580_v33 = vld [vmem:[#allocation11_spill] sm:$0xff] }
 0x2b6   :  { %21490 = vmatmul.mubr.msk.f32.vlgmr.msra.gmra.mrb[104].mxu0 %vm872_vm1, %v23387_v49  ;;  %21497 = vmatmul.mubr.msk.f32.vlgmr.msra.gmra.mrb[104].mxu1 %vm872_vm1, %v23388_v41  ;;  %v8385_v3 = vadd.f32 %v25045_v27, %v24681_v10  ;;  %v25259_v56 = vpack.c.bf16 %v8382_v28, %v8381_v12  ;;  %v8386_v61 = vadd.f32 %v25073_v48, %v24694_v5  ;;  %v23389_v27 = vld [vmem:[#allocation4 + $0x1a0] sm:$0xff]  ;;  %v23395_v49 = vld [vmem:[#allocation4 + $0x1c8] sm:$0xff]  ;;  %v23398_v8 = vld [vmem:[#allocation4 + $0x1f0] sm:$0xff] }
 0x2b7   :  { %22816 = vmatpush3.bf16.msra.mxu0 %v22813_v60  ;;  %22820 = vmatpush3.bf16.msra.mxu1 %v22817_v25  ;;  %v8387_v52 = vadd.f32 %v25059_v2, %v24690_v18  ;;  %v25265_v51 = vpack.c.bf16 %v8384_v7, %v8383_v24  ;;  %v8388_v4 = vadd.f32 %v25075_v44, %v24702_v23  ;;  %v28574_v2 = vld [vmem:[#allocation32_spill] sm:$0xff]  ;;  %v23391_v60 = vld [vmem:[#allocation4 + $0x1a8] sm:$0xff]  ;;  %v23392_v23 = vld [vmem:[#allocation4 + $0x1b8] sm:$0xff] }
 0x2b8   :  { %22822 = vmatprep.subr.bf16.mxu0 %v22821_v40  ;;  %22826 = vmatprep.subr.bf16.mxu1 %v22825_v16  ;;  %v8389_v10 = vadd.f32 %v25081_v19, %v24743_v36  ;;  %v25273_v5 = vpack.c.bf16 %v8386_v61, %v8385_v3  ;;  %v8390_v18 = vadd.f32 %v25099_v50, %v24762_v38  ;;  %v28575_v44 = vld [vmem:[#allocation33_spill] sm:$0xff]  ;;  %v28576_v25 = vld [vmem:[#allocation35_spill] sm:$0xff]  ;;  %v28577_v50 = vld [vmem:[#allocation36_spill] sm:$0xff] }
 0x2b9   :  { %21503 = vmatprep.mubr.msk.f32.mxu0 %vm872_vm1, %v23389_v27  ;;  %21510 = vmatprep.mubr.msk.f32.mxu1 %vm872_vm1, %v23390_v59  ;;  %v8391_v48 = vadd.f32 %v25087_v29, %v28574_v2  ;;  %v25281_v36 = vpack.c.bf16 %v8388_v4, %v8387_v52  ;;  %v8392_v19 = vadd.f32 %v25101_v15, %v28575_v44  ;;  %v28579_v15 = vld [vmem:[#allocation39_spill] sm:$0xff]  ;;  %v23399_v3 = vld [vmem:[#allocation4 + $0x1e8] sm:$0xff]  ;;  %v28586_v61 = vld [vmem:[#allocation42_spill] sm:$0xff] }
 0x2ba   :  { %21504 = vmatmul.mubr.msk.f32.vlgmr.msra.gmra.mrb[106].mxu0 %vm872_vm1, %v23391_v60  ;;  %21511 = vmatmul.mubr.msk.f32.vlgmr.msra.gmra.mrb[106].mxu1 %vm872_vm1, %v23392_v23  ;;  %v8393_v31 = vadd.f32 %v25125_v62, %v28576_v25  ;;  %v25287_v38 = vpack.c.bf16 %v8390_v18, %v8389_v10  ;;  %v8394_v29 = vadd.f32 %v25127_v26, %v28577_v50  ;;  %v28582_v24 = vld [vmem:[#allocation27_spill] sm:$0xff]  ;;  %v23402_v10 = vld [vmem:[#allocation4 + $0x210] sm:$0xff]  ;;  %v23403_v27 = vld [vmem:[#allocation4 + $0x208] sm:$0xff] }
 0x2bb   :  { %22824 = vmatpush3.bf16.msra.mxu0 %v22821_v40  ;;  %22828 = vmatpush3.bf16.msra.mxu1 %v22825_v16  ;;  %v8395_v35 = vadd.f32 %v25129_v53, %v28578_v54  ;;  %v25295_v12 = vpack.c.bf16 %v8392_v19, %v8391_v48  ;;  %v8396_v58 = vadd.f32 %v25131_v47, %v28579_v15  ;;  %v23393_v40 = vld [vmem:[#allocation4 + $0x1c0] sm:$0xff]  ;;  %v23394_v16 = vld [vmem:[#allocation4 + $0x1d0] sm:$0xff]  ;;  %v23396_v47 = vld [vmem:[#allocation4 + $0x1d8] sm:$0xff] }
 0x2bc   :  { %22830 = vmatprep.subr.bf16.mxu0 %v25235_v30  ;;  %22834 = vmatprep.subr.bf16.mxu1 %v25239_v34  ;;  %v8397_v62 = vadd.f32 %v25157_v21, %v24887_v57  ;;  %v25303_v26 = vpack.c.bf16 %v8394_v29, %v8393_v31  ;;  %v8398_v53 = vadd.f32 %v25159_v17, %v24889_v1  ;;  %v28581_v21 = vld [vmem:[#allocation12_spill] sm:$0xff]  ;;  %v23407_v59 = vld [vmem:[#allocation4 + $0x228] sm:$0xff]  ;;  %v23408_v18 = vld [vmem:[#allocation4 + $0x238] sm:$0xff] }
 0x2bd   :  { %21517 = vmatprep.mubr.msk.f32.mxu0 %vm872_vm1, %v23393_v40  ;;  %21524 = vmatprep.mubr.msk.f32.mxu1 %vm872_vm1, %v23394_v16  ;;  %v8399_v28 = vadd.f32 %v25161_v22, %v28580_v33  ;;  %v25311_v57 = vpack.c.bf16 %v8396_v58, %v8395_v35  ;;  %v8400_v41 = vadd.f32 %v25163_v14, %v28581_v21  ;;  %v23411_v2 = vld [vmem:[#allocation4 + $0x248] sm:$0xff]  ;;  %v23412_v48 = vld [vmem:[#allocation4 + $0x258] sm:$0xff]  ;;  %v23414_v60 = vld [vmem:[#allocation4 + $0x270] sm:$0xff] }
 0x2be   :  { %21518 = vmatmul.mubr.msk.f32.vlgmr.msra.gmra.mrb[108].mxu0 %vm872_vm1, %v23395_v49  ;;  %21525 = vmatmul.mubr.msk.f32.vlgmr.msra.gmra.mrb[108].mxu1 %vm872_vm1, %v23396_v47  ;;  %v8401_v39 = vadd.f32 %v25189_v6, %v24923_v13  ;;  %v25319_v1 = vpack.c.bf16 %v8398_v53, %v8397_v62  ;;  %v8402_v17 = vadd.f32 %v25193_v55, %v24945_v46  ;;  %v28583_v6 = vld [vmem:[#allocation34_spill] sm:$0xff]  ;;  %v28585_v55 = vld [vmem:[#allocation40_spill] sm:$0xff]  ;;  %v23415_v23 = vld [vmem:[#allocation4 + $0x268] sm:$0xff] }
 0x2bf   :  { %22832 = vmatpush3.bf16.msra.mxu0 %v25235_v30  ;;  %22836 = vmatpush3.bf16.msra.mxu1 %v25239_v34  ;;  %v8403_v22 = vadd.f32 %v25191_v43, %v24947_v9  ;;  %v25327_v14 = vpack.c.bf16 %v8400_v41, %v8399_v28  ;;  %v8404_v13 = vadd.f32 %v25195_v37, %v28582_v24  ;;  %v23397_v34 = vld [vmem:[#allocation4 + $0x1e0] sm:$0xff]  ;;  %v28584_v9 = vld [vmem:[#allocation41_spill] sm:$0xff]  ;;  %v23400_v37 = vld [vmem:[#allocation4 + $0x1f8] sm:$0xff] }
 0x2c0   :  { %22838 = vmatprep.subr.bf16.mxu0 %v25245_v0  ;;  %22842 = vmatprep.subr.bf16.mxu1 %v25247_v45  ;;  %v8405_v30 = vadd.f32 %v25217_v63, %v28583_v6  ;;  %v25335_v46 = vpack.c.bf16 %v8402_v17, %v8401_v39  ;;  %v8406_v43 = vadd.f32 %v25221_v42, %v28584_v9  ;;  %v23417_v44 = vld [vmem:[#allocation4 + $0x280] sm:$0xff]  ;;  %v23418_v19 = vld [vmem:[#allocation4 + $0x290] sm:$0xff]  ;;  %v23419_v25 = vld [vmem:[#allocation4 + $0x288] sm:$0xff] }
 0x2c1   :  { %21531 = vmatprep.mubr.msk.f32.mxu0 %vm872_vm1, %v23397_v34  ;;  %21538 = vmatprep.mubr.msk.f32.mxu1 %vm872_vm1, %v23398_v8  ;;  %v8407_v7 = vadd.f32 %v25223_v32, %v28585_v55  ;;  %v25343_v63 = vpack.c.bf16 %v8404_v13, %v8403_v22  ;;  %v8408_v52 = vadd.f32 %v25225_v20, %v28586_v61  ;;  %v23401_v32 = vld [vmem:[#allocation4 + $0x200] sm:$0xff]  ;;  %v23404_v20 = vld [vmem:[#allocation4 + $0x218] sm:$0xff]  ;;  %v23422_v50 = vld [vmem:[#allocation4 + $0x2b0] sm:$0xff] }
 0x2c2   :  { %21532 = vmatmul.mubr.msk.f32.vlgmr.msra.gmra.mrb[110].mxu0 %vm872_vm1, %v23399_v3  ;;  %21539 = vmatmul.mubr.msk.f32.vlgmr.msra.gmra.mrb[110].mxu1 %vm872_vm1, %v23400_v37  ;;  %v25349_v4 = vpack.c.bf16 %v8406_v43, %v8405_v30  ;;  %v23420_v31 = vld [vmem:[#allocation4 + $0x298] sm:$0xff]  ;;  %v23423_v29 = vld [vmem:[#allocation4 + $0x2a8] sm:$0xff]  ;;  %v23425_v35 = vld [vmem:[#allocation4 + $0x2c0] sm:$0xff]  ;;  %28610 = vst [vmem:[#allocation26_spill] sm:$0xff] %v25557_v11 }
 0x2c3   :  { %22840 = vmatpush3.bf16.msra.mxu0 %v25245_v0  ;;  %22844 = vmatpush3.bf16.msra.mxu1 %v25247_v45  ;;  %v25353_v42 = vpack.c.bf16 %v8408_v52, %v8407_v7  ;;  %v23405_v0 = vld [vmem:[#allocation4 + $0x220] sm:$0xff]  ;;  %v23406_v45 = vld [vmem:[#allocation4 + $0x230] sm:$0xff]  ;;  %v23424_v54 = vld [vmem:[#allocation4 + $0x2b8] sm:$0xff] }
 0x2c4   :  { %22846 = vmatprep.subr.bf16.mxu0 %v25259_v56  ;;  %22850 = vmatprep.subr.bf16.mxu1 %v25265_v51  ;;  %v23427_v15 = vld [vmem:[#allocation4 + $0x2c8] sm:$0xff]  ;;  %v23428_v58 = vld [vmem:[#allocation4 + $0x2d8] sm:$0xff]  ;;  %v23429_v62 = vld [vmem:[#allocation4 + $0x2e0] sm:$0xff] }
 0x2c5   :  { %21545 = vmatprep.mubr.msk.f32.mxu0 %vm872_vm1, %v23401_v32  ;;  %21552 = vmatprep.mubr.msk.f32.mxu1 %vm872_vm1, %v23402_v10  ;;  %v23430_v40 = vld [vmem:[#allocation4 + $0x2f0] sm:$0xff]  ;;  %v23431_v16 = vld [vmem:[#allocation4 + $0x2e8] sm:$0xff]  ;;  %v144_v53 = vld [vmem:[#allocation4 + $0x300] sm:$0xff] }
 0x2c6   :  { %21546 = vmatmul.mubr.msk.f32.vlgmr.msra.gmra.mrb[112].mxu0 %vm872_vm1, %v23403_v27  ;;  %21553 = vmatmul.mubr.msk.f32.vlgmr.msra.gmra.mrb[112].mxu1 %vm872_vm1, %v23404_v20  ;;  %v146_v33 = vld [vmem:[#allocation4 + $0x310] sm:$0xff] }
 0x2c7   :  { %22848 = vmatpush3.bf16.msra.mxu0 %v25259_v56  ;;  %22852 = vmatpush3.bf16.msra.mxu1 %v25265_v51  ;;  %v23409_v56 = vld [vmem:[#allocation4 + $0x240] sm:$0xff]  ;;  %v23410_v51 = vld [vmem:[#allocation4 + $0x250] sm:$0xff] }
 0x2c8   :  { %22854 = vmatprep.subr.bf16.mxu0 %v25273_v5  ;;  %22858 = vmatprep.subr.bf16.mxu1 %v25281_v36 }
 0x2c9   :  { %21559 = vmatprep.mubr.msk.f32.mxu0 %vm872_vm1, %v23405_v0  ;;  %21566 = vmatprep.mubr.msk.f32.mxu1 %vm872_vm1, %v23406_v45  ;;  %v25481_v0 = vld [vmem:[#allocation2 + $0x8] sm:$0xff] }
 0x2ca   :  { %21560 = vmatmul.mubr.msk.f32.vlgmr.msra.gmra.mrb[114].mxu0 %vm872_vm1, %v23407_v59  ;;  %21567 = vmatmul.mubr.msk.f32.vlgmr.msra.gmra.mrb[114].mxu1 %vm872_vm1, %v23408_v18  ;;  %v25485_v59 = vld [vmem:[#allocation2 + $0x18] sm:$0xff] }
 0x2cb   :  { %22856 = vmatpush3.bf16.msra.mxu0 %v25273_v5  ;;  %22860 = vmatpush3.bf16.msra.mxu1 %v25281_v36  ;;  %v23413_v5 = vld [vmem:[#allocation4 + $0x260] sm:$0xff]  ;;  %v23416_v36 = vld [vmem:[#allocation4 + $0x278] sm:$0xff] }
 0x2cc   :  { %22862 = vmatprep.subr.bf16.mxu0 %v25287_v38  ;;  %22866 = vmatprep.subr.bf16.mxu1 %v25295_v12 }
 0x2cd   :  { %21573 = vmatprep.mubr.msk.f32.mxu0 %vm872_vm1, %v23409_v56  ;;  %21580 = vmatprep.mubr.msk.f32.mxu1 %vm872_vm1, %v23410_v51 }
 0x2ce   :  { %21574 = vmatmul.mubr.msk.f32.vlgmr.msra.gmra.mrb[116].mxu0 %vm872_vm1, %v23411_v2  ;;  %21581 = vmatmul.mubr.msk.f32.vlgmr.msra.gmra.mrb[116].mxu1 %vm872_vm1, %v23412_v48  ;;  %v25493_v2 = vld [vmem:[#allocation2] sm:$0xff] }
 0x2cf   :  { %22864 = vmatpush3.bf16.msra.mxu0 %v25287_v38  ;;  %22868 = vmatpush3.bf16.msra.mxu1 %v25295_v12  ;;  %v23421_v38 = vld [vmem:[#allocation4 + $0x2a0] sm:$0xff]  ;;  %v23426_v12 = vld [vmem:[#allocation4 + $0x2d0] sm:$0xff] }
 0x2d0   :  { %22870 = vmatprep.subr.bf16.mxu0 %v25303_v26  ;;  %22874 = vmatprep.subr.bf16.mxu1 %v25311_v57 }
 0x2d1   :  { %21587 = vmatprep.mubr.msk.f32.mxu0 %vm872_vm1, %v23413_v5  ;;  %21594 = vmatprep.mubr.msk.f32.mxu1 %vm872_vm1, %v23414_v60  ;;  %v25497_v5 = vld [vmem:[#allocation2 + $0x10] sm:$0xff] }
 0x2d2   :  { %21588 = vmatmul.mubr.msk.f32.vlgmr.msra.gmra.mrb[118].mxu0 %vm872_vm1, %v23415_v23  ;;  %21595 = vmatmul.mubr.msk.f32.vlgmr.msra.gmra.mrb[118].mxu1 %vm872_vm1, %v23416_v36 }
 0x2d3   :  { %22872 = vmatpush3.bf16.msra.mxu0 %v25303_v26  ;;  %22876 = vmatpush3.bf16.msra.mxu1 %v25311_v57  ;;  %v23432_v26 = vld [vmem:[#allocation4 + $0x2f8] sm:$0xff] }
 0x2d4   :  { %22878 = vmatprep.subr.bf16.mxu0 %v25319_v1  ;;  %22882 = vmatprep.subr.bf16.mxu1 %v25327_v14 }
 0x2d5   :  { %21601 = vmatprep.mubr.msk.f32.mxu0 %vm872_vm1, %v23417_v44  ;;  %21608 = vmatprep.mubr.msk.f32.mxu1 %vm872_vm1, %v23418_v19 }
 0x2d6   :  { %21602 = vmatmul.mubr.msk.f32.vlgmr.msra.gmra.mrb[120].mxu0 %vm872_vm1, %v23419_v25  ;;  %21609 = vmatmul.mubr.msk.f32.vlgmr.msra.gmra.mrb[120].mxu1 %vm872_vm1, %v23420_v31 }
 0x2d7   :  { %22880 = vmatpush3.bf16.msra.mxu0 %v25319_v1  ;;  %22884 = vmatpush3.bf16.msra.mxu1 %v25327_v14 }
 0x2d8   :  { %22886 = vmatprep.subr.bf16.mxu0 %v25335_v46  ;;  %22890 = vmatprep.subr.bf16.mxu1 %v25343_v63 }
 0x2d9   :  { %21615 = vmatprep.mubr.msk.f32.mxu0 %vm872_vm1, %v23421_v38  ;;  %21622 = vmatprep.mubr.msk.f32.mxu1 %vm872_vm1, %v23422_v50  ;;  %v25517_v38 = vld [vmem:[#allocation2 + $0x28] sm:$0xff] }
 0x2da   :  { %21616 = vmatmul.mubr.msk.f32.vlgmr.msra.gmra.mrb[122].mxu0 %vm872_vm1, %v23423_v29  ;;  %21623 = vmatmul.mubr.msk.f32.vlgmr.msra.gmra.mrb[122].mxu1 %vm872_vm1, %v23424_v54  ;;  %v25521_v29 = vld [vmem:[#allocation2 + $0x38] sm:$0xff] }
 0x2db   :  { %22888 = vmatpush3.bf16.msra.mxu0 %v25335_v46  ;;  %22892 = vmatpush3.bf16.msra.mxu1 %v25343_v63  ;;  %28601 = vst [vmem:[#allocation25_spill] sm:$0xff] %v25521_v29 }
 0x2dc   :  { %22894 = vmatprep.subr.bf16.mxu0 %v25349_v4  ;;  %22898 = vmatprep.subr.bf16.mxu1 %v25353_v42 }
 0x2dd   :  { %21629 = vmatprep.mubr.msk.f32.mxu0 %vm872_vm1, %v23425_v35  ;;  %21636 = vmatprep.mubr.msk.f32.mxu1 %vm872_vm1, %v23426_v12 }
 0x2de   :  { %21630 = vmatmul.mubr.msk.f32.vlgmr.msra.gmra.mrb[124].mxu0 %vm872_vm1, %v23427_v15  ;;  %21637 = vmatmul.mubr.msk.f32.vlgmr.msra.gmra.mrb[124].mxu1 %vm872_vm1, %v23428_v58  ;;  %v25529_v15 = vld [vmem:[#allocation2 + $0x20] sm:$0xff] }
 0x2df   :  { %22896 = vmatpush3.bf16.msra.mxu0 %v25349_v4  ;;  %22900 = vmatpush3.bf16.msra.mxu1 %v25353_v42  ;;  %28602 = vst [vmem:[#allocation30_spill] sm:$0xff] %v25529_v15 }
 0x2e0   :  { %21643 = vmatprep.mubr.msk.f32.mxu0 %vm872_vm1, %v23429_v62  ;;  %21650 = vmatprep.mubr.msk.f32.mxu1 %vm872_vm1, %v23430_v40  ;;  %v25533_v62 = vld [vmem:[#allocation2 + $0x30] sm:$0xff] }
 0x2e1   :  { %28604 = vst [vmem:[#allocation43_spill] sm:$0xff] %v25533_v62 }
 0x2e2   :  { %21644 = vmatmul.mubr.msk.f32.vlgmr.msra.gmra.mrb[126].mxu0 %vm872_vm1, %v23431_v16  ;;  %21651 = vmatmul.mubr.msk.f32.vlgmr.msra.gmra.mrb[126].mxu1 %vm872_vm1, %v23432_v26 }
 0x2e3   :  { %21657 = vmatprep.mubr.msk.f32.mxu0 %vm872_vm1, %v144_v53  ;;  %21664 = vmatprep.mubr.msk.f32.mxu1 %vm872_vm1, %v146_v33 }
 0x33b   :  { %v25415_v28 = vpop.f32.mrb[80].mxu0 }
 0x33c   :  { %v25417_v49 = vpop.f32.mrb[80].mxu1  ;;  %v25419_v47 = vpop.f32.mrb[81].mxu0 }
 0x33d   :  { %v25421_v57 = vpop.f32.mrb[81].mxu1 }
 0x343   :  { %v25423_v21 = vpop.f32.mrb[82].mxu0 }
 0x344   :  { %v25425_v41 = vpop.f32.mrb[82].mxu1  ;;  %v25427_v39 = vpop.f32.mrb[83].mxu0 }
 0x345   :  { %v25429_v1 = vpop.f32.mrb[83].mxu1 }
 0x34a   :  { %v25431_v17 = vpop.f32.mrb[84].mxu0  ;;  %v25433_v22 = vpop.f32.mrb[84].mxu1 }
 0x34b   :  { %28587 = vst [vmem:[#allocation45_spill] sm:$0xff] %v25431_v17  ;;  %28588 = vst [vmem:[#allocation13_spill] sm:$0xff] %v25433_v22  ;;  %v25435_v14 = vpop.f32.mrb[85].mxu0  ;;  %v25437_v24 = vpop.f32.mrb[85].mxu1 }
 0x34c   :  { %28589 = vst [vmem:[#allocation14_spill] sm:$0xff] %v25437_v24 }
 0x353   :  { %v25439_v13 = vpop.f32.mrb[86].mxu0  ;;  %v25441_v6 = vpop.f32.mrb[86].mxu1 }
 0x354   :  { %28590 = vst [vmem:[#allocation46_spill] sm:$0xff] %v25439_v13  ;;  %28591 = vst [vmem:[#allocation47_spill] sm:$0xff] %v25441_v6  ;;  %v25443_v30 = vpop.f32.mrb[87].mxu0  ;;  %v25445_v34 = vpop.f32.mrb[87].mxu1 }
 0x35c   :  { %v25447_v8 = vpop.f32.mrb[88].mxu0 }
 0x35d   :  { %28592 = vst [vmem:[#allocation48_spill] sm:$0xff] %v25447_v8  ;;  %v25451_v9 = vpop.f32.mrb[89].mxu0 }
 0x35e   :  { %v25449_v46 = vpop.f32.mrb[88].mxu1 }
 0x35f   :  { %28593 = vst [vmem:[#allocation15_spill] sm:$0xff] %v25449_v46  ;;  %v25453_v43 = vpop.f32.mrb[89].mxu1 }
 0x362   :  { %v25455_v55 = vpop.f32.mrb[90].mxu0 }
 0x363   :  { %28594 = vst [vmem:[#allocation51_spill] sm:$0xff] %v25455_v55  ;;  %v25457_v7 = vpop.f32.mrb[91].mxu0  ;;  %v25459_v3 = vpop.f32.mrb[90].mxu1 }
 0x364   :  { %28595 = vst [vmem:[#allocation17_spill] sm:$0xff] %v25459_v3  ;;  %v25461_v37 = vpop.f32.mrb[91].mxu1 }
 0x36b   :  { %v25463_v63 = vpop.f32.mrb[92].mxu0  ;;  %v25465_v61 = vpop.f32.mrb[92].mxu1 }
 0x36c   :  { %28596 = vst [vmem:[#allocation16_spill] sm:$0xff] %v25465_v61  ;;  %v25467_v52 = vpop.f32.mrb[93].mxu0  ;;  %v25469_v4 = vpop.f32.mrb[93].mxu1 }
 0x370   :  { %v25471_v42 = vpop.f32.mrb[94].mxu0  ;;  %v25473_v32 = vpop.f32.mrb[94].mxu1 }
 0x371   :  { %28597 = vst [vmem:[#allocation18_spill] sm:$0xff] %v25473_v32  ;;  %v25475_v10 = vpop.f32.mrb[95].mxu0  ;;  %v25477_v27 = vpop.f32.mrb[95].mxu1 }
 0x374   :  { %v25483_v45 = vpop.f32.mrb[96].mxu1 }
 0x375   :  { %v25479_v20 = vpop.f32.mrb[96].mxu0  ;;  %v9612_v56 = vsub.f32 %v25417_v49, %v25483_v45  ;;  %v25495_v48 = vpop.f32.mrb[97].mxu1 }
 0x376   :  { %v9610_v18 = vsub.f32 %v25415_v28, %v25479_v20  ;;  %v25491_v51 = vpop.f32.mrb[97].mxu0  ;;  %v9611_v23 = vsub.f32 %v25421_v57, %v25495_v48 }
 0x377   :  { %v9609_v60 = vsub.f32 %v25419_v47, %v25491_v51  ;;  %v25507_v44 = vmul.f32 %v25485_v59, %v9612_v56 }
 0x378   :  { %v25504_v36 = vmul.f32 %v25481_v0, %v9610_v18  ;;  %v25513_v25 = vmul.f32 %v25497_v5, %v9611_v23 }
 0x379   :  { %28598 = vst [vmem:[#allocation52_spill] sm:$0xff] %v25507_v44  ;;  %v25510_v19 = vmul.f32 %v25493_v2, %v9609_v60 }
 0x37a   :  { %28600 = vst [vmem:[#allocation54_spill] sm:$0xff] %v25513_v25  ;;  %v22905_v53 = vpack.c.bf16 %v25507_v44, %v25513_v25  ;;  %v25573_v25 = vld [vmem:[#allocation2 + $0x50] sm:$0xff] }
 0x37b   :  { %28599 = vst [vmem:[#allocation53_spill] sm:$0xff] %v25510_v19  ;;  %v25515_v31 = vpop.f32.mrb[98].mxu0  ;;  %v25519_v50 = vpop.f32.mrb[98].mxu1  ;;  %v22901_v26 = vpack.c.bf16 %v25504_v36, %v25510_v19  ;;  %28616 = vst [vmem:[#allocation60_spill] sm:$0xff] %v25573_v25 }
 0x37c   :  { %v9614_v54 = vsub.f32 %v25423_v21, %v25515_v31  ;;  %v9616_v35 = vsub.f32 %v25425_v41, %v25519_v50  ;;  %v25527_v12 = vpop.f32.mrb[99].mxu0  ;;  %v25531_v58 = vpop.f32.mrb[99].mxu1  ;;  %22906 = vmatprep.subr.bf16.mxu1 %v22905_v53 }
 0x37d   :  { %28603 = vst [vmem:[#allocation37_spill] sm:$0xff] %v25531_v58  ;;  %v9613_v40 = vsub.f32 %v25427_v39, %v25527_v12  ;;  %v9615_v16 = vsub.f32 %v25429_v1, %v25531_v58  ;;  %v25561_v58 = vld [vmem:[#allocation2 + $0x58] sm:$0xff]  ;;  %22902 = vmatprep.subr.bf16.mxu0 %v22901_v26  ;;  %22908 = vmatpush3.bf16.msra.mxu1 %v22905_v53  ;;  %v25589_v53 = vld [vmem:[#allocation2 + $0x68] sm:$0xff] }
 0x37e   :  { %v25544_v33 = vmul.f32 %v25517_v38, %v9614_v54  ;;  %v25547_v18 = vmul.f32 %v25521_v29, %v9616_v35  ;;  %28612 = vst [vmem:[#allocation38_spill] sm:$0xff] %v25561_v58  ;;  %22904 = vmatpush3.bf16.msra.mxu0 %v22901_v26  ;;  %28619 = vst [vmem:[#allocation59_spill] sm:$0xff] %v25589_v53 }
 0x37f   :  { %v25550_v56 = vmul.f32 %v25529_v15, %v9613_v40  ;;  %v25553_v60 = vmul.f32 %v25533_v62, %v9615_v16  ;;  %v25559_v19 = vpop.f32.mrb[100].mxu1  ;;  %v25569_v16 = vld [vmem:[#allocation2 + $0x40] sm:$0xff] }
 0x380   :  { %28605 = vst [vmem:[#allocation49_spill] sm:$0xff] %v25544_v33  ;;  %28606 = vst [vmem:[#allocation55_spill] sm:$0xff] %v25547_v18  ;;  %v9620_v35 = vsub.f32 %v25433_v22, %v25559_v19  ;;  %v25571_v44 = vpop.f32.mrb[101].mxu1  ;;  %v145_v22 = vld [vmem:[#allocation4 + $0x308] sm:$0xff] }
 0x381   :  { %28607 = vst [vmem:[#allocation19_spill] sm:$0xff] %v25550_v56  ;;  %28608 = vst [vmem:[#allocation57_spill] sm:$0xff] %v25553_v60  ;;  %v25555_v23 = vpop.f32.mrb[100].mxu0  ;;  %v9619_v15 = vsub.f32 %v25437_v24, %v25571_v44  ;;  %21658 = vmatmul.mubr.msk.f32.vlgmr.msra.gmra.mrb[128].mxu0 %vm872_vm1, %v145_v22  ;;  %v151_v22 = vld [vmem:[#allocation4 + $0x338] sm:$0xff] }
 0x382   :  { %28609 = vst [vmem:[#allocation58_spill] sm:$0xff] %v25555_v23  ;;  %28611 = vst [vmem:[#allocation31_spill] sm:$0xff] %v25559_v19  ;;  %v9618_v54 = vsub.f32 %v25431_v17, %v25555_v23  ;;  %v25567_v40 = vpop.f32.mrb[101].mxu0  ;;  %v22909_v23 = vpack.c.bf16 %v25544_v33, %v25550_v56  ;;  %v22913_v19 = vpack.c.bf16 %v25547_v18, %v25553_v60  ;;  %v147_v17 = vld [vmem:[#allocation4 + $0x318] sm:$0xff]  ;;  %v150_v60 = vld [vmem:[#allocation4 + $0x330] sm:$0xff] }
 0x383   :  { %28613 = vst [vmem:[#allocation44_spill] sm:$0xff] %v25567_v40  ;;  %28614 = vst [vmem:[#allocation50_spill] sm:$0xff] %v25569_v16  ;;  %v9617_v62 = vsub.f32 %v25435_v14, %v25567_v40  ;;  %v25587_v26 = vmul.f32 %v25561_v58, %v9620_v35  ;;  %v25601_v18 = vld [vmem:[#allocation2 + $0x78] sm:$0xff]  ;;  %v25613_v58 = vld [vmem:[#allocation2 + $0x70] sm:$0xff]  ;;  %21665 = vmatmul.mubr.msk.f32.vlgmr.msra.gmra.mrb[128].mxu1 %vm872_vm1, %v147_v17 }
 0x384   :  { %28615 = vst [vmem:[#allocation56_spill] sm:$0xff] %v25571_v44  ;;  %v25584_v29 = vmul.f32 %v25557_v11, %v9618_v54  ;;  %v25595_v44 = vmul.f32 %v25573_v25, %v9619_v15  ;;  %28624 = vst [vmem:[#allocation9_spill] sm:$0xff] %v25601_v18  ;;  %22910 = vmatprep.subr.bf16.mxu0 %v22909_v23  ;;  %22914 = vmatprep.subr.bf16.mxu1 %v22913_v19  ;;  %v148_v54 = vld [vmem:[#allocation4 + $0x320] sm:$0xff] }
 0x385   :  { %28618 = vst [vmem:[#allocation29_spill] sm:$0xff] %v25587_v26  ;;  %v25592_v40 = vmul.f32 %v25569_v16, %v9617_v62  ;;  %v25597_v33 = vpop.f32.mrb[102].mxu0  ;;  %v25599_v56 = vpop.f32.mrb[102].mxu1  ;;  %v25609_v15 = vld [vmem:[#allocation2 + $0x60] sm:$0xff]  ;;  %28626 = vst [vmem:[#allocation33_spill] sm:$0xff] %v25613_v58  ;;  %22912 = vmatpush3.bf16.msra.mxu0 %v22909_v23  ;;  %22916 = vmatpush3.bf16.msra.mxu1 %v22913_v19 }
 0x386   :  { %28617 = vst [vmem:[#allocation21_spill] sm:$0xff] %v25584_v29  ;;  %28621 = vst [vmem:[#allocation22_spill] sm:$0xff] %v25595_v44  ;;  %v9622_v35 = vsub.f32 %v25439_v13, %v25597_v33  ;;  %v9624_v62 = vsub.f32 %v25441_v6, %v25599_v56  ;;  %v25607_v16 = vpop.f32.mrb[103].mxu0  ;;  %v25611_v25 = vpop.f32.mrb[103].mxu1  ;;  %v149_v6 = vld [vmem:[#allocation4 + $0x328] sm:$0xff]  ;;  %21671 = vmatprep.mubr.msk.f32.mxu0 %vm872_vm1, %v148_v54  ;;  %21678 = vmatprep.mubr.msk.f32.mxu1 %vm872_vm1, %v150_v60  ;;  %v152_v60 = vld [vmem:[#allocation4 + $0x340] sm:$0xff] }
 0x387   :  { %28620 = vst [vmem:[#allocation23_spill] sm:$0xff] %v25592_v40  ;;  %28622 = vst [vmem:[#allocation28_spill] sm:$0xff] %v25597_v33  ;;  %v9621_v11 = vsub.f32 %v25443_v30, %v25607_v16  ;;  %v9623_v33 = vsub.f32 %v25445_v34, %v25611_v25  ;;  %v22921_v17 = vpack.c.bf16 %v25587_v26, %v25595_v44 }
 0x388   :  { %28623 = vst [vmem:[#allocation8_spill] sm:$0xff] %v25599_v56  ;;  %28625 = vst [vmem:[#allocation32_spill] sm:$0xff] %v25609_v15  ;;  %v22917_v56 = vpack.c.bf16 %v25584_v29, %v25592_v40  ;;  %v25624_v13 = vmul.f32 %v25589_v53, %v9622_v35  ;;  %v25627_v24 = vmul.f32 %v25601_v18, %v9624_v62  ;;  %v25641_v35 = vld [vmem:[#allocation2 + $0x88] sm:$0xff]  ;;  %v25645_v40 = vld [vmem:[#allocation2 + $0x98] sm:$0xff]  ;;  %21672 = vmatmul.mubr.msk.f32.vlgmr.msra.gmra.mrb[130].mxu0 %vm872_vm1, %v149_v6 }
 0x389   :  { %v25634_v19 = vmul.f32 %v25609_v15, %v9621_v11  ;;  %v25637_v23 = vmul.f32 %v25613_v58, %v9623_v33  ;;  %v25639_v29 = vpop.f32.mrb[104].mxu0  ;;  %v25643_v62 = vpop.f32.mrb[104].mxu1  ;;  %28633 = vst [vmem:[#allocation27_spill] sm:$0xff] %v25645_v40  ;;  %22922 = vmatprep.subr.bf16.mxu1 %v22921_v17  ;;  %v25653_v33 = vld [vmem:[#allocation2 + $0x80] sm:$0xff]  ;;  %v25657_v58 = vld [vmem:[#allocation2 + $0x90] sm:$0xff]  ;;  %21679 = vmatmul.mubr.msk.f32.vlgmr.msra.gmra.mrb[130].mxu1 %vm872_vm1, %v151_v22 }
 0x38a   :  { %28627 = vst [vmem:[#allocation35_spill] sm:$0xff] %v25624_v13  ;;  %28628 = vst [vmem:[#allocation36_spill] sm:$0xff] %v25627_v24  ;;  %22918 = vmatprep.subr.bf16.mxu0 %v22917_v56  ;;  %v9626_v54 = vsub.f32 %v25447_v8, %v25639_v29  ;;  %v9628_v11 = vsub.f32 %v25449_v46, %v25643_v62  ;;  %v25651_v26 = vpop.f32.mrb[105].mxu0  ;;  %v25655_v44 = vpop.f32.mrb[105].mxu1  ;;  %v154_v15 = vld [vmem:[#allocation4 + $0x350] sm:$0xff]  ;;  %v153_v46 = vld [vmem:[#allocation4 + $0x348] sm:$0xff]  ;;  %22924 = vmatpush3.bf16.msra.mxu1 %v22921_v17 }
 0x38b   :  { %28629 = vst [vmem:[#allocation10_spill] sm:$0xff] %v25634_v19  ;;  %28630 = vst [vmem:[#allocation39_spill] sm:$0xff] %v25637_v23  ;;  %v9625_v18 = vsub.f32 %v25451_v9, %v25651_v26  ;;  %22920 = vmatpush3.bf16.msra.mxu0 %v22917_v56  ;;  %21685 = vmatprep.mubr.msk.f32.mxu0 %vm872_vm1, %v152_v60  ;;  %v22929_v6 = vpack.c.bf16 %v25627_v24, %v25637_v23  ;;  %v156_v17 = vld [vmem:[#allocation4 + $0x360] sm:$0xff] }
 0x38c   :  { %28631 = vst [vmem:[#allocation11_spill] sm:$0xff] %v25639_v29  ;;  %28632 = vst [vmem:[#allocation12_spill] sm:$0xff] %v25643_v62  ;;  %v9627_v29 = vsub.f32 %v25453_v43, %v25655_v44  ;;  %v22925_v62 = vpack.c.bf16 %v25624_v13, %v25634_v19  ;;  %v25668_v8 = vmul.f32 %v25641_v35, %v9626_v54  ;;  %v25684_v54 = vld [vmem:[#allocation2 + $0xa8] sm:$0xff]  ;;  %21692 = vmatprep.mubr.msk.f32.mxu1 %vm872_vm1, %v154_v15  ;;  %v25697_v24 = vld [vmem:[#allocation2 + $0xa0] sm:$0xff] }
 0x38d   :  { %28634 = vst [vmem:[#allocation34_spill] sm:$0xff] %v25653_v33  ;;  %28635 = vst [vmem:[#allocation41_spill] sm:$0xff] %v25655_v44  ;;  %v25671_v53 = vmul.f32 %v25645_v40, %v9628_v11  ;;  %v155_v44 = vld [vmem:[#allocation4 + $0x358] sm:$0xff]  ;;  %v25677_v22 = vmul.f32 %v25653_v33, %v9625_v18  ;;  %v25682_v13 = vpop.f32.mrb[106].mxu0  ;;  %v25686_v19 = vpop.f32.mrb[106].mxu1  ;;  %22930 = vmatprep.subr.bf16.mxu1 %v22929_v6  ;;  %v158_v15 = vld [vmem:[#allocation4 + $0x370] sm:$0xff] }
 0x38e   :  { %28636 = vst [vmem:[#allocation40_spill] sm:$0xff] %v25657_v58  ;;  %28637 = vst [vmem:[#allocation42_spill] sm:$0xff] %v25668_v8  ;;  %v25680_v56 = vmul.f32 %v25657_v58, %v9627_v29  ;;  %v25688_v11 = vld [vmem:[#allocation2 + $0xb8] sm:$0xff]  ;;  %22926 = vmatprep.subr.bf16.mxu0 %v22925_v62  ;;  %v9630_v60 = vsub.f32 %v25455_v55, %v25682_v13  ;;  %v9632_v18 = vsub.f32 %v25459_v3, %v25686_v19  ;;  %v25695_v29 = vpop.f32.mrb[107].mxu0  ;;  %v25699_v23 = vpop.f32.mrb[107].mxu1  ;;  %v25701_v58 = vld [vmem:[#allocation2 + $0xb0] sm:$0xff] }
 0x38f   :  { %28638 = vst [vmem:[#allocation61_spill] sm:$0xff] %v25671_v53  ;;  %28639 = vst [vmem:[#allocation62_spill] sm:$0xff] %v25677_v22  ;;  %21686 = vmatmul.mubr.msk.f32.vlgmr.msra.gmra.mrb[132].mxu0 %vm872_vm1, %v153_v46  ;;  %v9629_v33 = vsub.f32 %v25457_v7, %v25695_v29  ;;  %21693 = vmatmul.mubr.msk.f32.vlgmr.msra.gmra.mrb[132].mxu1 %vm872_vm1, %v155_v44  ;;  %v157_v3 = vld [vmem:[#allocation4 + $0x368] sm:$0xff] }
 0x390   :  { %28640 = vst [vmem:[#allocation63_spill] sm:$0xff] %v25680_v56  ;;  %28641 = vst [vmem:[#allocation64_spill] sm:$0xff] %v25682_v13  ;;  %v9631_v13 = vsub.f32 %v25461_v37, %v25699_v23  ;;  %22928 = vmatpush3.bf16.msra.mxu0 %v22925_v62  ;;  %v25712_v55 = vmul.f32 %v25684_v54, %v9630_v60  ;;  %v25715_v40 = vmul.f32 %v25688_v11, %v9632_v18  ;;  %v25728_v60 = vld [vmem:[#allocation2 + $0xc8] sm:$0xff]  ;;  %v25732_v18 = vld [vmem:[#allocation2 + $0xd8] sm:$0xff] }
 0x391   :  { %28642 = vst [vmem:[#allocation65_spill] sm:$0xff] %v25684_v54  ;;  %28643 = vst [vmem:[#allocation66_spill] sm:$0xff] %v25686_v19  ;;  %v22933_v19 = vpack.c.bf16 %v25668_v8, %v25677_v22  ;;  %22932 = vmatpush3.bf16.msra.mxu1 %v22929_v6  ;;  %21699 = vmatprep.mubr.msk.f32.mxu0 %vm872_vm1, %v156_v17  ;;  %v22937_v46 = vpack.c.bf16 %v25671_v53, %v25680_v56  ;;  %v25726_v8 = vpop.f32.mrb[108].mxu0  ;;  %v25730_v22 = vpop.f32.mrb[108].mxu1  ;;  %v160_v6 = vld [vmem:[#allocation4 + $0x380] sm:$0xff] }
 0x392   :  { %28644 = vst [vmem:[#allocation67_spill] sm:$0xff] %v25688_v11  ;;  %28645 = vst [vmem:[#allocation68_spill] sm:$0xff] %v25697_v24  ;;  %v25721_v44 = vmul.f32 %v25697_v24, %v9629_v33  ;;  %v25724_v62 = vmul.f32 %v25701_v58, %v9631_v13  ;;  %21706 = vmatprep.mubr.msk.f32.mxu1 %vm872_vm1, %v158_v15  ;;  %v9634_v17 = vsub.f32 %v25463_v63, %v25726_v8  ;;  %v25739_v13 = vpop.f32.mrb[109].mxu0  ;;  %v25741_v53 = vld [vmem:[#allocation2 + $0xc0] sm:$0xff]  ;;  %v25743_v56 = vpop.f32.mrb[109].mxu1  ;;  %v162_v15 = vld [vmem:[#allocation4 + $0x390] sm:$0xff] }
 0x393   :  { %28646 = vst [vmem:[#allocation69_spill] sm:$0xff] %v25699_v23  ;;  %28647 = vst [vmem:[#allocation70_spill] sm:$0xff] %v25701_v58  ;;  %v159_v23 = vld [vmem:[#allocation4 + $0x378] sm:$0xff]  ;;  %22934 = vmatprep.subr.bf16.mxu0 %v22933_v19  ;;  %v9636_v33 = vsub.f32 %v25465_v61, %v25730_v22  ;;  %22938 = vmatprep.subr.bf16.mxu1 %v22937_v46  ;;  %v25745_v58 = vld [vmem:[#allocation2 + $0xd0] sm:$0xff]  ;;  %v9633_v24 = vsub.f32 %v25467_v52, %v25739_v13 }
 0x394   :  { %28648 = vst [vmem:[#allocation71_spill] sm:$0xff] %v25712_v55  ;;  %28649 = vst [vmem:[#allocation72_spill] sm:$0xff] %v25715_v40  ;;  %21700 = vmatmul.mubr.msk.f32.vlgmr.msra.gmra.mrb[134].mxu0 %vm872_vm1, %v157_v3  ;;  %21707 = vmatmul.mubr.msk.f32.vlgmr.msra.gmra.mrb[134].mxu1 %vm872_vm1, %v159_v23  ;;  %v161_v61 = vld [vmem:[#allocation4 + $0x388] sm:$0xff]  ;;  %v25756_v11 = vmul.f32 %v25728_v60, %v9634_v17  ;;  %v22945_v3 = vpack.c.bf16 %v25715_v40, %v25724_v62  ;;  %v25785_v40 = vld [vmem:[#allocation2 + $0xe0] sm:$0xff] }
 0x395   :  { %28650 = vst [vmem:[#allocation73_spill] sm:$0xff] %v25721_v44  ;;  %28651 = vst [vmem:[#allocation74_spill] sm:$0xff] %v25724_v62  ;;  %22936 = vmatpush3.bf16.msra.mxu0 %v22933_v19  ;;  %v25759_v54 = vmul.f32 %v25732_v18, %v9636_v33  ;;  %22940 = vmatpush3.bf16.msra.mxu1 %v22937_v46  ;;  %v25765_v23 = vmul.f32 %v25741_v53, %v9633_v24  ;;  %v25772_v17 = vld [vmem:[#allocation2 + $0xe8] sm:$0xff]  ;;  %v25776_v33 = vld [vmem:[#allocation2 + $0xf8] sm:$0xff] }
 0x396   :  { %28652 = vst [vmem:[#allocation75_spill] sm:$0xff] %v25726_v8  ;;  %28653 = vst [vmem:[#allocation76_spill] sm:$0xff] %v25730_v22  ;;  %v9635_v8 = vsub.f32 %v25469_v4, %v25743_v56  ;;  %v22941_v22 = vpack.c.bf16 %v25712_v55, %v25721_v44  ;;  %21713 = vmatprep.mubr.msk.f32.mxu0 %vm872_vm1, %v160_v6  ;;  %v25770_v55 = vpop.f32.mrb[110].mxu0  ;;  %v25774_v44 = vpop.f32.mrb[110].mxu1  ;;  %21720 = vmatprep.mubr.msk.f32.mxu1 %vm872_vm1, %v162_v15  ;;  %v164_v46 = vld [vmem:[#allocation4 + $0x3a0] sm:$0xff]  ;;  %v166_v15 = vld [vmem:[#allocation4 + $0x3b0] sm:$0xff] }
 0x397   :  { %28654 = vst [vmem:[#allocation77_spill] sm:$0xff] %v25732_v18  ;;  %28655 = vst [vmem:[#allocation78_spill] sm:$0xff] %v25739_v13  ;;  %v9638_v6 = vsub.f32 %v25471_v42, %v25770_v55  ;;  %v9640_v24 = vsub.f32 %v25473_v32, %v25774_v44  ;;  %22946 = vmatprep.subr.bf16.mxu1 %v22945_v3  ;;  %v25787_v62 = vpop.f32.mrb[111].mxu1  ;;  %v165_v32 = vld [vmem:[#allocation4 + $0x3a8] sm:$0xff] }
 0x398   :  { %28656 = vst [vmem:[#allocation79_spill] sm:$0xff] %v25741_v53  ;;  %28657 = vst [vmem:[#allocation80_spill] sm:$0xff] %v25743_v56  ;;  %v163_v56 = vld [vmem:[#allocation4 + $0x398] sm:$0xff]  ;;  %v25768_v19 = vmul.f32 %v25745_v58, %v9635_v8  ;;  %22942 = vmatprep.subr.bf16.mxu0 %v22941_v22  ;;  %v25783_v8 = vpop.f32.mrb[111].mxu0  ;;  %21714 = vmatmul.mubr.msk.f32.vlgmr.msra.gmra.mrb[136].mxu0 %vm872_vm1, %v161_v61 }
 0x399   :  { %28658 = vst [vmem:[#allocation81_spill] sm:$0xff] %v25745_v58  ;;  %28659 = vst [vmem:[#allocation82_spill] sm:$0xff] %v25756_v11  ;;  %v25789_v58 = vld [vmem:[#allocation2 + $0xf0] sm:$0xff]  ;;  %v9637_v53 = vsub.f32 %v25475_v10, %v25783_v8  ;;  %21721 = vmatmul.mubr.msk.f32.vlgmr.msra.gmra.mrb[136].mxu1 %vm872_vm1, %v163_v56  ;;  %22944 = vmatpush3.bf16.msra.mxu0 %v22941_v22  ;;  %v25800_v13 = vmul.f32 %v25772_v17, %v9638_v6  ;;  %v168_v6 = vld [vmem:[#allocation4 + $0x3c0] sm:$0xff] }
 0x39a   :  { %28660 = vst [vmem:[#allocation83_spill] sm:$0xff] %v25759_v54  ;;  %28661 = vst [vmem:[#allocation84_spill] sm:$0xff] %v25765_v23  ;;  %v25803_v18 = vmul.f32 %v25776_v33, %v9640_v24  ;;  %22948 = vmatpush3.bf16.msra.mxu1 %v22945_v3  ;;  %21727 = vmatprep.mubr.msk.f32.mxu0 %vm872_vm1, %v164_v46  ;;  %v22953_v61 = vpack.c.bf16 %v25759_v54, %v25768_v19 }
 0x39b   :  { %28662 = vst [vmem:[#allocation85_spill] sm:$0xff] %v25768_v19  ;;  %28663 = vst [vmem:[#allocation86_spill] sm:$0xff] %v25770_v55  ;;  %v9639_v55 = vsub.f32 %v25477_v27, %v25787_v62  ;;  %v25809_v56 = vmul.f32 %v25785_v40, %v9637_v53  ;;  %21734 = vmatprep.mubr.msk.f32.mxu1 %vm872_vm1, %v166_v15  ;;  %v170_v53 = vld [vmem:[#allocation4 + $0x3d0] sm:$0xff] }
 0x39c   :  { %28664 = vst [vmem:[#allocation87_spill] sm:$0xff] %v25774_v44  ;;  %28665 = vst [vmem:[#allocation88_spill] sm:$0xff] %v25787_v62  ;;  %v22949_v44 = vpack.c.bf16 %v25756_v11, %v25765_v23  ;;  %v167_v62 = vld [vmem:[#allocation4 + $0x3b8] sm:$0xff]  ;;  %v21547_v11 = vpop.f32.mrb[112].mxu0  ;;  %v21554_v23 = vpop.f32.mrb[112].mxu1  ;;  %22954 = vmatprep.subr.bf16.mxu1 %v22953_v61  ;;  %21728 = vmatmul.mubr.msk.f32.vlgmr.msra.gmra.mrb[138].mxu0 %vm872_vm1, %v165_v32 }
 0x39d   :  { %v25812_v22 = vmul.f32 %v25789_v58, %v9639_v55  ;;  %v9642_v3 = vsub.f32 %v21547_v11, %v25415_v28  ;;  %v9644_v46 = vsub.f32 %v21554_v23, %v25417_v49  ;;  %v8475_v24 = vpop.f32.mrb[113].mxu0  ;;  %v8550_v54 = vpop.f32.mrb[113].mxu1  ;;  %21735 = vmatmul.mubr.msk.f32.vlgmr.msra.gmra.mrb[138].mxu1 %vm872_vm1, %v167_v62  ;;  %v22957_v15 = vpack.c.bf16 %v25800_v13, %v25809_v56  ;;  %v169_v11 = vld [vmem:[#allocation4 + $0x3c8] sm:$0xff]  ;;  %v171_v62 = vld [vmem:[#allocation4 + $0x3d8] sm:$0xff] }
 0x39e   :  { %22950 = vmatprep.subr.bf16.mxu0 %v22949_v44  ;;  %v9641_v19 = vsub.f32 %v8475_v24, %v25419_v47  ;;  %v9643_v55 = vsub.f32 %v8550_v54, %v25421_v57  ;;  %22956 = vmatpush3.bf16.msra.mxu1 %v22953_v61  ;;  %v21561_v54 = vpop.f32.mrb[114].mxu0  ;;  %v173_v24 = vld [vmem:[#allocation4 + $0x3e8] sm:$0xff] }
 0x39f   :  { %22952 = vmatpush3.bf16.msra.mxu0 %v22949_v44  ;;  %v9674_v28 = vsub.f32 %v9642_v3, %v25479_v20  ;;  %v9676_v49 = vsub.f32 %v9644_v46, %v25483_v45  ;;  %21741 = vmatprep.mubr.msk.f32.mxu0 %vm872_vm1, %v168_v6  ;;  %v22961_v32 = vpack.c.bf16 %v25803_v18, %v25812_v22  ;;  %v21568_v44 = vpop.f32.mrb[114].mxu1  ;;  %v8625_v6 = vpop.f32.mrb[115].mxu0 }
 0x3a0   :  { %v9673_v47 = vsub.f32 %v9641_v19, %v25491_v51  ;;  %v9675_v57 = vsub.f32 %v9643_v55, %v25495_v48  ;;  %21748 = vmatprep.mubr.msk.f32.mxu1 %vm872_vm1, %v170_v53  ;;  %22958 = vmatprep.subr.bf16.mxu0 %v22957_v15  ;;  %v9646_v23 = vsub.f32 %v21561_v54, %v25423_v21  ;;  %v8700_v51 = vpop.f32.mrb[115].mxu1  ;;  %v172_v19 = vld [vmem:[#allocation4 + $0x3e0] sm:$0xff]  ;;  %v28666_v53 = vld [vmem:[#allocation37_spill] sm:$0xff] }
 0x3a1   :  { %v9770_v20 = vmul.f32 %v25481_v0, %v9674_v28  ;;  %v25833_v45 = vmul.f32 %v25485_v59, %v9676_v49  ;;  %v9648_v61 = vsub.f32 %v21568_v44, %v25425_v41  ;;  %22962 = vmatprep.subr.bf16.mxu1 %v22961_v32  ;;  %v9645_v46 = vsub.f32 %v8625_v6, %v25427_v39  ;;  %v174_v59 = vld [vmem:[#allocation4 + $0x3f0] sm:$0xff]  ;;  %v21582_v55 = vpop.f32.mrb[116].mxu1  ;;  %v175_v28 = vld [vmem:[#allocation4 + $0x3f8] sm:$0xff] }
 0x3a2   :  { %v25838_v48 = vmul.f32 %v25493_v2, %v9673_v47  ;;  %v25841_v3 = vmul.f32 %v25497_v5, %v9675_v57  ;;  %v9647_v0 = vsub.f32 %v8700_v51, %v25429_v1  ;;  %21742 = vmatmul.mubr.msk.f32.vlgmr.msra.gmra.mrb[140].mxu0 %vm872_vm1, %v169_v11  ;;  %v9678_v21 = vsub.f32 %v9646_v23, %v25515_v31  ;;  %v21575_v1 = vpop.f32.mrb[116].mxu0  ;;  %v28669_v47 = vld [vmem:[#allocation13_spill] sm:$0xff]  ;;  %v8850_v54 = vpop.f32.mrb[117].mxu1  ;;  %v28670_v44 = vld [vmem:[#allocation30_spill] sm:$0xff]  ;;  %v28671_v23 = vld [vmem:[#allocation43_spill] sm:$0xff] }
 0x3a3   :  { %v9680_v41 = vsub.f32 %v9648_v61, %v25519_v50  ;;  %21749 = vmatmul.mubr.msk.f32.vlgmr.msra.gmra.mrb[140].mxu1 %vm872_vm1, %v171_v62  ;;  %22960 = vmatpush3.bf16.msra.mxu0 %v22957_v15  ;;  %v25850_v2 = vadd.f32 %v9770_v20, %v25504_v36  ;;  %v9677_v5 = vsub.f32 %v9645_v46, %v25527_v12  ;;  %v28667_v15 = vld [vmem:[#allocation25_spill] sm:$0xff]  ;;  %v8775_v57 = vpop.f32.mrb[117].mxu0  ;;  %v28672_v61 = vld [vmem:[#allocation14_spill] sm:$0xff]  ;;  %v28674_v46 = vld [vmem:[#allocation31_spill] sm:$0xff] }
 0x3a4   :  { %v9679_v39 = vsub.f32 %v9647_v0, %v28666_v53  ;;  %22964 = vmatpush3.bf16.msra.mxu1 %v22961_v32  ;;  %21755 = vmatprep.mubr.msk.f32.mxu0 %vm872_vm1, %v172_v19  ;;  %v22965_v31 = vpack.c.bf16 %v9770_v20, %v25838_v48  ;;  %v25857_v50 = vmul.f32 %v25517_v38, %v9678_v21  ;;  %v28668_v36 = vld [vmem:[#allocation45_spill] sm:$0xff]  ;;  %v177_v32 = vld [vmem:[#allocation4 + $0x400] sm:$0xff]  ;;  %v28673_v51 = vld [vmem:[#allocation58_spill] sm:$0xff] }
 0x3a5   :  { %v25860_v49 = vmul.f32 %v28667_v15, %v9680_v41  ;;  %v9650_v11 = vsub.f32 %v21575_v1, %v28668_v36  ;;  %v9652_v12 = vsub.f32 %v21582_v55, %v28669_v47  ;;  %21762 = vmatprep.mubr.msk.f32.mxu1 %vm872_vm1, %v174_v59  ;;  %v25866_v62 = vmul.f32 %v28670_v44, %v9677_v5  ;;  %v28675_v21 = vld [vmem:[#allocation44_spill] sm:$0xff]  ;;  %v178_v1 = vld [vmem:[#allocation4 + $0x408] sm:$0xff]  ;;  %v28677_v15 = vld [vmem:[#allocation26_spill] sm:$0xff] }
 0x3a6   :  { %v25869_v20 = vmul.f32 %v28671_v23, %v9679_v39  ;;  %v9649_v38 = vsub.f32 %v8775_v57, %v25435_v14  ;;  %v9651_v6 = vsub.f32 %v8850_v54, %v28672_v61  ;;  %21756 = vmatmul.mubr.msk.f32.vlgmr.msra.gmra.mrb[142].mxu0 %vm872_vm1, %v173_v24  ;;  %22966 = vmatprep.subr.bf16.mxu0 %v22965_v31  ;;  %v28676_v5 = vld [vmem:[#allocation56_spill] sm:$0xff]  ;;  %v21589_v14 = vpop.f32.mrb[118].mxu0  ;;  %v21596_v39 = vpop.f32.mrb[118].mxu1  ;;  %v179_v24 = vld [vmem:[#allocation4 + $0x410] sm:$0xff]  ;;  %v28680_v57 = vld [vmem:[#allocation47_spill] sm:$0xff] }
 0x3a7   :  { %v9682_v19 = vsub.f32 %v9650_v11, %v28673_v51  ;;  %v9684_v0 = vsub.f32 %v9652_v12, %v28674_v46  ;;  %21763 = vmatmul.mubr.msk.f32.vlgmr.msra.gmra.mrb[142].mxu1 %vm872_vm1, %v175_v28  ;;  %v22969_v59 = vpack.c.bf16 %v25833_v45, %v25841_v3  ;;  %22968 = vmatpush3.bf16.msra.mxu0 %v22965_v31  ;;  %v28678_v36 = vld [vmem:[#allocation38_spill] sm:$0xff]  ;;  %v8925_v54 = vpop.f32.mrb[119].mxu0  ;;  %v9000_v44 = vpop.f32.mrb[119].mxu1  ;;  %v181_v23 = vld [vmem:[#allocation4 + $0x420] sm:$0xff]  ;;  %v180_v46 = vld [vmem:[#allocation4 + $0x418] sm:$0xff] }
 0x3a8   :  { %v9681_v41 = vsub.f32 %v9649_v38, %v28675_v21  ;;  %v9683_v53 = vsub.f32 %v9651_v6, %v28676_v5  ;;  %21769 = vmatprep.mubr.msk.f32.mxu0 %vm872_vm1, %v177_v32  ;;  %v22973_v55 = vpack.c.bf16 %v25857_v50, %v25866_v62  ;;  %v28679_v47 = vld [vmem:[#allocation46_spill] sm:$0xff]  ;;  %v9656_v31 = vsub.f32 %v21596_v39, %v28680_v57  ;;  %v28682_v61 = vld [vmem:[#allocation60_spill] sm:$0xff] }
 0x3a9   :  { %v25885_v28 = vmul.f32 %v28677_v15, %v9682_v19  ;;  %v25888_v11 = vmul.f32 %v28678_v36, %v9684_v0  ;;  %22970 = vmatprep.subr.bf16.mxu1 %v22969_v59  ;;  %v9654_v12 = vsub.f32 %v21589_v14, %v28679_v47  ;;  %v28681_v32 = vld [vmem:[#allocation50_spill] sm:$0xff]  ;;  %v9653_v51 = vsub.f32 %v8925_v54, %v25443_v30  ;;  %v28683_v0 = vld [vmem:[#allocation28_spill] sm:$0xff]  ;;  %v21603_v30 = vpop.f32.mrb[120].mxu0  ;;  %v21610_v39 = vpop.f32.mrb[120].mxu1  ;;  %v28685_v36 = vld [vmem:[#allocation59_spill] sm:$0xff] }
 0x3aa   :  { %v25893_v38 = vmul.f32 %v28681_v32, %v9681_v41  ;;  %v25896_v6 = vmul.f32 %v28682_v61, %v9683_v53  ;;  %22972 = vmatpush3.bf16.msra.mxu1 %v22969_v59  ;;  %v9655_v19 = vsub.f32 %v9000_v44, %v25445_v34  ;;  %v28684_v5 = vld [vmem:[#allocation8_spill] sm:$0xff]  ;;  %21776 = vmatprep.mubr.msk.f32.mxu1 %vm872_vm1, %v179_v24  ;;  %v183_v34 = vld [vmem:[#allocation4 + $0x430] sm:$0xff]  ;;  %v9150_v57 = vpop.f32.mrb[121].mxu1  ;;  %v28689_v44 = vld [vmem:[#allocation33_spill] sm:$0xff] }
 0x3ab   :  { %v9686_v21 = vsub.f32 %v9654_v12, %v28683_v0  ;;  %v9688_v14 = vsub.f32 %v9656_v31, %v28684_v5  ;;  %21770 = vmatmul.mubr.msk.f32.vlgmr.msra.gmra.mrb[144].mxu0 %vm872_vm1, %v178_v1  ;;  %v22977_v41 = vpack.c.bf16 %v25860_v49, %v25869_v20  ;;  %v9685_v53 = vsub.f32 %v9653_v51, %v25607_v16  ;;  %v28686_v1 = vld [vmem:[#allocation9_spill] sm:$0xff]  ;;  %v28687_v16 = vld [vmem:[#allocation48_spill] sm:$0xff]  ;;  %v9075_v12 = vpop.f32.mrb[121].mxu0  ;;  %v28690_v32 = vld [vmem:[#allocation15_spill] sm:$0xff] }
 0x3ac   :  { %v9687_v59 = vsub.f32 %v9655_v19, %v25611_v25  ;;  %22974 = vmatprep.subr.bf16.mxu0 %v22973_v55  ;;  %21783 = vmatprep.mubr.msk.f32.mxu0 %vm872_vm1, %v181_v23  ;;  %v22981_v15 = vpack.c.bf16 %v25885_v28, %v25893_v38  ;;  %v9658_v25 = vsub.f32 %v21603_v30, %v28687_v16  ;;  %v28688_v31 = vld [vmem:[#allocation32_spill] sm:$0xff]  ;;  %v182_v51 = vld [vmem:[#allocation4 + $0x428] sm:$0xff]  ;;  %v184_v19 = vld [vmem:[#allocation4 + $0x438] sm:$0xff] }
 0x3ad   :  { %v25912_v24 = vmul.f32 %v28685_v36, %v9686_v21  ;;  %v25915_v47 = vmul.f32 %v28686_v1, %v9688_v14  ;;  %21777 = vmatmul.mubr.msk.f32.vlgmr.msra.gmra.mrb[144].mxu1 %vm872_vm1, %v180_v46  ;;  %22978 = vmatprep.subr.bf16.mxu1 %v22977_v41  ;;  %v25920_v54 = vmul.f32 %v28688_v31, %v9685_v53  ;;  %v28691_v0 = vld [vmem:[#allocation11_spill] sm:$0xff]  ;;  %v28692_v14 = vld [vmem:[#allocation12_spill] sm:$0xff] }
 0x3ae   :  { %v25923_v23 = vmul.f32 %v28689_v44, %v9687_v59  ;;  %22976 = vmatpush3.bf16.msra.mxu0 %v22973_v55  ;;  %22980 = vmatpush3.bf16.msra.mxu1 %v22977_v41  ;;  %v9660_v61 = vsub.f32 %v21610_v39, %v28690_v32  ;;  %v9690_v21 = vsub.f32 %v9658_v25, %v28691_v0  ;;  %v21617_v55 = vpop.f32.mrb[122].mxu0  ;;  %v21624_v41 = vpop.f32.mrb[122].mxu1  ;;  %v185_v25 = vld [vmem:[#allocation4 + $0x440] sm:$0xff]  ;;  %v28695_v44 = vld [vmem:[#allocation51_spill] sm:$0xff]  ;;  %v28696_v32 = vld [vmem:[#allocation17_spill] sm:$0xff] }
 0x3af   :  { %v9657_v46 = vsub.f32 %v9075_v12, %v25451_v9  ;;  %v9659_v5 = vsub.f32 %v9150_v57, %v25453_v43  ;;  %21790 = vmatprep.mubr.msk.f32.mxu1 %vm872_vm1, %v183_v34  ;;  %22982 = vmatprep.subr.bf16.mxu0 %v22981_v15  ;;  %v22985_v59 = vpack.c.bf16 %v25888_v11, %v25896_v6  ;;  %v28693_v34 = vld [vmem:[#allocation41_spill] sm:$0xff]  ;;  %v9225_v1 = vpop.f32.mrb[123].mxu0  ;;  %v9300_v16 = vpop.f32.mrb[123].mxu1  ;;  %v187_v12 = vld [vmem:[#allocation4 + $0x450] sm:$0xff]  ;;  %v28694_v57 = vld [vmem:[#allocation27_spill] sm:$0xff] }
 0x3b0   :  { %v9692_v53 = vsub.f32 %v9660_v61, %v28692_v14  ;;  %v22989_v30 = vpack.c.bf16 %v25912_v24, %v25920_v54  ;;  %v22993_v39 = vpack.c.bf16 %v25915_v47, %v25923_v23  ;;  %v25938_v9 = vmul.f32 %v25641_v35, %v9690_v21  ;;  %v28697_v0 = vld [vmem:[#allocation34_spill] sm:$0xff]  ;;  %v188_v14 = vld [vmem:[#allocation4 + $0x458] sm:$0xff] }
 0x3b1   :  { %v9689_v43 = vsub.f32 %v9657_v46, %v25651_v26  ;;  %v9691_v36 = vsub.f32 %v9659_v5, %v28693_v34  ;;  %21784 = vmatmul.mubr.msk.f32.vlgmr.msra.gmra.mrb[146].mxu0 %vm872_vm1, %v182_v51  ;;  %21791 = vmatmul.mubr.msk.f32.vlgmr.msra.gmra.mrb[146].mxu1 %vm872_vm1, %v184_v19  ;;  %v9662_v35 = vsub.f32 %v21617_v55, %v28695_v44  ;;  %v186_v26 = vld [vmem:[#allocation4 + $0x448] sm:$0xff]  ;;  %v28698_v51 = vld [vmem:[#allocation40_spill] sm:$0xff]  ;;  %v21631_v55 = vpop.f32.mrb[124].mxu0 }
 0x3b2   :  { %v25945_v31 = vmul.f32 %v28694_v57, %v9692_v53  ;;  %22986 = vmatprep.subr.bf16.mxu1 %v22985_v59  ;;  %22984 = vmatpush3.bf16.msra.mxu0 %v22981_v15  ;;  %v9664_v61 = vsub.f32 %v21624_v41, %v28696_v32  ;;  %v9661_v19 = vsub.f32 %v9225_v1, %v25457_v7  ;;  %v28699_v53 = vld [vmem:[#allocation64_spill] sm:$0xff]  ;;  %v28700_v15 = vld [vmem:[#allocation66_spill] sm:$0xff]  ;;  %v21638_v41 = vpop.f32.mrb[124].mxu1  ;;  %v28702_v7 = vld [vmem:[#allocation69_spill] sm:$0xff] }
 0x3b3   :  { %v25950_v21 = vmul.f32 %v28697_v0, %v9689_v43  ;;  %v25953_v46 = vmul.f32 %v28698_v51, %v9691_v36  ;;  %22988 = vmatpush3.bf16.msra.mxu1 %v22985_v59  ;;  %v9663_v5 = vsub.f32 %v9300_v16, %v25461_v37  ;;  %v9694_v34 = vsub.f32 %v9662_v35, %v28699_v53  ;;  %v28701_v43 = vld [vmem:[#allocation53_spill] sm:$0xff]  ;;  %v9375_v16 = vpop.f32.mrb[125].mxu0  ;;  %v9450_v44 = vpop.f32.mrb[125].mxu1  ;;  %v191_v35 = vld [vmem:[#allocation4 + $0x470] sm:$0xff]  ;;  %v28706_v51 = vld [vmem:[#allocation68_spill] sm:$0xff] }
 0x3b4   :  { %v9696_v57 = vsub.f32 %v9664_v61, %v28700_v15  ;;  %21797 = vmatprep.mubr.msk.f32.mxu0 %vm872_vm1, %v185_v25  ;;  %21804 = vmatprep.mubr.msk.f32.mxu1 %vm872_vm1, %v187_v12  ;;  %v25963_v36 = vadd.f32 %v25838_v48, %v28701_v43  ;;  %v9693_v59 = vsub.f32 %v9661_v19, %v25695_v29  ;;  %v189_v25 = vld [vmem:[#allocation4 + $0x460] sm:$0xff]  ;;  %v28703_v12 = vld [vmem:[#allocation65_spill] sm:$0xff]  ;;  %v28704_v61 = vld [vmem:[#allocation67_spill] sm:$0xff] }
 0x3b5   :  { %v9695_v1 = vsub.f32 %v9663_v5, %v28702_v7  ;;  %21798 = vmatmul.mubr.msk.f32.vlgmr.msra.gmra.mrb[148].mxu0 %vm872_vm1, %v186_v26  ;;  %22990 = vmatprep.subr.bf16.mxu0 %v22989_v30  ;;  %v9666_v37 = vsub.f32 %v21631_v55, %v25463_v63  ;;  %v25970_v32 = vmul.f32 %v28703_v12, %v9694_v34  ;;  %v28705_v29 = vld [vmem:[#allocation16_spill] sm:$0xff]  ;;  %v28707_v19 = vld [vmem:[#allocation70_spill] sm:$0xff]  ;;  %v28708_v5 = vld [vmem:[#allocation75_spill] sm:$0xff] }
 0x3b6   :  { %v25973_v0 = vmul.f32 %v28704_v61, %v9696_v57  ;;  %21805 = vmatmul.mubr.msk.f32.vlgmr.msra.gmra.mrb[148].mxu1 %vm872_vm1, %v188_v14  ;;  %22994 = vmatprep.subr.bf16.mxu1 %v22993_v39  ;;  %v9668_v48 = vsub.f32 %v21638_v41, %v28705_v29  ;;  %v25978_v26 = vmul.f32 %v28706_v51, %v9693_v59  ;;  %v190_v34 = vld [vmem:[#allocation4 + $0x468] sm:$0xff]  ;;  %v192_v15 = vld [vmem:[#allocation4 + $0x478] sm:$0xff]  ;;  %v28709_v55 = vld [vmem:[#allocation76_spill] sm:$0xff]  ;;  %v21645_v41 = vpop.f32.mrb[126].mxu0  ;;  %v21652_v59 = vpop.f32.mrb[126].mxu1 }
 0x3b7   :  { %v25981_v63 = vmul.f32 %v28707_v19, %v9695_v1  ;;  %22992 = vmatpush3.bf16.msra.mxu0 %v22989_v30  ;;  %22996 = vmatpush3.bf16.msra.mxu1 %v22993_v39  ;;  %v9698_v53 = vsub.f32 %v9666_v37, %v28708_v5  ;;  %v9665_v43 = vsub.f32 %v9375_v16, %v25467_v52  ;;  %v9525_v52 = vpop.f32.mrb[127].mxu0  ;;  %v9600_v37 = vpop.f32.mrb[127].mxu1  ;;  %v195_v61 = vld [vmem:[#allocation4 + $0x490] sm:$0xff]  ;;  %v28715_v5 = vld [vmem:[#allocation79_spill] sm:$0xff] }
 0x3b8   :  { %v9700_v57 = vsub.f32 %v9668_v48, %v28709_v55  ;;  %v9667_v14 = vsub.f32 %v9450_v44, %v25469_v4  ;;  %21811 = vmatprep.mubr.msk.f32.mxu0 %vm872_vm1, %v189_v25  ;;  %21818 = vmatprep.mubr.msk.f32.mxu1 %vm872_vm1, %v191_v35  ;;  %v22997_v30 = vpack.c.bf16 %v25938_v9, %v25950_v21  ;;  %v28710_v4 = vld [vmem:[#allocation77_spill] sm:$0xff]  ;;  %v28711_v44 = vld [vmem:[#allocation78_spill] sm:$0xff]  ;;  %v28712_v35 = vld [vmem:[#allocation80_spill] sm:$0xff] }
 0x3b9   :  { %v25990_v7 = vmul.f32 %v25728_v60, %v9698_v53  ;;  %v23001_v39 = vpack.c.bf16 %v25945_v31, %v25953_v46  ;;  %v9670_v1 = vsub.f32 %v21645_v41, %v25471_v42  ;;  %v9697_v25 = vsub.f32 %v9665_v43, %v28711_v44  ;;  %v193_v60 = vld [vmem:[#allocation4 + $0x480] sm:$0xff]  ;;  %v28713_v29 = vld [vmem:[#allocation86_spill] sm:$0xff]  ;;  %v28716_v55 = vld [vmem:[#allocation81_spill] sm:$0xff] }
 0x3ba   :  { %v25998_v16 = vmul.f32 %v28710_v4, %v9700_v57  ;;  %v9699_v12 = vsub.f32 %v9667_v14, %v28712_v35  ;;  %21812 = vmatmul.mubr.msk.f32.vlgmr.msra.gmra.mrb[150].mxu0 %vm872_vm1, %v190_v34  ;;  %21819 = vmatmul.mubr.msk.f32.vlgmr.msra.gmra.mrb[150].mxu1 %vm872_vm1, %v192_v15  ;;  %v28714_v42 = vld [vmem:[#allocation18_spill] sm:$0xff]  ;;  %v9669_v19 = vsub.f32 %v9525_v52, %v25475_v10  ;;  %v194_v15 = vld [vmem:[#allocation4 + $0x488] sm:$0xff]  ;;  %v196_v43 = vld [vmem:[#allocation4 + $0x498] sm:$0xff] }
 0x3bb   :  { %22998 = vmatprep.subr.bf16.mxu0 %v22997_v30  ;;  %23002 = vmatprep.subr.bf16.mxu1 %v23001_v39  ;;  %v9702_v48 = vsub.f32 %v9670_v1, %v28713_v29  ;;  %v9672_v51 = vsub.f32 %v21652_v59, %v28714_v42  ;;  %v26008_v53 = vmul.f32 %v28715_v5, %v9697_v25  ;;  %v28717_v41 = vld [vmem:[#allocation87_spill] sm:$0xff]  ;;  %v28718_v10 = vld [vmem:[#allocation88_spill] sm:$0xff]  ;;  %v199_v4 = vld [vmem:[#allocation4 + $0x4b0] sm:$0xff] }
 0x3bc   :  { %v26011_v57 = vmul.f32 %v28716_v55, %v9699_v12  ;;  %23000 = vmatpush3.bf16.msra.mxu0 %v22997_v30  ;;  %23004 = vmatpush3.bf16.msra.mxu1 %v23001_v39  ;;  %v9671_v34 = vsub.f32 %v9600_v37, %v25477_v27  ;;  %v9701_v59 = vsub.f32 %v9669_v19, %v25783_v8  ;;  %v197_v37 = vld [vmem:[#allocation4 + $0x4a0] sm:$0xff]  ;;  %v198_v12 = vld [vmem:[#allocation4 + $0x4a8] sm:$0xff] }
 0x3bd   :  { %v26015_v14 = vmul.f32 %v25772_v17, %v9702_v48  ;;  %v9704_v1 = vsub.f32 %v9672_v51, %v28717_v41  ;;  %21825 = vmatprep.mubr.msk.f32.mxu0 %vm872_vm1, %v193_v60  ;;  %21832 = vmatprep.mubr.msk.f32.mxu1 %vm872_vm1, %v195_v61  ;;  %v23005_v30 = vpack.c.bf16 %v25970_v32, %v25978_v26  ;;  %v200_v60 = vld [vmem:[#allocation4 + $0x4b8] sm:$0xff]  ;;  %v28720_v29 = vld [vmem:[#allocation52_spill] sm:$0xff]  ;;  %v28723_v51 = vld [vmem:[#allocation57_spill] sm:$0xff] }
 0x3be   :  { %v9703_v52 = vsub.f32 %v9671_v34, %v28718_v10  ;;  %v23009_v27 = vpack.c.bf16 %v25973_v0, %v25981_v63  ;;  %v23013_v17 = vpack.c.bf16 %v25990_v7, %v26008_v53  ;;  %v26032_v8 = vmul.f32 %v25785_v40, %v9701_v59  ;;  %v28719_v40 = vld [vmem:[#allocation54_spill] sm:$0xff]  ;;  %v28721_v48 = vld [vmem:[#allocation19_spill] sm:$0xff]  ;;  %v201_v5 = vld [vmem:[#allocation4 + $0x4c0] sm:$0xff] }
 0x3bf   :  { %v26029_v39 = vmul.f32 %v25776_v33, %v9704_v1  ;;  %21826 = vmatmul.mubr.msk.f32.vlgmr.msra.gmra.mrb[152].mxu0 %vm872_vm1, %v194_v15  ;;  %21833 = vmatmul.mubr.msk.f32.vlgmr.msra.gmra.mrb[152].mxu1 %vm872_vm1, %v196_v43  ;;  %v23017_v44 = vpack.c.bf16 %v25998_v16, %v26011_v57  ;;  %v26043_v33 = vpack.c.bf16 %v25850_v2, %v25963_v36  ;;  %v28722_v2 = vld [vmem:[#allocation49_spill] sm:$0xff]  ;;  %v28724_v34 = vld [vmem:[#allocation55_spill] sm:$0xff]  ;;  %v28727_v1 = vld [vmem:[#allocation22_spill] sm:$0xff] }
 0x3c0   :  { %v26039_v25 = vmul.f32 %v25789_v58, %v9703_v52  ;;  %23006 = vmatprep.subr.bf16.mxu0 %v23005_v30  ;;  %23010 = vmatprep.subr.bf16.mxu1 %v23009_v27  ;;  %v12395_v35 = vadd.f32 %v25841_v3, %v28719_v40  ;;  %v23021_v61 = vpack.c.bf16 %v26015_v14, %v26032_v8  ;;  %v28725_v15 = vld [vmem:[#allocation23_spill] sm:$0xff]  ;;  %v202_v10 = vld [vmem:[#allocation4 + $0x4c8] sm:$0xff] }
 0x3c1   :  { %23008 = vmatpush3.bf16.msra.mxu0 %v23005_v30  ;;  %23012 = vmatpush3.bf16.msra.mxu1 %v23009_v27  ;;  %v12396_v58 = vadd.f32 %v25833_v45, %v28720_v29  ;;  %v12397_v42 = vadd.f32 %v25866_v62, %v28721_v48  ;;  %v12398_v36 = vadd.f32 %v25857_v50, %v28722_v2  ;;  %v203_v45 = vld [vmem:[#allocation4 + $0x4d0] sm:$0xff]  ;;  %v28726_v50 = vld [vmem:[#allocation21_spill] sm:$0xff]  ;;  %v204_v52 = vld [vmem:[#allocation4 + $0x4d8] sm:$0xff] }
 0x3c2   :  { %21839 = vmatprep.mubr.msk.f32.mxu0 %vm872_vm1, %v197_v37  ;;  %21846 = vmatprep.mubr.msk.f32.mxu1 %vm872_vm1, %v199_v4  ;;  %v23025_v3 = vpack.c.bf16 %v26029_v39, %v26039_v25  ;;  %v12399_v19 = vadd.f32 %v25869_v20, %v28723_v51  ;;  %v12400_v62 = vadd.f32 %v25860_v49, %v28724_v34  ;;  %v28728_v30 = vld [vmem:[#allocation29_spill] sm:$0xff]  ;;  %v28729_v27 = vld [vmem:[#allocation10_spill] sm:$0xff]  ;;  %v28730_v4 = vld [vmem:[#allocation35_spill] sm:$0xff] }
 0x3c3   :  { %23014 = vmatprep.subr.bf16.mxu0 %v23013_v17  ;;  %23018 = vmatprep.subr.bf16.mxu1 %v23017_v44  ;;  %v23033_v55 = vpack.c.bf16 %v12396_v58, %v12395_v35  ;;  %v12401_v43 = vadd.f32 %v25893_v38, %v28725_v15  ;;  %v26067_v41 = vpack.c.bf16 %v12398_v36, %v12397_v42  ;;  %v207_v29 = vld [vmem:[#allocation4 + $0x4f0] sm:$0xff]  ;;  %v28735_v48 = vld [vmem:[#allocation63_spill] sm:$0xff] }
 0x3c4   :  { %21840 = vmatmul.mubr.msk.f32.vlgmr.msra.gmra.mrb[154].mxu0 %vm872_vm1, %v198_v12  ;;  %21847 = vmatmul.mubr.msk.f32.vlgmr.msra.gmra.mrb[154].mxu1 %vm872_vm1, %v200_v60  ;;  %v12402_v20 = vadd.f32 %v25885_v28, %v28726_v50  ;;  %v12403_v59 = vadd.f32 %v25896_v6, %v28727_v1  ;;  %v26073_v49 = vpack.c.bf16 %v12400_v62, %v12399_v19  ;;  %v205_v60 = vld [vmem:[#allocation4 + $0x4e0] sm:$0xff]  ;;  %v28734_v58 = vld [vmem:[#allocation42_spill] sm:$0xff]  ;;  %v208_v2 = vld [vmem:[#allocation4 + $0x4f8] sm:$0xff] }
 0x3c5   :  { %23016 = vmatpush3.bf16.msra.mxu0 %v23013_v17  ;;  %23020 = vmatpush3.bf16.msra.mxu1 %v23017_v44  ;;  %v12404_v38 = vadd.f32 %v25888_v11, %v28728_v30  ;;  %v12405_v37 = vadd.f32 %v25920_v54, %v28729_v27  ;;  %v12406_v6 = vadd.f32 %v25912_v24, %v28730_v4  ;;  %v28731_v17 = vld [vmem:[#allocation39_spill] sm:$0xff]  ;;  %v28732_v11 = vld [vmem:[#allocation36_spill] sm:$0xff]  ;;  %v28733_v54 = vld [vmem:[#allocation62_spill] sm:$0xff] }
 0x3c6   :  { %21853 = vmatprep.mubr.msk.f32.mxu0 %vm872_vm1, %v201_v5  ;;  %21860 = vmatprep.mubr.msk.f32.mxu1 %vm872_vm1, %v203_v45  ;;  %v26081_v28 = vpack.c.bf16 %v12402_v20, %v12401_v43  ;;  %v12407_v44 = vadd.f32 %v25923_v23, %v28731_v17  ;;  %v12408_v35 = vadd.f32 %v25915_v47, %v28732_v11  ;;  %v206_v47 = vld [vmem:[#allocation4 + $0x4e8] sm:$0xff]  ;;  %v28741_v62 = vld [vmem:[#allocation84_spill] sm:$0xff]  ;;  %v212_v43 = vld [vmem:[#allocation4 + $0x510] sm:$0xff] }
 0x3c7   :  { %23022 = vmatprep.subr.bf16.mxu0 %v23021_v61  ;;  %23026 = vmatprep.subr.bf16.mxu1 %v23025_v3  ;;  %v26087_v40 = vpack.c.bf16 %v12404_v38, %v12403_v59  ;;  %v12409_v12 = vadd.f32 %v25950_v21, %v28733_v54  ;;  %v26095_v24 = vpack.c.bf16 %v12406_v6, %v12405_v37  ;;  %v28736_v21 = vld [vmem:[#allocation61_spill] sm:$0xff]  ;;  %v224_v37 = vld [vmem:[#allocation4 + $0x570] sm:$0xff]  ;;  %v225_v4 = vld [vmem:[#allocation4 + $0x578] sm:$0xff] }
 0x3c8   :  { %21854 = vmatmul.mubr.msk.f32.vlgmr.msra.gmra.mrb[156].mxu0 %vm872_vm1, %v202_v10  ;;  %21861 = vmatmul.mubr.msk.f32.vlgmr.msra.gmra.mrb[156].mxu1 %vm872_vm1, %v204_v52  ;;  %v12410_v23 = vadd.f32 %v25938_v9, %v28734_v58  ;;  %v12411_v42 = vadd.f32 %v25953_v46, %v28735_v48  ;;  %v26101_v36 = vpack.c.bf16 %v12408_v35, %v12407_v44  ;;  %v28737_v19 = vld [vmem:[#allocation73_spill] sm:$0xff]  ;;  %v28738_v9 = vld [vmem:[#allocation71_spill] sm:$0xff]  ;;  %v226_v6 = vld [vmem:[#allocation4 + $0x580] sm:$0xff] }
 0x3c9   :  { %23024 = vmatpush3.bf16.msra.mxu0 %v23021_v61  ;;  %23028 = vmatpush3.bf16.msra.mxu1 %v23025_v3  ;;  %v12412_v51 = vadd.f32 %v25945_v31, %v28736_v21  ;;  %v12413_v5 = vadd.f32 %v25978_v26, %v28737_v19  ;;  %v12414_v46 = vadd.f32 %v25970_v32, %v28738_v9  ;;  %v28739_v61 = vld [vmem:[#allocation74_spill] sm:$0xff]  ;;  %v28740_v31 = vld [vmem:[#allocation72_spill] sm:$0xff]  ;;  %v28743_v1 = vld [vmem:[#allocation85_spill] sm:$0xff] }
 0x3ca   :  { %23030 = vmatprep.subr.bf16.mxu0 %v26043_v33  ;;  %23034 = vmatprep.subr.bf16.mxu1 %v23033_v55  ;;  %v26108_v45 = vpack.c.bf16 %v12410_v23, %v12409_v12  ;;  %v12415_v3 = vadd.f32 %v25981_v63, %v28739_v61  ;;  %v12416_v26 = vadd.f32 %v25973_v0, %v28740_v31  ;;  %v210_v32 = vld [vmem:[#allocation4 + $0x500] sm:$0xff]  ;;  %v28742_v63 = vld [vmem:[#allocation82_spill] sm:$0xff]  ;;  %v211_v0 = vld [vmem:[#allocation4 + $0x508] sm:$0xff] }
 0x3cb   :  { %21867 = vmatprep.mubr.msk.f32.mxu0 %vm872_vm1, %v205_v60  ;;  %21874 = vmatprep.mubr.msk.f32.mxu1 %vm872_vm1, %v207_v29  ;;  %v26116_v34 = vpack.c.bf16 %v12412_v51, %v12411_v42  ;;  %v12417_v15 = vadd.f32 %v26008_v53, %v28741_v62  ;;  %v26124_v50 = vpack.c.bf16 %v12414_v46, %v12413_v5  ;;  %v213_v10 = vld [vmem:[#allocation4 + $0x518] sm:$0xff]  ;;  %v228_v17 = vld [vmem:[#allocation4 + $0x590] sm:$0xff]  ;;  %v227_v44 = vld [vmem:[#allocation4 + $0x588] sm:$0xff] }
 0x3cc   :  { %21868 = vmatmul.mubr.msk.f32.vlgmr.msra.gmra.mrb[158].mxu0 %vm872_vm1, %v206_v47  ;;  %21875 = vmatmul.mubr.msk.f32.vlgmr.msra.gmra.mrb[158].mxu1 %vm872_vm1, %v208_v2  ;;  %v12418_v20 = vadd.f32 %v25990_v7, %v28742_v63  ;;  %v12419_v59 = vadd.f32 %v26011_v57, %v28743_v1  ;;  %v26131_v53 = vpack.c.bf16 %v12416_v26, %v12415_v3  ;;  %v28744_v52 = vld [vmem:[#allocation83_spill] sm:$0xff]  ;;  %v230_v11 = vld [vmem:[#allocation4 + $0x5a0] sm:$0xff]  ;;  %v232_v35 = vld [vmem:[#allocation4 + $0x5b0] sm:$0xff] }
 0x3cd   :  { %23032 = vmatpush3.bf16.msra.mxu0 %v26043_v33  ;;  %23036 = vmatpush3.bf16.msra.mxu1 %v23033_v55  ;;  %v12420_v30 = vadd.f32 %v25998_v16, %v28744_v52  ;;  %v12421_v38 = vadd.f32 %v26032_v8, %v25809_v56  ;;  %v12422_v57 = vadd.f32 %v26015_v14, %v25800_v13  ;;  %v214_v8 = vld [vmem:[#allocation4 + $0x520] sm:$0xff]  ;;  %v216_v55 = vld [vmem:[#allocation4 + $0x530] sm:$0xff]  ;;  %v215_v13 = vld [vmem:[#allocation4 + $0x528] sm:$0xff] }
 0x3ce   :  { %23038 = vmatprep.subr.bf16.mxu0 %v26067_v41  ;;  %23042 = vmatprep.subr.bf16.mxu1 %v26073_v49  ;;  %v26139_v7 = vpack.c.bf16 %v12418_v20, %v12417_v15  ;;  %v12423_v33 = vadd.f32 %v26039_v25, %v25812_v22  ;;  %v12424_v56 = vadd.f32 %v26029_v39, %v25803_v18  ;;  %v217_v22 = vld [vmem:[#allocation4 + $0x538] sm:$0xff]  ;;  %v218_v18 = vld [vmem:[#allocation4 + $0x540] sm:$0xff]  ;;  %v220_v39 = vld [vmem:[#allocation4 + $0x550] sm:$0xff] }
 0x3cf   :  { %21881 = vmatprep.mubr.msk.f32.mxu0 %vm872_vm1, %v210_v32  ;;  %21888 = vmatprep.mubr.msk.f32.mxu1 %vm872_vm1, %v212_v43  ;;  %v26147_v16 = vpack.c.bf16 %v12420_v30, %v12419_v59  ;;  %v26153_v27 = vpack.c.bf16 %v12422_v57, %v12421_v38  ;;  %v219_v25 = vld [vmem:[#allocation4 + $0x548] sm:$0xff]  ;;  %v233_v12 = vld [vmem:[#allocation4 + $0x5b8] sm:$0xff]  ;;  %v234_v60 = vld [vmem:[#allocation4 + $0x5c0] sm:$0xff] }
 0x3d0   :  { %21882 = vmatmul.mubr.msk.f32.vlgmr.msra.gmra.mrb[160].mxu0 %vm872_vm1, %v211_v0  ;;  %21889 = vmatmul.mubr.msk.f32.vlgmr.msra.gmra.mrb[160].mxu1 %vm872_vm1, %v213_v10  ;;  %v26157_v14 = vpack.c.bf16 %v12424_v56, %v12423_v33  ;;  %v231_v54 = vld [vmem:[#allocation4 + $0x5a8] sm:$0xff]  ;;  %v236_v29 = vld [vmem:[#allocation4 + $0x5d0] sm:$0xff]  ;;  %v237_v58 = vld [vmem:[#allocation4 + $0x5d8] sm:$0xff] }
 0x3d1   :  { %23040 = vmatpush3.bf16.msra.mxu0 %v26067_v41  ;;  %23044 = vmatpush3.bf16.msra.mxu1 %v26073_v49  ;;  %v221_v41 = vld [vmem:[#allocation4 + $0x558] sm:$0xff]  ;;  %v222_v49 = vld [vmem:[#allocation4 + $0x560] sm:$0xff]  ;;  %v240_v48 = vld [vmem:[#allocation4 + $0x5f0] sm:$0xff] }
 0x3d2   :  { %23046 = vmatprep.subr.bf16.mxu0 %v26081_v28  ;;  %23050 = vmatprep.subr.bf16.mxu1 %v26087_v40  ;;  %v238_v23 = vld [vmem:[#allocation4 + $0x5e0] sm:$0xff]  ;;  %v239_v42 = vld [vmem:[#allocation4 + $0x5e8] sm:$0xff]  ;;  %v241_v47 = vld [vmem:[#allocation4 + $0x5f8] sm:$0xff] }
 0x3d3   :  { %21895 = vmatprep.mubr.msk.f32.mxu0 %vm872_vm1, %v214_v8  ;;  %21902 = vmatprep.mubr.msk.f32.mxu1 %vm872_vm1, %v216_v55  ;;  %v23433_v2 = vld [vmem:[#allocation4 + $0x300] sm:$0xff] }
 0x3d4   :  { %21896 = vmatmul.mubr.msk.f32.vlgmr.msra.gmra.mrb[162].mxu0 %vm872_vm1, %v215_v13  ;;  %21903 = vmatmul.mubr.msk.f32.vlgmr.msra.gmra.mrb[162].mxu1 %vm872_vm1, %v217_v22 }
 0x3d5   :  { %23048 = vmatpush3.bf16.msra.mxu0 %v26081_v28  ;;  %23052 = vmatpush3.bf16.msra.mxu1 %v26087_v40  ;;  %v223_v28 = vld [vmem:[#allocation4 + $0x568] sm:$0xff]  ;;  %v229_v40 = vld [vmem:[#allocation4 + $0x598] sm:$0xff] }
 0x3d6   :  { %23054 = vmatprep.subr.bf16.mxu0 %v26095_v24  ;;  %23058 = vmatprep.subr.bf16.mxu1 %v26101_v36 }
 0x3d7   :  { %21909 = vmatprep.mubr.msk.f32.mxu0 %vm872_vm1, %v218_v18  ;;  %21916 = vmatprep.mubr.msk.f32.mxu1 %vm872_vm1, %v220_v39 }
 0x3d8   :  { %21910 = vmatmul.mubr.msk.f32.vlgmr.msra.gmra.mrb[164].mxu0 %vm872_vm1, %v219_v25  ;;  %21917 = vmatmul.mubr.msk.f32.vlgmr.msra.gmra.mrb[164].mxu1 %vm872_vm1, %v221_v41 }
 0x3d9   :  { %23056 = vmatpush3.bf16.msra.mxu0 %v26095_v24  ;;  %23060 = vmatpush3.bf16.msra.mxu1 %v26101_v36  ;;  %v235_v24 = vld [vmem:[#allocation4 + $0x5c8] sm:$0xff]  ;;  %v23434_v36 = vld [vmem:[#allocation4 + $0x310] sm:$0xff] }
 0x3da   :  { %23062 = vmatprep.subr.bf16.mxu0 %v26108_v45  ;;  %23066 = vmatprep.subr.bf16.mxu1 %v26116_v34 }
 0x3db   :  { %21923 = vmatprep.mubr.msk.f32.mxu0 %vm872_vm1, %v222_v49  ;;  %21930 = vmatprep.mubr.msk.f32.mxu1 %vm872_vm1, %v224_v37 }
 0x3dc   :  { %21924 = vmatmul.mubr.msk.f32.vlgmr.msra.gmra.mrb[166].mxu0 %vm872_vm1, %v223_v28  ;;  %21931 = vmatmul.mubr.msk.f32.vlgmr.msra.gmra.mrb[166].mxu1 %vm872_vm1, %v225_v4 }
 0x3dd   :  { %23064 = vmatpush3.bf16.msra.mxu0 %v26108_v45  ;;  %23068 = vmatpush3.bf16.msra.mxu1 %v26116_v34 }
 0x3de   :  { %23070 = vmatprep.subr.bf16.mxu0 %v26124_v50  ;;  %23074 = vmatprep.subr.bf16.mxu1 %v26131_v53 }
 0x3df   :  { %21937 = vmatprep.mubr.msk.f32.mxu0 %vm872_vm1, %v226_v6  ;;  %21944 = vmatprep.mubr.msk.f32.mxu1 %vm872_vm1, %v228_v17 }
 0x3e0   :  { %21938 = vmatmul.mubr.msk.f32.vlgmr.msra.gmra.mrb[168].mxu0 %vm872_vm1, %v227_v44  ;;  %21945 = vmatmul.mubr.msk.f32.vlgmr.msra.gmra.mrb[168].mxu1 %vm872_vm1, %v229_v40 }
 0x3e1   :  { %23072 = vmatpush3.bf16.msra.mxu0 %v26124_v50  ;;  %23076 = vmatpush3.bf16.msra.mxu1 %v26131_v53 }
 0x3e2   :  { %23078 = vmatprep.subr.bf16.mxu0 %v26139_v7  ;;  %23082 = vmatprep.subr.bf16.mxu1 %v26147_v16 }
 0x3e3   :  { %21951 = vmatprep.mubr.msk.f32.mxu0 %vm872_vm1, %v230_v11  ;;  %21958 = vmatprep.mubr.msk.f32.mxu1 %vm872_vm1, %v232_v35 }
 0x3e4   :  { %21952 = vmatmul.mubr.msk.f32.vlgmr.msra.gmra.mrb[170].mxu0 %vm872_vm1, %v231_v54  ;;  %21959 = vmatmul.mubr.msk.f32.vlgmr.msra.gmra.mrb[170].mxu1 %vm872_vm1, %v233_v12 }
 0x3e5   :  { %23080 = vmatpush3.bf16.msra.mxu0 %v26139_v7  ;;  %23084 = vmatpush3.bf16.msra.mxu1 %v26147_v16 }
 0x3e6   :  { %23086 = vmatprep.subr.bf16.mxu0 %v26153_v27  ;;  %23090 = vmatprep.subr.bf16.mxu1 %v26157_v14 }
 0x3e7   :  { %21965 = vmatprep.mubr.msk.f32.mxu0 %vm872_vm1, %v234_v60  ;;  %21972 = vmatprep.mubr.msk.f32.mxu1 %vm872_vm1, %v236_v29 }
 0x3e8   :  { %21966 = vmatmul.mubr.msk.f32.vlgmr.msra.gmra.mrb[172].mxu0 %vm872_vm1, %v235_v24  ;;  %21973 = vmatmul.mubr.msk.f32.vlgmr.msra.gmra.mrb[172].mxu1 %vm872_vm1, %v237_v58  ;;  %v28759_v58 = vld [vmem:[#allocation20_spill] sm:$0xff] }
 0x3e9   :  { %23088 = vmatpush3.bf16.msra.mxu0 %v26153_v27  ;;  %23092 = vmatpush3.bf16.msra.mxu1 %v26157_v14 }
 0x3ea   :  { %21979 = vmatprep.mubr.msk.f32.mxu0 %vm872_vm1, %v238_v23  ;;  %21986 = vmatprep.mubr.msk.f32.mxu1 %vm872_vm1, %v240_v48 }
 0x3ec   :  { %21980 = vmatmul.mubr.msk.f32.vlgmr.msra.gmra.mrb[174].mxu0 %vm872_vm1, %v239_v42  ;;  %21987 = vmatmul.mubr.msk.f32.vlgmr.msra.gmra.mrb[174].mxu1 %vm872_vm1, %v241_v47 }
 0x3ed   :  { %21993 = vmatprep.mubr.msk.f32.mxu0 %vm872_vm1, %v23433_v2  ;;  %22000 = vmatprep.mubr.msk.f32.mxu1 %vm872_vm1, %v23434_v36 }
 0x454   :  { %v26213_v21 = vpop.f32.mrb[128].mxu0 }
 0x455   :  { %v26217_v19 = vpop.f32.mrb[129].mxu0 }
 0x456   :  { %v26215_v51 = vpop.f32.mrb[128].mxu1 }
 0x457   :  { %v26219_v5 = vpop.f32.mrb[129].mxu1 }
 0x45b   :  { %v26221_v45 = vpop.f32.mrb[130].mxu0 }
 0x45c   :  { %v26223_v9 = vpop.f32.mrb[130].mxu1  ;;  %v26225_v46 = vpop.f32.mrb[131].mxu0 }
 0x45d   :  { %v26227_v61 = vpop.f32.mrb[131].mxu1 }
 0x462   :  { %v26229_v3 = vpop.f32.mrb[132].mxu0  ;;  %v26231_v34 = vpop.f32.mrb[132].mxu1 }
 0x463   :  { %28745 = vst [vmem:[#allocation37_spill] sm:$0xff] %v26231_v34  ;;  %v26233_v31 = vpop.f32.mrb[133].mxu0  ;;  %v26235_v26 = vpop.f32.mrb[133].mxu1 }
 0x464   :  { %28746 = vst [vmem:[#allocation25_spill] sm:$0xff] %v26233_v31  ;;  %28747 = vst [vmem:[#allocation45_spill] sm:$0xff] %v26235_v26 }
 0x467   :  { %v26237_v62 = vpop.f32.mrb[134].mxu0  ;;  %v26239_v15 = vpop.f32.mrb[134].mxu1 }
 0x468   :  { %28748 = vst [vmem:[#allocation13_spill] sm:$0xff] %v26237_v62  ;;  %28749 = vst [vmem:[#allocation30_spill] sm:$0xff] %v26239_v15  ;;  %v26241_v32 = vpop.f32.mrb[135].mxu0  ;;  %v26243_v43 = vpop.f32.mrb[135].mxu1 }
 0x46b   :  { %v26245_v50 = vpop.f32.mrb[136].mxu0 }
 0x46c   :  { %v26247_v63 = vpop.f32.mrb[136].mxu1  ;;  %v26249_v20 = vpop.f32.mrb[137].mxu0 }
 0x46d   :  { %v26251_v1 = vpop.f32.mrb[137].mxu1 }
 0x46f   :  { %v26253_v59 = vpop.f32.mrb[138].mxu0 }
 0x470   :  { %28750 = vst [vmem:[#allocation43_spill] sm:$0xff] %v26253_v59  ;;  %v26255_v0 = vpop.f32.mrb[138].mxu1  ;;  %v26257_v10 = vpop.f32.mrb[139].mxu0 }
 0x471   :  { %28751 = vst [vmem:[#allocation14_spill] sm:$0xff] %v26255_v0  ;;  %v26259_v53 = vpop.f32.mrb[139].mxu1 }
 0x475   :  { %v26261_v52 = vpop.f32.mrb[140].mxu0 }
 0x476   :  { %v26263_v30 = vpop.f32.mrb[140].mxu1  ;;  %v26265_v38 = vpop.f32.mrb[141].mxu0 }
 0x477   :  { %28752 = vst [vmem:[#allocation58_spill] sm:$0xff] %v26265_v38  ;;  %v26267_v7 = vpop.f32.mrb[141].mxu1 }
 0x478   :  { %28753 = vst [vmem:[#allocation31_spill] sm:$0xff] %v26267_v7 }
 0x479   :  { %v26269_v57 = vpop.f32.mrb[142].mxu0 }
 0x47a   :  { %28754 = vst [vmem:[#allocation44_spill] sm:$0xff] %v26269_v57  ;;  %v26271_v33 = vpop.f32.mrb[142].mxu1  ;;  %v26273_v16 = vpop.f32.mrb[143].mxu0 }
 0x47b   :  { %28755 = vst [vmem:[#allocation56_spill] sm:$0xff] %v26271_v33  ;;  %28756 = vst [vmem:[#allocation26_spill] sm:$0xff] %v26273_v16  ;;  %v26275_v56 = vpop.f32.mrb[143].mxu1 }
 0x47c   :  { %28757 = vst [vmem:[#allocation38_spill] sm:$0xff] %v26275_v56 }
 0x47e   :  { %v26277_v8 = vpop.f32.mrb[144].mxu0 }
 0x47f   :  { %v13722_v55 = vsub.f32 %v26213_v21, %v26277_v8  ;;  %v26281_v27 = vpop.f32.mrb[145].mxu0 }
 0x480   :  { %v26283_v13 = vpop.f32.mrb[144].mxu1  ;;  %v13721_v22 = vsub.f32 %v26217_v19, %v26281_v27 }
 0x481   :  { %v13724_v14 = vsub.f32 %v26215_v51, %v26283_v13  ;;  %v26289_v18 = vpop.f32.mrb[145].mxu1 }
 0x482   :  { %v13723_v39 = vsub.f32 %v26219_v5, %v26289_v18 }
 0x484   :  { %v26293_v25 = vpop.f32.mrb[146].mxu0  ;;  %v26295_v41 = vpop.f32.mrb[146].mxu1 }
 0x485   :  { %v13726_v49 = vsub.f32 %v26221_v45, %v26293_v25  ;;  %v13728_v37 = vsub.f32 %v26223_v9, %v26295_v41  ;;  %v26301_v28 = vpop.f32.mrb[147].mxu0  ;;  %v26303_v4 = vpop.f32.mrb[147].mxu1 }
 0x486   :  { %v13725_v6 = vsub.f32 %v26225_v46, %v26301_v28  ;;  %v13727_v17 = vsub.f32 %v26227_v61, %v26303_v4 }
 0x487   :  { %v14089_v44 = vcombine.low %v13722_v55, %v13726_v49  ;;  %v14090_v40 = vcombine.high %v13722_v55, %v13726_v49  ;;  %v14105_v11 = vcombine.low %v13724_v14, %v13728_v37  ;;  %v14106_v35 = vcombine.high %v13724_v14, %v13728_v37 }
 0x488   :  { %v13817_v54 = vcombine.low %v13721_v22, %v13725_v6  ;;  %v13818_v12 = vcombine.high %v13721_v22, %v13725_v6  ;;  %v13833_v60 = vcombine.low %v13723_v39, %v13727_v17  ;;  %v13834_v29 = vcombine.high %v13723_v39, %v13727_v17  ;;  %v26309_v24 = vpop.f32.mrb[148].mxu0 }
 0x489   :  { %28758 = vst [vmem:[#allocation46_spill] sm:$0xff] %v26309_v24  ;;  %v26312_v23 = vrot.slane %v14089_v44, %v28759_v58  ;;  %v26315_v48 = vrot.slane %v14090_v40, %v28759_v58  ;;  %v26318_v42 = vrot.slane %v14105_v11, %v28759_v58  ;;  %v26321_v47 = vrot.slane %v14106_v35, %v28759_v58  ;;  %v26323_v2 = vpop.f32.mrb[148].mxu1  ;;  %v26325_v36 = vpop.f32.mrb[149].mxu0  ;;  %v28771_v44 = vld [vmem:[#allocation24_spill] sm:$0xff] }
 0x48a   :  { %28764 = vst [vmem:[#allocation8_spill] sm:$0xff] %v26323_v2  ;;  %28765 = vst [vmem:[#allocation59_spill] sm:$0xff] %v26325_v36  ;;  %v13825_v55 = vrot.slane %v13817_v54, %v28759_v58  ;;  %v13832_v22 = vrot.slane %v13818_v12, %v28759_v58  ;;  %v13841_v14 = vrot.slane %v13833_v60, %v28759_v58  ;;  %v26331_v49 = vpop.f32.mrb[149].mxu1 }
 0x48b   :  { %28760 = vst [vmem:[#allocation47_spill] sm:$0xff] %v26312_v23  ;;  %28761 = vst [vmem:[#allocation50_spill] sm:$0xff] %v26315_v48  ;;  %v13848_v39 = vrot.slane %v13834_v29, %v28759_v58  ;;  %v13730_v12 = vsub.f32 %v26229_v3, %v26309_v24  ;;  %v13732_v60 = vsub.f32 %v26231_v34, %v26323_v2 }
 0x48c   :  { %28762 = vst [vmem:[#allocation60_spill] sm:$0xff] %v26318_v42  ;;  %28763 = vst [vmem:[#allocation28_spill] sm:$0xff] %v26321_v47  ;;  %v13881_v40 = vcombine.low %v13825_v55, %v13841_v14  ;;  %v13882_v11 = vcombine.high %v13825_v55, %v13841_v14  ;;  %v13729_v29 = vsub.f32 %v26233_v31, %v26325_v36 }
 0x48d   :  { %28766 = vst [vmem:[#allocation9_spill] sm:$0xff] %v26331_v49  ;;  %v13897_v35 = vcombine.low %v13832_v22, %v13848_v39  ;;  %v13898_v54 = vcombine.high %v13832_v22, %v13848_v39  ;;  %v13731_v6 = vsub.f32 %v26235_v26, %v26331_v49  ;;  %v26349_v17 = vpop.f32.mrb[150].mxu0  ;;  %v26351_v37 = vpop.f32.mrb[150].mxu1 }
 0x48e   :  { %28767 = vst [vmem:[#allocation48_spill] sm:$0xff] %v26349_v17  ;;  %28768 = vst [vmem:[#allocation32_spill] sm:$0xff] %v26351_v37  ;;  %v13734_v55 = vsub.f32 %v26237_v62, %v26349_v17  ;;  %v13736_v22 = vsub.f32 %v26239_v15, %v26351_v37  ;;  %v26357_v14 = vpop.f32.mrb[151].mxu0  ;;  %v26359_v39 = vpop.f32.mrb[151].mxu1  ;;  %v13889_v47 = vrot.slane %v13881_v40, %v28771_v44 }
 0x48f   :  { %28769 = vst [vmem:[#allocation33_spill] sm:$0xff] %v26357_v14  ;;  %28770 = vst [vmem:[#allocation15_spill] sm:$0xff] %v26359_v39  ;;  %v26363_v48 = vrot.slane %v13882_v11, %v28771_v44  ;;  %v13733_v49 = vsub.f32 %v26241_v32, %v26357_v14  ;;  %v13735_v36 = vsub.f32 %v26243_v43, %v26359_v39 }
 0x490   :  { %v26370_v17 = vrot.slane %v13897_v35, %v28771_v44  ;;  %v26373_v37 = vrot.slane %v13898_v54, %v28771_v44  ;;  %v14121_v15 = vcombine.low %v13730_v12, %v13734_v55  ;;  %v14122_v62 = vcombine.high %v13730_v12, %v13734_v55 }
 0x491   :  { %v14137_v2 = vcombine.low %v13732_v60, %v13736_v22  ;;  %v14138_v24 = vcombine.high %v13732_v60, %v13736_v22  ;;  %v13849_v40 = vcombine.low %v13729_v29, %v13733_v49  ;;  %v13850_v26 = vcombine.high %v13729_v29, %v13733_v49 }
 0x492   :  { %28772 = vst [vmem:[#allocation11_spill] sm:$0xff] %v26370_v17  ;;  %28773 = vst [vmem:[#allocation12_spill] sm:$0xff] %v26373_v37  ;;  %v13865_v11 = vcombine.low %v13731_v6, %v13735_v36  ;;  %v13866_v31 = vcombine.high %v13731_v6, %v13735_v36  ;;  %v26376_v34 = vrot.slane %v14121_v15, %v28759_v58  ;;  %v26387_v37 = vpop.f32.mrb[152].mxu0  ;;  %v26389_v12 = vpop.f32.mrb[152].mxu1 }
 0x493   :  { %v26379_v14 = vrot.slane %v14122_v62, %v28759_v58  ;;  %v26382_v35 = vrot.slane %v14137_v2, %v28759_v58  ;;  %v26385_v54 = vrot.slane %v14138_v24, %v28759_v58  ;;  %v13857_v49 = vrot.slane %v13849_v40, %v28759_v58  ;;  %v26395_v62 = vpop.f32.mrb[153].mxu0  ;;  %v26397_v60 = vpop.f32.mrb[153].mxu1 }
 0x494   :  { %28774 = vst [vmem:[#allocation41_spill] sm:$0xff] %v26376_v34  ;;  %v13864_v36 = vrot.slane %v13850_v26, %v28759_v58  ;;  %v13873_v15 = vrot.slane %v13865_v11, %v28759_v58  ;;  %v13880_v6 = vrot.slane %v13866_v31, %v28759_v58  ;;  %28778 = vst [vmem:[#allocation34_spill] sm:$0xff] %v26397_v60 }
 0x495   :  { %28775 = vst [vmem:[#allocation27_spill] sm:$0xff] %v26379_v14  ;;  %28776 = vst [vmem:[#allocation51_spill] sm:$0xff] %v26382_v35  ;;  %v14185_v24 = vcombine.low %v26376_v34, %v26382_v35  ;;  %v13738_v11 = vsub.f32 %v26245_v50, %v26387_v37  ;;  %v13740_v17 = vsub.f32 %v26247_v63, %v26389_v12 }
 0x496   :  { %28777 = vst [vmem:[#allocation17_spill] sm:$0xff] %v26385_v54  ;;  %v13913_v55 = vcombine.low %v13857_v49, %v13873_v15  ;;  %v13914_v22 = vcombine.high %v13857_v49, %v13873_v15  ;;  %v13929_v40 = vcombine.low %v13864_v36, %v13880_v6  ;;  %v13930_v31 = vcombine.high %v13864_v36, %v13880_v6 }
 0x497   :  { %v13737_v39 = vsub.f32 %v26249_v20, %v26395_v62  ;;  %v13739_v2 = vsub.f32 %v26251_v1, %v26397_v60  ;;  %v26415_v29 = vpop.f32.mrb[154].mxu0  ;;  %v26417_v35 = vpop.f32.mrb[154].mxu1 }
 0x498   :  { %28779 = vst [vmem:[#allocation40_spill] sm:$0xff] %v26415_v29  ;;  %28780 = vst [vmem:[#allocation64_spill] sm:$0xff] %v26417_v35  ;;  %v13921_v49 = vrot.slane %v13913_v55, %v28771_v44  ;;  %v13928_v36 = vrot.slane %v13914_v22, %v28771_v44  ;;  %v26422_v15 = vrot.slane %v13929_v40, %v28771_v44  ;;  %v26431_v14 = vpop.f32.mrb[155].mxu0  ;;  %v26433_v34 = vpop.f32.mrb[155].mxu1 }
 0x499   :  { %v26425_v6 = vrot.slane %v13930_v31, %v28771_v44  ;;  %v13742_v26 = vsub.f32 %v26253_v59, %v26415_v29  ;;  %v13744_v54 = vsub.f32 %v26255_v0, %v26417_v35  ;;  %28783 = vst [vmem:[#allocation69_spill] sm:$0xff] %v26431_v14  ;;  %28784 = vst [vmem:[#allocation65_spill] sm:$0xff] %v26433_v34 }
 0x49a   :  { %28781 = vst [vmem:[#allocation66_spill] sm:$0xff] %v26422_v15  ;;  %v28785_v55 = vcombine.low %v26312_v23, %v26318_v42  ;;  %v26442_v40 = vrot.slane %v14185_v24, %v28771_v44  ;;  %v13741_v31 = vsub.f32 %v26257_v10, %v26431_v14  ;;  %v13743_v29 = vsub.f32 %v26259_v53, %v26433_v34 }
 0x49b   :  { %28782 = vst [vmem:[#allocation53_spill] sm:$0xff] %v26425_v6  ;;  %v26448_v35 = vcombine.low %v13889_v47, %v13921_v49  ;;  %v26450_v6 = vcombine.high %v13889_v47, %v13921_v49  ;;  %v14225_v0 = vcombine.low %v13738_v11, %v13742_v26  ;;  %v14226_v59 = vcombine.high %v13738_v11, %v13742_v26  ;;  %v26452_v24 = vpop.f32.mrb[156].mxu0 }
 0x49c   :  { %v26439_v22 = vrot.slane %v28785_v55, %v28771_v44  ;;  %28787 = vst [vmem:[#allocation16_spill] sm:$0xff] %v26442_v40  ;;  %v14241_v15 = vcombine.low %v13740_v17, %v13744_v54  ;;  %v14242_v60 = vcombine.high %v13740_v17, %v13744_v54  ;;  %v13953_v42 = vcombine.low %v13737_v39, %v13741_v31  ;;  %v26454_v40 = vpop.f32.mrb[156].mxu1  ;;  %v26468_v17 = vpop.f32.mrb[157].mxu0 }
 0x49d   :  { %28788 = vst [vmem:[#allocation68_spill] sm:$0xff] %v26450_v6  ;;  %v13954_v55 = vcombine.high %v13737_v39, %v13741_v31  ;;  %v13969_v23 = vcombine.low %v13739_v2, %v13743_v29  ;;  %28789 = vst [vmem:[#allocation70_spill] sm:$0xff] %v26452_v24  ;;  %v26457_v14 = vrot.slane %v14225_v0, %v28759_v58  ;;  %v26470_v39 = vpop.f32.mrb[157].mxu1 }
 0x49e   :  { %28786 = vst [vmem:[#allocation67_spill] sm:$0xff] %v26439_v22  ;;  %v13970_v22 = vcombine.high %v13739_v2, %v13743_v29  ;;  %28790 = vst [vmem:[#allocation75_spill] sm:$0xff] %v26454_v40  ;;  %v26460_v34 = vrot.slane %v14226_v59, %v28759_v58  ;;  %v26463_v47 = vrot.slane %v14241_v15, %v28759_v58 }
 0x49f   :  { %28791 = vst [vmem:[#allocation76_spill] sm:$0xff] %v26457_v14  ;;  %v26466_v26 = vrot.slane %v14242_v60, %v28759_v58  ;;  %28795 = vst [vmem:[#allocation86_spill] sm:$0xff] %v26468_v17  ;;  %v13961_v54 = vrot.slane %v13953_v42, %v28759_v58  ;;  %v26474_v2 = vrot.slane %v13954_v55, %v28759_v58  ;;  %v26492_v31 = vpop.f32.mrb[158].mxu0  ;;  %v26494_v55 = vpop.f32.mrb[158].mxu1 }
 0x4a0   :  { %28792 = vst [vmem:[#allocation77_spill] sm:$0xff] %v26460_v34  ;;  %28793 = vst [vmem:[#allocation78_spill] sm:$0xff] %v26463_v47  ;;  %v13977_v0 = vrot.slane %v13969_v23, %v28759_v58  ;;  %v26478_v59 = vrot.slane %v13970_v22, %v28759_v58  ;;  %v13746_v60 = vsub.f32 %v26261_v52, %v26452_v24  ;;  %v26506_v29 = vpop.f32.mrb[159].mxu1 }
 0x4a1   :  { %28794 = vst [vmem:[#allocation80_spill] sm:$0xff] %v26466_v26  ;;  %28796 = vst [vmem:[#allocation18_spill] sm:$0xff] %v26470_v39  ;;  %v13748_v11 = vsub.f32 %v26263_v30, %v26454_v40  ;;  %v13745_v42 = vsub.f32 %v26265_v38, %v26468_v17  ;;  %v13750_v22 = vsub.f32 %v26269_v57, %v26492_v31 }
 0x4a2   :  { %v14017_v49 = vcombine.low %v13961_v54, %v13977_v0  ;;  %v14018_v15 = vcombine.high %v13961_v54, %v13977_v0  ;;  %28797 = vst [vmem:[#allocation79_spill] sm:$0xff] %v26492_v31  ;;  %28798 = vst [vmem:[#allocation81_spill] sm:$0xff] %v26494_v55  ;;  %v13747_v54 = vsub.f32 %v26267_v7, %v26470_v39  ;;  %v26504_v0 = vpop.f32.mrb[159].mxu0 }
 0x4a3   :  { %28799 = vst [vmem:[#allocation87_spill] sm:$0xff] %v26504_v0  ;;  %28800 = vst [vmem:[#allocation88_spill] sm:$0xff] %v26506_v29  ;;  %v13752_v23 = vsub.f32 %v26271_v33, %v26494_v55  ;;  %v13749_v26 = vsub.f32 %v26273_v16, %v26504_v0  ;;  %v13751_v34 = vsub.f32 %v26275_v56, %v26506_v29  ;;  %v21883_v0 = vpop.f32.mrb[160].mxu0  ;;  %v21890_v16 = vpop.f32.mrb[160].mxu1 }
 0x4a4   :  { %v26517_v47 = vrot.slane %v14017_v49, %v28771_v44  ;;  %v26520_v14 = vcombine.low %v26363_v48, %v13928_v36  ;;  %v26523_v39 = vrot.slane %v14018_v15, %v28771_v44  ;;  %v26526_v31 = vcombine.high %v26363_v48, %v13928_v36  ;;  %v12497_v24 = vpop.f32.mrb[161].mxu0  ;;  %v12578_v7 = vpop.f32.mrb[161].mxu1 }
 0x4a5   :  { %v14257_v57 = vcombine.low %v13746_v60, %v13750_v22  ;;  %v14258_v55 = vcombine.high %v13746_v60, %v13750_v22  ;;  %v14273_v33 = vcombine.low %v13748_v11, %v13752_v23  ;;  %v14274_v17 = vcombine.high %v13748_v11, %v13752_v23 }
 0x4a6   :  { %28801 = vst [vmem:[#allocation54_spill] sm:$0xff] %v26520_v14  ;;  %28802 = vst [vmem:[#allocation52_spill] sm:$0xff] %v26526_v31  ;;  %v13985_v40 = vcombine.low %v13745_v42, %v13749_v26  ;;  %v13986_v29 = vcombine.high %v13745_v42, %v13749_v26  ;;  %v14001_v56 = vcombine.low %v13747_v54, %v13751_v34 }
 0x4a7   :  { %v14002_v49 = vcombine.high %v13747_v54, %v13751_v34  ;;  %v26529_v38 = vrot.slane %v14257_v57, %v28759_v58  ;;  %v26532_v15 = vrot.slane %v14258_v55, %v28759_v58  ;;  %v26535_v48 = vrot.slane %v14273_v33, %v28759_v58  ;;  %v21904_v42 = vpop.f32.mrb[162].mxu1 }
 0x4a8   :  { %v26538_v36 = vrot.slane %v14274_v17, %v28759_v58  ;;  %v26541_v60 = vrot.slane %v13985_v40, %v28759_v58  ;;  %v26544_v26 = vrot.slane %v13986_v29, %v28759_v58  ;;  %v26547_v34 = vrot.slane %v14001_v56, %v28759_v58  ;;  %v21897_v29 = vpop.f32.mrb[162].mxu0 }
 0x4a9   :  { %28803 = vst [vmem:[#allocation19_spill] sm:$0xff] %v26532_v15  ;;  %v26550_v57 = vrot.slane %v14002_v49, %v28759_v58  ;;  %v12659_v54 = vpop.f32.mrb[163].mxu0  ;;  %v12740_v49 = vpop.f32.mrb[163].mxu1  ;;  %v13754_v17 = vsub.f32 %v21883_v0, %v26213_v21  ;;  %v13756_v40 = vsub.f32 %v21890_v16, %v26215_v51  ;;  %v13753_v33 = vsub.f32 %v12497_v24, %v26217_v19  ;;  %v28805_v24 = vld [vmem:[#allocation37_spill] sm:$0xff] }
 0x4aa   :  { %28804 = vst [vmem:[#allocation49_spill] sm:$0xff] %v26538_v36  ;;  %v13755_v11 = vsub.f32 %v12578_v7, %v26219_v5  ;;  %v13758_v56 = vsub.f32 %v21897_v29, %v26221_v45  ;;  %v13760_v23 = vsub.f32 %v21904_v42, %v26223_v9  ;;  %v13757_v36 = vsub.f32 %v12659_v54, %v26225_v46  ;;  %v28806_v0 = vld [vmem:[#allocation25_spill] sm:$0xff] }
 0x4ab   :  { %v13759_v22 = vsub.f32 %v12740_v49, %v26227_v61  ;;  %v13786_v55 = vsub.f32 %v13754_v17, %v26277_v8  ;;  %v13788_v15 = vsub.f32 %v13756_v40, %v26283_v13  ;;  %v13785_v21 = vsub.f32 %v13753_v33, %v26281_v27  ;;  %v21911_v16 = vpop.f32.mrb[164].mxu0  ;;  %v21918_v19 = vpop.f32.mrb[164].mxu1  ;;  %v28807_v33 = vld [vmem:[#allocation45_spill] sm:$0xff] }
 0x4ac   :  { %v13787_v51 = vsub.f32 %v13755_v11, %v26289_v18  ;;  %v13790_v5 = vsub.f32 %v13758_v56, %v26293_v25  ;;  %v13792_v45 = vsub.f32 %v13760_v23, %v26295_v41  ;;  %v13789_v9 = vsub.f32 %v13757_v36, %v26301_v28  ;;  %v12821_v7 = vpop.f32.mrb[165].mxu0  ;;  %v12902_v61 = vpop.f32.mrb[165].mxu1 }
 0x4ad   :  { %v13791_v46 = vsub.f32 %v13759_v22, %v26303_v4  ;;  %v13762_v8 = vsub.f32 %v21911_v16, %v26229_v3  ;;  %v13764_v13 = vsub.f32 %v21918_v19, %v28805_v24  ;;  %v13761_v27 = vsub.f32 %v12821_v7, %v28806_v0  ;;  %v28813_v16 = vld [vmem:[#allocation30_spill] sm:$0xff] }
 0x4ae   :  { %v13763_v18 = vsub.f32 %v12902_v61, %v28807_v33  ;;  %v14633_v11 = vcombine.low %v13786_v55, %v13790_v5  ;;  %v14634_v17 = vcombine.high %v13786_v55, %v13790_v5  ;;  %v14649_v40 = vcombine.low %v13788_v15, %v13792_v45  ;;  %v28808_v33 = vld [vmem:[#allocation46_spill] sm:$0xff]  ;;  %v28812_v5 = vld [vmem:[#allocation13_spill] sm:$0xff] }
 0x4af   :  { %v14650_v25 = vcombine.high %v13788_v15, %v13792_v45  ;;  %v14361_v29 = vcombine.low %v13785_v21, %v13789_v9  ;;  %v14362_v41 = vcombine.high %v13785_v21, %v13789_v9  ;;  %v14377_v42 = vcombine.low %v13787_v51, %v13791_v46  ;;  %v21925_v36 = vpop.f32.mrb[166].mxu0  ;;  %v21932_v4 = vpop.f32.mrb[166].mxu1 }
 0x4b0   :  { %v14378_v28 = vcombine.high %v13787_v51, %v13791_v46  ;;  %v26589_v56 = vrot.slane %v14633_v11, %v28759_v58  ;;  %v26592_v3 = vrot.slane %v14634_v17, %v28759_v58  ;;  %v26595_v23 = vrot.slane %v14649_v40, %v28759_v58  ;;  %v12983_v55 = vpop.f32.mrb[167].mxu0  ;;  %v13064_v15 = vpop.f32.mrb[167].mxu1  ;;  %v28809_v17 = vld [vmem:[#allocation8_spill] sm:$0xff] }
 0x4b1   :  { %v26598_v22 = vrot.slane %v14650_v25, %v28759_v58  ;;  %v26601_v54 = vrot.slane %v14361_v29, %v28759_v58  ;;  %v26604_v49 = vrot.slane %v14362_v41, %v28759_v58  ;;  %v26607_v21 = vrot.slane %v14377_v42, %v28759_v58  ;;  %v28810_v25 = vld [vmem:[#allocation59_spill] sm:$0xff]  ;;  %v28811_v41 = vld [vmem:[#allocation9_spill] sm:$0xff] }
 0x4b2   :  { %v26610_v51 = vrot.slane %v14378_v28, %v28759_v58  ;;  %v13794_v11 = vsub.f32 %v13762_v8, %v28808_v33  ;;  %v13796_v40 = vsub.f32 %v13764_v13, %v28809_v17  ;;  %v13793_v29 = vsub.f32 %v13761_v27, %v28810_v25 }
 0x4b3   :  { %v21939_v24 = vpop.f32.mrb[168].mxu0  ;;  %v21946_v0 = vpop.f32.mrb[168].mxu1  ;;  %v13795_v42 = vsub.f32 %v13763_v18, %v28811_v41  ;;  %v13766_v19 = vsub.f32 %v21925_v36, %v28812_v5  ;;  %v13768_v7 = vsub.f32 %v21932_v4, %v28813_v16  ;;  %v28814_v61 = vcombine.low %v26541_v60, %v26547_v34  ;;  %v28816_v5 = vld [vmem:[#allocation48_spill] sm:$0xff] }
 0x4b4   :  { %v26632_v28 = vpop.f32.mrb[169].mxu0  ;;  %v26634_v45 = vpop.f32.mrb[169].mxu1  ;;  %v13765_v8 = vsub.f32 %v12983_v55, %v26241_v32  ;;  %v13767_v13 = vsub.f32 %v13064_v15, %v26243_v43  ;;  %v28815_v27 = vcombine.high %v26541_v60, %v26547_v34  ;;  %v13770_v33 = vsub.f32 %v21939_v24, %v26245_v50  ;;  %v28817_v16 = vld [vmem:[#allocation32_spill] sm:$0xff]  ;;  %v28820_v60 = vld [vmem:[#allocation33_spill] sm:$0xff]  ;;  %v28821_v15 = vld [vmem:[#allocation15_spill] sm:$0xff] }
 0x4b5   :  { %v14057_v46 = vrot.slane %v28814_v61, %v28771_v44  ;;  %v13772_v36 = vsub.f32 %v21946_v0, %v26247_v63  ;;  %v13798_v4 = vsub.f32 %v13766_v19, %v28816_v5  ;;  %v13800_v17 = vsub.f32 %v13768_v7, %v28817_v16 }
 0x4b6   :  { %v14064_v18 = vrot.slane %v28815_v27, %v28771_v44  ;;  %v13797_v34 = vsub.f32 %v13765_v8, %v28820_v60  ;;  %v13799_v50 = vsub.f32 %v13767_v13, %v28821_v15 }
 0x4b7   :  { %v26653_v25 = vcombine.low %v26517_v47, %v14057_v46  ;;  %v26656_v32 = vcombine.high %v26517_v47, %v14057_v46  ;;  %v26658_v43 = vpop.f32.mrb[170].mxu0  ;;  %v26660_v55 = vpop.f32.mrb[170].mxu1  ;;  %v14665_v47 = vcombine.low %v13794_v11, %v13798_v4  ;;  %v14666_v46 = vcombine.high %v13794_v11, %v13798_v4 }
 0x4b8   :  { %v26665_v63 = vcombine.low %v26523_v39, %v14064_v18  ;;  %v26668_v19 = vcombine.high %v26523_v39, %v14064_v18  ;;  %v26670_v7 = vpop.f32.mrb[171].mxu0  ;;  %v26672_v61 = vpop.f32.mrb[171].mxu1  ;;  %v14681_v24 = vcombine.low %v13796_v40, %v13800_v17  ;;  %v14682_v0 = vcombine.high %v13796_v40, %v13800_v17 }
 0x4b9   :  { %28818 = vst [vmem:[#allocation57_spill] sm:$0xff] %v26653_v25  ;;  %28819 = vst [vmem:[#allocation55_spill] sm:$0xff] %v26656_v32  ;;  %v23093_v41 = vpack.c.bf16 %v26653_v25, %v26448_v35  ;;  %v23097_v8 = vpack.c.bf16 %v26656_v32, %v26450_v6  ;;  %v14393_v13 = vcombine.low %v13793_v29, %v13797_v34  ;;  %v28837_v32 = vld [vmem:[#allocation65_spill] sm:$0xff]  ;;  %v23440_v25 = vld [vmem:[#allocation4 + $0x338] sm:$0xff] }
 0x4ba   :  { %28822 = vst [vmem:[#allocation23_spill] sm:$0xff] %v26665_v63  ;;  %28823 = vst [vmem:[#allocation21_spill] sm:$0xff] %v26668_v19  ;;  %v14394_v27 = vcombine.high %v13793_v29, %v13797_v34  ;;  %v26679_v5 = vrot.slane %v14665_v47, %v28759_v58  ;;  %v26682_v39 = vrot.slane %v14666_v46, %v28759_v58 }
 0x4bb   :  { %v26685_v18 = vrot.slane %v14681_v24, %v28759_v58  ;;  %v26688_v11 = vrot.slane %v14682_v0, %v28759_v58  ;;  %v26690_v40 = vpop.f32.mrb[172].mxu0  ;;  %v26692_v4 = vpop.f32.mrb[172].mxu1  ;;  %23094 = vmatprep.subr.bf16.mxu0 %v23093_v41  ;;  %23098 = vmatprep.subr.bf16.mxu1 %v23097_v8  ;;  %v26695_v29 = vrot.slane %v14393_v13, %v28759_v58  ;;  %v28825_v24 = vld [vmem:[#allocation66_spill] sm:$0xff] }
 0x4bc   :  { %v26698_v16 = vrot.slane %v14394_v27, %v28759_v58  ;;  %v14409_v17 = vcombine.low %v13795_v42, %v13799_v50  ;;  %v26700_v60 = vpop.f32.mrb[173].mxu0  ;;  %v26702_v34 = vpop.f32.mrb[173].mxu1  ;;  %23096 = vmatpush3.bf16.msra.mxu0 %v23093_v41  ;;  %v14410_v0 = vcombine.high %v13795_v42, %v13799_v50  ;;  %23100 = vmatpush3.bf16.msra.mxu1 %v23097_v8 }
 0x4bd   :  { %v23101_v27 = vpack.c.bf16 %v26665_v63, %v26520_v14  ;;  %v23105_v15 = vpack.c.bf16 %v26668_v19, %v26526_v31  ;;  %v26720_v47 = vsub.f32 %v13770_v33, %v26387_v37  ;;  %v26723_v46 = vsub.f32 %v13772_v36, %v26389_v12  ;;  %v23435_v36 = vld [vmem:[#allocation4 + $0x308] sm:$0xff]  ;;  %v28826_v37 = vld [vmem:[#allocation11_spill] sm:$0xff]  ;;  %v28830_v19 = vld [vmem:[#allocation14_spill] sm:$0xff] }
 0x4be   :  { %v26713_v13 = vrot.slane %v14409_v17, %v28759_v58  ;;  %v13769_v41 = vsub.f32 %v26632_v28, %v26249_v20  ;;  %v13771_v42 = vsub.f32 %v26634_v45, %v26251_v1  ;;  %v26734_v17 = vrot.slane %v14410_v0, %v28759_v58  ;;  %v28824_v45 = vld [vmem:[#allocation34_spill] sm:$0xff]  ;;  %v23436_v0 = vld [vmem:[#allocation4 + $0x318] sm:$0xff]  ;;  %v28835_v14 = vld [vmem:[#allocation64_spill] sm:$0xff] }
 0x4bf   :  { %v26729_v50 = vpop.f32.mrb[174].mxu0  ;;  %v26731_v8 = vpop.f32.mrb[174].mxu1  ;;  %23102 = vmatprep.subr.bf16.mxu0 %v23101_v27  ;;  %23106 = vmatprep.subr.bf16.mxu1 %v23105_v15  ;;  %v26752_v12 = vcombine.low %v28826_v37, %v28825_v24  ;;  %v23438_v31 = vld [vmem:[#allocation4 + $0x330] sm:$0xff] }
 0x4c0   :  { %v26740_v33 = vpop.f32.mrb[175].mxu0  ;;  %v26742_v20 = vpop.f32.mrb[175].mxu1  ;;  %v13801_v1 = vsub.f32 %v13769_v41, %v26395_v62  ;;  %v26746_v28 = vsub.f32 %v13771_v42, %v28824_v45  ;;  %21994 = vmatmul.mubr.msk.f32.vlgmr.msra.gmra.mrb[176].mxu0 %vm872_vm1, %v23435_v36  ;;  %22001 = vmatmul.mubr.msk.f32.vlgmr.msra.gmra.mrb[176].mxu1 %vm872_vm1, %v23436_v0  ;;  %v28827_v62 = vcombine.low %v26474_v2, %v26478_v59  ;;  %v28829_v0 = vld [vmem:[#allocation43_spill] sm:$0xff] }
 0x4c1   :  { %23104 = vmatpush3.bf16.msra.mxu0 %v23101_v27  ;;  %23108 = vmatpush3.bf16.msra.mxu1 %v23105_v15  ;;  %v28828_v42 = vcombine.low %v26544_v26, %v26550_v57  ;;  %v26768_v36 = vcombine.high %v28826_v37, %v28825_v24  ;;  %v13774_v9 = vsub.f32 %v26658_v43, %v28829_v0  ;;  %v23437_v27 = vld [vmem:[#allocation4 + $0x320] sm:$0xff]  ;;  %v28831_v24 = vld [vmem:[#allocation53_spill] sm:$0xff] }
 0x4c2   :  { %v14041_v41 = vrot.slane %v28827_v62, %v28771_v44  ;;  %v13776_v15 = vsub.f32 %v26660_v55, %v28830_v19  ;;  %22007 = vmatprep.mubr.msk.f32.mxu0 %vm872_vm1, %v23437_v27  ;;  %22014 = vmatprep.mubr.msk.f32.mxu1 %vm872_vm1, %v23438_v31  ;;  %v13773_v62 = vsub.f32 %v26670_v7, %v26257_v10  ;;  %v28832_v37 = vld [vmem:[#allocation12_spill] sm:$0xff]  ;;  %v23439_v7 = vld [vmem:[#allocation4 + $0x328] sm:$0xff] }
 0x4c3   :  { %v14073_v45 = vrot.slane %v28828_v42, %v28771_v44  ;;  %v13775_v42 = vsub.f32 %v26672_v61, %v26259_v53  ;;  %v26782_v63 = vcombine.low %v28832_v37, %v28831_v24  ;;  %v28833_v43 = vcombine.high %v26474_v2, %v26478_v59  ;;  %v28834_v31 = vld [vmem:[#allocation40_spill] sm:$0xff]  ;;  %v28836_v53 = vld [vmem:[#allocation69_spill] sm:$0xff] }
 0x4c4   :  { %v13806_v27 = vsub.f32 %v13774_v9, %v28834_v31  ;;  %v13808_v10 = vsub.f32 %v13776_v15, %v28835_v14  ;;  %22008 = vmatmul.mubr.msk.f32.vlgmr.msra.gmra.mrb[178].mxu0 %vm872_vm1, %v23439_v7  ;;  %v13805_v61 = vsub.f32 %v13773_v62, %v28836_v53  ;;  %22015 = vmatmul.mubr.msk.f32.vlgmr.msra.gmra.mrb[178].mxu1 %vm872_vm1, %v23440_v25  ;;  %v23441_v25 = vld [vmem:[#allocation4 + $0x340] sm:$0xff] }
 0x4c5   :  { %v14048_v55 = vrot.slane %v28833_v43, %v28771_v44  ;;  %v26788_v19 = vcombine.low %v14041_v41, %v14073_v45  ;;  %v26790_v0 = vcombine.high %v14041_v41, %v14073_v45  ;;  %v13807_v6 = vsub.f32 %v13775_v42, %v28837_v32  ;;  %22021 = vmatprep.mubr.msk.f32.mxu0 %vm872_vm1, %v23441_v25  ;;  %v23442_v42 = vld [vmem:[#allocation4 + $0x350] sm:$0xff] }
 0x4c6   :  { %v28838_v2 = vcombine.high %v26544_v26, %v26550_v57  ;;  %v26804_v9 = vcombine.high %v28832_v37, %v28831_v24  ;;  %v14769_v32 = vcombine.low %v26720_v47, %v13806_v27  ;;  %v14770_v45 = vcombine.high %v26720_v47, %v13806_v27  ;;  %22028 = vmatprep.mubr.msk.f32.mxu1 %vm872_vm1, %v23442_v42  ;;  %v28852_v42 = vld [vmem:[#allocation78_spill] sm:$0xff] }
 0x4c7   :  { %v23109_v14 = vpack.c.bf16 %v26788_v19, %v26752_v12  ;;  %v23113_v41 = vpack.c.bf16 %v26790_v0, %v26768_v36  ;;  %v14785_v26 = vcombine.low %v26723_v46, %v13808_v10  ;;  %v14786_v57 = vcombine.high %v26723_v46, %v13808_v10 }
 0x4c8   :  { %v14080_v59 = vrot.slane %v28838_v2, %v28771_v44  ;;  %28839 = vst [vmem:[#allocation22_spill] sm:$0xff] %v26804_v9  ;;  %v14497_v15 = vcombine.low %v13801_v1, %v13805_v61  ;;  %v14498_v62 = vcombine.high %v13801_v1, %v13805_v61  ;;  %v26817_v24 = vrot.slane %v14769_v32, %v28759_v58  ;;  %v28850_v2 = vld [vmem:[#allocation18_spill] sm:$0xff] }
 0x4c9   :  { %23110 = vmatprep.subr.bf16.mxu0 %v23109_v14  ;;  %23114 = vmatprep.subr.bf16.mxu1 %v23113_v41  ;;  %v26820_v37 = vrot.slane %v14770_v45, %v28759_v58  ;;  %v14513_v47 = vcombine.low %v26746_v28, %v13807_v6  ;;  %v26824_v43 = vrot.slane %v14785_v26, %v28759_v58 }
 0x4ca   :  { %v26827_v46 = vrot.slane %v14786_v57, %v28759_v58  ;;  %v26830_v1 = vrot.slane %v14497_v15, %v28759_v58  ;;  %v26833_v31 = vrot.slane %v14498_v62, %v28759_v58  ;;  %23112 = vmatpush3.bf16.msra.mxu0 %v23109_v14  ;;  %v14514_v27 = vcombine.high %v26746_v28, %v13807_v6  ;;  %v28842_v57 = vld [vmem:[#allocation58_spill] sm:$0xff]  ;;  %v23444_v62 = vld [vmem:[#allocation4 + $0x358] sm:$0xff] }
 0x4cb   :  { %v26837_v10 = vrot.slane %v14513_v47, %v28759_v58  ;;  %23116 = vmatpush3.bf16.msra.mxu1 %v23113_v41  ;;  %v26839_v7 = vcombine.low %v14048_v55, %v14080_v59  ;;  %v26841_v53 = vcombine.high %v14048_v55, %v14080_v59  ;;  %v23443_v41 = vld [vmem:[#allocation4 + $0x348] sm:$0xff]  ;;  %v13778_v25 = vsub.f32 %v26690_v40, %v26261_v52  ;;  %v28844_v52 = vld [vmem:[#allocation16_spill] sm:$0xff]  ;;  %v28845_v40 = vld [vmem:[#allocation67_spill] sm:$0xff] }
 0x4cc   :  { %v26852_v28 = vrot.slane %v14514_v27, %v28759_v58  ;;  %v13780_v26 = vsub.f32 %v26692_v4, %v26263_v30  ;;  %v13777_v15 = vsub.f32 %v26700_v60, %v28842_v57  ;;  %v28843_v27 = vld [vmem:[#allocation31_spill] sm:$0xff]  ;;  %v26878_v6 = vcombine.low %v28845_v40, %v28844_v52  ;;  %v28847_v30 = vld [vmem:[#allocation70_spill] sm:$0xff]  ;;  %v28851_v47 = vld [vmem:[#allocation76_spill] sm:$0xff] }
 0x4cd   :  { %28840 = vst [vmem:[#allocation29_spill] sm:$0xff] %v26839_v7  ;;  %28841 = vst [vmem:[#allocation10_spill] sm:$0xff] %v26841_v53  ;;  %v23117_v59 = vpack.c.bf16 %v26839_v7, %v26782_v63  ;;  %22022 = vmatmul.mubr.msk.f32.vlgmr.msra.gmra.mrb[180].mxu0 %vm872_vm1, %v23443_v41  ;;  %v23121_v45 = vpack.c.bf16 %v26841_v53, %v26804_v9  ;;  %v13779_v41 = vsub.f32 %v26702_v34, %v28843_v27  ;;  %v28848_v60 = vld [vmem:[#allocation75_spill] sm:$0xff]  ;;  %v28866_v53 = vld [vmem:[#allocation81_spill] sm:$0xff] }
 0x4ce   :  { %22029 = vmatmul.mubr.msk.f32.vlgmr.msra.gmra.mrb[180].mxu1 %vm872_vm1, %v23444_v62  ;;  %28846 = vst [vmem:[#allocation35_spill] sm:$0xff] %v26878_v6  ;;  %v13810_v4 = vsub.f32 %v13778_v25, %v28847_v30  ;;  %v13812_v57 = vsub.f32 %v13780_v26, %v28848_v60  ;;  %v28849_v62 = vld [vmem:[#allocation86_spill] sm:$0xff]  ;;  %v28853_v55 = vcombine.low %v28851_v47, %v28852_v42  ;;  %v28856_v26 = vld [vmem:[#allocation44_spill] sm:$0xff]  ;;  %v23448_v7 = vld [vmem:[#allocation4 + $0x378] sm:$0xff] }
 0x4cf   :  { %23118 = vmatprep.subr.bf16.mxu0 %v23117_v59  ;;  %23122 = vmatprep.subr.bf16.mxu1 %v23121_v45  ;;  %v13809_v32 = vsub.f32 %v13777_v15, %v28849_v62  ;;  %v13811_v61 = vsub.f32 %v13779_v41, %v28850_v2  ;;  %v28854_v27 = vcombine.low %v26529_v38, %v26535_v48  ;;  %v28857_v15 = vld [vmem:[#allocation56_spill] sm:$0xff]  ;;  %v23446_v41 = vld [vmem:[#allocation4 + $0x370] sm:$0xff] }
 0x4d0   :  { %23120 = vmatpush3.bf16.msra.mxu0 %v23117_v59  ;;  %23124 = vmatpush3.bf16.msra.mxu1 %v23121_v45  ;;  %v14297_v34 = vrot.slane %v28853_v55, %v28771_v44  ;;  %v26894_v25 = vcombine.high %v28845_v40, %v28844_v52  ;;  %v13782_v59 = vsub.f32 %v26729_v50, %v28856_v26  ;;  %v23445_v45 = vld [vmem:[#allocation4 + $0x360] sm:$0xff]  ;;  %v28858_v55 = vld [vmem:[#allocation26_spill] sm:$0xff]  ;;  %v23447_v50 = vld [vmem:[#allocation4 + $0x368] sm:$0xff] }
 0x4d1   :  { %v14329_v14 = vrot.slane %v28854_v27, %v28771_v44  ;;  %v13784_v2 = vsub.f32 %v26731_v8, %v28857_v15  ;;  %22035 = vmatprep.mubr.msk.f32.mxu0 %vm872_vm1, %v23445_v45  ;;  %22042 = vmatprep.mubr.msk.f32.mxu1 %vm872_vm1, %v23446_v41  ;;  %v13781_v30 = vsub.f32 %v26740_v33, %v28858_v55  ;;  %v28861_v52 = vld [vmem:[#allocation38_spill] sm:$0xff]  ;;  %v28862_v8 = vld [vmem:[#allocation47_spill] sm:$0xff]  ;;  %v28863_v27 = vld [vmem:[#allocation60_spill] sm:$0xff] }
 0x4d2   :  { %28855 = vst [vmem:[#allocation39_spill] sm:$0xff] %v26894_v25  ;;  %v13783_v40 = vsub.f32 %v26742_v20, %v28861_v52  ;;  %v28864_v26 = vcombine.high %v28862_v8, %v28863_v27  ;;  %v28865_v45 = vld [vmem:[#allocation79_spill] sm:$0xff]  ;;  %v28871_v27 = vld [vmem:[#allocation88_spill] sm:$0xff] }
 0x4d3   :  { %v26904_v60 = vcombine.low %v14297_v34, %v14329_v14  ;;  %v26906_v62 = vcombine.high %v14297_v34, %v14329_v14  ;;  %22036 = vmatmul.mubr.msk.f32.vlgmr.msra.gmra.mrb[182].mxu0 %vm872_vm1, %v23447_v50  ;;  %v13814_v41 = vsub.f32 %v13782_v59, %v28865_v45  ;;  %v13816_v9 = vsub.f32 %v13784_v2, %v28866_v53  ;;  %v28867_v33 = vld [vmem:[#allocation87_spill] sm:$0xff]  ;;  %v28868_v14 = vld [vmem:[#allocation41_spill] sm:$0xff] }
 0x4d4   :  { %v14168_v15 = vrot.slane %v28864_v26, %v28771_v44  ;;  %v13813_v55 = vsub.f32 %v13781_v30, %v28867_v33  ;;  %22043 = vmatmul.mubr.msk.f32.vlgmr.msra.gmra.mrb[182].mxu1 %vm872_vm1, %v23448_v7  ;;  %v28869_v20 = vld [vmem:[#allocation51_spill] sm:$0xff]  ;;  %v13815_v59 = vsub.f32 %v13783_v40, %v28871_v27  ;;  %v28872_v53 = vcombine.high %v28851_v47, %v28852_v42  ;;  %v23449_v30 = vld [vmem:[#allocation4 + $0x380] sm:$0xff] }
 0x4d5   :  { %28859 = vst [vmem:[#allocation36_spill] sm:$0xff] %v26904_v60  ;;  %28860 = vst [vmem:[#allocation62_spill] sm:$0xff] %v26906_v62  ;;  %v28870_v34 = vcombine.high %v28868_v14, %v28869_v20  ;;  %v23125_v50 = vpack.c.bf16 %v26904_v60, %v26878_v6  ;;  %v23129_v8 = vpack.c.bf16 %v26906_v62, %v26894_v25  ;;  %22049 = vmatprep.mubr.msk.f32.mxu0 %vm872_vm1, %v23449_v30  ;;  %v23450_v14 = vld [vmem:[#allocation4 + $0x390] sm:$0xff]  ;;  %v23453_v62 = vld [vmem:[#allocation4 + $0x3a0] sm:$0xff] }
 0x4d6   :  { %v14304_v2 = vrot.slane %v28872_v53, %v28771_v44  ;;  %v14801_v7 = vcombine.low %v13810_v4, %v13814_v41  ;;  %v14802_v26 = vcombine.high %v13810_v4, %v13814_v41  ;;  %v14817_v45 = vcombine.low %v13812_v57, %v13816_v9  ;;  %22056 = vmatprep.mubr.msk.f32.mxu1 %vm872_vm1, %v23450_v14  ;;  %v28884_v53 = vld [vmem:[#allocation49_spill] sm:$0xff]  ;;  %v23454_v60 = vld [vmem:[#allocation4 + $0x3b0] sm:$0xff] }
 0x4d7   :  { %v14200_v52 = vrot.slane %v28870_v34, %v28771_v44  ;;  %v14818_v33 = vcombine.high %v13812_v57, %v13816_v9  ;;  %23126 = vmatprep.subr.bf16.mxu0 %v23125_v50  ;;  %23130 = vmatprep.subr.bf16.mxu1 %v23129_v8  ;;  %v14529_v20 = vcombine.low %v13809_v32, %v13813_v55 }
 0x4d8   :  { %v14530_v34 = vcombine.high %v13809_v32, %v13813_v55  ;;  %v14545_v40 = vcombine.low %v13811_v61, %v13815_v59  ;;  %v26935_v27 = vrot.slane %v14801_v7, %v28759_v58  ;;  %v26938_v42 = vrot.slane %v14802_v26, %v28759_v58  ;;  %23128 = vmatpush3.bf16.msra.mxu0 %v23125_v50  ;;  %v23451_v26 = vld [vmem:[#allocation4 + $0x388] sm:$0xff] }
 0x4d9   :  { %v26941_v47 = vrot.slane %v14817_v45, %v28759_v58  ;;  %v26944_v4 = vrot.slane %v14818_v33, %v28759_v58  ;;  %v26947_v9 = vrot.slane %v14529_v20, %v28759_v58  ;;  %v14546_v32 = vcombine.high %v13811_v61, %v13815_v59  ;;  %23132 = vmatpush3.bf16.msra.mxu1 %v23129_v8  ;;  %v28874_v20 = vld [vmem:[#allocation50_spill] sm:$0xff] }
 0x4da   :  { %v26950_v57 = vrot.slane %v14530_v34, %v28759_v58  ;;  %v26953_v41 = vrot.slane %v14545_v40, %v28759_v58  ;;  %v26970_v59 = vcombine.low %v14168_v15, %v14200_v52  ;;  %v28873_v45 = vcombine.high %v26529_v38, %v26535_v48  ;;  %v28875_v34 = vld [vmem:[#allocation28_spill] sm:$0xff]  ;;  %v28880_v48 = vld [vmem:[#allocation77_spill] sm:$0xff] }
 0x4db   :  { %v26964_v7 = vrot.slane %v14546_v32, %v28759_v58  ;;  %22050 = vmatmul.mubr.msk.f32.vlgmr.msra.gmra.mrb[184].mxu0 %vm872_vm1, %v23451_v26  ;;  %v26977_v14 = vcombine.high %v14168_v15, %v14200_v52  ;;  %v23452_v58 = vld [vmem:[#allocation4 + $0x398] sm:$0xff]  ;;  %v28876_v40 = vcombine.low %v28874_v20, %v28875_v34  ;;  %v28881_v15 = vld [vmem:[#allocation80_spill] sm:$0xff] }
 0x4dc   :  { %v14593_v61 = vcombine.low %v26947_v9, %v26953_v41  ;;  %v14594_v8 = vcombine.high %v26947_v9, %v26953_v41  ;;  %v14336_v33 = vrot.slane %v28873_v45, %v28771_v44  ;;  %22057 = vmatmul.mubr.msk.f32.vlgmr.msra.gmra.mrb[184].mxu1 %vm872_vm1, %v23452_v58  ;;  %v28877_v32 = vld [vmem:[#allocation27_spill] sm:$0xff]  ;;  %v28878_v41 = vld [vmem:[#allocation17_spill] sm:$0xff]  ;;  %v28882_v52 = vcombine.low %v28880_v48, %v28881_v15 }
 0x4dd   :  { %v14177_v9 = vrot.slane %v28876_v40, %v28771_v44  ;;  %v28879_v30 = vcombine.low %v28877_v32, %v28878_v41  ;;  %v28883_v58 = vld [vmem:[#allocation19_spill] sm:$0xff]  ;;  %22063 = vmatprep.mubr.msk.f32.mxu0 %vm872_vm1, %v23453_v62  ;;  %22070 = vmatprep.mubr.msk.f32.mxu1 %vm872_vm1, %v23454_v60 }
 0x4de   :  { %v14313_v45 = vrot.slane %v28882_v52, %v28771_v44  ;;  %v28885_v40 = vcombine.low %v28883_v58, %v28884_v53  ;;  %v27003_v25 = vcombine.high %v14304_v2, %v14336_v33 }
 0x4df   :  { %v14209_v26 = vrot.slane %v28879_v30, %v28771_v44  ;;  %v27001_v30 = vcombine.low %v14304_v2, %v14336_v33  ;;  %v28889_v2 = vcombine.high %v28877_v32, %v28878_v41 }
 0x4e0   :  { %v14345_v55 = vrot.slane %v28885_v40, %v28771_v44  ;;  %v28888_v40 = vcombine.high %v28874_v20, %v28875_v34  ;;  %v23137_v60 = vpack.c.bf16 %v27003_v25, %v26977_v14  ;;  %v28891_v20 = vcombine.high %v28883_v58, %v28884_v53 }
 0x4e1   :  { %v27005_v50 = vcombine.low %v14177_v9, %v14209_v26  ;;  %v27007_v38 = vcombine.high %v14177_v9, %v14209_v26  ;;  %v14216_v33 = vrot.slane %v28889_v2, %v28771_v44  ;;  %v23133_v9 = vpack.c.bf16 %v27001_v30, %v26970_v59 }
 0x4e2   :  { %v27010_v52 = vcombine.low %v14313_v45, %v14345_v55  ;;  %v27012_v6 = vcombine.high %v14313_v45, %v14345_v55  ;;  %v14184_v62 = vrot.slane %v28888_v40, %v28771_v44  ;;  %v28890_v55 = vcombine.high %v28880_v48, %v28881_v15  ;;  %23138 = vmatprep.subr.bf16.mxu1 %v23137_v60 }
 0x4e3   :  { %28886 = vst [vmem:[#allocation42_spill] sm:$0xff] %v27007_v38  ;;  %v14352_v34 = vrot.slane %v28891_v20, %v28771_v44  ;;  %23134 = vmatprep.subr.bf16.mxu0 %v23133_v9  ;;  %v28896_v53 = vcombine.low %v26601_v54, %v26607_v21  ;;  %23140 = vmatpush3.bf16.msra.mxu1 %v23137_v60 }
 0x4e4   :  { %28887 = vst [vmem:[#allocation63_spill] sm:$0xff] %v27012_v6  ;;  %v14320_v26 = vrot.slane %v28890_v55, %v28771_v44  ;;  %v23141_v32 = vpack.c.bf16 %v27010_v52, %v27005_v50  ;;  %v23145_v41 = vpack.c.bf16 %v27012_v6, %v27007_v38  ;;  %v27038_v45 = vcombine.low %v14184_v62, %v14216_v33  ;;  %v23455_v6 = vld [vmem:[#allocation4 + $0x3a8] sm:$0xff] }
 0x4e5   :  { %v27040_v40 = vcombine.high %v14184_v62, %v14216_v33  ;;  %v14433_v15 = vrot.slane %v28896_v53, %v28771_v44  ;;  %23136 = vmatpush3.bf16.msra.mxu0 %v23133_v9  ;;  %v28897_v58 = vcombine.low %v26695_v29, %v26713_v13  ;;  %v28898_v62 = vcombine.low %v26830_v1, %v26837_v10 }
 0x4e6   :  { %28892 = vst [vmem:[#allocation61_spill] sm:$0xff] %v27038_v45  ;;  %v27042_v2 = vcombine.low %v14320_v26, %v14352_v34  ;;  %v27044_v48 = vcombine.high %v14320_v26, %v14352_v34  ;;  %v14601_v26 = vrot.slane %v14593_v61, %v28771_v44  ;;  %23142 = vmatprep.subr.bf16.mxu0 %v23141_v32 }
 0x4e7   :  { %28893 = vst [vmem:[#allocation73_spill] sm:$0xff] %v27040_v40  ;;  %v14465_v55 = vrot.slane %v28897_v58, %v28771_v44  ;;  %v14569_v33 = vrot.slane %v28898_v62, %v28771_v44  ;;  %23146 = vmatprep.subr.bf16.mxu1 %v23145_v41  ;;  %v28899_v60 = vcombine.high %v26601_v54, %v26607_v21 }
 0x4e8   :  { %28894 = vst [vmem:[#allocation71_spill] sm:$0xff] %v27042_v2  ;;  %28895 = vst [vmem:[#allocation74_spill] sm:$0xff] %v27044_v48  ;;  %v23149_v20 = vpack.c.bf16 %v27042_v2, %v27038_v45  ;;  %v23153_v9 = vpack.c.bf16 %v27044_v48, %v27040_v40  ;;  %22064 = vmatmul.mubr.msk.f32.vlgmr.msra.gmra.mrb[186].mxu0 %vm872_vm1, %v23455_v6  ;;  %v23456_v2 = vld [vmem:[#allocation4 + $0x3b8] sm:$0xff]  ;;  %v28900_v48 = vcombine.high %v26695_v29, %v26713_v13  ;;  %v23462_v40 = vld [vmem:[#allocation4 + $0x3f0] sm:$0xff] }
 0x4e9   :  { %v14440_v34 = vrot.slane %v28899_v60, %v28771_v44  ;;  %v27067_v53 = vcombine.low %v14433_v15, %v14465_v55  ;;  %v27069_v58 = vcombine.low %v14569_v33, %v14601_v26  ;;  %v27071_v62 = vcombine.high %v14433_v15, %v14465_v55  ;;  %22071 = vmatmul.mubr.msk.f32.vlgmr.msra.gmra.mrb[186].mxu1 %vm872_vm1, %v23456_v2 }
 0x4ea   :  { %v27073_v61 = vcombine.high %v14569_v33, %v14601_v26  ;;  %v14472_v54 = vrot.slane %v28900_v48, %v28771_v44  ;;  %v28901_v21 = vcombine.high %v26830_v1, %v26837_v10  ;;  %v14608_v15 = vrot.slane %v14594_v8, %v28771_v44  ;;  %23144 = vmatpush3.bf16.msra.mxu0 %v23141_v32  ;;  %v23457_v8 = vld [vmem:[#allocation4 + $0x3c0] sm:$0xff]  ;;  %v23458_v32 = vld [vmem:[#allocation4 + $0x3d0] sm:$0xff] }
 0x4eb   :  { %23148 = vmatpush3.bf16.msra.mxu1 %v23145_v41  ;;  %v23157_v6 = vpack.c.bf16 %v27069_v58, %v27067_v53  ;;  %v28902_v29 = vcombine.low %v26604_v49, %v26610_v51  ;;  %23150 = vmatprep.subr.bf16.mxu0 %v23149_v20  ;;  %v28903_v55 = vcombine.low %v26698_v16, %v26734_v17 }
 0x4ec   :  { %v14576_v60 = vrot.slane %v28901_v21, %v28771_v44  ;;  %v23161_v2 = vpack.c.bf16 %v27073_v61, %v27071_v62  ;;  %23154 = vmatprep.subr.bf16.mxu1 %v23153_v9  ;;  %v27094_v48 = vcombine.low %v14440_v34, %v14472_v54  ;;  %v27098_v10 = vcombine.high %v14440_v34, %v14472_v54  ;;  %v23459_v34 = vld [vmem:[#allocation4 + $0x3c8] sm:$0xff]  ;;  %v23460_v54 = vld [vmem:[#allocation4 + $0x3d8] sm:$0xff] }
 0x4ed   :  { %v14449_v13 = vrot.slane %v28902_v29, %v28771_v44  ;;  %22077 = vmatprep.mubr.msk.f32.mxu0 %vm872_vm1, %v23457_v8  ;;  %22084 = vmatprep.mubr.msk.f32.mxu1 %vm872_vm1, %v23458_v32  ;;  %v14481_v33 = vrot.slane %v28903_v55, %v28771_v44  ;;  %v28904_v26 = vcombine.low %v26833_v31, %v26852_v28 }
 0x4ee   :  { %v27096_v1 = vcombine.low %v14576_v60, %v14608_v15  ;;  %v27102_v41 = vcombine.high %v14576_v60, %v14608_v15  ;;  %22078 = vmatmul.mubr.msk.f32.vlgmr.msra.gmra.mrb[188].mxu0 %vm872_vm1, %v23459_v34  ;;  %22085 = vmatmul.mubr.msk.f32.vlgmr.msra.gmra.mrb[188].mxu1 %vm872_vm1, %v23460_v54  ;;  %v28905_v15 = vcombine.low %v26950_v57, %v26964_v7  ;;  %v23461_v54 = vld [vmem:[#allocation4 + $0x3e0] sm:$0xff] }
 0x4ef   :  { %v14585_v21 = vrot.slane %v28904_v26, %v28771_v44  ;;  %v28906_v8 = vcombine.high %v26604_v49, %v26610_v51  ;;  %23152 = vmatpush3.bf16.msra.mxu0 %v23149_v20  ;;  %23156 = vmatpush3.bf16.msra.mxu1 %v23153_v9  ;;  %v27126_v26 = vcombine.low %v14449_v13, %v14481_v33 }
 0x4f0   :  { %v23165_v60 = vpack.c.bf16 %v27096_v1, %v27094_v48  ;;  %v14617_v29 = vrot.slane %v28905_v15, %v28771_v44  ;;  %v23169_v55 = vpack.c.bf16 %v27102_v41, %v27098_v10  ;;  %v27128_v34 = vcombine.high %v14449_v13, %v14481_v33  ;;  %22091 = vmatprep.mubr.msk.f32.mxu0 %vm872_vm1, %v23461_v54 }
 0x4f1   :  { %v14456_v32 = vrot.slane %v28906_v8, %v28771_v44  ;;  %22098 = vmatprep.mubr.msk.f32.mxu1 %vm872_vm1, %v23462_v40  ;;  %v28907_v49 = vcombine.high %v26698_v16, %v26734_v17  ;;  %23158 = vmatprep.subr.bf16.mxu0 %v23157_v6  ;;  %v28908_v20 = vcombine.high %v26833_v31, %v26852_v28  ;;  %v23464_v16 = vld [vmem:[#allocation4 + $0x3f8] sm:$0xff] }
 0x4f2   :  { %v27132_v15 = vcombine.low %v14585_v21, %v14617_v29  ;;  %v27134_v45 = vcombine.high %v14585_v21, %v14617_v29  ;;  %23162 = vmatprep.subr.bf16.mxu1 %v23161_v2  ;;  %v28909_v40 = vcombine.high %v26950_v57, %v26964_v7  ;;  %v28910_v33 = vcombine.low %v26589_v56, %v26595_v23  ;;  %v23463_v29 = vld [vmem:[#allocation4 + $0x3e8] sm:$0xff] }
 0x4f3   :  { %v14488_v51 = vrot.slane %v28907_v49, %v28771_v44  ;;  %v14592_v9 = vrot.slane %v28908_v20, %v28771_v44  ;;  %22092 = vmatmul.mubr.msk.f32.vlgmr.msra.gmra.mrb[190].mxu0 %vm872_vm1, %v23463_v29  ;;  %22099 = vmatmul.mubr.msk.f32.vlgmr.msra.gmra.mrb[190].mxu1 %vm872_vm1, %v23464_v16  ;;  %v28911_v54 = vcombine.low %v26679_v5, %v26685_v18  ;;  %v23467_v16 = vld [vmem:[#allocation4 + $0x408] sm:$0xff] }
 0x4f4   :  { %v14624_v13 = vrot.slane %v28909_v40, %v28771_v44  ;;  %v14705_v21 = vrot.slane %v28910_v33, %v28771_v44  ;;  %v23173_v17 = vpack.c.bf16 %v27132_v15, %v27126_v26  ;;  %v23177_v31 = vpack.c.bf16 %v27134_v45, %v27128_v34  ;;  %23160 = vmatpush3.bf16.msra.mxu0 %v23157_v6 }
 0x4f5   :  { %v27158_v28 = vcombine.low %v14456_v32, %v14488_v51  ;;  %23164 = vmatpush3.bf16.msra.mxu1 %v23161_v2  ;;  %v27162_v7 = vcombine.high %v14456_v32, %v14488_v51  ;;  %23166 = vmatprep.subr.bf16.mxu0 %v23165_v60  ;;  %v14737_v49 = vrot.slane %v28911_v54, %v28771_v44  ;;  %v23465_v32 = vld [vmem:[#allocation4 + $0x400] sm:$0xff]  ;;  %v23466_v51 = vld [vmem:[#allocation4 + $0x410] sm:$0xff]  ;;  %v23468_v54 = vld [vmem:[#allocation4 + $0x418] sm:$0xff] }
 0x4f6   :  { %v27160_v57 = vcombine.low %v14592_v9, %v14624_v13  ;;  %v27164_v8 = vcombine.high %v14592_v9, %v14624_v13  ;;  %23170 = vmatprep.subr.bf16.mxu1 %v23169_v55  ;;  %v28912_v20 = vcombine.low %v26817_v24, %v26824_v43  ;;  %v28913_v6 = vcombine.low %v26935_v27, %v26941_v47 }
 0x4f7   :  { %22105 = vmatprep.mubr.msk.f32.mxu0 %vm872_vm1, %v23465_v32  ;;  %22112 = vmatprep.mubr.msk.f32.mxu1 %vm872_vm1, %v23466_v51  ;;  %v28914_v33 = vcombine.high %v26589_v56, %v26595_v23  ;;  %v27194_v32 = vcombine.high %v14705_v21, %v14737_v49  ;;  %v28915_v56 = vcombine.high %v26679_v5, %v26685_v18 }
 0x4f8   :  { %v14841_v40 = vrot.slane %v28912_v20, %v28771_v44  ;;  %v14873_v2 = vrot.slane %v28913_v6, %v28771_v44  ;;  %v23181_v9 = vpack.c.bf16 %v27160_v57, %v27158_v28  ;;  %v23185_v13 = vpack.c.bf16 %v27164_v8, %v27162_v7  ;;  %22106 = vmatmul.mubr.msk.f32.vlgmr.msra.gmra.mrb[192].mxu0 %vm872_vm1, %v23467_v16 }
 0x4f9   :  { %v14712_v29 = vrot.slane %v28914_v33, %v28771_v44  ;;  %22113 = vmatmul.mubr.msk.f32.vlgmr.msra.gmra.mrb[192].mxu1 %vm872_vm1, %v23468_v54  ;;  %v27190_v20 = vcombine.low %v14705_v21, %v14737_v49  ;;  %23168 = vmatpush3.bf16.msra.mxu0 %v23165_v60  ;;  %v14744_v23 = vrot.slane %v28915_v56, %v28771_v44  ;;  %v23469_v49 = vld [vmem:[#allocation4 + $0x420] sm:$0xff] }
 0x4fa   :  { %v27192_v6 = vcombine.low %v14841_v40, %v14873_v2  ;;  %23172 = vmatpush3.bf16.msra.mxu1 %v23169_v55  ;;  %v27196_v51 = vcombine.high %v14841_v40, %v14873_v2  ;;  %v28916_v33 = vcombine.high %v26817_v24, %v26824_v43  ;;  %23174 = vmatprep.subr.bf16.mxu0 %v23173_v17  ;;  %v23470_v24 = vld [vmem:[#allocation4 + $0x430] sm:$0xff] }
 0x4fb   :  { %23178 = vmatprep.subr.bf16.mxu1 %v23177_v31  ;;  %v28917_v60 = vcombine.high %v26935_v27, %v26941_v47  ;;  %v28918_v5 = vcombine.low %v26592_v3, %v26598_v22  ;;  %22119 = vmatprep.mubr.msk.f32.mxu0 %vm872_vm1, %v23469_v49  ;;  %v27222_v40 = vcombine.low %v14712_v29, %v14744_v23  ;;  %v23471_v27 = vld [vmem:[#allocation4 + $0x428] sm:$0xff]  ;;  %v23472_v47 = vld [vmem:[#allocation4 + $0x438] sm:$0xff] }
 0x4fc   :  { %v14848_v16 = vrot.slane %v28916_v33, %v28771_v44  ;;  %v27208_v21 = vpack.c.bf16 %v27192_v6, %v27190_v20  ;;  %22126 = vmatprep.mubr.msk.f32.mxu1 %vm872_vm1, %v23470_v24  ;;  %v23193_v43 = vpack.c.bf16 %v27196_v51, %v27194_v32  ;;  %v27224_v2 = vcombine.high %v14712_v29, %v14744_v23 }
 0x4fd   :  { %v14880_v55 = vrot.slane %v28917_v60, %v28771_v44  ;;  %v14721_v18 = vrot.slane %v28918_v5, %v28771_v44  ;;  %22120 = vmatmul.mubr.msk.f32.vlgmr.msra.gmra.mrb[194].mxu0 %vm872_vm1, %v23471_v27  ;;  %22127 = vmatmul.mubr.msk.f32.vlgmr.msra.gmra.mrb[194].mxu1 %vm872_vm1, %v23472_v47  ;;  %v28919_v33 = vcombine.low %v26682_v39, %v26688_v11  ;;  %v23473_v27 = vld [vmem:[#allocation4 + $0x440] sm:$0xff]  ;;  %v23474_v47 = vld [vmem:[#allocation4 + $0x450] sm:$0xff] }
 0x4fe   :  { %23176 = vmatpush3.bf16.msra.mxu0 %v23173_v17  ;;  %23180 = vmatpush3.bf16.msra.mxu1 %v23177_v31  ;;  %v28920_v29 = vcombine.low %v26820_v37, %v26827_v46  ;;  %v28921_v5 = vcombine.low %v26938_v42, %v26944_v4 }
 0x4ff   :  { %v27228_v54 = vcombine.low %v14848_v16, %v14880_v55  ;;  %v27230_v56 = vcombine.high %v14848_v16, %v14880_v55  ;;  %v14753_v60 = vrot.slane %v28919_v33, %v28771_v44  ;;  %v28922_v16 = vcombine.high %v26592_v3, %v26598_v22  ;;  %23182 = vmatprep.subr.bf16.mxu0 %v23181_v9 }
 0x500   :  { %v14857_v23 = vrot.slane %v28920_v29, %v28771_v44  ;;  %v14889_v49 = vrot.slane %v28921_v5, %v28771_v44  ;;  %23186 = vmatprep.subr.bf16.mxu1 %v23185_v13  ;;  %22133 = vmatprep.mubr.msk.f32.mxu0 %vm872_vm1, %v23473_v27  ;;  %v23475_v29 = vld [vmem:[#allocation4 + $0x448] sm:$0xff]  ;;  %v23476_v5 = vld [vmem:[#allocation4 + $0x458] sm:$0xff] }
 0x501   :  { %v14728_v55 = vrot.slane %v28922_v16, %v28771_v44  ;;  %v27250_v17 = vpack.c.bf16 %v27228_v54, %v27222_v40  ;;  %v27254_v31 = vpack.c.bf16 %v27230_v56, %v27224_v2  ;;  %v27256_v24 = vcombine.low %v14721_v18, %v14753_v60  ;;  %22140 = vmatprep.mubr.msk.f32.mxu1 %vm872_vm1, %v23474_v47 }
 0x502   :  { %v27260_v3 = vcombine.low %v14857_v23, %v14889_v49  ;;  %v27262_v22 = vcombine.high %v14721_v18, %v14753_v60  ;;  %v27264_v33 = vcombine.high %v14857_v23, %v14889_v49  ;;  %22134 = vmatmul.mubr.msk.f32.vlgmr.msra.gmra.mrb[196].mxu0 %vm872_vm1, %v23475_v29  ;;  %22141 = vmatmul.mubr.msk.f32.vlgmr.msra.gmra.mrb[196].mxu1 %vm872_vm1, %v23476_v5  ;;  %v23479_v29 = vld [vmem:[#allocation4 + $0x468] sm:$0xff]  ;;  %v23480_v5 = vld [vmem:[#allocation4 + $0x478] sm:$0xff] }
 0x503   :  { %v28923_v16 = vcombine.high %v26682_v39, %v26688_v11  ;;  %v28924_v47 = vcombine.high %v26820_v37, %v26827_v46  ;;  %v28925_v18 = vcombine.high %v26938_v42, %v26944_v4  ;;  %23184 = vmatpush3.bf16.msra.mxu0 %v23181_v9  ;;  %23188 = vmatpush3.bf16.msra.mxu1 %v23185_v13  ;;  %v23477_v42 = vld [vmem:[#allocation4 + $0x460] sm:$0xff]  ;;  %v23478_v4 = vld [vmem:[#allocation4 + $0x470] sm:$0xff]  ;;  %v28926_v13 = vld [vmem:[#allocation57_spill] sm:$0xff] }
 0x504   :  { %v27282_v23 = vpack.c.bf16 %v27260_v3, %v27256_v24  ;;  %v27286_v39 = vpack.c.bf16 %v27264_v33, %v27262_v22  ;;  %v17305_v11 = vadd.f32 %v27067_v53, %v26448_v35  ;;  %23190 = vmatprep.subr.bf16.mxu0 %v27208_v21  ;;  %23194 = vmatprep.subr.bf16.mxu1 %v23193_v43  ;;  %v28927_v53 = vld [vmem:[#allocation68_spill] sm:$0xff] }
 0x505   :  { %v14760_v27 = vrot.slane %v28923_v16, %v28771_v44  ;;  %v14864_v38 = vrot.slane %v28924_v47, %v28771_v44  ;;  %v14896_v60 = vrot.slane %v28925_v18, %v28771_v44  ;;  %22147 = vmatprep.mubr.msk.f32.mxu0 %vm872_vm1, %v23477_v42  ;;  %22154 = vmatprep.mubr.msk.f32.mxu1 %vm872_vm1, %v23478_v4  ;;  %v28928_v16 = vld [vmem:[#allocation55_spill] sm:$0xff]  ;;  %v28931_v42 = vld [vmem:[#allocation52_spill] sm:$0xff] }
 0x506   :  { %v17306_v35 = vadd.f32 %v27069_v58, %v28926_v13  ;;  %v17307_v49 = vadd.f32 %v27071_v62, %v28927_v53  ;;  %22148 = vmatmul.mubr.msk.f32.vlgmr.msra.gmra.mrb[198].mxu0 %vm872_vm1, %v23479_v29  ;;  %22155 = vmatmul.mubr.msk.f32.vlgmr.msra.gmra.mrb[198].mxu1 %vm872_vm1, %v23480_v5  ;;  %v28930_v18 = vld [vmem:[#allocation23_spill] sm:$0xff]  ;;  %v23481_v4 = vld [vmem:[#allocation4 + $0x480] sm:$0xff]  ;;  %v23483_v53 = vld [vmem:[#allocation4 + $0x488] sm:$0xff]  ;;  %v17316_v29 = vadd.f32 %v27134_v45, %v26790_v0 }
 0x507   :  { %v27291_v37 = vcombine.low %v14728_v55, %v14760_v27  ;;  %v27293_v46 = vcombine.low %v14864_v38, %v14896_v60  ;;  %v27295_v44 = vcombine.high %v14728_v55, %v14760_v27  ;;  %v27299_v9 = vcombine.high %v14864_v38, %v14896_v60  ;;  %v28929_v27 = vld [vmem:[#allocation54_spill] sm:$0xff]  ;;  %23192 = vmatpush3.bf16.msra.mxu0 %v27208_v21  ;;  %v28932_v21 = vld [vmem:[#allocation21_spill] sm:$0xff] }
 0x508   :  { %v17308_v38 = vadd.f32 %v27073_v61, %v28928_v16  ;;  %v17309_v47 = vadd.f32 %v27094_v48, %v28929_v27  ;;  %23196 = vmatpush3.bf16.msra.mxu1 %v23193_v43  ;;  %v27320_v62 = vpack.c.bf16 %v17306_v35, %v17305_v11  ;;  %v17310_v60 = vadd.f32 %v27096_v1, %v28930_v18  ;;  %v23482_v11 = vld [vmem:[#allocation4 + $0x490] sm:$0xff]  ;;  %v28937_v16 = vld [vmem:[#allocation36_spill] sm:$0xff]  ;;  %v23487_v27 = vld [vmem:[#allocation4 + $0x4a8] sm:$0xff] }
 0x509   :  { %v27309_v55 = vpack.c.bf16 %v27293_v46, %v27291_v37  ;;  %v27318_v58 = vpack.c.bf16 %v27299_v9, %v27295_v44  ;;  %23198 = vmatprep.subr.bf16.mxu0 %v27250_v17  ;;  %23202 = vmatprep.subr.bf16.mxu1 %v27254_v31  ;;  %v17311_v48 = vadd.f32 %v27098_v10, %v28931_v42  ;;  %v23484_v10 = vld [vmem:[#allocation4 + $0x498] sm:$0xff]  ;;  %v28935_v45 = vld [vmem:[#allocation10_spill] sm:$0xff] }
 0x50a   :  { %v27326_v61 = vpack.c.bf16 %v17308_v38, %v17307_v49  ;;  %v17312_v43 = vadd.f32 %v27102_v41, %v28932_v21  ;;  %22161 = vmatprep.mubr.msk.f32.mxu0 %vm872_vm1, %v23481_v4  ;;  %22168 = vmatprep.mubr.msk.f32.mxu1 %vm872_vm1, %v23482_v11  ;;  %v27334_v13 = vpack.c.bf16 %v17310_v60, %v17309_v47  ;;  %v23486_v5 = vld [vmem:[#allocation4 + $0x4b0] sm:$0xff]  ;;  %v28938_v47 = vld [vmem:[#allocation39_spill] sm:$0xff] }
 0x50b   :  { %v17313_v1 = vadd.f32 %v27126_v26, %v26752_v12  ;;  %v17314_v35 = vadd.f32 %v27132_v15, %v26788_v19  ;;  %22162 = vmatmul.mubr.msk.f32.vlgmr.msra.gmra.mrb[200].mxu0 %vm872_vm1, %v23483_v53  ;;  %22169 = vmatmul.mubr.msk.f32.vlgmr.msra.gmra.mrb[200].mxu1 %vm872_vm1, %v23484_v10  ;;  %v17315_v49 = vadd.f32 %v27128_v34, %v26768_v36  ;;  %v28933_v26 = vld [vmem:[#allocation29_spill] sm:$0xff]  ;;  %v28934_v34 = vld [vmem:[#allocation22_spill] sm:$0xff]  ;;  %v23496_v10 = vld [vmem:[#allocation4 + $0x4f8] sm:$0xff] }
 0x50c   :  { %v27342_v41 = vpack.c.bf16 %v17312_v43, %v17311_v48  ;;  %23200 = vmatpush3.bf16.msra.mxu0 %v27250_v17  ;;  %23204 = vmatpush3.bf16.msra.mxu1 %v27254_v31  ;;  %v17317_v19 = vadd.f32 %v27158_v28, %v26782_v63  ;;  %v17318_v15 = vadd.f32 %v27160_v57, %v28933_v26  ;;  %v23485_v31 = vld [vmem:[#allocation4 + $0x4a0] sm:$0xff]  ;;  %v28936_v28 = vld [vmem:[#allocation35_spill] sm:$0xff]  ;;  %v28939_v60 = vld [vmem:[#allocation62_spill] sm:$0xff] }
 0x50d   :  { %v27350_v12 = vpack.c.bf16 %v17314_v35, %v17313_v1  ;;  %23206 = vmatprep.subr.bf16.mxu0 %v27282_v23  ;;  %23210 = vmatprep.subr.bf16.mxu1 %v27286_v39  ;;  %v27358_v36 = vpack.c.bf16 %v17316_v29, %v17315_v49  ;;  %v17319_v0 = vadd.f32 %v27162_v7, %v28934_v34  ;;  %v23488_v7 = vld [vmem:[#allocation4 + $0x4b8] sm:$0xff]  ;;  %v23490_v21 = vld [vmem:[#allocation4 + $0x4d0] sm:$0xff]  ;;  %v28944_v1 = vld [vmem:[#allocation73_spill] sm:$0xff] }
 0x50e   :  { %v17320_v17 = vadd.f32 %v27164_v8, %v28935_v45  ;;  %22175 = vmatprep.mubr.msk.f32.mxu0 %vm872_vm1, %v23485_v31  ;;  %22182 = vmatprep.mubr.msk.f32.mxu1 %vm872_vm1, %v23486_v5  ;;  %v27366_v63 = vpack.c.bf16 %v17318_v15, %v17317_v19  ;;  %v17321_v57 = vadd.f32 %v27190_v20, %v28936_v28  ;;  %v28941_v43 = vld [vmem:[#allocation63_spill] sm:$0xff]  ;;  %v23493_v35 = vld [vmem:[#allocation4 + $0x4e0] sm:$0xff]  ;;  %v23494_v53 = vld [vmem:[#allocation4 + $0x4f0] sm:$0xff] }
 0x50f   :  { %v17322_v38 = vadd.f32 %v27192_v6, %v28937_v16  ;;  %22176 = vmatmul.mubr.msk.f32.vlgmr.msra.gmra.mrb[202].mxu0 %vm872_vm1, %v23487_v27  ;;  %22183 = vmatmul.mubr.msk.f32.vlgmr.msra.gmra.mrb[202].mxu1 %vm872_vm1, %v23488_v7  ;;  %v17323_v18 = vadd.f32 %v27194_v32, %v28938_v47  ;;  %v17324_v42 = vadd.f32 %v27196_v51, %v28939_v60  ;;  %v23499_v29 = vld [vmem:[#allocation4 + $0x508] sm:$0xff]  ;;  %v23500_v19 = vld [vmem:[#allocation4 + $0x518] sm:$0xff]  ;;  %v23513_v31 = vld [vmem:[#allocation4 + $0x580] sm:$0xff] }
 0x510   :  { %v27374_v8 = vpack.c.bf16 %v17320_v17, %v17319_v0  ;;  %23208 = vmatpush3.bf16.msra.mxu0 %v27282_v23  ;;  %23212 = vmatpush3.bf16.msra.mxu1 %v27286_v39  ;;  %v17325_v6 = vadd.f32 %v27222_v40, %v26970_v59  ;;  %v17326_v48 = vadd.f32 %v27228_v54, %v27001_v30  ;;  %v23489_v39 = vld [vmem:[#allocation4 + $0x4c0] sm:$0xff]  ;;  %v23491_v54 = vld [vmem:[#allocation4 + $0x4c8] sm:$0xff]  ;;  %v23504_v15 = vld [vmem:[#allocation4 + $0x538] sm:$0xff] }
 0x511   :  { %v27382_v20 = vpack.c.bf16 %v17322_v38, %v17321_v57  ;;  %23214 = vmatprep.subr.bf16.mxu0 %v27309_v55  ;;  %23218 = vmatprep.subr.bf16.mxu1 %v27318_v58  ;;  %v27390_v32 = vpack.c.bf16 %v17324_v42, %v17323_v18  ;;  %v17327_v51 = vadd.f32 %v27224_v2, %v26977_v14  ;;  %v23492_v14 = vld [vmem:[#allocation4 + $0x4d8] sm:$0xff]  ;;  %v28940_v2 = vld [vmem:[#allocation42_spill] sm:$0xff]  ;;  %v23503_v26 = vld [vmem:[#allocation4 + $0x528] sm:$0xff] }
 0x512   :  { %v17328_v23 = vadd.f32 %v27230_v56, %v27003_v25  ;;  %22189 = vmatprep.mubr.msk.f32.mxu0 %vm872_vm1, %v23489_v39  ;;  %22196 = vmatprep.mubr.msk.f32.mxu1 %vm872_vm1, %v23490_v21  ;;  %v27398_v59 = vpack.c.bf16 %v17326_v48, %v17325_v6  ;;  %v17329_v30 = vadd.f32 %v27256_v24, %v27005_v50  ;;  %v23507_v34 = vld [vmem:[#allocation4 + $0x548] sm:$0xff]  ;;  %v23508_v0 = vld [vmem:[#allocation4 + $0x558] sm:$0xff]  ;;  %v23514_v5 = vld [vmem:[#allocation4 + $0x590] sm:$0xff] }
 0x513   :  { %v17330_v40 = vadd.f32 %v27260_v3, %v27010_v52  ;;  %22190 = vmatmul.mubr.msk.f32.vlgmr.msra.gmra.mrb[204].mxu0 %vm872_vm1, %v23491_v54  ;;  %22197 = vmatmul.mubr.msk.f32.vlgmr.msra.gmra.mrb[204].mxu1 %vm872_vm1, %v23492_v14  ;;  %v17331_v56 = vadd.f32 %v27262_v22, %v28940_v2  ;;  %v17332_v4 = vadd.f32 %v27264_v33, %v28941_v43  ;;  %v28942_v52 = vld [vmem:[#allocation61_spill] sm:$0xff]  ;;  %v28943_v3 = vld [vmem:[#allocation71_spill] sm:$0xff]  ;;  %v23517_v57 = vld [vmem:[#allocation4 + $0x5a0] sm:$0xff] }
 0x514   :  { %v27406_v25 = vpack.c.bf16 %v17328_v23, %v17327_v51  ;;  %23216 = vmatpush3.bf16.msra.mxu0 %v27309_v55  ;;  %23220 = vmatpush3.bf16.msra.mxu1 %v27318_v58  ;;  %v17333_v24 = vadd.f32 %v27291_v37, %v28942_v52  ;;  %v17334_v11 = vadd.f32 %v27293_v46, %v28943_v3  ;;  %v28945_v55 = vld [vmem:[#allocation74_spill] sm:$0xff]  ;;  %v23495_v46 = vld [vmem:[#allocation4 + $0x4e8] sm:$0xff]  ;;  %v23512_v17 = vld [vmem:[#allocation4 + $0x578] sm:$0xff] }
 0x515   :  { %v27414_v50 = vpack.c.bf16 %v17330_v40, %v17329_v30  ;;  %23222 = vmatprep.subr.bf16.mxu0 %v27320_v62  ;;  %23226 = vmatprep.subr.bf16.mxu1 %v27326_v61  ;;  %v27422_v22 = vpack.c.bf16 %v17332_v4, %v17331_v56  ;;  %v17335_v33 = vadd.f32 %v27295_v44, %v28944_v1  ;;  %v23497_v44 = vld [vmem:[#allocation4 + $0x500] sm:$0xff]  ;;  %v23511_v45 = vld [vmem:[#allocation4 + $0x568] sm:$0xff]  ;;  %v23516_v28 = vld [vmem:[#allocation4 + $0x598] sm:$0xff] }
 0x516   :  { %v17336_v58 = vadd.f32 %v27299_v9, %v28945_v55  ;;  %22203 = vmatprep.mubr.msk.f32.mxu0 %vm872_vm1, %v23493_v35  ;;  %22210 = vmatprep.mubr.msk.f32.mxu1 %vm872_vm1, %v23494_v53  ;;  %v27430_v37 = vpack.c.bf16 %v17334_v11, %v17333_v24  ;;  %v23498_v9 = vld [vmem:[#allocation4 + $0x510] sm:$0xff]  ;;  %v23519_v38 = vld [vmem:[#allocation4 + $0x5a8] sm:$0xff]  ;;  %v23520_v27 = vld [vmem:[#allocation4 + $0x5b8] sm:$0xff] }
 0x517   :  { %22204 = vmatmul.mubr.msk.f32.vlgmr.msra.gmra.mrb[206].mxu0 %vm872_vm1, %v23495_v46  ;;  %22211 = vmatmul.mubr.msk.f32.vlgmr.msra.gmra.mrb[206].mxu1 %vm872_vm1, %v23496_v10  ;;  %v23518_v16 = vld [vmem:[#allocation4 + $0x5b0] sm:$0xff]  ;;  %v19357_v7 = vld [vmem:[%s28105_s3 + $0xc0] sm:$0xff]  ;;  %v23523_v6 = vld [vmem:[#allocation4 + $0x5c8] sm:$0xff] }
 0x518   :  { %v27434_v49 = vpack.c.bf16 %v17336_v58, %v17335_v33  ;;  %23224 = vmatpush3.bf16.msra.mxu0 %v27320_v62  ;;  %23228 = vmatpush3.bf16.msra.mxu1 %v27326_v61  ;;  %v23501_v62 = vld [vmem:[#allocation4 + $0x520] sm:$0xff]  ;;  %v23502_v61 = vld [vmem:[#allocation4 + $0x530] sm:$0xff]  ;;  %v23524_v48 = vld [vmem:[#allocation4 + $0x5d8] sm:$0xff] }
 0x519   :  { %23230 = vmatprep.subr.bf16.mxu0 %v27334_v13  ;;  %23234 = vmatprep.subr.bf16.mxu1 %v27342_v41  ;;  %v23521_v47 = vld [vmem:[#allocation4 + $0x5c0] sm:$0xff]  ;;  %v23522_v18 = vld [vmem:[#allocation4 + $0x5d0] sm:$0xff]  ;;  %v19362_v21 = vld [vmem:[%s28105_s3 + $0xe8] sm:$0xff] }
 0x51a   :  { %22217 = vmatprep.mubr.msk.f32.mxu0 %vm872_vm1, %v23497_v44  ;;  %22224 = vmatprep.mubr.msk.f32.mxu1 %vm872_vm1, %v23498_v9  ;;  %v19359_v42 = vld [vmem:[%s28105_s3 + $0xd0] sm:$0xff]  ;;  %v19361_v39 = vld [vmem:[%s28105_s3 + $0xe0] sm:$0xff]  ;;  %v23528_v30 = vld [vmem:[#allocation4 + $0x5f8] sm:$0xff] }
 0x51b   :  { %22218 = vmatmul.mubr.msk.f32.vlgmr.msra.gmra.mrb[208].mxu0 %vm872_vm1, %v23499_v29  ;;  %22225 = vmatmul.mubr.msk.f32.vlgmr.msra.gmra.mrb[208].mxu1 %vm872_vm1, %v23500_v19  ;;  %v23526_v51 = vld [vmem:[#allocation4 + $0x5f0] sm:$0xff]  ;;  %v23293_v40 = vpack.c.bf16 %v19362_v21, %v19361_v39  ;;  %v19364_v14 = vld [vmem:[%s28105_s3 + $0xf8] sm:$0xff]  ;;  %v19365_v2 = vld [vmem:[%s28105_s3 + $0x100] sm:$0xff] }
 0x51c   :  { %23232 = vmatpush3.bf16.msra.mxu0 %v27334_v13  ;;  %23236 = vmatpush3.bf16.msra.mxu1 %v27342_v41  ;;  %v23505_v13 = vld [vmem:[#allocation4 + $0x540] sm:$0xff]  ;;  %v23506_v41 = vld [vmem:[#allocation4 + $0x550] sm:$0xff]  ;;  %v19366_v56 = vld [vmem:[%s28105_s3 + $0x108] sm:$0xff] }
 0x51d   :  { %23238 = vmatprep.subr.bf16.mxu0 %v27350_v12  ;;  %23242 = vmatprep.subr.bf16.mxu1 %v27358_v36  ;;  %v19363_v54 = vld [vmem:[%s28105_s3 + $0xf0] sm:$0xff]  ;;  %v23301_v43 = vpack.c.bf16 %v19366_v56, %v19365_v2  ;;  %v19369_v24 = vld [vmem:[%s28105_s3 + $0x120] sm:$0xff]  ;;  %v19370_v3 = vld [vmem:[%s28105_s3 + $0x128] sm:$0xff] }
 0x51e   :  { %22231 = vmatprep.mubr.msk.f32.mxu0 %vm872_vm1, %v23501_v62  ;;  %22238 = vmatprep.mubr.msk.f32.mxu1 %vm872_vm1, %v23502_v61  ;;  %v19367_v4 = vld [vmem:[%s28105_s3 + $0x110] sm:$0xff]  ;;  %v23309_v11 = vpack.c.bf16 %v19370_v3, %v19369_v24  ;;  %v19372_v1 = vld [vmem:[%s28105_s3 + $0x138] sm:$0xff]  ;;  %v19373_v55 = vld [vmem:[%s28105_s3 + $0x140] sm:$0xff] }
 0x51f   :  { %22232 = vmatmul.mubr.msk.f32.vlgmr.msra.gmra.mrb[210].mxu0 %vm872_vm1, %v23503_v26  ;;  %22239 = vmatmul.mubr.msk.f32.vlgmr.msra.gmra.mrb[210].mxu1 %vm872_vm1, %v23504_v15  ;;  %v19374_v58 = vld [vmem:[%s28105_s3 + $0x148] sm:$0xff]  ;;  %v19375_v53 = vld [vmem:[%s28105_s3 + $0x150] sm:$0xff]  ;;  %v19377_v10 = vld [vmem:[%s28105_s3 + $0x160] sm:$0xff] }
 0x520   :  { %23240 = vmatpush3.bf16.msra.mxu0 %v27350_v12  ;;  %23244 = vmatpush3.bf16.msra.mxu1 %v27358_v36  ;;  %v23509_v12 = vld [vmem:[#allocation4 + $0x560] sm:$0xff]  ;;  %v23510_v36 = vld [vmem:[#allocation4 + $0x570] sm:$0xff]  ;;  %v23317_v35 = vpack.c.bf16 %v19374_v58, %v19373_v55  ;;  %v19380_v29 = vld [vmem:[%s28105_s3 + $0x178] sm:$0xff] }
 0x521   :  { %23246 = vmatprep.subr.bf16.mxu0 %v27366_v63  ;;  %23250 = vmatprep.subr.bf16.mxu1 %v27374_v8  ;;  %v19379_v9 = vld [vmem:[%s28105_s3 + $0x170] sm:$0xff] }
 0x522   :  { %22245 = vmatprep.mubr.msk.f32.mxu0 %vm872_vm1, %v23505_v13  ;;  %22252 = vmatprep.mubr.msk.f32.mxu1 %vm872_vm1, %v23506_v41  ;;  %v23329_v19 = vpack.c.bf16 %v19380_v29, %v19379_v9 }
 0x523   :  { %22246 = vmatmul.mubr.msk.f32.vlgmr.msra.gmra.mrb[212].mxu0 %vm872_vm1, %v23507_v34  ;;  %22253 = vmatmul.mubr.msk.f32.vlgmr.msra.gmra.mrb[212].mxu1 %vm872_vm1, %v23508_v0 }
 0x524   :  { %23248 = vmatpush3.bf16.msra.mxu0 %v27366_v63  ;;  %23252 = vmatpush3.bf16.msra.mxu1 %v27374_v8  ;;  %v23515_v63 = vld [vmem:[#allocation4 + $0x588] sm:$0xff] }
 0x525   :  { %23254 = vmatprep.subr.bf16.mxu0 %v27382_v20  ;;  %23258 = vmatprep.subr.bf16.mxu1 %v27390_v32  ;;  %v19358_v8 = vld [vmem:[%s28105_s3 + $0xc8] sm:$0xff] }
 0x526   :  { %22259 = vmatprep.mubr.msk.f32.mxu0 %vm872_vm1, %v23509_v12  ;;  %22266 = vmatprep.mubr.msk.f32.mxu1 %vm872_vm1, %v23510_v36  ;;  %v23285_v60 = vpack.c.bf16 %v19358_v8, %v19357_v7 }
 0x527   :  { %22260 = vmatmul.mubr.msk.f32.vlgmr.msra.gmra.mrb[214].mxu0 %vm872_vm1, %v23511_v45  ;;  %22267 = vmatmul.mubr.msk.f32.vlgmr.msra.gmra.mrb[214].mxu1 %vm872_vm1, %v23512_v17 }
 0x528   :  { %23256 = vmatpush3.bf16.msra.mxu0 %v27382_v20  ;;  %23260 = vmatpush3.bf16.msra.mxu1 %v27390_v32  ;;  %v19360_v20 = vld [vmem:[%s28105_s3 + $0xd8] sm:$0xff]  ;;  %v23525_v32 = vld [vmem:[#allocation4 + $0x5e0] sm:$0xff] }
 0x529   :  { %23262 = vmatprep.subr.bf16.mxu0 %v27398_v59  ;;  %23266 = vmatprep.subr.bf16.mxu1 %v27406_v25  ;;  %v23289_v23 = vpack.c.bf16 %v19360_v20, %v19359_v42 }
 0x52a   :  { %22273 = vmatprep.mubr.msk.f32.mxu0 %vm872_vm1, %v23513_v31  ;;  %22280 = vmatprep.mubr.msk.f32.mxu1 %vm872_vm1, %v23514_v5 }
 0x52b   :  { %22274 = vmatmul.mubr.msk.f32.vlgmr.msra.gmra.mrb[216].mxu0 %vm872_vm1, %v23515_v63  ;;  %22281 = vmatmul.mubr.msk.f32.vlgmr.msra.gmra.mrb[216].mxu1 %vm872_vm1, %v23516_v28 }
 0x52c   :  { %23264 = vmatpush3.bf16.msra.mxu0 %v27398_v59  ;;  %23268 = vmatpush3.bf16.msra.mxu1 %v27406_v25  ;;  %v23527_v59 = vld [vmem:[#allocation4 + $0x5e8] sm:$0xff]  ;;  %v23297_v25 = vpack.c.bf16 %v19364_v14, %v19363_v54 }
 0x52d   :  { %23270 = vmatprep.subr.bf16.mxu0 %v27414_v50  ;;  %23274 = vmatprep.subr.bf16.mxu1 %v27422_v22 }
 0x52e   :  { %22287 = vmatprep.mubr.msk.f32.mxu0 %vm872_vm1, %v23517_v57  ;;  %22294 = vmatprep.mubr.msk.f32.mxu1 %vm872_vm1, %v23518_v16 }
 0x52f   :  { %22288 = vmatmul.mubr.msk.f32.vlgmr.msra.gmra.mrb[218].mxu0 %vm872_vm1, %v23519_v38  ;;  %22295 = vmatmul.mubr.msk.f32.vlgmr.msra.gmra.mrb[218].mxu1 %vm872_vm1, %v23520_v27 }
 0x530   :  { %23272 = vmatpush3.bf16.msra.mxu0 %v27414_v50  ;;  %23276 = vmatpush3.bf16.msra.mxu1 %v27422_v22  ;;  %v19368_v50 = vld [vmem:[%s28105_s3 + $0x118] sm:$0xff]  ;;  %v19371_v22 = vld [vmem:[%s28105_s3 + $0x130] sm:$0xff] }
 0x531   :  { %23278 = vmatprep.subr.bf16.mxu0 %v27430_v37  ;;  %23282 = vmatprep.subr.bf16.mxu1 %v27434_v49  ;;  %v23305_v52 = vpack.c.bf16 %v19368_v50, %v19367_v4  ;;  %v23313_v33 = vpack.c.bf16 %v19372_v1, %v19371_v22 }
 0x532   :  { %22301 = vmatprep.mubr.msk.f32.mxu0 %vm872_vm1, %v23521_v47  ;;  %22308 = vmatprep.mubr.msk.f32.mxu1 %vm872_vm1, %v23522_v18 }
 0x533   :  { %22302 = vmatmul.mubr.msk.f32.vlgmr.msra.gmra.mrb[220].mxu0 %vm872_vm1, %v23523_v6  ;;  %22309 = vmatmul.mubr.msk.f32.vlgmr.msra.gmra.mrb[220].mxu1 %vm872_vm1, %v23524_v48 }
 0x534   :  { %23280 = vmatpush3.bf16.msra.mxu0 %v27430_v37  ;;  %23284 = vmatpush3.bf16.msra.mxu1 %v27434_v49  ;;  %v19376_v37 = vld [vmem:[%s28105_s3 + $0x158] sm:$0xff]  ;;  %v19378_v49 = vld [vmem:[%s28105_s3 + $0x168] sm:$0xff] }
 0x535   :  { %22315 = vmatprep.mubr.msk.f32.mxu0 %vm872_vm1, %v23525_v32  ;;  %22322 = vmatprep.mubr.msk.f32.mxu1 %vm872_vm1, %v23526_v51  ;;  %v23321_v46 = vpack.c.bf16 %v19376_v37, %v19375_v53  ;;  %v23325_v44 = vpack.c.bf16 %v19378_v49, %v19377_v10 }
 0x536   :  { %23286 = vmatprep.subr.bf16.mxu0 %v23285_v60  ;;  %23310 = vmatprep.subr.bf16.mxu1 %v23309_v11 }
 0x537   :  { %22316 = vmatmul.mubr.msk.f32.vlgmr.msra.gmra.mrb[222].mxu0 %vm872_vm1, %v23527_v59  ;;  %22323 = vmatmul.mubr.msk.f32.vlgmr.msra.gmra.mrb[222].mxu1 %vm872_vm1, %v23528_v30 }
 0x538   :  { %23288 = vmatpush3.bf16.msra.mxu0 %v23285_v60  ;;  %23312 = vmatpush3.bf16.msra.mxu1 %v23309_v11 }
 0x539   :  { %23290 = vmatprep.subr.bf16.mxu0 %v23289_v23  ;;  %23314 = vmatprep.subr.bf16.mxu1 %v23313_v33 }
 0x53c   :  { %23292 = vmatpush3.bf16.msra.mxu0 %v23289_v23  ;;  %23316 = vmatpush3.bf16.msra.mxu1 %v23313_v33 }
 0x53d   :  { %23294 = vmatprep.subr.bf16.mxu0 %v23293_v40  ;;  %23318 = vmatprep.subr.bf16.mxu1 %v23317_v35 }
 0x540   :  { %23296 = vmatpush3.bf16.msra.mxu0 %v23293_v40  ;;  %23320 = vmatpush3.bf16.msra.mxu1 %v23317_v35 }
 0x541   :  { %23298 = vmatprep.subr.bf16.mxu0 %v23297_v25  ;;  %23322 = vmatprep.subr.bf16.mxu1 %v23321_v46 }
 0x544   :  { %23300 = vmatpush3.bf16.msra.mxu0 %v23297_v25  ;;  %23324 = vmatpush3.bf16.msra.mxu1 %v23321_v46 }
 0x545   :  { %23302 = vmatprep.subr.bf16.mxu0 %v23301_v43  ;;  %23326 = vmatprep.subr.bf16.mxu1 %v23325_v44 }
 0x548   :  { %23304 = vmatpush3.bf16.msra.mxu0 %v23301_v43  ;;  %23328 = vmatpush3.bf16.msra.mxu1 %v23325_v44 }
 0x549   :  { %23306 = vmatprep.subr.bf16.mxu0 %v23305_v52  ;;  %23330 = vmatprep.subr.bf16.mxu1 %v23329_v19 }
 0x54c   :  { %23308 = vmatpush3.bf16.msra.mxu0 %v23305_v52  ;;  %23332 = vmatpush3.bf16.msra.mxu1 %v23329_v19 }
 0x593   :  { %v27570_v62 = vpop.f32.mrb[176].mxu0  ;;  %v27572_v61 = vpop.f32.mrb[176].mxu1 }
 0x594   :  { %v27574_v26 = vpop.f32.mrb[177].mxu0  ;;  %v27576_v15 = vpop.f32.mrb[177].mxu1 }
 0x597   :  { %v27578_v13 = vpop.f32.mrb[178].mxu0  ;;  %v27582_v34 = vpop.f32.mrb[178].mxu1 }
 0x598   :  { %v27580_v41 = vpop.f32.mrb[179].mxu0  ;;  %v27584_v0 = vpop.f32.mrb[179].mxu1 }
 0x5a0   :  { %v27586_v12 = vpop.f32.mrb[180].mxu0 }
 0x5a1   :  { %v27588_v36 = vpop.f32.mrb[181].mxu0  ;;  %v27590_v45 = vpop.f32.mrb[180].mxu1 }
 0x5a2   :  { %v27592_v17 = vpop.f32.mrb[181].mxu1 }
 0x5a6   :  { %v27594_v31 = vpop.f32.mrb[182].mxu0 }
 0x5a7   :  { %v27596_v5 = vpop.f32.mrb[183].mxu0  ;;  %v27598_v63 = vpop.f32.mrb[182].mxu1 }
 0x5a8   :  { %v27600_v28 = vpop.f32.mrb[183].mxu1 }
 0x5ae   :  { %v27602_v57 = vpop.f32.mrb[184].mxu0 }
 0x5af   :  { %28946 = vst [vmem:[#allocation72_spill] sm:$0xff] %v27602_v57  ;;  %v27604_v16 = vpop.f32.mrb[185].mxu0  ;;  %v27606_v38 = vpop.f32.mrb[184].mxu1 }
 0x5b0   :  { %28947 = vst [vmem:[#allocation84_spill] sm:$0xff] %v27604_v16  ;;  %v27608_v27 = vpop.f32.mrb[185].mxu1 }
 0x5b1   :  { %28948 = vst [vmem:[#allocation82_spill] sm:$0xff] %v27608_v27 }
 0x5bb   :  { %v27610_v7 = vpop.f32.mrb[186].mxu0 }
 0x5bc   :  { %v27612_v8 = vpop.f32.mrb[186].mxu1  ;;  %v27614_v47 = vpop.f32.mrb[187].mxu0 }
 0x5bd   :  { %v27616_v18 = vpop.f32.mrb[187].mxu1 }
 0x5c1   :  { %v27618_v60 = vpop.f32.mrb[188].mxu0  ;;  %v27620_v42 = vpop.f32.mrb[188].mxu1 }
 0x5c2   :  { %28949 = vst [vmem:[#allocation85_spill] sm:$0xff] %v27620_v42  ;;  %v27622_v20 = vpop.f32.mrb[189].mxu0  ;;  %v27624_v6 = vpop.f32.mrb[189].mxu1 }
 0x5c6   :  { %v27626_v48 = vpop.f32.mrb[190].mxu0  ;;  %v27628_v32 = vpop.f32.mrb[190].mxu1 }
 0x5c7   :  { %28950 = vst [vmem:[#allocation83_spill] sm:$0xff] %v27626_v48  ;;  %v27630_v51 = vpop.f32.mrb[191].mxu0  ;;  %v27632_v23 = vpop.f32.mrb[191].mxu1 }
 0x5cb   :  { %v27634_v39 = vpop.f32.mrb[192].mxu0 }
 0x5cc   :  { %v27636_v21 = vpop.f32.mrb[192].mxu1  ;;  %v18538_v59 = vsub.f32 %v27570_v62, %v27634_v39  ;;  %v27640_v30 = vpop.f32.mrb[193].mxu0 }
 0x5cd   :  { %v18540_v40 = vsub.f32 %v27572_v61, %v27636_v21  ;;  %v27644_v54 = vpop.f32.mrb[193].mxu1  ;;  %v18537_v14 = vsub.f32 %v27574_v26, %v27640_v30 }
 0x5ce   :  { %v18539_v25 = vsub.f32 %v27576_v15, %v27644_v54 }
 0x5cf   :  { %22349 = vmatprep.mubr.msk.f32.mxu0 %vm325_vm0, %v18537_v14 }
 0x5d0   :  { %v27650_v2 = vpop.f32.mrb[194].mxu0  ;;  %v27653_v56 = vpop.f32.mrb[194].mxu1  ;;  %22350 = vmatmul.mubr.msk.f32.vlgmr.msra.gmra.mrb[224].mxu0 %vm325_vm0, %v18538_v59 }
 0x5d1   :  { %v18542_v43 = vsub.f32 %v27578_v13, %v27650_v2  ;;  %v27657_v4 = vpop.f32.mrb[195].mxu0  ;;  %v18544_v50 = vsub.f32 %v27582_v34, %v27653_v56  ;;  %v27662_v52 = vpop.f32.mrb[195].mxu1  ;;  %22352 = vmatprep.mubr.msk.f32.mxu0 %vm325_vm0, %v18539_v25 }
 0x5d2   :  { %v18541_v24 = vsub.f32 %v27580_v41, %v27657_v4  ;;  %v18543_v3 = vsub.f32 %v27584_v0, %v27662_v52 }
 0x5d4   :  { %22353 = vmatmul.mubr.msk.f32.gmra.mrb[226].mxu0 %vm325_vm0, %v18540_v40 }
 0x5d5   :  { %v27669_v11 = vpop.f32.mrb[196].mxu0  ;;  %v27671_v22 = vpop.f32.mrb[196].mxu1  ;;  %22355 = vmatprep.mubr.msk.f32.mxu0 %vm325_vm0, %v18541_v24 }
 0x5d6   :  { %v18546_v1 = vsub.f32 %v27586_v12, %v27669_v11  ;;  %v27675_v33 = vpop.f32.mrb[197].mxu0  ;;  %v18548_v55 = vsub.f32 %v27590_v45, %v27671_v22  ;;  %v27680_v58 = vpop.f32.mrb[197].mxu1 }
 0x5d7   :  { %v18545_v35 = vsub.f32 %v27588_v36, %v27675_v33  ;;  %v18547_v53 = vsub.f32 %v27592_v17, %v27680_v58 }
 0x5d8   :  { %22356 = vmatmul.mubr.msk.f32.gmra.mrb[228].mxu0 %vm325_vm0, %v18542_v43 }
 0x5d9   :  { %v27687_v37 = vpop.f32.mrb[198].mxu0  ;;  %v27689_v46 = vpop.f32.mrb[198].mxu1  ;;  %22358 = vmatprep.mubr.msk.f32.mxu0 %vm325_vm0, %v18543_v3 }
 0x5da   :  { %v18550_v10 = vsub.f32 %v27594_v31, %v27687_v37  ;;  %v27693_v49 = vpop.f32.mrb[199].mxu0  ;;  %v18552_v44 = vsub.f32 %v27598_v63, %v27689_v46  ;;  %v27698_v9 = vpop.f32.mrb[199].mxu1 }
 0x5db   :  { %28951 = vst [vmem:[#allocation20_spill] sm:$0xff] %v27693_v49  ;;  %28952 = vst [vmem:[#allocation24_spill] sm:$0xff] %v27698_v9  ;;  %v18549_v29 = vsub.f32 %v27596_v5, %v27693_v49  ;;  %v18551_v19 = vsub.f32 %v27600_v28, %v27698_v9 }
 0x5dc   :  { %22359 = vmatmul.mubr.msk.f32.gmra.mrb[230].mxu0 %vm325_vm0, %v18544_v50 }
 0x5dd   :  { %22361 = vmatprep.mubr.msk.f32.mxu0 %vm325_vm0, %v18545_v35 }
 0x5de   :  { %v27705_v59 = vpop.f32.mrb[200].mxu0  ;;  %v27707_v40 = vpop.f32.mrb[200].mxu1 }
 0x5df   :  { %28953 = vst [vmem:[#allocation37_spill] sm:$0xff] %v27705_v59  ;;  %v18554_v14 = vsub.f32 %v27602_v57, %v27705_v59  ;;  %v27711_v25 = vpop.f32.mrb[201].mxu0  ;;  %v27716_v24 = vpop.f32.mrb[201].mxu1 }
 0x5e0   :  { %28954 = vst [vmem:[#allocation25_spill] sm:$0xff] %v27711_v25  ;;  %28955 = vst [vmem:[#allocation45_spill] sm:$0xff] %v27716_v24  ;;  %v18553_v3 = vsub.f32 %v27604_v16, %v27711_v25  ;;  %v18555_v9 = vsub.f32 %v27608_v27, %v27716_v24  ;;  %22362 = vmatmul.mubr.msk.f32.gmra.mrb[232].mxu0 %vm325_vm0, %v18546_v1 }
 0x5e1   :  { %22364 = vmatprep.mubr.msk.f32.mxu0 %vm325_vm0, %v18547_v53 }
 0x5e2   :  { %v27723_v49 = vpop.f32.mrb[202].mxu0  ;;  %v27725_v59 = vpop.f32.mrb[202].mxu1 }
 0x5e3   :  { %28956 = vst [vmem:[#allocation46_spill] sm:$0xff] %v27725_v59  ;;  %v27729_v57 = vpop.f32.mrb[203].mxu0  ;;  %v27734_v25 = vpop.f32.mrb[203].mxu1 }
 0x5e4   :  { %22365 = vmatmul.mubr.msk.f32.gmra.mrb[234].mxu0 %vm325_vm0, %v18548_v55 }
 0x5e5   :  { %22367 = vmatprep.mubr.msk.f32.mxu0 %vm325_vm0, %v18549_v29 }
 0x5e6   :  { %v27741_v27 = vpop.f32.mrb[204].mxu0  ;;  %v27743_v50 = vpop.f32.mrb[204].mxu1 }
 0x5e7   :  { %28957 = vst [vmem:[#allocation8_spill] sm:$0xff] %v27741_v27  ;;  %28958 = vst [vmem:[#allocation59_spill] sm:$0xff] %v27743_v50  ;;  %v27747_v16 = vpop.f32.mrb[205].mxu0  ;;  %v27752_v35 = vpop.f32.mrb[205].mxu1 }
 0x5e8   :  { %22368 = vmatmul.mubr.msk.f32.gmra.mrb[236].mxu0 %vm325_vm0, %v18550_v10 }
 0x5e9   :  { %22370 = vmatprep.mubr.msk.f32.mxu0 %vm325_vm0, %v18551_v19 }
 0x5ea   :  { %v27759_v59 = vpop.f32.mrb[206].mxu0  ;;  %v27761_v1 = vpop.f32.mrb[206].mxu1 }
 0x5eb   :  { %28959 = vst [vmem:[#allocation9_spill] sm:$0xff] %v27759_v59  ;;  %28960 = vst [vmem:[#allocation13_spill] sm:$0xff] %v27761_v1  ;;  %v27765_v27 = vpop.f32.mrb[207].mxu0  ;;  %v27770_v53 = vpop.f32.mrb[207].mxu1 }
 0x5ec   :  { %28961 = vst [vmem:[#allocation30_spill] sm:$0xff] %v27770_v53  ;;  %22371 = vmatmul.mubr.msk.f32.gmra.mrb[238].mxu0 %vm325_vm0, %v18552_v44 }
 0x5ed   :  { %22373 = vmatprep.mubr.msk.f32.mxu0 %vm325_vm0, %v18553_v3 }
 0x5ee   :  { %v22219_v50 = vpop.f32.mrb[208].mxu0  ;;  %v22226_v42 = vpop.f32.mrb[208].mxu1 }
 0x5ef   :  { %v18570_v55 = vsub.f32 %v22219_v50, %v27570_v62  ;;  %v18572_v59 = vsub.f32 %v22226_v42, %v27572_v61  ;;  %v17403_v10 = vpop.f32.mrb[209].mxu0  ;;  %v17478_v48 = vpop.f32.mrb[209].mxu1 }
 0x5f0   :  { %v18569_v43 = vsub.f32 %v17403_v10, %v27574_v26  ;;  %v18571_v1 = vsub.f32 %v17478_v48, %v27576_v15  ;;  %22374 = vmatmul.mubr.msk.f32.gmra.mrb[240].mxu0 %vm325_vm0, %v18554_v14  ;;  %v28967_v10 = vld [vmem:[#allocation24_spill] sm:$0xff] }
 0x5f1   :  { %v18602_v19 = vsub.f32 %v18570_v55, %v27634_v39  ;;  %v18604_v24 = vsub.f32 %v18572_v59, %v27636_v21  ;;  %22376 = vmatprep.mubr.msk.f32.mxu0 %vm325_vm0, %v18555_v9 }
 0x5f2   :  { %v18601_v29 = vsub.f32 %v18569_v43, %v27640_v30  ;;  %v18603_v62 = vsub.f32 %v18571_v1, %v27644_v54  ;;  %v22233_v50 = vpop.f32.mrb[210].mxu0  ;;  %v22240_v61 = vpop.f32.mrb[210].mxu1 }
 0x5f3   :  { %v18574_v42 = vsub.f32 %v22233_v50, %v27578_v13  ;;  %v18576_v44 = vsub.f32 %v22240_v61, %v27582_v34  ;;  %v17553_v53 = vpop.f32.mrb[211].mxu0  ;;  %v17628_v26 = vpop.f32.mrb[211].mxu1 }
 0x5f4   :  { %v18573_v15 = vsub.f32 %v17553_v53, %v27580_v41  ;;  %v18575_v48 = vsub.f32 %v17628_v26, %v27584_v0  ;;  %22421 = vmatprep.mubr.msk.f32.mxu1 %vm325_vm0, %v18601_v29  ;;  %v28971_v26 = vld [vmem:[#allocation84_spill] sm:$0xff] }
 0x5f5   :  { %v18606_v39 = vsub.f32 %v18574_v42, %v27650_v2  ;;  %v18608_v21 = vsub.f32 %v18576_v44, %v27653_v56  ;;  %22422 = vmatmul.mubr.msk.f32.vlgmr.msra.gmra.mrb[224].mxu1 %vm325_vm0, %v18602_v19  ;;  %v28962_v2 = vsub.f32 %v27606_v38, %v27707_v40 }
 0x5f6   :  { %v18605_v13 = vsub.f32 %v18573_v15, %v27657_v4  ;;  %v18607_v34 = vsub.f32 %v18575_v48, %v27662_v52  ;;  %v22247_v30 = vpop.f32.mrb[212].mxu0  ;;  %v22254_v54 = vpop.f32.mrb[212].mxu1  ;;  %22424 = vmatprep.mubr.msk.f32.mxu1 %vm325_vm0, %v18603_v62  ;;  %v28963_v52 = vsub.f32 %v27614_v47, %v27729_v57  ;;  %v28968_v62 = vld [vmem:[#allocation72_spill] sm:$0xff]  ;;  %v28972_v48 = vld [vmem:[#allocation82_spill] sm:$0xff] }
 0x5f7   :  { %v18578_v41 = vsub.f32 %v22247_v30, %v27586_v12  ;;  %v18580_v0 = vsub.f32 %v22254_v54, %v27590_v45  ;;  %v17703_v9 = vpop.f32.mrb[213].mxu0  ;;  %v17778_v59 = vpop.f32.mrb[213].mxu1  ;;  %22377 = vmatmul.mubr.msk.f32.gmra.mrb[242].mxu0 %vm325_vm0, %v28962_v2  ;;  %v28975_v54 = vld [vmem:[#allocation25_spill] sm:$0xff] }
 0x5f8   :  { %v18577_v56 = vsub.f32 %v17703_v9, %v27588_v36  ;;  %v18579_v4 = vsub.f32 %v17778_v59, %v27592_v17  ;;  %22379 = vmatprep.mubr.msk.f32.mxu0 %vm325_vm0, %v28963_v52 }
 0x5f9   :  { %v18610_v12 = vsub.f32 %v18578_v41, %v27669_v11  ;;  %v27814_v45 = vsub.f32 %v18580_v0, %v27671_v22  ;;  %22425 = vmatmul.mubr.msk.f32.gmra.mrb[226].mxu1 %vm325_vm0, %v18604_v24  ;;  %v28964_v11 = vsub.f32 %v27610_v7, %v27723_v49  ;;  %v28966_v24 = vld [vmem:[#allocation20_spill] sm:$0xff]  ;;  %v28976_v0 = vld [vmem:[#allocation45_spill] sm:$0xff] }
 0x5fa   :  { %v18609_v14 = vsub.f32 %v18577_v56, %v27675_v33  ;;  %v18611_v43 = vsub.f32 %v18579_v4, %v27680_v58  ;;  %v22261_v3 = vpop.f32.mrb[214].mxu0  ;;  %v22268_v36 = vpop.f32.mrb[214].mxu1  ;;  %22427 = vmatprep.mubr.msk.f32.mxu1 %vm325_vm0, %v18605_v13  ;;  %v28965_v58 = vsub.f32 %v27616_v18, %v27734_v25  ;;  %v28973_v13 = vsub.f32 %v27622_v20, %v27747_v16 }
 0x5fb   :  { %v18582_v17 = vsub.f32 %v22261_v3, %v27594_v31  ;;  %v18584_v1 = vsub.f32 %v22268_v36, %v27598_v63  ;;  %v17853_v53 = vpop.f32.mrb[215].mxu0  ;;  %v17928_v55 = vpop.f32.mrb[215].mxu1  ;;  %22380 = vmatmul.mubr.msk.f32.gmra.mrb[244].mxu0 %vm325_vm0, %v28964_v11  ;;  %v28977_v36 = vld [vmem:[#allocation8_spill] sm:$0xff] }
 0x5fc   :  { %v18581_v22 = vsub.f32 %v17853_v53, %v27596_v5  ;;  %v18583_v33 = vsub.f32 %v17928_v55, %v27600_v28  ;;  %22382 = vmatprep.mubr.msk.f32.mxu0 %vm325_vm0, %v28965_v58 }
 0x5fd   :  { %v27833_v31 = vsub.f32 %v18582_v17, %v27687_v37  ;;  %v27836_v63 = vsub.f32 %v18584_v1, %v27689_v46  ;;  %22428 = vmatmul.mubr.msk.f32.gmra.mrb[228].mxu1 %vm325_vm0, %v18606_v39  ;;  %v28969_v46 = vld [vmem:[#allocation46_spill] sm:$0xff]  ;;  %v28978_v17 = vsub.f32 %v27618_v60, %v28977_v36  ;;  %v28979_v1 = vsub.f32 %v27624_v6, %v27752_v35 }
 0x5fe   :  { %v18613_v29 = vsub.f32 %v18581_v22, %v28966_v24  ;;  %v27841_v19 = vsub.f32 %v18583_v33, %v28967_v10  ;;  %v22275_v5 = vpop.f32.mrb[216].mxu0  ;;  %v22282_v28 = vpop.f32.mrb[216].mxu1  ;;  %22430 = vmatprep.mubr.msk.f32.mxu1 %vm325_vm0, %v18607_v34  ;;  %v28970_v44 = vsub.f32 %v27612_v8, %v28969_v46  ;;  %v28974_v34 = vld [vmem:[#allocation37_spill] sm:$0xff] }
 0x5ff   :  { %v18586_v50 = vsub.f32 %v22275_v5, %v28968_v62  ;;  %v18588_v61 = vsub.f32 %v22282_v28, %v27606_v38  ;;  %v18003_v37 = vpop.f32.mrb[217].mxu0  ;;  %v18078_v42 = vpop.f32.mrb[217].mxu1 }
 0x600   :  { %22383 = vmatmul.mubr.msk.f32.gmra.mrb[246].mxu0 %vm325_vm0, %v28970_v44  ;;  %v18585_v15 = vsub.f32 %v18003_v37, %v28971_v26  ;;  %v18587_v39 = vsub.f32 %v18078_v42, %v28972_v48  ;;  %v28985_v42 = vld [vmem:[#allocation9_spill] sm:$0xff] }
 0x601   :  { %22385 = vmatprep.mubr.msk.f32.mxu0 %vm325_vm0, %v28973_v13  ;;  %v18618_v30 = vsub.f32 %v18586_v50, %v28974_v34  ;;  %v18620_v38 = vsub.f32 %v18588_v61, %v27707_v40  ;;  %22431 = vmatmul.mubr.msk.f32.gmra.mrb[230].mxu1 %vm325_vm0, %v18608_v21  ;;  %v28989_v26 = vld [vmem:[#allocation13_spill] sm:$0xff] }
 0x602   :  { %v18617_v41 = vsub.f32 %v18585_v15, %v28975_v54  ;;  %v18619_v9 = vsub.f32 %v18587_v39, %v28976_v0  ;;  %v22289_v59 = vpop.f32.mrb[218].mxu0  ;;  %v22296_v2 = vpop.f32.mrb[218].mxu1  ;;  %22433 = vmatprep.mubr.msk.f32.mxu1 %vm325_vm0, %v18609_v14 }
 0x603   :  { %v18590_v56 = vsub.f32 %v22289_v59, %v27610_v7  ;;  %v18592_v4 = vsub.f32 %v22296_v2, %v27612_v8  ;;  %v18153_v52 = vpop.f32.mrb[219].mxu0  ;;  %v18228_v3 = vpop.f32.mrb[219].mxu1 }
 0x604   :  { %22386 = vmatmul.mubr.msk.f32.gmra.mrb[248].mxu0 %vm325_vm0, %v28978_v17  ;;  %v18589_v40 = vsub.f32 %v18153_v52, %v27614_v47  ;;  %v18591_v21 = vsub.f32 %v18228_v3, %v27616_v18  ;;  %v28980_v18 = vld [vmem:[#allocation85_spill] sm:$0xff] }
 0x605   :  { %22388 = vmatprep.mubr.msk.f32.mxu0 %vm325_vm0, %v28979_v1  ;;  %v18622_v7 = vsub.f32 %v18590_v56, %v27723_v49  ;;  %v18624_v8 = vsub.f32 %v18592_v4, %v28969_v46  ;;  %22434 = vmatmul.mubr.msk.f32.gmra.mrb[232].mxu1 %vm325_vm0, %v18610_v12  ;;  %v28981_v49 = vld [vmem:[#allocation59_spill] sm:$0xff] }
 0x606   :  { %v18621_v14 = vsub.f32 %v18589_v40, %v27729_v57  ;;  %v18623_v53 = vsub.f32 %v18591_v21, %v27734_v25  ;;  %v22303_v55 = vpop.f32.mrb[220].mxu0  ;;  %v22310_v11 = vpop.f32.mrb[220].mxu1  ;;  %22436 = vmatprep.mubr.msk.f32.mxu1 %vm325_vm0, %v18611_v43  ;;  %v28982_v24 = vsub.f32 %v28980_v18, %v28981_v49  ;;  %v28983_v25 = vsub.f32 %v27630_v51, %v27765_v27 }
 0x607   :  { %v18594_v47 = vsub.f32 %v22303_v55, %v27618_v60  ;;  %v18596_v22 = vsub.f32 %v22310_v11, %v28980_v18  ;;  %v18303_v33 = vpop.f32.mrb[221].mxu0  ;;  %v18378_v58 = vpop.f32.mrb[221].mxu1 }
 0x608   :  { %22389 = vmatmul.mubr.msk.f32.gmra.mrb[250].mxu0 %vm325_vm0, %v28982_v24  ;;  %v18593_v12 = vsub.f32 %v18303_v33, %v27622_v20  ;;  %v18595_v57 = vsub.f32 %v18378_v58, %v27624_v6  ;;  %v28984_v6 = vld [vmem:[#allocation83_spill] sm:$0xff] }
 0x609   :  { %22391 = vmatprep.mubr.msk.f32.mxu0 %vm325_vm0, %v28983_v25  ;;  %v18626_v60 = vsub.f32 %v18594_v47, %v28977_v36  ;;  %v18628_v43 = vsub.f32 %v18596_v22, %v28981_v49  ;;  %22437 = vmatmul.mubr.msk.f32.gmra.mrb[234].mxu1 %vm325_vm0, %v27814_v45  ;;  %v28986_v46 = vsub.f32 %v28984_v6, %v28985_v42 }
 0x60a   :  { %v18625_v10 = vsub.f32 %v18593_v12, %v27747_v16  ;;  %v18627_v5 = vsub.f32 %v18595_v57, %v27752_v35  ;;  %v22317_v28 = vpop.f32.mrb[222].mxu0  ;;  %v22324_v20 = vpop.f32.mrb[222].mxu1  ;;  %22439 = vmatprep.mubr.msk.f32.mxu1 %vm325_vm0, %v18613_v29  ;;  %v28987_v35 = vld [vmem:[#allocation30_spill] sm:$0xff] }
 0x60b   :  { %v18598_v62 = vsub.f32 %v22317_v28, %v28984_v6  ;;  %v18600_v50 = vsub.f32 %v22324_v20, %v27628_v32  ;;  %v18453_v61 = vpop.f32.mrb[223].mxu0  ;;  %v18528_v37 = vpop.f32.mrb[223].mxu1  ;;  %v28988_v44 = vsub.f32 %v27632_v23, %v28987_v35 }
 0x60c   :  { %22392 = vmatmul.mubr.msk.f32.gmra.mrb[252].mxu0 %vm325_vm0, %v28986_v46  ;;  %v18597_v45 = vsub.f32 %v18453_v61, %v27630_v51  ;;  %v18599_v16 = vsub.f32 %v18528_v37, %v27632_v23  ;;  %v28990_v51 = vsub.f32 %v27628_v32, %v28989_v26 }
 0x60d   :  { %22394 = vmatprep.mubr.msk.f32.mxu0 %vm325_vm0, %v28988_v44  ;;  %v18630_v29 = vsub.f32 %v18598_v62, %v28985_v42  ;;  %v18632_v15 = vsub.f32 %v18600_v50, %v28989_v26  ;;  %22440 = vmatmul.mubr.msk.f32.gmra.mrb[236].mxu1 %vm325_vm0, %v27833_v31 }
 0x60e   :  { %v18629_v48 = vsub.f32 %v18597_v45, %v27765_v27  ;;  %v18631_v39 = vsub.f32 %v18599_v16, %v28987_v35  ;;  %22442 = vmatprep.mubr.msk.f32.mxu1 %vm325_vm0, %v27841_v19 }
 0x610   :  { %22395 = vmatmul.mubr.msk.f32.gmra.mrb[254].mxu0 %vm325_vm0, %v28990_v51 }
 0x611   :  { %22443 = vmatmul.mubr.msk.f32.gmra.mrb[238].mxu1 %vm325_vm0, %v27836_v63 }
 0x612   :  { %22445 = vmatprep.mubr.msk.f32.mxu1 %vm325_vm0, %v18617_v41 }
 0x615   :  { %22446 = vmatmul.mubr.msk.f32.gmra.mrb[240].mxu1 %vm325_vm0, %v18618_v30 }
 0x616   :  { %22448 = vmatprep.mubr.msk.f32.mxu1 %vm325_vm0, %v18619_v9 }
 0x619   :  { %22449 = vmatmul.mubr.msk.f32.gmra.mrb[242].mxu1 %vm325_vm0, %v18620_v38 }
 0x61a   :  { %22451 = vmatprep.mubr.msk.f32.mxu1 %vm325_vm0, %v18621_v14 }
 0x61d   :  { %22452 = vmatmul.mubr.msk.f32.gmra.mrb[244].mxu1 %vm325_vm0, %v18622_v7 }
 0x61e   :  { %22454 = vmatprep.mubr.msk.f32.mxu1 %vm325_vm0, %v18623_v53 }
 0x621   :  { %22455 = vmatmul.mubr.msk.f32.gmra.mrb[246].mxu1 %vm325_vm0, %v18624_v8 }
 0x622   :  { %22457 = vmatprep.mubr.msk.f32.mxu1 %vm325_vm0, %v18625_v10 }
 0x625   :  { %22458 = vmatmul.mubr.msk.f32.gmra.mrb[248].mxu1 %vm325_vm0, %v18626_v60 }
 0x626   :  { %22460 = vmatprep.mubr.msk.f32.mxu1 %vm325_vm0, %v18627_v5 }
 0x629   :  { %22461 = vmatmul.mubr.msk.f32.gmra.mrb[250].mxu1 %vm325_vm0, %v18628_v43 }
 0x62a   :  { %22463 = vmatprep.mubr.msk.f32.mxu1 %vm325_vm0, %v18629_v48 }
 0x62d   :  { %22464 = vmatmul.mubr.msk.f32.gmra.mrb[252].mxu1 %vm325_vm0, %v18630_v29 }
 0x62e   :  { %22466 = vmatprep.mubr.msk.f32.mxu1 %vm325_vm0, %v18631_v39 }
 0x631   :  { %22467 = vmatmul.mubr.msk.f32.gmra.mrb[254].mxu1 %vm325_vm0, %v18632_v15 }
 0x6a3   :  { %v22351_v27 = vpop.f32.mrb[224].mxu0 }
 0x6a4   :  { %v18795_v32 = vpop.f32.mrb[225].mxu0 }
 0x6a7   :  { %v22354_v23 = vpop.f32.mrb[226].mxu0 }
 0x6a8   :  { %v18805_v31 = vpop.f32.mrb[227].mxu0 }
 0x6ab   :  { %v22357_v63 = vpop.f32.mrb[228].mxu0 }
 0x6ac   :  { %v18815_v19 = vpop.f32.mrb[229].mxu0 }
 0x6af   :  { %v22360_v13 = vpop.f32.mrb[230].mxu0 }
 0x6b0   :  { %v18825_v34 = vpop.f32.mrb[231].mxu0 }
 0x6b3   :  { %v22363_v30 = vpop.f32.mrb[232].mxu0 }
 0x6b4   :  { %v18835_v38 = vpop.f32.mrb[233].mxu0 }
 0x6b7   :  { %v22366_v54 = vpop.f32.mrb[234].mxu0 }
 0x6b8   :  { %v18845_v41 = vpop.f32.mrb[235].mxu0 }
 0x6bb   :  { %v22369_v0 = vpop.f32.mrb[236].mxu0 }
 0x6bc   :  { %v18855_v9 = vpop.f32.mrb[237].mxu0 }
 0x6bf   :  { %v27941_v59 = vpop.f32.mrb[238].mxu0 }
 0x6c0   :  { %v27943_v2 = vpop.f32.mrb[239].mxu0 }
 0x6c3   :  { %v27945_v56 = vpop.f32.mrb[240].mxu0 }
 0x6c4   :  { %v27947_v4 = vpop.f32.mrb[241].mxu0 }
 0x6c8   :  { %v22423_v52 = vpop.f32.mrb[224].mxu1 }
 0x6c9   :  { %v19276_v3 = vsub.f32 %v22351_v27, %v22423_v52  ;;  %v19116_v36 = vpop.f32.mrb[225].mxu1 }
 0x6ca   :  { %v19275_v17 = vsub.f32 %v18795_v32, %v19116_v36  ;;  %v27949_v40 = vpop.f32.mrb[242].mxu0 }
 0x6cb   :  { %19308 = vst.msk [vmem:[%s28106_s4 + $0x8] sm:$0xff] %vm325_vm0, %v19276_v3  ;;  %v27955_v21 = vpop.f32.mrb[243].mxu0 }
 0x6cc   :  { %19307 = vst.msk [vmem:[%s28106_s4] sm:$0xff] %vm325_vm0, %v19275_v17  ;;  %v22426_v1 = vpop.f32.mrb[226].mxu1 }
 0x6cd   :  { %v19278_v7 = vsub.f32 %v22354_v23, %v22426_v1  ;;  %v19126_v8 = vpop.f32.mrb[227].mxu1 }
 0x6ce   :  { %v19277_v14 = vsub.f32 %v18805_v31, %v19126_v8  ;;  %v27961_v53 = vpop.f32.mrb[244].mxu0 }
 0x6cf   :  { %19310 = vst.msk [vmem:[%s28106_s4 + $0x18] sm:$0xff] %vm325_vm0, %v19278_v7  ;;  %v27967_v55 = vpop.f32.mrb[245].mxu0 }
 0x6d0   :  { %19309 = vst.msk [vmem:[%s28106_s4 + $0x10] sm:$0xff] %vm325_vm0, %v19277_v14  ;;  %v22429_v11 = vpop.f32.mrb[228].mxu1 }
 0x6d1   :  { %v19280_v47 = vsub.f32 %v22357_v63, %v22429_v11  ;;  %v19136_v18 = vpop.f32.mrb[229].mxu1 }
 0x6d2   :  { %v19279_v22 = vsub.f32 %v18815_v19, %v19136_v18 }
 0x6d3   :  { %v27973_v33 = vpop.f32.mrb[246].mxu0  ;;  %19312 = vst.msk [vmem:[%s28106_s4 + $0x28] sm:$0xff] %vm325_vm0, %v19280_v47 }
 0x6d4   :  { %v27979_v58 = vpop.f32.mrb[247].mxu0  ;;  %19311 = vst.msk [vmem:[%s28106_s4 + $0x20] sm:$0xff] %vm325_vm0, %v19279_v22  ;;  %v22432_v49 = vpop.f32.mrb[230].mxu1 }
 0x6d5   :  { %v19282_v24 = vsub.f32 %v22360_v13, %v22432_v49  ;;  %v19146_v12 = vpop.f32.mrb[231].mxu1 }
 0x6d6   :  { %v19281_v57 = vsub.f32 %v18825_v34, %v19146_v12 }
 0x6d7   :  { %v27985_v25 = vpop.f32.mrb[248].mxu0  ;;  %19314 = vst.msk [vmem:[%s28106_s4 + $0x38] sm:$0xff] %vm325_vm0, %v19282_v24 }
 0x6d8   :  { %v18915_v60 = vpop.f32.mrb[249].mxu0  ;;  %19313 = vst.msk [vmem:[%s28106_s4 + $0x30] sm:$0xff] %vm325_vm0, %v19281_v57  ;;  %v22435_v43 = vpop.f32.mrb[232].mxu1 }
 0x6d9   :  { %v19284_v10 = vsub.f32 %v22363_v30, %v22435_v43  ;;  %v19156_v5 = vpop.f32.mrb[233].mxu1 }
 0x6da   :  { %v19283_v28 = vsub.f32 %v18835_v38, %v19156_v5 }
 0x6db   :  { %v22390_v20 = vpop.f32.mrb[250].mxu0  ;;  %19316 = vst.msk [vmem:[%s28106_s4 + $0x48] sm:$0xff] %vm325_vm0, %v19284_v10 }
 0x6dc   :  { %v18925_v6 = vpop.f32.mrb[251].mxu0  ;;  %19315 = vst.msk [vmem:[%s28106_s4 + $0x40] sm:$0xff] %vm325_vm0, %v19283_v28  ;;  %v22438_v62 = vpop.f32.mrb[234].mxu1 }
 0x6dd   :  { %v19286_v50 = vsub.f32 %v22366_v54, %v22438_v62  ;;  %v19166_v61 = vpop.f32.mrb[235].mxu1 }
 0x6de   :  { %v19285_v37 = vsub.f32 %v18845_v41, %v19166_v61 }
 0x6df   :  { %v22393_v42 = vpop.f32.mrb[252].mxu0  ;;  %19318 = vst.msk [vmem:[%s28106_s4 + $0x58] sm:$0xff] %vm325_vm0, %v19286_v50 }
 0x6e0   :  { %v18935_v46 = vpop.f32.mrb[253].mxu0  ;;  %19317 = vst.msk [vmem:[%s28106_s4 + $0x50] sm:$0xff] %vm325_vm0, %v19285_v37  ;;  %v22441_v45 = vpop.f32.mrb[236].mxu1 }
 0x6e1   :  { %v19288_v16 = vsub.f32 %v22369_v0, %v22441_v45  ;;  %v19176_v35 = vpop.f32.mrb[237].mxu1 }
 0x6e2   :  { %v19287_v44 = vsub.f32 %v18855_v9, %v19176_v35 }
 0x6e3   :  { %v22396_v29 = vpop.f32.mrb[254].mxu0  ;;  %19320 = vst.msk [vmem:[%s28106_s4 + $0x68] sm:$0xff] %vm325_vm0, %v19288_v16 }
 0x6e4   :  { %v18945_v26 = vpop.f32.mrb[255].mxu0  ;;  %19319 = vst.msk [vmem:[%s28106_s4 + $0x60] sm:$0xff] %vm325_vm0, %v19287_v44  ;;  %v22444_v15 = vpop.f32.mrb[238].mxu1 }
 0x6e5   :  { %v19290_v48 = vsub.f32 %v27941_v59, %v22444_v15  ;;  %v19186_v39 = vpop.f32.mrb[239].mxu1 }
 0x6e6   :  { %v19289_v51 = vsub.f32 %v27943_v2, %v19186_v39 }
 0x6e7   :  { %19322 = vst.msk [vmem:[%s28106_s4 + $0x78] sm:$0xff] %vm325_vm0, %v19290_v48 }
 0x6e8   :  { %19321 = vst.msk [vmem:[%s28106_s4 + $0x70] sm:$0xff] %vm325_vm0, %v19289_v51  ;;  %v22447_v27 = vpop.f32.mrb[240].mxu1 }
 0x6e9   :  { %v19292_v32 = vsub.f32 %v27945_v56, %v22447_v27  ;;  %v19196_v23 = vpop.f32.mrb[241].mxu1 }
 0x6ea   :  { %v19291_v31 = vsub.f32 %v27947_v4, %v19196_v23 }
 0x6eb   :  { %19324 = vst.msk [vmem:[%s28106_s4 + $0x88] sm:$0xff] %vm325_vm0, %v19292_v32 }
 0x6ec   :  { %19323 = vst.msk [vmem:[%s28106_s4 + $0x80] sm:$0xff] %vm325_vm0, %v19291_v31  ;;  %v22450_v63 = vpop.f32.mrb[242].mxu1 }
 0x6ed   :  { %v19294_v19 = vsub.f32 %v27949_v40, %v22450_v63  ;;  %v19206_v13 = vpop.f32.mrb[243].mxu1 }
 0x6ee   :  { %v19293_v34 = vsub.f32 %v27955_v21, %v19206_v13 }
 0x6ef   :  { %19326 = vst.msk [vmem:[%s28106_s4 + $0x98] sm:$0xff] %vm325_vm0, %v19294_v19 }
 0x6f0   :  { %19325 = vst.msk [vmem:[%s28106_s4 + $0x90] sm:$0xff] %vm325_vm0, %v19293_v34  ;;  %v22453_v30 = vpop.f32.mrb[244].mxu1 }
 0x6f1   :  { %v19296_v38 = vsub.f32 %v27961_v53, %v22453_v30  ;;  %v19216_v54 = vpop.f32.mrb[245].mxu1 }
 0x6f2   :  { %v19295_v41 = vsub.f32 %v27967_v55, %v19216_v54 }
 0x6f3   :  { %19328 = vst.msk [vmem:[%s28106_s4 + $0xa8] sm:$0xff] %vm325_vm0, %v19296_v38 }
 0x6f4   :  { %19327 = vst.msk [vmem:[%s28106_s4 + $0xa0] sm:$0xff] %vm325_vm0, %v19295_v41  ;;  %v22456_v0 = vpop.f32.mrb[246].mxu1 }
 0x6f5   :  { %v19298_v9 = vsub.f32 %v27973_v33, %v22456_v0  ;;  %v19226_v59 = vpop.f32.mrb[247].mxu1 }
 0x6f6   :  { %v19297_v2 = vsub.f32 %v27979_v58, %v19226_v59 }
 0x6f7   :  { %19330 = vst.msk [vmem:[%s28106_s4 + $0xb8] sm:$0xff] %vm325_vm0, %v19298_v9 }
 0x6f8   :  { %19329 = vst.msk [vmem:[%s28106_s4 + $0xb0] sm:$0xff] %vm325_vm0, %v19297_v2  ;;  %v22459_v56 = vpop.f32.mrb[248].mxu1 }
 0x6f9   :  { %v19300_v4 = vsub.f32 %v27985_v25, %v22459_v56  ;;  %v19236_v52 = vpop.f32.mrb[249].mxu1 }
 0x6fa   :  { %v19299_v3 = vsub.f32 %v18915_v60, %v19236_v52 }
 0x6fb   :  { %19332 = vst.msk [vmem:[%s28106_s4 + $0xc8] sm:$0xff] %vm325_vm0, %v19300_v4 }
 0x6fc   :  { %19331 = vst.msk [vmem:[%s28106_s4 + $0xc0] sm:$0xff] %vm325_vm0, %v19299_v3  ;;  %v22462_v36 = vpop.f32.mrb[250].mxu1 }
 0x6fd   :  { %v19302_v17 = vsub.f32 %v22390_v20, %v22462_v36  ;;  %v19246_v40 = vpop.f32.mrb[251].mxu1 }
 0x6fe   :  { %v19301_v21 = vsub.f32 %v18925_v6, %v19246_v40 }
 0x6ff   :  { %19334 = vst.msk [vmem:[%s28106_s4 + $0xd8] sm:$0xff] %vm325_vm0, %v19302_v17 }
 0x700   :  { %19333 = vst.msk [vmem:[%s28106_s4 + $0xd0] sm:$0xff] %vm325_vm0, %v19301_v21  ;;  %v22465_v1 = vpop.f32.mrb[252].mxu1 }
 0x701   :  { %v19304_v7 = vsub.f32 %v22393_v42, %v22465_v1  ;;  %v19256_v8 = vpop.f32.mrb[253].mxu1 }
 0x702   :  { %v19303_v14 = vsub.f32 %v18935_v46, %v19256_v8 }
 0x703   :  { %19336 = vst.msk [vmem:[%s28106_s4 + $0xe8] sm:$0xff] %vm325_vm0, %v19304_v7 }
 0x704   :  { %19335 = vst.msk [vmem:[%s28106_s4 + $0xe0] sm:$0xff] %vm325_vm0, %v19303_v14  ;;  %v22468_v53 = vpop.f32.mrb[254].mxu1 }
 0x705   :  { %v19306_v55 = vsub.f32 %v22396_v29, %v22468_v53  ;;  %v19266_v11 = vpop.f32.mrb[255].mxu1 }
 0x706   :  { %v19305_v47 = vsub.f32 %v18945_v26, %v19266_v11 }
 0x707   :  { %19338 = vst.msk [vmem:[%s28106_s4 + $0xf8] sm:$0xff] %vm325_vm0, %v19306_v55 }
 0x708   :  { %19337 = vst.msk [vmem:[%s28106_s4 + $0xf0] sm:$0xff] %vm325_vm0, %v19305_v47 }
 0x709   :  { %19343 = vsyncpa [#allocation3], 1 }
 0x70a   :  { %19344 = vsyncpa [#allocation5], 1 }

</bundles_post_ra>
